<compile_context>
chip_gen: v5e
topology: v5e:2x2
jax: 0.10.0
libtpu: 0.0.40
codegen_flags: <defaults>
</compile_context>

<pallas_src>
import functools
import math

import jax
import jax.numpy as jnp
from jax.experimental import pallas as pl
from jax.experimental.pallas import tpu as pltpu


# ----------------------------- tiling helper -----------------------------

def _pick_tile(dim, cap, align=8):
    """Largest tile <= cap that divides dim (multiple of align), else dim."""
    if dim <= cap:
        return dim
    t = (cap // align) * align
    while t >= align:
        if dim % t == 0:
            return t
        t -= align
    return dim


# ----------------------------- Pallas kernels -----------------------------

def _attn_block_kernel(x_ref, wq_ref, wk_ref, wv_ref, bq_ref, bk_ref, bv_ref,
                       wo_ref, bo_ref, g_ref, beta_ref, o_ref, acc_ref,
                       *, scale, eps):
    """Fused per-(batch, head) step:
         q/k/v = x @ W_{q,k,v}[h] + b ; softmax(q k^T) v ; acc += o_h @ Wo[h]
       Last head: LayerNorm(acc + bo + x) -> o_ref.   Blocks:
         x_ref (T, D) f32, w*_ref (D, Dh) bf16, wo_ref (Dh, D) bf16,
         o_ref (T, D) bf16, acc_ref (T, D) f32 scratch (persists across h)."""
    h_idx = pl.program_id(1)

    x = x_ref[...]                                   # (T, D) f32
    xb = x.astype(jnp.bfloat16)

    q = jnp.dot(xb, wq_ref[...], preferred_element_type=jnp.float32) + bq_ref[...]
    k = jnp.dot(xb, wk_ref[...], preferred_element_type=jnp.float32) + bk_ref[...]
    v = jnp.dot(xb, wv_ref[...], preferred_element_type=jnp.float32) + bv_ref[...]
    q = q * scale                                    # scale (T, Dh), not (T, T)

    # scores: contract head_dim directly (no explicit transpose)
    s = jax.lax.dot_general(q.astype(jnp.bfloat16), k.astype(jnp.bfloat16),
                            (((1,), (1,)), ((), ())),
                            preferred_element_type=jnp.float32)       # (T, T)
    m = jnp.max(s, axis=-1, keepdims=True)
    e = jnp.exp(s - m)
    p = e * pl.reciprocal(jnp.sum(e, axis=-1, keepdims=True), approx=True)

    o_h = jnp.dot(p.astype(jnp.bfloat16), v.astype(jnp.bfloat16),
                  preferred_element_type=jnp.float32)                 # (T, Dh)

    # this head's contribution to fc_out: (T, Dh) @ (Dh, D)
    fc = jnp.dot(o_h.astype(jnp.bfloat16), wo_ref[...],
                 preferred_element_type=jnp.float32)                  # (T, D)

    @pl.when(h_idx == 0)
    def _():
        # fold fc_out bias + residual into the first head's write (no zero pass)
        acc_ref[...] = fc + bo_ref[...] + x

    @pl.when(h_idx != 0)
    def _():
        acc_ref[...] += fc

    @pl.when(h_idx == pl.num_programs(1) - 1)
    def _():
        z = acc_ref[...]
        mu = jnp.mean(z, axis=-1, keepdims=True)
        var = jnp.mean((z - mu) ** 2, axis=-1, keepdims=True)
        zhat = (z - mu) * jax.lax.rsqrt(var + eps)
        o_ref[...] = (zhat * g_ref[...] + beta_ref[...]).astype(o_ref.dtype)


def _ffn_kernel(x_ref, w1_ref, b1_ref, w2_ref, b2_ref, g_ref, beta_ref, o_ref,
                *, eps):
    """Fused y = LayerNorm(GELU(x @ W1 + b1) @ W2 + b2 + x).  x_ref bf16 (tm, D)."""
    x = x_ref[...]                                                    # (tm, D) bf16
    h = jnp.dot(x, w1_ref[...], preferred_element_type=jnp.float32) + b1_ref[...]
    # exact GELU (erf form), matching torch.nn.GELU() default
    h = 0.5 * h * (1.0 + jax.lax.erf(h * (1.0 / math.sqrt(2.0))))
    y = (jnp.dot(h.astype(jnp.bfloat16), w2_ref[...],
                 preferred_element_type=jnp.float32) + b2_ref[...])
    z = y + x.astype(jnp.float32)                                     # residual
    mu = jnp.mean(z, axis=-1, keepdims=True)
    var = jnp.mean((z - mu) ** 2, axis=-1, keepdims=True)
    zhat = (z - mu) * jax.lax.rsqrt(var + eps)
    o_ref[...] = (zhat * g_ref[...] + beta_ref[...]).astype(o_ref.dtype)


# ----------------------------- kernel wrappers -----------------------------

def attention_block(x, wq, wk, wv, bq, bk, bv, wo, bo, g, beta,
                    *, num_heads, head_dim, eps):
    """x (B,T,D) f32; per-head weights (H,D,Dh)/(H,Dh,D) bf16 -> LN1 out bf16."""
    B, T, D = x.shape
    Dh = head_dim
    kern = functools.partial(_attn_block_kernel,
                             scale=1.0 / math.sqrt(Dh), eps=eps)
    return pl.pallas_call(
        kern,
        out_shape=jax.ShapeDtypeStruct((B, T, D), jnp.bfloat16),
        grid_spec=pltpu.PrefetchScalarGridSpec(
            num_scalar_prefetch=0,
            grid=(B, num_heads),
            in_specs=[
                pl.BlockSpec((None, T, D), lambda b, h: (b, 0, 0)),    # x (resident over h)
                pl.BlockSpec((None, D, Dh), lambda b, h: (h, 0, 0)),   # Wq[h]
                pl.BlockSpec((None, D, Dh), lambda b, h: (h, 0, 0)),   # Wk[h]
                pl.BlockSpec((None, D, Dh), lambda b, h: (h, 0, 0)),   # Wv[h]
                pl.BlockSpec((None, 1, Dh), lambda b, h: (h, 0, 0)),   # bq[h]
                pl.BlockSpec((None, 1, Dh), lambda b, h: (h, 0, 0)),   # bk[h]
                pl.BlockSpec((None, 1, Dh), lambda b, h: (h, 0, 0)),   # bv[h]
                pl.BlockSpec((None, Dh, D), lambda b, h: (h, 0, 0)),   # Wo[h]
                pl.BlockSpec((1, D), lambda b, h: (0, 0)),             # bo
                pl.BlockSpec((1, D), lambda b, h: (0, 0)),             # ln1 gamma
                pl.BlockSpec((1, D), lambda b, h: (0, 0)),             # ln1 beta
            ],
            out_specs=pl.BlockSpec((None, T, D), lambda b, h: (b, 0, 0)),
            scratch_shapes=[pltpu.VMEM((T, D), jnp.float32)],
        ),
        compiler_params=pltpu.CompilerParams(
            dimension_semantics=("parallel", "arbitrary")),
    )(x, wq, wk, wv, bq, bk, bv, wo, bo, g, beta)


def ffn_block(x2d, w1, b1, w2, b2, g, beta, *, eps, tm_cap=128):
    """x2d (M, D) bf16 -> LayerNorm2(FFN(x2d) + x2d) as (M, D) f32."""
    M, D = x2d.shape
    FF = w1.shape[1]
    tm = _pick_tile(M, tm_cap)
    kern = functools.partial(_ffn_kernel, eps=eps)
    return pl.pallas_call(
        kern,
        out_shape=jax.ShapeDtypeStruct((M, D), jnp.float32),
        grid_spec=pltpu.PrefetchScalarGridSpec(
            num_scalar_prefetch=0,
            grid=(M // tm,),
            in_specs=[
                pl.BlockSpec((tm, D), lambda i: (i, 0)),
                pl.BlockSpec((D, FF), lambda i: (0, 0)),
                pl.BlockSpec((1, FF), lambda i: (0, 0)),
                pl.BlockSpec((FF, D), lambda i: (0, 0)),
                pl.BlockSpec((1, D), lambda i: (0, 0)),
                pl.BlockSpec((1, D), lambda i: (0, 0)),
                pl.BlockSpec((1, D), lambda i: (0, 0)),
            ],
            out_specs=pl.BlockSpec((tm, D), lambda i: (i, 0)),
        ),
        compiler_params=pltpu.CompilerParams(dimension_semantics=("parallel",)),
    )(x2d, w1, b1, w2, b2, g, beta)


# ----------------------------- block forward -----------------------------

def transformer_block_forward(x, p, *, num_heads, eps=1e-5):
    B, T, D = x.shape
    H = num_heads
    Dh = D // H
    FF = p["w_ff1"].shape[1]

    # one-time host/XLA-side relayout of weights into per-head slabs so the
    # kernel never slices 32-lane columns or concatenates heads.
    wq = p["wq"].reshape(D, H, Dh).transpose(1, 0, 2)    # (H, D, Dh) bf16
    wk = p["wk"].reshape(D, H, Dh).transpose(1, 0, 2)
    wv = p["wv"].reshape(D, H, Dh).transpose(1, 0, 2)
    bq = p["bq"].reshape(H, 1, Dh)
    bk = p["bk"].reshape(H, 1, Dh)
    bv = p["bv"].reshape(H, 1, Dh)
    wo = p["wo"].reshape(H, Dh, D)                       # (H, Dh, D) bf16
    bo = p["bo"].reshape(1, D)

    # fused: QKV proj + attention + fc_out + residual + LayerNorm1  (one call)
    x1 = attention_block(x, wq, wk, wv, bq, bk, bv, wo, bo,
                         p["ln1_g"].reshape(1, D), p["ln1_b"].reshape(1, D),
                         num_heads=H, head_dim=Dh, eps=eps)   # (B,T,D) bf16
    # dropout: identity (eval mode)

    # fused: ff1 + GELU + ff2 + residual + LayerNorm2  (one call)
    x1_2d = x1.reshape(B * T, D)
    out = ffn_block(x1_2d,
                    p["w_ff1"], p["b_ff1"].reshape(1, FF),
                    p["w_ff2"], p["b_ff2"].reshape(1, D),
                    p["ln2_g"].reshape(1, D), p["ln2_b"].reshape(1, D),
                    eps=eps)                                  # (B*T, D) f32
    # dropout: identity (eval mode)

    return out.reshape(B, T, D)


# ----------------------------- pure-JAX reference -----------------------------

def reference_block(x, p, num_heads, eps=1e-5):
    B, T, D = x.shape
    Dh = D // num_heads
    f32 = lambda a: a.astype(jnp.float32)

    x2d = x.reshape(B * T, D)
    q = x2d @ f32(p["wq"]) + p["bq"]
    k = x2d @ f32(p["wk"]) + p["bk"]
    v = x2d @ f32(p["wv"]) + p["bv"]
    heads = lambda t: t.reshape(B, T, num_heads, Dh)
    q, k, v = heads(q), heads(k), heads(v)

    energy = jnp.einsum("bqhd,bkhd->bhqk", q, k) / math.sqrt(Dh)
    attn = jax.nn.softmax(energy, axis=-1)
    o = jnp.einsum("bhqk,bkhd->bqhd", attn, v).reshape(B * T, D)

    def ln(z, g, b):
        mu = z.mean(-1, keepdims=True)
        var = ((z - mu) ** 2).mean(-1, keepdims=True)
        return (z - mu) * jax.lax.rsqrt(var + eps) * g + b

    x1 = ln(o @ f32(p["wo"]) + p["bo"] + x2d, p["ln1_g"], p["ln1_b"])
    h = x1 @ f32(p["w_ff1"]) + p["b_ff1"]
    h = 0.5 * h * (1.0 + jax.lax.erf(h / math.sqrt(2.0)))
    x2 = ln(h @ f32(p["w_ff2"]) + p["b_ff2"] + x1, p["ln2_g"], p["ln2_b"])
    return x2.reshape(B, T, D)


# ----------------------------- main -----------------------------

if __name__ == "__main__":
    # Small, lane-aligned config: embed=128, heads=4 (head_dim=32), ff=512,
    # batch=2, seq=256 -> attention grid (2,4), FFN grid (4,).
    B, T, D, H, FF = 2, 256, 128, 4, 512

    key = jax.random.PRNGKey(0)
    keys = jax.random.split(key, 20)

    def w_init(k, shape):   # weights stored (in, out) in bf16 for the MXU
        return (0.02 * jax.random.normal(k, shape, jnp.float32)).astype(jnp.bfloat16)

    def b_init(k, shape):
        return (0.01 * jax.random.normal(k, shape, jnp.float32)).astype(jnp.float32)

    params = {
        "wq": w_init(keys[1], (D, D)),  "bq": b_init(keys[2], (D,)),
        "wk": w_init(keys[3], (D, D)),  "bk": b_init(keys[4], (D,)),
        "wv": w_init(keys[5], (D, D)),  "bv": b_init(keys[6], (D,)),
        "wo": w_init(keys[7], (D, D)),  "bo": b_init(keys[8], (D,)),
        "ln1_g": (1.0 + 0.1 * jax.random.normal(keys[9], (D,))).astype(jnp.float32),
        "ln1_b": b_init(keys[10], (D,)),
        "w_ff1": w_init(keys[11], (D, FF)), "b_ff1": b_init(keys[12], (FF,)),
        "w_ff2": w_init(keys[13], (FF, D)), "b_ff2": b_init(keys[14], (D,)),
        "ln2_g": (1.0 + 0.1 * jax.random.normal(keys[15], (D,))).astype(jnp.float32),
        "ln2_b": b_init(keys[16], (D,)),
    }

    x = jax.random.normal(keys[0], (B, T, D), jnp.float32)

    fwd = jax.jit(functools.partial(transformer_block_forward, num_heads=H))
    out = fwd(x, params)
    jax.block_until_ready(out)

    assert out.shape == (B, T, D)
    assert bool(jnp.all(jnp.isfinite(out)))

    # numerical check vs pure-JAX reference (same bf16 weights, f32 math)
    ref = reference_block(x, params, H)
    err = jnp.max(jnp.abs(out - ref))
    assert bool(err < 0.1), f"max abs error {err}"

    print("KERNEL_OK")
</pallas_src>

<mosaic_0001>
module attributes {stable_mosaic.version = 11 : i64} {
  func.func @_ffn_kernel(%arg0: i32, %arg1: memref<128x128xbf16, #tpu.memory_space<vmem>>, %arg2: memref<128x512xbf16, #tpu.memory_space<vmem>>, %arg3: memref<1x512xf32, #tpu.memory_space<vmem>>, %arg4: memref<512x128xbf16, #tpu.memory_space<vmem>>, %arg5: memref<1x128xf32, #tpu.memory_space<vmem>>, %arg6: memref<1x128xf32, #tpu.memory_space<vmem>>, %arg7: memref<1x128xf32, #tpu.memory_space<vmem>>, %arg8: memref<128x128xf32, #tpu.memory_space<vmem>>) attributes {dimension_semantics = [#tpu.dimension_semantics<parallel>], iteration_bounds = array<i64: 4>, scalar_prefetch = 0 : i64, scratch_operands = 0 : i64, tpu.core_type = #tpu.core_type<tc>, window_params = [{transform_indices = @transform_0, window_bounds = array<i64: 128, 128>}, {pipeline_mode = #tpu.pipeline_mode<synchronous>, transform_indices = @transform_1, window_bounds = array<i64: 128, 512>}, {pipeline_mode = #tpu.pipeline_mode<synchronous>, transform_indices = @transform_2, window_bounds = array<i64: 1, 512>}, {pipeline_mode = #tpu.pipeline_mode<synchronous>, transform_indices = @transform_3, window_bounds = array<i64: 512, 128>}, {pipeline_mode = #tpu.pipeline_mode<synchronous>, transform_indices = @transform_4, window_bounds = array<i64: 1, 128>}, {pipeline_mode = #tpu.pipeline_mode<synchronous>, transform_indices = @transform_5, window_bounds = array<i64: 1, 128>}, {pipeline_mode = #tpu.pipeline_mode<synchronous>, transform_indices = @transform_6, window_bounds = array<i64: 1, 128>}, {transform_indices = @transform_7, window_bounds = array<i64: 128, 128>}]} {
    %c0 = arith.constant 0 : index
    %c0_0 = arith.constant 0 : index
    %0 = vector.load %arg1[%c0, %c0_0] : memref<128x128xbf16, #tpu.memory_space<vmem>>, vector<128x128xbf16>
    %c0_1 = arith.constant 0 : index
    %c0_2 = arith.constant 0 : index
    %1 = vector.load %arg2[%c0_1, %c0_2] : memref<128x512xbf16, #tpu.memory_space<vmem>>, vector<128x512xbf16>
    %cst = arith.constant dense<0.000000e+00> : vector<128x512xf32>
    %2 = tpu.matmul %0, %1, %cst {dimension_numbers = #tpu.dot_dimension_numbers<[1], [0], [0], [1], [0, 0, 1, 1], [], []>} : vector<128x128xbf16>, vector<128x512xbf16>, vector<128x512xf32> -> vector<128x512xf32>
    %c0_3 = arith.constant 0 : index
    %c0_4 = arith.constant 0 : index
    %3 = vector.load %arg3[%c0_3, %c0_4] : memref<1x512xf32, #tpu.memory_space<vmem>>, vector<1x512xf32>
    %4 = vector.broadcast %3 : vector<1x512xf32> to vector<128x512xf32>
    %5 = arith.addf %2, %4 : vector<128x512xf32>
    %cst_5 = arith.constant 5.000000e-01 : f32
    %6 = vector.broadcast %cst_5 : f32 to vector<128x512xf32>
    %7 = arith.mulf %6, %5 : vector<128x512xf32>
    %cst_6 = arith.constant 0.707106769 : f32
    %8 = vector.broadcast %cst_6 : f32 to vector<128x512xf32>
    %9 = arith.mulf %5, %8 : vector<128x512xf32>
    %10 = math.erf %9 : vector<128x512xf32>
    %cst_7 = arith.constant 1.000000e+00 : f32
    %11 = vector.broadcast %cst_7 : f32 to vector<128x512xf32>
    %12 = arith.addf %11, %10 : vector<128x512xf32>
    %13 = arith.mulf %7, %12 : vector<128x512xf32>
    %14 = arith.truncf %13 : vector<128x512xf32> to vector<128x512xbf16>
    %c0_8 = arith.constant 0 : index
    %c0_9 = arith.constant 0 : index
    %15 = vector.load %arg4[%c0_8, %c0_9] : memref<512x128xbf16, #tpu.memory_space<vmem>>, vector<512x128xbf16>
    %cst_10 = arith.constant dense<0.000000e+00> : vector<128x128xf32>
    %16 = tpu.matmul %14, %15, %cst_10 {dimension_numbers = #tpu.dot_dimension_numbers<[1], [0], [0], [1], [0, 0, 1, 1], [], []>} : vector<128x512xbf16>, vector<512x128xbf16>, vector<128x128xf32> -> vector<128x128xf32>
    %c0_11 = arith.constant 0 : index
    %c0_12 = arith.constant 0 : index
    %17 = vector.load %arg5[%c0_11, %c0_12] : memref<1x128xf32, #tpu.memory_space<vmem>>, vector<1x128xf32>
    %18 = vector.broadcast %17 : vector<1x128xf32> to vector<128x128xf32>
    %19 = arith.addf %16, %18 : vector<128x128xf32>
    %20 = arith.extf %0 : vector<128x128xbf16> to vector<128x128xf32>
    %21 = arith.addf %19, %20 : vector<128x128xf32>
    %cst_13 = arith.constant dense<0.000000e+00> : vector<128xf32>
    %22 = vector.multi_reduction <add>, %21, %cst_13 [1] : vector<128x128xf32> to vector<128xf32>
    %23 = vector.shape_cast %22 : vector<128xf32> to vector<128x1xf32>
    %cst_14 = arith.constant 1.280000e+02 : f32
    %24 = vector.broadcast %cst_14 : f32 to vector<128x1xf32>
    %25 = arith.divf %23, %24 : vector<128x1xf32>
    %26 = vector.broadcast %25 : vector<128x1xf32> to vector<128x128xf32>
    %27 = arith.subf %21, %26 : vector<128x128xf32>
    %28 = arith.mulf %27, %27 : vector<128x128xf32>
    %cst_15 = arith.constant dense<0.000000e+00> : vector<128xf32>
    %29 = vector.multi_reduction <add>, %28, %cst_15 [1] : vector<128x128xf32> to vector<128xf32>
    %30 = vector.shape_cast %29 : vector<128xf32> to vector<128x1xf32>
    %cst_16 = arith.constant 1.280000e+02 : f32
    %31 = vector.broadcast %cst_16 : f32 to vector<128x1xf32>
    %32 = arith.divf %30, %31 : vector<128x1xf32>
    %33 = vector.broadcast %25 : vector<128x1xf32> to vector<128x128xf32>
    %34 = arith.subf %21, %33 : vector<128x128xf32>
    %cst_17 = arith.constant 9.99999974E-6 : f32
    %35 = vector.broadcast %cst_17 : f32 to vector<128x1xf32>
    %36 = arith.addf %32, %35 : vector<128x1xf32>
    %37 = math.rsqrt %36 : vector<128x1xf32>
    %38 = vector.broadcast %37 : vector<128x1xf32> to vector<128x128xf32>
    %39 = arith.mulf %34, %38 : vector<128x128xf32>
    %c0_18 = arith.constant 0 : index
    %c0_19 = arith.constant 0 : index
    %40 = vector.load %arg6[%c0_18, %c0_19] : memref<1x128xf32, #tpu.memory_space<vmem>>, vector<1x128xf32>
    %41 = vector.broadcast %40 : vector<1x128xf32> to vector<128x128xf32>
    %42 = arith.mulf %39, %41 : vector<128x128xf32>
    %c0_20 = arith.constant 0 : index
    %c0_21 = arith.constant 0 : index
    %43 = vector.load %arg7[%c0_20, %c0_21] : memref<1x128xf32, #tpu.memory_space<vmem>>, vector<1x128xf32>
    %44 = vector.broadcast %43 : vector<1x128xf32> to vector<128x128xf32>
    %45 = arith.addf %42, %44 : vector<128x128xf32>
    %c0_22 = arith.constant 0 : index
    %c0_23 = arith.constant 0 : index
    %46 = vector.load %arg8[%c0_22, %c0_23] : memref<128x128xf32, #tpu.memory_space<vmem>>, vector<128x128xf32>
    tpu.vector_store %arg8[%c0_22, %c0_23], %45 {strides = array<i32>} : memref<128x128xf32, #tpu.memory_space<vmem>>, vector<128x128xf32>,
    return
  }
  func.func @transform_0(%arg0: i32) -> (i32, i32) {
    %c0_i32 = arith.constant 0 : i32
    %c0_i32_0 = arith.constant 0 : i32
    return %arg0, %c0_i32 : i32, i32
  }
  func.func @transform_1(%arg0: i32) -> (i32, i32) {
    %c0_i32 = arith.constant 0 : i32
    %c0_i32_0 = arith.constant 0 : i32
    %c0_i32_1 = arith.constant 0 : i32
    return %c0_i32, %c0_i32_0 : i32, i32
  }
  func.func @transform_2(%arg0: i32) -> (i32, i32) {
    %c0_i32 = arith.constant 0 : i32
    %c0_i32_0 = arith.constant 0 : i32
    %c0_i32_1 = arith.constant 0 : i32
    return %c0_i32, %c0_i32_0 : i32, i32
  }
  func.func @transform_3(%arg0: i32) -> (i32, i32) {
    %c0_i32 = arith.constant 0 : i32
    %c0_i32_0 = arith.constant 0 : i32
    %c0_i32_1 = arith.constant 0 : i32
    return %c0_i32, %c0_i32_0 : i32, i32
  }
  func.func @transform_4(%arg0: i32) -> (i32, i32) {
    %c0_i32 = arith.constant 0 : i32
    %c0_i32_0 = arith.constant 0 : i32
    %c0_i32_1 = arith.constant 0 : i32
    return %c0_i32, %c0_i32_0 : i32, i32
  }
  func.func @transform_5(%arg0: i32) -> (i32, i32) {
    %c0_i32 = arith.constant 0 : i32
    %c0_i32_0 = arith.constant 0 : i32
    %c0_i32_1 = arith.constant 0 : i32
    return %c0_i32, %c0_i32_0 : i32, i32
  }
  func.func @transform_6(%arg0: i32) -> (i32, i32) {
    %c0_i32 = arith.constant 0 : i32
    %c0_i32_0 = arith.constant 0 : i32
    %c0_i32_1 = arith.constant 0 : i32
    return %c0_i32, %c0_i32_0 : i32, i32
  }
  func.func @transform_7(%arg0: i32) -> (i32, i32) {
    %c0_i32 = arith.constant 0 : i32
    %c0_i32_0 = arith.constant 0 : i32
    return %arg0, %c0_i32 : i32, i32
  }
}

module attributes {stable_mosaic.version = 11 : i64} {
  func.func @_attn_block_kernel(%arg0: i32, %arg1: i32, %arg2: memref<1x256x128xf32, #tpu.memory_space<vmem>>, %arg3: memref<1x128x32xbf16, #tpu.memory_space<vmem>>, %arg4: memref<1x128x32xbf16, #tpu.memory_space<vmem>>, %arg5: memref<1x128x32xbf16, #tpu.memory_space<vmem>>, %arg6: memref<1x1x32xf32, #tpu.memory_space<vmem>>, %arg7: memref<1x1x32xf32, #tpu.memory_space<vmem>>, %arg8: memref<1x1x32xf32, #tpu.memory_space<vmem>>, %arg9: memref<1x32x128xbf16, #tpu.memory_space<vmem>>, %arg10: memref<1x128xf32, #tpu.memory_space<vmem>>, %arg11: memref<1x128xf32, #tpu.memory_space<vmem>>, %arg12: memref<1x128xf32, #tpu.memory_space<vmem>>, %arg13: memref<1x256x128xbf16, #tpu.memory_space<vmem>>, %arg14: memref<256x128xf32, #tpu.memory_space<vmem>>) attributes {dimension_semantics = [#tpu.dimension_semantics<parallel>, #tpu.dimension_semantics<arbitrary>], iteration_bounds = array<i64: 2, 4>, scalar_prefetch = 0 : i64, scratch_operands = 1 : i64, tpu.core_type = #tpu.core_type<tc>, window_params = [{transform_indices = @transform_0, window_bounds = array<i64: 1, 256, 128>}, {transform_indices = @transform_1, window_bounds = array<i64: 1, 128, 32>}, {transform_indices = @transform_2, window_bounds = array<i64: 1, 128, 32>}, {transform_indices = @transform_3, window_bounds = array<i64: 1, 128, 32>}, {transform_indices = @transform_4, window_bounds = array<i64: 1, 1, 32>}, {transform_indices = @transform_5, window_bounds = array<i64: 1, 1, 32>}, {transform_indices = @transform_6, window_bounds = array<i64: 1, 1, 32>}, {transform_indices = @transform_7, window_bounds = array<i64: 1, 32, 128>}, {pipeline_mode = #tpu.pipeline_mode<synchronous>, transform_indices = @transform_8, window_bounds = array<i64: 1, 128>}, {pipeline_mode = #tpu.pipeline_mode<synchronous>, transform_indices = @transform_9, window_bounds = array<i64: 1, 128>}, {pipeline_mode = #tpu.pipeline_mode<synchronous>, transform_indices = @transform_10, window_bounds = array<i64: 1, 128>}, {transform_indices = @transform_11, window_bounds = array<i64: 1, 256, 128>}]} {
    %c0 = arith.constant 0 : index
    %c0_0 = arith.constant 0 : index
    %c0_1 = arith.constant 0 : index
    %0 = vector.load %arg2[%c0, %c0_0, %c0_1] : memref<1x256x128xf32, #tpu.memory_space<vmem>>, vector<1x256x128xf32>
    %1 = vector.shape_cast %0 : vector<1x256x128xf32> to vector<256x128xf32>
    %2 = arith.truncf %1 : vector<256x128xf32> to vector<256x128xbf16>
    %c0_2 = arith.constant 0 : index
    %c0_3 = arith.constant 0 : index
    %c0_4 = arith.constant 0 : index
    %3 = vector.load %arg3[%c0_2, %c0_3, %c0_4] : memref<1x128x32xbf16, #tpu.memory_space<vmem>>, vector<1x128x32xbf16>
    %4 = vector.shape_cast %3 : vector<1x128x32xbf16> to vector<128x32xbf16>
    %cst = arith.constant dense<0.000000e+00> : vector<256x32xf32>
    %5 = tpu.matmul %2, %4, %cst {dimension_numbers = #tpu.dot_dimension_numbers<[1], [0], [0], [1], [0, 0, 1, 1], [], []>} : vector<256x128xbf16>, vector<128x32xbf16>, vector<256x32xf32> -> vector<256x32xf32>
    %c0_5 = arith.constant 0 : index
    %c0_6 = arith.constant 0 : index
    %c0_7 = arith.constant 0 : index
    %6 = vector.load %arg6[%c0_5, %c0_6, %c0_7] : memref<1x1x32xf32, #tpu.memory_space<vmem>>, vector<1x1x32xf32>
    %7 = vector.shape_cast %6 : vector<1x1x32xf32> to vector<1x32xf32>
    %8 = vector.broadcast %7 : vector<1x32xf32> to vector<256x32xf32>
    %9 = arith.addf %5, %8 : vector<256x32xf32>
    %c0_8 = arith.constant 0 : index
    %c0_9 = arith.constant 0 : index
    %c0_10 = arith.constant 0 : index
    %10 = vector.load %arg4[%c0_8, %c0_9, %c0_10] : memref<1x128x32xbf16, #tpu.memory_space<vmem>>, vector<1x128x32xbf16>
    %11 = vector.shape_cast %10 : vector<1x128x32xbf16> to vector<128x32xbf16>
    %cst_11 = arith.constant dense<0.000000e+00> : vector<256x32xf32>
    %12 = tpu.matmul %2, %11, %cst_11 {dimension_numbers = #tpu.dot_dimension_numbers<[1], [0], [0], [1], [0, 0, 1, 1], [], []>} : vector<256x128xbf16>, vector<128x32xbf16>, vector<256x32xf32> -> vector<256x32xf32>
    %c0_12 = arith.constant 0 : index
    %c0_13 = arith.constant 0 : index
    %c0_14 = arith.constant 0 : index
    %13 = vector.load %arg7[%c0_12, %c0_13, %c0_14] : memref<1x1x32xf32, #tpu.memory_space<vmem>>, vector<1x1x32xf32>
    %14 = vector.shape_cast %13 : vector<1x1x32xf32> to vector<1x32xf32>
    %15 = vector.broadcast %14 : vector<1x32xf32> to vector<256x32xf32>
    %16 = arith.addf %12, %15 : vector<256x32xf32>
    %c0_15 = arith.constant 0 : index
    %c0_16 = arith.constant 0 : index
    %c0_17 = arith.constant 0 : index
    %17 = vector.load %arg5[%c0_15, %c0_16, %c0_17] : memref<1x128x32xbf16, #tpu.memory_space<vmem>>, vector<1x128x32xbf16>
    %18 = vector.shape_cast %17 : vector<1x128x32xbf16> to vector<128x32xbf16>
    %cst_18 = arith.constant dense<0.000000e+00> : vector<256x32xf32>
    %19 = tpu.matmul %2, %18, %cst_18 {dimension_numbers = #tpu.dot_dimension_numbers<[1], [0], [0], [1], [0, 0, 1, 1], [], []>} : vector<256x128xbf16>, vector<128x32xbf16>, vector<256x32xf32> -> vector<256x32xf32>
    %c0_19 = arith.constant 0 : index
    %c0_20 = arith.constant 0 : index
    %c0_21 = arith.constant 0 : index
    %20 = vector.load %arg8[%c0_19, %c0_20, %c0_21] : memref<1x1x32xf32, #tpu.memory_space<vmem>>, vector<1x1x32xf32>
    %21 = vector.shape_cast %20 : vector<1x1x32xf32> to vector<1x32xf32>
    %22 = vector.broadcast %21 : vector<1x32xf32> to vector<256x32xf32>
    %23 = arith.addf %19, %22 : vector<256x32xf32>
    %cst_22 = arith.constant 0.176776692 : f32
    %24 = vector.broadcast %cst_22 : f32 to vector<256x32xf32>
    %25 = arith.mulf %9, %24 : vector<256x32xf32>
    %26 = arith.truncf %25 : vector<256x32xf32> to vector<256x32xbf16>
    %27 = arith.truncf %16 : vector<256x32xf32> to vector<256x32xbf16>
    %cst_23 = arith.constant dense<0.000000e+00> : vector<256x256xf32>
    %28 = tpu.matmul %26, %27, %cst_23 {dimension_numbers = #tpu.dot_dimension_numbers<[1], [1], [0], [0], [0, 0, 1, 0], [], []>} : vector<256x32xbf16>, vector<256x32xbf16>, vector<256x256xf32> -> vector<256x256xf32>
    %cst_24 = arith.constant dense<0xFF800000> : vector<256xf32>
    %29 = vector.multi_reduction <maximumf>, %28, %cst_24 [1] : vector<256x256xf32> to vector<256xf32>
    %30 = vector.shape_cast %29 : vector<256xf32> to vector<256x1xf32>
    %31 = vector.broadcast %30 : vector<256x1xf32> to vector<256x256xf32>
    %32 = arith.subf %28, %31 : vector<256x256xf32>
    %33 = math.exp %32 : vector<256x256xf32>
    %cst_25 = arith.constant dense<0.000000e+00> : vector<256xf32>
    %34 = vector.multi_reduction <add>, %33, %cst_25 [1] : vector<256x256xf32> to vector<256xf32>
    %35 = vector.shape_cast %34 : vector<256xf32> to vector<256x1xf32>
    %36 = tpu.reciprocal %35 {approx = true} : vector<256x1xf32> -> vector<256x1xf32>
    %37 = vector.broadcast %36 : vector<256x1xf32> to vector<256x256xf32>
    %38 = arith.mulf %33, %37 : vector<256x256xf32>
    %39 = arith.truncf %38 : vector<256x256xf32> to vector<256x256xbf16>
    %40 = arith.truncf %23 : vector<256x32xf32> to vector<256x32xbf16>
    %cst_26 = arith.constant dense<0.000000e+00> : vector<256x32xf32>
    %41 = tpu.matmul %39, %40, %cst_26 {dimension_numbers = #tpu.dot_dimension_numbers<[1], [0], [0], [1], [0, 0, 1, 1], [], []>} : vector<256x256xbf16>, vector<256x32xbf16>, vector<256x32xf32> -> vector<256x32xf32>
    %42 = arith.truncf %41 : vector<256x32xf32> to vector<256x32xbf16>
    %c0_27 = arith.constant 0 : index
    %c0_28 = arith.constant 0 : index
    %c0_29 = arith.constant 0 : index
    %43 = vector.load %arg9[%c0_27, %c0_28, %c0_29] : memref<1x32x128xbf16, #tpu.memory_space<vmem>>, vector<1x32x128xbf16>
    %44 = vector.shape_cast %43 : vector<1x32x128xbf16> to vector<32x128xbf16>
    %cst_30 = arith.constant dense<0.000000e+00> : vector<256x128xf32>
    %45 = tpu.matmul %42, %44, %cst_30 {dimension_numbers = #tpu.dot_dimension_numbers<[1], [0], [0], [1], [0, 0, 1, 1], [], []>} : vector<256x32xbf16>, vector<32x128xbf16>, vector<256x128xf32> -> vector<256x128xf32>
    %c0_i32 = arith.constant 0 : i32
    %46 = arith.cmpi eq, %arg1, %c0_i32 : i32
    %47 = arith.extui %46 : i1 to i32
    %c0_i32_31 = arith.constant 0 : i32
    %48 = arith.cmpi ne, %47, %c0_i32_31 : i32
    scf.if %48 {
      %c0_35 = arith.constant 0 : index
      %c0_36 = arith.constant 0 : index
      %55 = vector.load %arg10[%c0_35, %c0_36] : memref<1x128xf32, #tpu.memory_space<vmem>>, vector<1x128xf32>
      %56 = vector.broadcast %55 : vector<1x128xf32> to vector<256x128xf32>
      %57 = arith.addf %45, %56 : vector<256x128xf32>
      %58 = arith.addf %57, %1 : vector<256x128xf32>
      %c0_37 = arith.constant 0 : index
      %c0_38 = arith.constant 0 : index
      %59 = vector.load %arg14[%c0_37, %c0_38] : memref<256x128xf32, #tpu.memory_space<vmem>>, vector<256x128xf32>
      tpu.vector_store %arg14[%c0_37, %c0_38], %58 {strides = array<i32>} : memref<256x128xf32, #tpu.memory_space<vmem>>, vector<256x128xf32>,
    } else {
    }
    %c0_i32_32 = arith.constant 0 : i32
    %49 = arith.cmpi ne, %arg1, %c0_i32_32 : i32
    %50 = arith.extui %49 : i1 to i32
    %c0_i32_33 = arith.constant 0 : i32
    %51 = arith.cmpi ne, %50, %c0_i32_33 : i32
    scf.if %51 {
      %c0_35 = arith.constant 0 : index
      %c0_36 = arith.constant 0 : index
      %55 = vector.load %arg14[%c0_35, %c0_36] : memref<256x128xf32, #tpu.memory_space<vmem>>, vector<256x128xf32>
      %56 = arith.addf %55, %45 : vector<256x128xf32>
      %c0_37 = arith.constant 0 : index
      %c0_38 = arith.constant 0 : index
      %57 = vector.load %arg14[%c0_37, %c0_38] : memref<256x128xf32, #tpu.memory_space<vmem>>, vector<256x128xf32>
      tpu.vector_store %arg14[%c0_37, %c0_38], %56 {strides = array<i32>} : memref<256x128xf32, #tpu.memory_space<vmem>>, vector<256x128xf32>,
    } else {
    }
    %c3_i32 = arith.constant 3 : i32
    %52 = arith.cmpi eq, %arg1, %c3_i32 : i32
    %53 = arith.extui %52 : i1 to i32
    %c0_i32_34 = arith.constant 0 : i32
    %54 = arith.cmpi ne, %53, %c0_i32_34 : i32
    scf.if %54 {
      %c0_35 = arith.constant 0 : index
      %c0_36 = arith.constant 0 : index
      %55 = vector.load %arg14[%c0_35, %c0_36] : memref<256x128xf32, #tpu.memory_space<vmem>>, vector<256x128xf32>
      %cst_37 = arith.constant dense<0.000000e+00> : vector<256xf32>
      %56 = vector.multi_reduction <add>, %55, %cst_37 [1] : vector<256x128xf32> to vector<256xf32>
      %57 = vector.shape_cast %56 : vector<256xf32> to vector<256x1xf32>
      %cst_38 = arith.constant 1.280000e+02 : f32
      %58 = vector.broadcast %cst_38 : f32 to vector<256x1xf32>
      %59 = arith.divf %57, %58 : vector<256x1xf32>
      %60 = vector.broadcast %59 : vector<256x1xf32> to vector<256x128xf32>
      %61 = arith.subf %55, %60 : vector<256x128xf32>
      %62 = arith.mulf %61, %61 : vector<256x128xf32>
      %cst_39 = arith.constant dense<0.000000e+00> : vector<256xf32>
      %63 = vector.multi_reduction <add>, %62, %cst_39 [1] : vector<256x128xf32> to vector<256xf32>
      %64 = vector.shape_cast %63 : vector<256xf32> to vector<256x1xf32>
      %cst_40 = arith.constant 1.280000e+02 : f32
      %65 = vector.broadcast %cst_40 : f32 to vector<256x1xf32>
      %66 = arith.divf %64, %65 : vector<256x1xf32>
      %67 = vector.broadcast %59 : vector<256x1xf32> to vector<256x128xf32>
      %68 = arith.subf %55, %67 : vector<256x128xf32>
      %cst_41 = arith.constant 9.99999974E-6 : f32
      %69 = vector.broadcast %cst_41 : f32 to vector<256x1xf32>
      %70 = arith.addf %66, %69 : vector<256x1xf32>
      %71 = math.rsqrt %70 : vector<256x1xf32>
      %72 = vector.broadcast %71 : vector<256x1xf32> to vector<256x128xf32>
      %73 = arith.mulf %68, %72 : vector<256x128xf32>
      %c0_42 = arith.constant 0 : index
      %c0_43 = arith.constant 0 : index
      %74 = vector.load %arg11[%c0_42, %c0_43] : memref<1x128xf32, #tpu.memory_space<vmem>>, vector<1x128xf32>
      %75 = vector.broadcast %74 : vector<1x128xf32> to vector<256x128xf32>
      %76 = arith.mulf %73, %75 : vector<256x128xf32>
      %c0_44 = arith.constant 0 : index
      %c0_45 = arith.constant 0 : index
      %77 = vector.load %arg12[%c0_44, %c0_45] : memref<1x128xf32, #tpu.memory_space<vmem>>, vector<1x128xf32>
      %78 = vector.broadcast %77 : vector<1x128xf32> to vector<256x128xf32>
      %79 = arith.addf %76, %78 : vector<256x128xf32>
      %80 = arith.truncf %79 : vector<256x128xf32> to vector<256x128xbf16>
      %c0_46 = arith.constant 0 : index
      %c0_47 = arith.constant 0 : index
      %c0_48 = arith.constant 0 : index
      %81 = vector.load %arg13[%c0_46, %c0_47, %c0_48] : memref<1x256x128xbf16, #tpu.memory_space<vmem>>, vector<1x256x128xbf16>
      %82 = vector.shape_cast %81 : vector<1x256x128xbf16> to vector<256x128xbf16>
      %83 = vector.shape_cast %80 : vector<256x128xbf16> to vector<1x256x128xbf16>
      tpu.vector_store %arg13[%c0_46, %c0_47, %c0_48], %83 {strides = array<i32>} : memref<1x256x128xbf16, #tpu.memory_space<vmem>>, vector<1x256x128xbf16>,
    } else {
    }
    return
  }
  func.func @transform_0(%arg0: i32, %arg1: i32) -> (i32, i32, i32) {
    %c0_i32 = arith.constant 0 : i32
    %c0_i32_0 = arith.constant 0 : i32
    %c0_i32_1 = arith.constant 0 : i32
    return %arg0, %c0_i32, %c0_i32_0 : i32, i32, i32
  }
  func.func @transform_1(%arg0: i32, %arg1: i32) -> (i32, i32, i32) {
    %c0_i32 = arith.constant 0 : i32
    %c0_i32_0 = arith.constant 0 : i32
    %c0_i32_1 = arith.constant 0 : i32
    return %arg1, %c0_i32, %c0_i32_0 : i32, i32, i32
  }
  func.func @transform_2(%arg0: i32, %arg1: i32) -> (i32, i32, i32) {
    %c0_i32 = arith.constant 0 : i32
    %c0_i32_0 = arith.constant 0 : i32
    %c0_i32_1 = arith.constant 0 : i32
    return %arg1, %c0_i32, %c0_i32_0 : i32, i32, i32
  }
  func.func @transform_3(%arg0: i32, %arg1: i32) -> (i32, i32, i32) {
    %c0_i32 = arith.constant 0 : i32
    %c0_i32_0 = arith.constant 0 : i32
    %c0_i32_1 = arith.constant 0 : i32
    return %arg1, %c0_i32, %c0_i32_0 : i32, i32, i32
  }
  func.func @transform_4(%arg0: i32, %arg1: i32) -> (i32, i32, i32) {
    %c0_i32 = arith.constant 0 : i32
    %c0_i32_0 = arith.constant 0 : i32
    %c0_i32_1 = arith.constant 0 : i32
    return %arg1, %c0_i32, %c0_i32_0 : i32, i32, i32
  }
  func.func @transform_5(%arg0: i32, %arg1: i32) -> (i32, i32, i32) {
    %c0_i32 = arith.constant 0 : i32
    %c0_i32_0 = arith.constant 0 : i32
    %c0_i32_1 = arith.constant 0 : i32
    return %arg1, %c0_i32, %c0_i32_0 : i32, i32, i32
  }
  func.func @transform_6(%arg0: i32, %arg1: i32) -> (i32, i32, i32) {
    %c0_i32 = arith.constant 0 : i32
    %c0_i32_0 = arith.constant 0 : i32
    %c0_i32_1 = arith.constant 0 : i32
    return %arg1, %c0_i32, %c0_i32_0 : i32, i32, i32
  }
  func.func @transform_7(%arg0: i32, %arg1: i32) -> (i32, i32, i32) {
    %c0_i32 = arith.constant 0 : i32
    %c0_i32_0 = arith.constant 0 : i32
    %c0_i32_1 = arith.constant 0 : i32
    return %arg1, %c0_i32, %c0_i32_0 : i32, i32, i32
  }
  func.func @transform_8(%arg0: i32, %arg1: i32) -> (i32, i32) {
    %c0_i32 = arith.constant 0 : i32
    %c0_i32_0 = arith.constant 0 : i32
    %c0_i32_1 = arith.constant 0 : i32
    return %c0_i32, %c0_i32_0 : i32, i32
  }
  func.func @transform_9(%arg0: i32, %arg1: i32) -> (i32, i32) {
    %c0_i32 = arith.constant 0 : i32
    %c0_i32_0 = arith.constant 0 : i32
    %c0_i32_1 = arith.constant 0 : i32
    return %c0_i32, %c0_i32_0 : i32, i32
  }
  func.func @transform_10(%arg0: i32, %arg1: i32) -> (i32, i32) {
    %c0_i32 = arith.constant 0 : i32
    %c0_i32_0 = arith.constant 0 : i32
    %c0_i32_1 = arith.constant 0 : i32
    return %c0_i32, %c0_i32_0 : i32, i32
  }
  func.func @transform_11(%arg0: i32, %arg1: i32) -> (i32, i32, i32) {
    %c0_i32 = arith.constant 0 : i32
    %c0_i32_0 = arith.constant 0 : i32
    %c0_i32_1 = arith.constant 0 : i32
    return %arg0, %c0_i32, %c0_i32_0 : i32, i32, i32
  }
}

</mosaic_0001>

<bundles_post_ra>
// kernel: transformer_block_forward.3
= control target key start
LH: loop header
LB: loop body
LE: loop exit
PB: predicated region body
PF: predicated region fallthrough
CT: control target
= control target key end

     0   :  { %12 = vsyncpa [#allocation3], 0  ;;  %s9159_s0 = inlined_call_operand.vmem [shape: bf16[512,128], index: 0, kind: input, shape index: {}]   ;;  %s9160_s1 = inlined_call_operand.vmem [shape: bf16[128,512], index: 1, kind: input, shape index: {}]   ;;  %s9161_s2 = inlined_call_operand.vmem [shape: f32[1,512], index: 2, kind: input, shape index: {}]   ;;  %s9162_s3 = inlined_call_operand.vmem [shape: bf16[512,128], index: 3, kind: input, shape index: {}]   ;;  %s9163_s4 = inlined_call_operand.vmem [shape: f32[1,128], index: 4, kind: input, shape index: {}]   ;;  %s9164_s5 = inlined_call_operand.vmem [shape: f32[1,128], index: 5, kind: input, shape index: {}]   ;;  %s9165_s6 = inlined_call_operand.vmem [shape: f32[1,128], index: 6, kind: input, shape index: {}]   ;;  %s9166_s7 = inlined_call_operand.hbm [shape: f32[512,128], index: 7, kind: output, shape index: {}]  }
   0x1   :  { %14 = vsyncpa [#allocation3 + $0x1], 0  ;;  %s5290_s24 = smov 0   ;;  %s5292_s25 = smov 0  }
   0x2   :  { %s5294_s26 = smov 0   ;;  %s5296_s27 = smov 0  }
   0x3 LB: > { %s5311_s28 = sadd.s32 4294967295, %s5245_s27   ;;  %s4539_s29 = sadd.s32 4294967294, %s5245_s27   ;;  %s5245_s27 = sphi %s5296_s27, %s9566_s27   ;;  %s5241_s26 = sphi %s5294_s26, %s9565_s26   ;;  %s5237_s25 = sphi %s5292_s25, %s9564_s25   ;;  %s5233_s24 = sphi %s5290_s24, %s9563_s24  }
   0x4   : > { %s5315_s30 = sadd.s32 1, %s5245_s27   ;;  %s179_s8 = sadd.s32 1, %s5241_s26 }
   0x5   : > { %s176_s9 = ssub.s32 %s5245_s27, %s5315_s30  ;;  %p189_p0 = scmp.ne.s32.totalorder %s5241_s26, %s5237_s25 }
   0x6   : > { %p177_p1 = scmp.eq.s32.totalorder %s176_s9, 0  ;;  %p190_p2 = scmp.eq.s32.totalorder %s5311_s28, 3 }
   0x7   : > { %p195_p3 = scmp.ne.s32.totalorder %s5237_s25, %s5233_s24  ;;  %p196_p4 = scmp.eq.s32.totalorder %s4539_s29, 3 }
   0x8   : > { %s5326_s10 = scalar_select %p177_p1, %s5241_s26, %s179_s8  }
   0x9   : > { %p5328_p5 = por %p190_p2, %p189_p0  ;;  %p5332_p6 = por %p196_p4, %p195_p3 }
   0xa   : > { %p4542_p7 = scmp.ge.s32.totalorder %s5245_s27, 1  ;;  %p241_p8 = scmp.lt.s32.totalorder %s5245_s27, 5 }
   0xc   : > { %p242_p9 = pnand %p4542_p7, %p241_p8 }
   0xe   : > { %245 = sbr.rel (%p242_p9) target bundleno = 1315 (0x523), region = 48 }
  0x13   : > { %v4692_v0 = vld [vmem:[%s9160_s1 + $0xe0] sm:$0xf]  ;;  %v4941_v1 = vld [vmem:[%s9160_s1 + $0xec] sm:$0xf0]  ;;  %v4939_v2 = vld [vmem:[%s9160_s1 + $0xe4] sm:$0xf] }
  0x14   : > { %v4693_v3 = vor.u32 %v4941_v1, %v4692_v0  ;;  %v4694_v4 = vld [vmem:[%s9160_s1 + $0xf0] sm:$0xf0]  ;;  %v4700_v5 = vld [vmem:[%s9160_s1 + $0xe8] sm:$0xf]  ;;  %v4942_v6 = vld [vmem:[%s9160_s1 + $0xf4] sm:$0xf0] }
  0x15   : > { %v4697_v7 = vor.u32 %v4939_v2, %v4694_v4  ;;  %v4701_v8 = vor.u32 %v4942_v6, %v4700_v5  ;;  %v4940_v9 = vld [vmem:[%s9160_s1 + $0xec] sm:$0xf]  ;;  %v4702_v10 = vld [vmem:[%s9160_s1 + $0xf8] sm:$0xf0]  ;;  %v4676_v11 = vld [vmem:[%s9160_s1 + $0xc0] sm:$0xf] }
  0x16   : > { %546 = vmatpush.bf16.msra.mxu0 %v4693_v3  ;;  %v4705_v12 = vor.u32 %v4940_v9, %v4702_v10  ;;  %v4937_v13 = vld [vmem:[%s9160_s1 + $0xcc] sm:$0xf0]  ;;  %v4935_v14 = vld [vmem:[%s9160_s1 + $0xc4] sm:$0xf]  ;;  %v4678_v15 = vld [vmem:[%s9160_s1 + $0xd0] sm:$0xf0] }
  0x17   : > { %595 = vmatpush.bf16.msra.mxu1 %v4697_v7  ;;  %644 = vmatpush.bf16.msra.mxu2 %v4701_v8  ;;  %v4677_v16 = vor.u32 %v4937_v13, %v4676_v11  ;;  %v4681_v17 = vor.u32 %v4935_v14, %v4678_v15  ;;  %v4684_v18 = vld [vmem:[%s9160_s1 + $0xc8] sm:$0xf]  ;;  %v4938_v19 = vld [vmem:[%s9160_s1 + $0xd4] sm:$0xf0]  ;;  %v4936_v20 = vld [vmem:[%s9160_s1 + $0xcc] sm:$0xf] }
  0x18   : > { %693 = vmatpush.bf16.msra.mxu3 %v4705_v12  ;;  %v4685_v21 = vor.u32 %v4938_v19, %v4684_v18  ;;  %v4686_v22 = vld [vmem:[%s9160_s1 + $0xd8] sm:$0xf0]  ;;  %v4660_v23 = vld [vmem:[%s9160_s1 + $0xa0] sm:$0xf]  ;;  %v4933_v24 = vld [vmem:[%s9160_s1 + $0xac] sm:$0xf0] }
  0x19   : > { %v4689_v25 = vor.u32 %v4936_v20, %v4686_v22  ;;  %v4931_v26 = vld [vmem:[%s9160_s1 + $0xa4] sm:$0xf]  ;;  %v4662_v27 = vld [vmem:[%s9160_s1 + $0xb0] sm:$0xf0]  ;;  %v4668_v28 = vld [vmem:[%s9160_s1 + $0xa8] sm:$0xf]  ;;  %v4661_v29 = vor.u32 %v4933_v24, %v4660_v23 }
  0x1a   : > { %547 = vmatpush.bf16.msra.mxu0 %v4677_v16  ;;  %v4934_v30 = vld [vmem:[%s9160_s1 + $0xb4] sm:$0xf0]  ;;  %v4932_v31 = vld [vmem:[%s9160_s1 + $0xac] sm:$0xf]  ;;  %v4670_v32 = vld [vmem:[%s9160_s1 + $0xb8] sm:$0xf0]  ;;  %v4665_v33 = vor.u32 %v4931_v26, %v4662_v27 }
  0x1b   : > { %596 = vmatpush.bf16.msra.mxu1 %v4681_v17  ;;  %645 = vmatpush.bf16.msra.mxu2 %v4685_v21  ;;  %v4669_v34 = vor.u32 %v4934_v30, %v4668_v28  ;;  %v4644_v35 = vld [vmem:[%s9160_s1 + $0x80] sm:$0xf]  ;;  %v4929_v36 = vld [vmem:[%s9160_s1 + $0x8c] sm:$0xf0]  ;;  %v4927_v37 = vld [vmem:[%s9160_s1 + $0x84] sm:$0xf]  ;;  %v4673_v38 = vor.u32 %v4932_v31, %v4670_v32 }
  0x1c   : > { %694 = vmatpush.bf16.msra.mxu3 %v4689_v25  ;;  %v4646_v39 = vld [vmem:[%s9160_s1 + $0x90] sm:$0xf0]  ;;  %v4652_v40 = vld [vmem:[%s9160_s1 + $0x88] sm:$0xf]  ;;  %v4930_v41 = vld [vmem:[%s9160_s1 + $0x94] sm:$0xf0]  ;;  %v4645_v44 = vor.u32 %v4929_v36, %v4644_v35 }
  0x1d   : > { %v4928_v42 = vld [vmem:[%s9160_s1 + $0x8c] sm:$0xf]  ;;  %v4654_v43 = vld [vmem:[%s9160_s1 + $0x98] sm:$0xf0]  ;;  %v4649_v45 = vor.u32 %v4927_v37, %v4646_v39  ;;  %v4653_v46 = vor.u32 %v4930_v41, %v4652_v40  ;;  %v4628_v47 = vld [vmem:[%s9160_s1 + $0x60] sm:$0xf] }
  0x1e   : > { %548 = vmatpush.bf16.msra.mxu0 %v4661_v29  ;;  %v4925_v48 = vld [vmem:[%s9160_s1 + $0x6c] sm:$0xf0]  ;;  %v4923_v49 = vld [vmem:[%s9160_s1 + $0x64] sm:$0xf]  ;;  %v4657_v50 = vor.u32 %v4928_v42, %v4654_v43  ;;  %v4630_v51 = vld [vmem:[%s9160_s1 + $0x70] sm:$0xf0] }
  0x1f   : > { %597 = vmatpush.bf16.msra.mxu1 %v4665_v33  ;;  %646 = vmatpush.bf16.msra.mxu2 %v4669_v34  ;;  %v4636_v52 = vld [vmem:[%s9160_s1 + $0x68] sm:$0xf]  ;;  %v4926_v53 = vld [vmem:[%s9160_s1 + $0x74] sm:$0xf0]  ;;  %v4924_v54 = vld [vmem:[%s9160_s1 + $0x6c] sm:$0xf]  ;;  %v4629_v56 = vor.u32 %v4925_v48, %v4628_v47  ;;  %v4633_v57 = vor.u32 %v4923_v49, %v4630_v51 }
  0x20   : > { %695 = vmatpush.bf16.msra.mxu3 %v4673_v38  ;;  %v4638_v55 = vld [vmem:[%s9160_s1 + $0x78] sm:$0xf0]  ;;  %v4637_v58 = vor.u32 %v4926_v53, %v4636_v52  ;;  %v4612_v59 = vld [vmem:[%s9160_s1 + $0x40] sm:$0xf]  ;;  %v4921_v60 = vld [vmem:[%s9160_s1 + $0x4c] sm:$0xf0] }
  0x21   : > { %v4919_v61 = vld [vmem:[%s9160_s1 + $0x44] sm:$0xf]  ;;  %v4641_v62 = vor.u32 %v4924_v54, %v4638_v55  ;;  %v4614_v63 = vld [vmem:[%s9160_s1 + $0x50] sm:$0xf0]  ;;  %v4620_v0 = vld [vmem:[%s9160_s1 + $0x48] sm:$0xf]  ;;  %v4613_v5 = vor.u32 %v4921_v60, %v4612_v59 }
  0x22   : > { %549 = vmatpush.bf16.msra.mxu0 %v4645_v44  ;;  %v4922_v1 = vld [vmem:[%s9160_s1 + $0x54] sm:$0xf0]  ;;  %v4920_v2 = vld [vmem:[%s9160_s1 + $0x4c] sm:$0xf]  ;;  %v4622_v3 = vld [vmem:[%s9160_s1 + $0x58] sm:$0xf0]  ;;  %v4617_v9 = vor.u32 %v4919_v61, %v4614_v63 }
  0x23   : > { %598 = vmatpush.bf16.msra.mxu1 %v4649_v45  ;;  %647 = vmatpush.bf16.msra.mxu2 %v4653_v46  ;;  %v4596_v4 = vld [vmem:[%s9160_s1 + $0x20] sm:$0xf]  ;;  %v4917_v6 = vld [vmem:[%s9160_s1 + $0x2c] sm:$0xf0]  ;;  %v4915_v7 = vld [vmem:[%s9160_s1 + $0x24] sm:$0xf]  ;;  %v4621_v10 = vor.u32 %v4922_v1, %v4620_v0  ;;  %v4625_v14 = vor.u32 %v4920_v2, %v4622_v3 }
  0x24   : > { %696 = vmatpush.bf16.msra.mxu3 %v4657_v50  ;;  %v4598_v8 = vld [vmem:[%s9160_s1 + $0x30] sm:$0xf0]  ;;  %v4604_v11 = vld [vmem:[%s9160_s1 + $0x28] sm:$0xf]  ;;  %v4918_v12 = vld [vmem:[%s9160_s1 + $0x34] sm:$0xf0]  ;;  %v4597_v16 = vor.u32 %v4917_v6, %v4596_v4 }
  0x25   : > { %v4916_v13 = vld [vmem:[%s9160_s1 + $0x2c] sm:$0xf]  ;;  %v4606_v15 = vld [vmem:[%s9160_s1 + $0x38] sm:$0xf0]  ;;  %s4544_s13 = sshll.u32 %s5311_s28, 4  ;;  %v4601_v18 = vor.u32 %v4915_v7, %v4598_v8  ;;  %v4605_v19 = vor.u32 %v4918_v12, %v4604_v11  ;;  %v4965_v40 = vld [vmem:[%s9162_s3 + $0xb0] sm:$0xff] }
  0x26   : > { %550 = vmatpush.bf16.msra.mxu0 %v4629_v56  ;;  %p274_p10 = scmp.lt.s32.totalorder %s4544_s13, 63  ;;  %v4580_v17 = vld [vmem:[%s9160_s1] sm:$0xf]  ;;  %v4913_v20 = vld [vmem:[%s9160_s1 + $0xc] sm:$0xf0]  ;;  %v4609_v22 = vor.u32 %v4916_v13, %v4606_v15  ;;  %v4966_v35 = vld [vmem:[%s9162_s3 + $0xb8] sm:$0xff] }
  0x27   : > { %599 = vmatpush.bf16.msra.mxu1 %v4633_v57  ;;  %648 = vmatpush.bf16.msra.mxu2 %v4637_v58  ;;  %v4911_v21 = vld [vmem:[%s9160_s1 + $0x4] sm:$0xf]  ;;  %v4582_v23 = vld [vmem:[%s9160_s1 + $0x10] sm:$0xf0]  ;;  %v4588_v24 = vld [vmem:[%s9160_s1 + $0x8] sm:$0xf]  ;;  %v4581_v28 = vor.u32 %v4913_v20, %v4580_v17 }
  0x28   : > { %697 = vmatpush.bf16.msra.mxu3 %v4641_v62  ;;  %s9568_s13 = smov (!%p274_p10, %s4544_s13), 63  ;;  %v4914_v25 = vld [vmem:[%s9160_s1 + $0x14] sm:$0xf0]  ;;  %v4912_v26 = vld [vmem:[%s9160_s1 + $0xc] sm:$0xf]  ;;  %v4585_v29 = vor.u32 %v4911_v21, %v4582_v23  ;;  %v4949_v41 = vld [vmem:[%s9162_s3 + $0x30] sm:$0xff] }
  0x29   : > { %v4590_v27 = vld [vmem:[%s9160_s1 + $0x18] sm:$0xf0]  ;;  %s4545_s17 = sshll.u32 %s9568_s13, 2  ;;  %v4589_v30 = vor.u32 %v4914_v25, %v4588_v24  ;;  %v4973_v42 = vld [vmem:[%s9162_s3 + $0xf0] sm:$0xff]  ;;  %v4964_v45 = vld [vmem:[%s9162_s3 + $0xa8] sm:$0xff]  ;;  %s4975_s16 = sshll.u32 %s5311_s28, 7 }
  0x2a   : > { %551 = vmatpush.bf16.msra.mxu0 %v4613_v5  ;;  %s5534_s20 = scalar_lea.vmem %s9159_s0, %s4545_s17  ;;  %v4593_v31 = vor.u32 %v4912_v26, %v4590_v27  ;;  %v4950_v36 = vld [vmem:[%s9162_s3 + $0x38] sm:$0xff]  ;;  %v4957_v43 = vld [vmem:[%s9162_s3 + $0x70] sm:$0xff]  ;;  %v4948_v46 = vld [vmem:[%s9162_s3 + $0x28] sm:$0xff]  ;;  %s4473_s19 = scalar_lea.hbm %s9166_s7, %s4975_s16 }
  0x2b   : > { %600 = vmatpush.bf16.msra.mxu1 %v4617_v9  ;;  %649 = vmatpush.bf16.msra.mxu2 %v4621_v10  ;;  %v4903_v32 = vld [vmem:[%s5534_s20] sm:$0xff]  ;;  %v4904_v33 = vld [vmem:[%s5534_s20 + $0x8] sm:$0xff]  ;;  %v4905_v34 = vld [vmem:[%s5534_s20 + $0x10] sm:$0xff]  ;;  %s4476_s21 = sshll.u32 %s4473_s19, 4  ;;  %s5203_s9 = scalar_lea.hbm %s9166_s7, 512  ;;  %s4477_s21 = int_to_ptr.hbm [resolvable:$true] %s4476_s21 }
  0x2c   : > { %698 = vmatpush.bf16.msra.mxu3 %v4625_v14  ;;  %v4974_v37 = vld [vmem:[%s9162_s3 + $0xf8] sm:$0xff]  ;;  %v4907_v44 = vld [vmem:[%s5534_s20 + $0x20] sm:$0xff]  ;;  %v4972_v47 = vld [vmem:[%s9162_s3 + $0xe8] sm:$0xff]  ;;  %s5197_s22 = sshra.s32 %s4477_s21, 4  ;;  %s5198_s22 = int_to_ptr.hbm [resolvable:$true] %s5197_s22 }
  0x2d   : > { %v4958_v38 = vld [vmem:[%s9162_s3 + $0x78] sm:$0xff]  ;;  %v4956_v48 = vld [vmem:[%s9162_s3 + $0x68] sm:$0xff]  ;;  %v4963_v50 = vld [vmem:[%s9162_s3 + $0xa0] sm:$0xff]  ;;  %s5199_s23 = scalar_lea.hbm %s5198_s22, 128  ;;  %p5204_p0 = scmp.lt.s32.totalorder %s5198_s22, %s9166_s7 }
  0x2e   : > { %552 = vmatpush.bf16.msra.mxu0 %v4597_v16  ;;  %v4906_v39 = vld [vmem:[%s5534_s20 + $0x18] sm:$0xff]  ;;  %v4908_v49 = vld [vmem:[%s5534_s20 + $0x28] sm:$0xff]  ;;  %v4947_v51 = vld [vmem:[%s9162_s3 + $0x20] sm:$0xff]  ;;  %p5200_p11 = scmp.ne.s32.totalorder %s5198_s22, %s5199_s23  ;;  %p5205_p1 = scmp.lt.s32.totalorder %s5203_s9, %s5199_s23 }
  0x2f   : > { %601 = vmatpush.bf16.msra.mxu1 %v4601_v18  ;;  %650 = vmatpush.bf16.msra.mxu2 %v4605_v19  ;;  %v4971_v52 = vld [vmem:[%s9162_s3 + $0xe0] sm:$0xff]  ;;  %v4909_v54 = vld [vmem:[%s5534_s20 + $0x30] sm:$0xff]  ;;  %v4910_v55 = vld [vmem:[%s5534_s20 + $0x38] sm:$0xff] }
  0x30   : > { %699 = vmatpush.bf16.msra.mxu3 %v4609_v22  ;;  %v4955_v53 = vld [vmem:[%s9162_s3 + $0x60] sm:$0xff]  ;;  %p5201_p12 = pnand %p5200_p11, %p5328_p5  ;;  %p5206_p2 = por %p5205_p1, %p5204_p0 }
  0x31   : > { %v328_v56 = vld [vmem:[%s9161_s2] sm:$0xf] }
  0x32   : > { %553 = vmatpush.bf16.msra.mxu0 %v4581_v28  ;;  %v5595_v57 = vperm.slane %v328_v56, 0  ;;  %v5597_v59 = vperm.slane %v328_v56, 1  ;;  %v5605_v63 = vperm.slane %v328_v56, 2  ;;  %v5610_v2 = vperm.slane %v328_v56, 3  ;;  %p5202_p13 = pneg %p5201_p12 }
  0x33   : > { %602 = vmatpush.bf16.msra.mxu1 %v4585_v29  ;;  %651 = vmatpush.bf16.msra.mxu2 %v4589_v30  ;;  %v4962_v30 = vld [vmem:[%s9162_s3 + $0x98] sm:$0xff] }
  0x34   : > { %700 = vmatpush.bf16.msra.mxu3 %v4593_v31  ;;  %9226 = vst [vmem:[#allocation5_spill] sm:$0xff] %v5605_v63  ;;  %p5207_p3 = pnand %p5206_p2, %p5202_p13 }
  0x35   : > { %554 = vmatmul.bf16.vlgmr.msra.gmra.mxu0 %v4903_v32 }
  0x36   : > { %603 = vmatmul.bf16.vlgmr.msra.gmra.mxu1 %v4903_v32  ;;  %652 = vmatmul.bf16.vlgmr.msra.gmra.mxu2 %v4903_v32 }
  0x37   : > { %701 = vmatmul.bf16.vlgmr.msra.gmra.mxu3 %v4903_v32  ;;  %3948 = vmatpush.bf16.msrb.mxu2 %v4966_v35 }
  0x38   : > { %3850 = vmatpush.bf16.msrb.mxu0 %v4950_v36  ;;  %3997 = vmatpush.bf16.msrb.mxu3 %v4974_v37 }
  0x39   : > { %3899 = vmatpush.bf16.msrb.mxu1 %v4958_v38 }
  0x3b   : > { %3949 = vmatpush.bf16.msrb.mxu2 %v4965_v40 }
  0x3c   : > { %3851 = vmatpush.bf16.msrb.mxu0 %v4949_v41  ;;  %3998 = vmatpush.bf16.msrb.mxu3 %v4973_v42 }
  0x3d   : > { %3900 = vmatpush.bf16.msrb.mxu1 %v4957_v43 }
  0x3f   : > { %3950 = vmatpush.bf16.msrb.mxu2 %v4964_v45 }
  0x40   : > { %3852 = vmatpush.bf16.msrb.mxu0 %v4948_v46  ;;  %3999 = vmatpush.bf16.msrb.mxu3 %v4972_v47 }
  0x41   : > { %3901 = vmatpush.bf16.msrb.mxu1 %v4956_v48 }
  0x43   : > { %3951 = vmatpush.bf16.msrb.mxu2 %v4963_v50 }
  0x44   : > { %3853 = vmatpush.bf16.msrb.mxu0 %v4947_v51  ;;  %4000 = vmatpush.bf16.msrb.mxu3 %v4971_v52 }
  0x45   : > { %559 = vmatmul.bf16.gmra.mxu0 %v4904_v33  ;;  %3902 = vmatpush.bf16.msrb.mxu1 %v4955_v53 }
  0x46   : > { %608 = vmatmul.bf16.gmra.mxu1 %v4904_v33  ;;  %657 = vmatmul.bf16.gmra.mxu2 %v4904_v33 }
  0x47   : > { %706 = vmatmul.bf16.gmra.mxu3 %v4904_v33  ;;  %3952 = vmatpush.bf16.msrb.mxu2 %v4962_v30 }
  0x55   : > { %564 = vmatmul.bf16.gmra.mxu0 %v4905_v34 }
  0x56   : > { %613 = vmatmul.bf16.gmra.mxu1 %v4905_v34  ;;  %662 = vmatmul.bf16.gmra.mxu2 %v4905_v34 }
  0x57   : > { %711 = vmatmul.bf16.gmra.mxu3 %v4905_v34 }
  0x65   : > { %569 = vmatmul.bf16.gmra.mxu0 %v4906_v39 }
  0x66   : > { %618 = vmatmul.bf16.gmra.mxu1 %v4906_v39  ;;  %667 = vmatmul.bf16.gmra.mxu2 %v4906_v39 }
  0x67   : > { %716 = vmatmul.bf16.gmra.mxu3 %v4906_v39 }
  0x75   : > { %574 = vmatmul.bf16.gmra.mxu0 %v4907_v44 }
  0x76   : > { %623 = vmatmul.bf16.gmra.mxu1 %v4907_v44  ;;  %672 = vmatmul.bf16.gmra.mxu2 %v4907_v44 }
  0x77   : > { %721 = vmatmul.bf16.gmra.mxu3 %v4907_v44 }
  0x85   : > { %579 = vmatmul.bf16.gmra.mxu0 %v4908_v49 }
  0x86   : > { %628 = vmatmul.bf16.gmra.mxu1 %v4908_v49  ;;  %677 = vmatmul.bf16.gmra.mxu2 %v4908_v49 }
  0x87   : > { %726 = vmatmul.bf16.gmra.mxu3 %v4908_v49 }
  0x95   : > { %584 = vmatmul.bf16.gmra.mxu0 %v4909_v54 }
  0x96   : > { %633 = vmatmul.bf16.gmra.mxu1 %v4909_v54  ;;  %682 = vmatmul.bf16.gmra.mxu2 %v4909_v54 }
  0x97   : > { %731 = vmatmul.bf16.gmra.mxu3 %v4909_v54 }
  0xa5   : > { %589 = vmatmul.bf16.gmra.mxu0 %v4910_v55 }
  0xa6   : > { %638 = vmatmul.bf16.gmra.mxu1 %v4910_v55  ;;  %687 = vmatmul.bf16.gmra.mxu2 %v4910_v55 }
  0xa7   : > { %736 = vmatmul.bf16.gmra.mxu3 %v4910_v55 }
  0xb2   : > { %v555_v58 = vpop.f32.mrf.mxu0 }
  0xb3   : > { %v604_v60 = vpop.f32.mrf.mxu1  ;;  %v5600_v61 = vadd.f32 %v555_v58, %v5595_v57 }
  0xb4   : > { %v5603_v62 = vadd.f32 %v604_v60, %v5597_v59 }
  0xb5   : > { %v5608_v1 = vmul.f32 0.70710677, %v5600_v61 }
  0xb6   : > { %v5613_v3 = vmul.f32 0.70710677, %v5603_v62 }
  0xb7   : > { %v870_v6 = vmul.f32 %v5608_v1, %v5608_v1 }
  0xb8   : > { %v910_v8 = vmul.f32 %v5613_v3, %v5613_v3 }
  0xb9   : > { %v653_v0 = vpop.f32.mrf.mxu2  ;;  %v5628_v10 = vmin.f32 %v870_v6, 16.0 }
  0xba   : > { %v702_v4 = vpop.f32.mrf.mxu3  ;;  %v5616_v5 = vadd.f32 %v653_v0, %v5605_v63  ;;  %v5633_v12 = vmin.f32 %v910_v8, 16.0  ;;  %v557_v14 = vpop.f32.mrf.mxu0 }
  0xbb   : > { %v5621_v7 = vadd.f32 %v702_v4, %v5610_v2  ;;  %v883_v15 = vmul.f32 3.8918573e-05, %v5628_v10  ;;  %v5642_v18 = vadd.f32 %v557_v14, %v5595_v57  ;;  %v872_v31 = vmul.f32 2.1237322e-06, %v5628_v10  ;;  %v606_v38 = vpop.f32.mrf.mxu1 }
  0xbc   : > { %v5626_v9 = vmul.f32 0.70710677, %v5616_v5  ;;  %v923_v17 = vmul.f32 3.8918573e-05, %v5633_v12  ;;  %v912_v34 = vmul.f32 2.1237322e-06, %v5633_v12  ;;  %v5670_v46 = vadd.f32 %v606_v38, %v5597_v59 }
  0xbd   : > { %v5631_v11 = vmul.f32 0.70710677, %v5621_v7  ;;  %v884_v20 = vadd.f32 0.001143296, %v883_v15  ;;  %v5649_v23 = vmul.f32 0.70710677, %v5642_v18 }
  0xbe   : > { %v950_v13 = vmul.f32 %v5626_v9, %v5626_v9  ;;  %v924_v22 = vadd.f32 0.001143296, %v923_v17  ;;  %v873_v39 = vadd.f32 0.00028619796, %v872_v31  ;;  %v913_v42 = vadd.f32 0.00028619796, %v912_v34 }
  0xbf   : > { %v990_v16 = vmul.f32 %v5631_v11, %v5631_v11  ;;  %v885_v25 = vmul.f32 %v884_v20, %v5628_v10  ;;  %v1030_v28 = vmul.f32 %v5649_v23, %v5649_v23  ;;  %v5676_v54 = vmul.f32 0.70710677, %v5670_v46  ;;  %v4946_v20 = vld [vmem:[%s9162_s3 + $0x18] sm:$0xff] }
  0xc0   : > { %v5644_v19 = vmin.f32 %v950_v13, 16.0  ;;  %v925_v27 = vmul.f32 %v924_v22, %v5633_v12  ;;  %v874_v47 = vmul.f32 %v873_v39, %v5628_v10  ;;  %v914_v50 = vmul.f32 %v913_v42, %v5633_v12  ;;  %v4954_v22 = vld [vmem:[%s9162_s3 + $0x58] sm:$0xff]  ;;  %3854 = vmatpush.bf16.msrb.mxu0 %v4946_v20 }
  0xc1   : > { %v5646_v21 = vmin.f32 %v990_v16, 16.0  ;;  %v886_v32 = vadd.f32 0.014752088, %v885_v25  ;;  %v5662_v36 = vmin.f32 %v1030_v28, 16.0  ;;  %v1070_v13 = vmul.f32 %v5676_v54, %v5676_v54  ;;  %3903 = vmatpush.bf16.msrb.mxu1 %v4954_v22  ;;  %v655_v34 = vpop.f32.mrf.mxu2 }
  0xc2   : > { %v963_v24 = vmul.f32 3.8918573e-05, %v5644_v19  ;;  %v926_v35 = vadd.f32 0.014752088, %v925_v27  ;;  %v952_v55 = vmul.f32 2.1237322e-06, %v5644_v19 }
  0xc3   : > { %v1003_v26 = vmul.f32 3.8918573e-05, %v5646_v21  ;;  %v887_v40 = vmul.f32 %v886_v32, %v5628_v10  ;;  %v1043_v44 = vmul.f32 3.8918573e-05, %v5662_v36  ;;  %v875_v56 = vadd.f32 0.0036580483, %v874_v47 }
  0xc4   : > { %v964_v29 = vadd.f32 0.001143296, %v963_v24  ;;  %v927_v43 = vmul.f32 %v926_v35, %v5633_v12  ;;  %v915_v0 = vadd.f32 0.0036580483, %v914_v50  ;;  %v953_v14 = vadd.f32 0.00028619796, %v952_v55 }
  0xc5   : > { %v1004_v33 = vadd.f32 0.001143296, %v1003_v26  ;;  %v888_v48 = vadd.f32 0.112945676, %v887_v40  ;;  %v1044_v52 = vadd.f32 0.001143296, %v1043_v44  ;;  %v876_v15 = vmul.f32 %v875_v56, %v5628_v10 }
  0xc6   : > { %v965_v37 = vmul.f32 %v964_v29, %v5644_v19  ;;  %v928_v51 = vadd.f32 0.112945676, %v927_v43  ;;  %v916_v24 = vmul.f32 %v915_v0, %v5633_v12  ;;  %v5694_v28 = vmin.f32 %v1070_v13, 16.0 }
  0xc7   : > { %v1005_v41 = vmul.f32 %v1004_v33, %v5646_v21  ;;  %v889_v58 = vmul.f32 %v888_v48, %v5628_v10  ;;  %v1045_v6 = vmul.f32 %v1044_v52, %v5662_v36  ;;  %v954_v29 = vmul.f32 %v953_v14, %v5644_v19 }
  0xc8   : > { %v966_v45 = vadd.f32 0.014752088, %v965_v37  ;;  %v929_v4 = vmul.f32 %v928_v51, %v5633_v12  ;;  %v877_v30 = vadd.f32 0.05243302, %v876_v15  ;;  %v992_v32 = vmul.f32 2.1237322e-06, %v5646_v21 }
  0xc9   : > { %v1006_v49 = vadd.f32 0.014752088, %v1005_v41  ;;  %v890_v16 = vadd.f32 0.4994258, %v889_v58  ;;  %v1046_v26 = vadd.f32 0.014752088, %v1045_v6  ;;  %v5707_v43 = vadd.f32 %v655_v34, %v5605_v63 }
  0xca   : > { %v967_v53 = vmul.f32 %v966_v45, %v5644_v19  ;;  %v930_v25 = vadd.f32 0.4994258, %v929_v4  ;;  %v917_v35 = vadd.f32 0.05243302, %v916_v24  ;;  %v1083_v40 = vmul.f32 3.8918573e-05, %v5694_v28  ;;  %v704_v4 = vpop.f32.mrf.mxu3 }
  0xcb   : > { %v1007_v60 = vmul.f32 %v1006_v49, %v5646_v21  ;;  %v891_v31 = vmul.f32 %v890_v16, %v5628_v10  ;;  %v1047_v38 = vmul.f32 %v1046_v26, %v5662_v36  ;;  %v4970_v41 = vld [vmem:[%s9162_s3 + $0xd8] sm:$0xff]  ;;  %v955_v42 = vadd.f32 0.0036580483, %v954_v29 }
  0xcc   : > { %v968_v8 = vadd.f32 0.112945676, %v967_v53  ;;  %v931_v37 = vmul.f32 %v930_v25, %v5633_v12  ;;  %v878_v44 = vmul.f32 %v877_v30, %v5628_v10  ;;  %v993_v47 = vadd.f32 0.00028619796, %v992_v32  ;;  %4001 = vmatpush.bf16.msrb.mxu3 %v4970_v41 }
  0xcd   : > { %v1008_v17 = vadd.f32 0.112945676, %v1007_v60  ;;  %v5710_v45 = vadd.f32 1.0, %v891_v31  ;;  %v1048_v50 = vadd.f32 0.112945676, %v1047_v38  ;;  %v918_v51 = vmul.f32 %v917_v35, %v5633_v12 }
  0xce   : > { %v969_v27 = vmul.f32 %v968_v8, %v5644_v19  ;;  %v5712_v49 = vadd.f32 1.0, %v931_v37  ;;  %v1084_v53 = vadd.f32 0.001143296, %v1083_v40  ;;  %v956_v55 = vmul.f32 %v955_v42, %v5644_v19 }
  0xcf   : > { %v1009_v33 = vmul.f32 %v1008_v17, %v5646_v21  ;;  %v5718_v56 = vmul.f32 0.70710677, %v5707_v43  ;;  %v879_v58 = vadd.f32 0.18741608, %v878_v44  ;;  %5021 = vrcp.f32 %v5710_v45 }
  0xd0   : > { %v970_v39 = vadd.f32 0.4994258, %v969_v27  ;;  %v994_v60 = vmul.f32 %v993_v47, %v5646_v21  ;;  %5023 = vrcp.f32 %v5712_v49  ;;  %v1032_v6 = vmul.f32 2.1237322e-06, %v5662_v36 }
  0xd1   : > { %v1010_v48 = vadd.f32 0.4994258, %v1009_v33  ;;  %v1049_v8 = vmul.f32 %v1048_v50, %v5662_v36  ;;  %v919_v13 = vadd.f32 0.18741608, %v918_v51  ;;  %v1085_v15 = vmul.f32 %v1084_v53, %v5694_v28 }
  0xd2   : > { %v971_v52 = vmul.f32 %v970_v39, %v5644_v19  ;;  %v957_v16 = vadd.f32 0.05243302, %v956_v55  ;;  %v1110_v17 = vmul.f32 %v5718_v56, %v5718_v56  ;;  %v5732_v20 = vadd.f32 %v704_v4, %v5610_v2 }
  0xd3   : > { %v1011_v0 = vmul.f32 %v1010_v48, %v5646_v21  ;;  %v880_v22 = vmul.f32 %v879_v58, %v5628_v10  ;;  %v995_v24 = vadd.f32 0.0036580483, %v994_v60  ;;  %v1033_v26 = vadd.f32 0.00028619796, %v1032_v6 }
  0xd4   : > { %v5726_v14 = vadd.f32 1.0, %v971_v52  ;;  %v1050_v27 = vadd.f32 0.4994258, %v1049_v8  ;;  %v5740_v30 = vmul.f32 0.5, %v5600_v61  ;;  %v920_v31 = vmul.f32 %v919_v13, %v5633_v12 }
  0xd5   : > { %v5735_v25 = vadd.f32 1.0, %v1011_v0  ;;  %v5737_v29 = vpop.eup %5021  ;;  %v1086_v32 = vadd.f32 0.014752088, %v1085_v15  ;;  %v5747_v34 = vmul.f32 0.5, %v5603_v62  ;;  %v958_v10 = vmul.f32 %v957_v16, %v5644_v19 }
  0xd6   : > { %5025 = vrcp.f32 %v5726_v14  ;;  %v5744_v33 = vpop.eup %5023  ;;  %v5750_v35 = vmin.f32 %v1110_v17, 16.0  ;;  %v5753_v37 = vmul.f32 0.70710677, %v5732_v20  ;;  %v881_v38 = vadd.f32 1.1283791, %v880_v22 }
  0xd7   : > { %v5756_v61 = vmul.f32 0.5, %v5616_v5  ;;  %v996_v12 = vmul.f32 %v995_v24, %v5646_v21  ;;  %5027 = vrcp.f32 %v5735_v25  ;;  %v894_v39 = vmul.f32 %v5737_v29, %v5710_v45 }
  0xd8   : > { %v5763_v62 = vmul.f32 0.5, %v5621_v7  ;;  %v1034_v40 = vmul.f32 %v1033_v26, %v5662_v36  ;;  %v1051_v41 = vmul.f32 %v1050_v27, %v5662_v36  ;;  %v921_v42 = vadd.f32 1.1283791, %v920_v31 }
  0xd9   : > { %v934_v44 = vmul.f32 %v5744_v33, %v5712_v49  ;;  %v5770_v5 = vmul.f32 0.5, %v5642_v18  ;;  %v1087_v47 = vmul.f32 %v1086_v32, %v5694_v28  ;;  %v959_v48 = vadd.f32 0.18741608, %v958_v10 }
  0xda   : > { %v5774_v50 = vmul.f32 0.5, %v5670_v46  ;;  %v1123_v7 = vmul.f32 3.8918573e-05, %v5750_v35  ;;  %v1150_v51 = vmul.f32 %v5753_v37, %v5753_v37  ;;  %v5782_v53 = vmul.f32 %v881_v38, %v5608_v1 }
  0xdb   : > { %v902_v55 = vand.u32 2147483647, %v5710_v45  ;;  %v997_v18 = vadd.f32 0.05243302, %v996_v12  ;;  %v1072_v58 = vmul.f32 2.1237322e-06, %v5694_v28  ;;  %v5792_v8 = vmul.f32 %v921_v42, %v5613_v3 }
  0xdc   : > { %v5779_v52 = vpop.eup %5025  ;;  %v895_v60 = vsub.f32 1.0, %v894_v39  ;;  %v904_v0 = vand.u32 2147483648, %v5710_v45  ;;  %v1035_v46 = vadd.f32 0.0036580483, %v1034_v40  ;;  %v5787_v4 = vadd.f32 1.0, %v1051_v41 }
  0xdd   : > { %v5789_v6 = vpop.eup %5027  ;;  %v935_v13 = vsub.f32 1.0, %v934_v44  ;;  %v944_v1 = vand.u32 2147483648, %v5712_v49  ;;  %v1088_v15 = vadd.f32 0.112945676, %v1087_v47  ;;  %vm898_vm0 = vweird.f32 %v5710_v45 }
  0xde   : > { %v960_v16 = vmul.f32 %v959_v48, %v5644_v19  ;;  %v974_v17 = vmul.f32 %v5779_v52, %v5726_v14  ;;  %v1124_v22 = vadd.f32 0.001143296, %v1123_v7  ;;  %v5799_v24 = vmin.f32 %v1150_v51, 16.0 }
  0xdf   : > { %vm938_vm1 = vweird.f32 %v5712_v49  ;;  %v942_v26 = vand.u32 2147483647, %v5712_v49  ;;  %v998_v3 = vmul.f32 %v997_v18, %v5646_v21  ;;  %v1073_v27 = vadd.f32 0.00028619796, %v1072_v58 }
  0xe0   : > { %v896_v31 = vmul.f32 %v5737_v29, %v895_v60  ;;  %v1014_v32 = vmul.f32 %v5789_v6, %v5735_v25  ;;  %v1036_v19 = vmul.f32 %v1035_v46, %v5662_v36  ;;  %5029 = vrcp.f32 %v5787_v4  ;;  %v560_v46 = vpop.f32.mrf.mxu0 }
  0xe1   : > { %v905_v10 = vor.u32 1.1754944e-38, %v904_v0  ;;  %v936_v38 = vmul.f32 %v5744_v33, %v935_v13  ;;  %v945_v12 = vor.u32 1.1754944e-38, %v944_v1  ;;  %v1089_v39 = vmul.f32 %v1088_v15, %v5694_v28 }
  0xe2   : > { %vm5811_vm2 = vcmp.eq.f32.partialorder %v902_v55, 8.507059e+37  ;;  %v961_v41 = vadd.f32 1.1283791, %v960_v16  ;;  %v975_v42 = vsub.f32 1.0, %v974_v17  ;;  %v1125_v44 = vmul.f32 %v1124_v22, %v5750_v35 }
  0xe3   : > { %v1163_v47 = vmul.f32 3.8918573e-05, %v5799_v24  ;;  %vm899_vm3 = vweird.f32 %v5737_v29  ;;  %vm5818_vm4 = vcmp.eq.f32.partialorder %v942_v26, 8.507059e+37  ;;  %v982_v7 = vand.u32 2147483647, %v5726_v14 }
  0xe4   : > { %v999_v51 = vadd.f32 0.18741608, %v998_v3  ;;  %v1074_v55 = vmul.f32 %v1073_v27, %v5694_v28  ;;  %v897_v18 = vadd.f32 %v5737_v29, %v896_v31  ;;  %v984_v58 = vand.u32 2147483648, %v5726_v14  ;;  %vm5839_vm6 = vmor %vm898_vm0, %vm899_vm3  ;;  %v4953_v27 = vld [vmem:[%s9162_s3 + $0x50] sm:$0xff] }
  0xe5   : > { %v1015_v60 = vsub.f32 1.0, %v1014_v32  ;;  %v1037_v0 = vadd.f32 0.05243302, %v1036_v19  ;;  %v937_v13 = vadd.f32 %v5744_v33, %v936_v38  ;;  %vm939_vm5 = vweird.f32 %v5744_v33  ;;  %3904 = vmatpush.bf16.msrb.mxu1 %v4953_v27 }
  0xe6   : > { %v1090_v1 = vadd.f32 0.4994258, %v1089_v39  ;;  %v1112_v15 = vmul.f32 2.1237322e-06, %v5750_v35  ;;  %v5829_v16 = vpop.eup %5029  ;;  %v5832_v17 = vmul.f32 %v961_v41, %v5626_v9  ;;  %v976_v22 = vmul.f32 %v5779_v52, %v975_v42  ;;  %vm5853_vm8 = vmor %vm938_vm1, %vm939_vm5 }
  0xe7   : > { %v1126_v26 = vadd.f32 0.014752088, %v1125_v44  ;;  %v1164_v3 = vadd.f32 0.001143296, %v1163_v47  ;;  %vm978_vm7 = vweird.f32 %v5726_v14  ;;  %v1000_v31 = vmul.f32 %v999_v51, %v5646_v21  ;;  %v4961_v47 = vld [vmem:[%s9162_s3 + $0x90] sm:$0xff] }
  0xe8   : > { %v1075_v32 = vadd.f32 0.0036580483, %v1074_v55  ;;  %v5846_v9 = vadd.f32 %v560_v46, %v5595_v57  ;;  %v901_v19 = vsel %vm5839_vm6, %v5737_v29, %v897_v18  ;;  %vm5857_vm9 = vcmp.eq.f32.partialorder %v982_v7, 8.507059e+37  ;;  %3953 = vmatpush.bf16.msrb.mxu2 %v4961_v47  ;;  %v4945_v14 = vld [vmem:[%s9162_s3 + $0x10] sm:$0xff]  ;;  %v609_v47 = vpop.f32.mrf.mxu1 }
  0xe9   : > { %v985_v39 = vor.u32 1.1754944e-38, %v984_v58  ;;  %v1016_v21 = vmul.f32 %v5789_v6, %v1015_v60  ;;  %v1038_v41 = vmul.f32 %v1037_v0, %v5662_v36  ;;  %v941_v42 = vsel %vm5853_vm8, %v5744_v33, %v937_v13  ;;  %3855 = vmatpush.bf16.msrb.mxu0 %v4945_v14 }
  0xea   : > { %v1054_v49 = vmul.f32 %v5829_v16, %v5787_v4  ;;  %v1091_v29 = vmul.f32 %v1090_v1, %v5694_v28  ;;  %v1113_v44 = vadd.f32 0.00028619796, %v1112_v15  ;;  %v977_v7 = vadd.f32 %v5779_v52, %v976_v22 }
  0xeb   : > { %vm979_vm10 = vweird.f32 %v5779_v52  ;;  %v1127_v51 = vmul.f32 %v1126_v26, %v5750_v35  ;;  %v1165_v55 = vmul.f32 %v1164_v3, %v5799_v24  ;;  %v906_v33 = vsel %vm5811_vm2, %v905_v10, %v901_v19 }
  0xec   : > { %v1001_v18 = vadd.f32 1.1283791, %v1000_v31  ;;  %v1076_v58 = vmul.f32 %v1075_v32, %v5694_v28  ;;  %v5880_v60 = vmul.f32 0.70710677, %v5846_v9  ;;  %v946_v0 = vsel %vm5818_vm4, %v945_v12, %v941_v42  ;;  %vm5888_vm12 = vmor %vm978_vm7, %vm979_vm10  ;;  %v4969_v42 = vld [vmem:[%s9162_s3 + $0xd0] sm:$0xff] }
  0xed   : > { %v1017_v46 = vadd.f32 %v5789_v6, %v1016_v21  ;;  %vm1019_vm11 = vweird.f32 %v5789_v6  ;;  %v1039_v13 = vadd.f32 0.18741608, %v1038_v41  ;;  %v1055_v10 = vsub.f32 1.0, %v1054_v49  ;;  %4002 = vmatpush.bf16.msrb.mxu3 %v4969_v42 }
  0xee   : > { %v5892_v1 = vadd.f32 1.0, %v1091_v29  ;;  %v1114_v15 = vmul.f32 %v1113_v44, %v5750_v35  ;;  %v1152_v22 = vmul.f32 2.1237322e-06, %v5799_v24  ;;  %v907_v12 = vmul.f32 %v906_v33, %v5782_v53 }
  0xef   : > { %v981_v48 = vsel %vm5888_vm12, %v5779_v52, %v977_v7  ;;  %v1128_v26 = vadd.f32 0.112945676, %v1127_v51  ;;  %v1166_v3 = vadd.f32 0.014752088, %v1165_v55  ;;  %vm1018_vm13 = vweird.f32 %v5735_v25 }
  0xf0   : > { %v1024_v31 = vand.u32 2147483648, %v5735_v25  ;;  %v1077_v32 = vadd.f32 0.05243302, %v1076_v58  ;;  %v1190_v53 = vmul.f32 %v5880_v60, %v5880_v60  ;;  %v947_v52 = vmul.f32 %v946_v0, %v5792_v8  ;;  %vm5914_vm14 = vmor %vm1018_vm13, %vm1019_vm11 }
  0xf1   : > { %v1002_v19 = vmul.f32 %v1001_v18, %v5631_v11  ;;  %v1022_v21 = vand.u32 2147483647, %v5735_v25  ;;  %v1040_v41 = vmul.f32 %v1039_v13, %v5662_v36  ;;  %v986_v8 = vsel %vm5857_vm9, %v985_v39, %v981_v48  ;;  %v658_v48 = vpop.f32.mrf.mxu2 }
  0xf2   : > { %v1021_v11 = vsel %vm5914_vm14, %v5789_v6, %v1017_v46  ;;  %v1115_v49 = vadd.f32 0.0036580483, %v1114_v15  ;;  %v1153_v29 = vadd.f32 0.00028619796, %v1152_v22  ;;  %v1056_v44 = vmul.f32 %v5829_v16, %v1055_v10 }
  0xf3   : > { %5031 = vrcp.f32 %v5892_v1  ;;  %v1129_v36 = vmul.f32 %v1128_v26, %v5750_v35  ;;  %v1167_v25 = vmul.f32 %v1166_v3, %v5799_v24  ;;  %v4706_v7 = vclamps-f32 %v907_v12, 1.0 }
  0xf4   : > { %v1025_v51 = vor.u32 1.1754944e-38, %v1024_v31  ;;  %v1078_v38 = vmul.f32 %v1077_v32, %v5694_v28  ;;  %v5933_v39 = vmin.f32 %v1190_v53, 16.0  ;;  %v4707_v55 = vclamps-f32 %v947_v52, 1.0 }
  0xf5   : > { %v987_v6 = vmul.f32 %v986_v8, %v5832_v17  ;;  %vm1023_vm15 = vcmp.eq.f32.partialorder %v1022_v21, 8.507059e+37  ;;  %v1041_v33 = vadd.f32 1.1283791, %v1040_v41  ;;  %v1116_v58 = vmul.f32 %v1115_v49, %v5750_v35 }
  0xf6   : > { %9241 = vst [vmem:[#allocation6_spill] sm:$0xff] %v5933_v39  ;;  %v1026_v18 = vsel %vm1023_vm15, %v1025_v51, %v1021_v11  ;;  %v1154_v0 = vmul.f32 %v1153_v29, %v5799_v24  ;;  %v5939_v46 = vadd.f32 %v609_v47, %v5597_v59  ;;  %v1057_v13 = vadd.f32 %v5829_v16, %v1056_v44 }
  0xf7   : > { %vm1059_vm0 = vweird.f32 %v5829_v16  ;;  %v1130_v40 = vadd.f32 0.4994258, %v1129_v36  ;;  %v1168_v10 = vadd.f32 0.112945676, %v1167_v25  ;;  %v3430_v15 = vadd.f32 1.0, %v4706_v7 }
  0xf8   : > { %v1064_v22 = vand.u32 2147483648, %v5787_v4  ;;  %v1079_v17 = vadd.f32 0.18741608, %v1078_v38  ;;  %v1192_v12 = vmul.f32 2.1237322e-06, %v5933_v39  ;;  %v4708_v3 = vclamps-f32 %v987_v6, 1.0 }
  0xf9   : > { %v5945_v26 = vpop.eup %5031  ;;  %v1027_v14 = vmul.f32 %v1026_v18, %v1002_v19  ;;  %vm1058_vm1 = vweird.f32 %v5787_v4  ;;  %v1062_v27 = vand.u32 2147483647, %v5787_v4  ;;  %v1117_v32 = vadd.f32 0.05243302, %v1116_v58 }
  0xfa   : > { %vm5949_vm2 = vmor %vm1058_vm1, %vm1059_vm0  ;;  %v1155_v53 = vadd.f32 0.0036580483, %v1154_v0  ;;  %v5954_v52 = vmul.f32 0.70710677, %v5939_v46  ;;  %v1131_v21 = vmul.f32 %v1130_v40, %v5750_v35  ;;  %v1169_v19 = vmul.f32 %v1168_v10, %v5799_v24 }
  0xfb   : > { %v1061_v45 = vsel %vm5949_vm2, %v5829_v16, %v1057_v13  ;;  %v5962_v41 = vadd.f32 %v658_v48, %v5605_v63  ;;  %v1065_v4 = vor.u32 1.1754944e-38, %v1064_v22  ;;  %v1080_v42 = vmul.f32 %v1079_v17, %v5694_v28 }
  0xfc   : > { %v1094_v8 = vmul.f32 %v5945_v26, %v5892_v1  ;;  %v1193_v11 = vadd.f32 0.00028619796, %v1192_v12  ;;  %v3431_v49 = vadd.f32 1.0, %v4707_v55  ;;  %v4709_v29 = vclamps-f32 %v1027_v14, 1.0  ;;  %v707_v55 = vpop.f32.mrf.mxu3 }
  0xfd   : > { %v1042_v44 = vmul.f32 %v1041_v33, %v5649_v23  ;;  %vm1063_vm3 = vcmp.eq.f32.partialorder %v1062_v27, 8.507059e+37  ;;  %v1118_v36 = vmul.f32 %v1117_v32, %v5750_v35  ;;  %v1156_v25 = vmul.f32 %v1155_v53, %v5799_v24  ;;  %v562_v27 = vpop.f32.mrf.mxu0 }
  0xfe   : > { %v1066_v16 = vsel %vm1063_vm3, %v1065_v4, %v1061_v45  ;;  %v1230_v47 = vmul.f32 %v5954_v52, %v5954_v52  ;;  %v3432_v7 = vadd.f32 1.0, %v4708_v3  ;;  %v5972_v51 = vadd.f32 1.0, %v1131_v21  ;;  %v4952_v45 = vld [vmem:[%s9162_s3 + $0x48] sm:$0xff] }
  0xff   : > { %v1170_v28 = vadd.f32 0.4994258, %v1169_v19  ;;  %v5975_v38 = vmul.f32 0.70710677, %v5962_v41  ;;  %v1081_v6 = vadd.f32 1.1283791, %v1080_v42  ;;  %v1194_v33 = vmul.f32 %v1193_v11, %v5933_v39  ;;  %3905 = vmatpush.bf16.msrb.mxu1 %v4952_v45 }
 0x100   : > { %v1095_v18 = vsub.f32 1.0, %v1094_v8  ;;  %v5978_v23 = vmul.f32 0.5, %v5707_v43  ;;  %v5982_v58 = vmul.f32 %v3430_v15, %v5740_v30  ;;  %v3433_v0 = vadd.f32 1.0, %v4709_v29  ;;  %v4960_v43 = vld [vmem:[%s9162_s3 + $0x88] sm:$0xff]  ;;  %v611_v29 = vpop.f32.mrf.mxu1 }
 0x101   : > { %v1067_v13 = vmul.f32 %v1066_v16, %v1042_v44  ;;  %v5985_v40 = vmul.f32 0.5, %v5732_v20  ;;  %v5988_v10 = vmul.f32 %v3431_v49, %v5747_v34  ;;  %v1119_v22 = vadd.f32 0.18741608, %v1118_v36  ;;  %3954 = vmatpush.bf16.msrb.mxu2 %v4960_v43  ;;  %v660_v44 = vpop.f32.mrf.mxu2 }
 0x102   : > { %v1157_v17 = vadd.f32 0.05243302, %v1156_v25  ;;  %v5990_v12 = vmin.f32 %v1230_v47, 16.0  ;;  %v5996_v48 = vmul.f32 %v3432_v7, %v5756_v61  ;;  %5033 = vrcp.f32 %v5972_v51 }
 0x103   : > { %9244 = vst [vmem:[#allocation7_spill] sm:$0xff] %v5988_v10  ;;  %v1171_v30 = vmul.f32 %v1170_v28, %v5799_v24  ;;  %v1270_v20 = vmul.f32 %v5975_v38, %v5975_v38  ;;  %v6003_v34 = vmul.f32 %v1081_v6, %v5676_v54  ;;  %v1096_v15 = vmul.f32 %v5945_v26, %v1095_v18  ;;  %v4944_v54 = vld [vmem:[%s9162_s3 + $0x8] sm:$0xff] }
 0x104   : > { %9245 = vst [vmem:[#allocation8_spill] sm:$0xff] %v5990_v12  ;;  %v6007_v3 = vmul.f32 0.5, %v5846_v9  ;;  %v1195_v14 = vadd.f32 0.0036580483, %v1194_v33  ;;  %v4710_v61 = vclamps-f32 %v1067_v13, 1.0  ;;  %v1104_v32 = vand.u32 2147483648, %v5892_v1  ;;  %3856 = vmatpush.bf16.msrb.mxu0 %v4944_v54  ;;  %v709_v7 = vpop.f32.mrf.mxu3 }
 0x105   : > { %9246 = vst [vmem:[#allocation9_spill] sm:$0xff] %v5996_v48  ;;  %v1102_v31 = vand.u32 2147483647, %v5892_v1  ;;  %v708_v53 = vadd.f32 %v707_v55, %v5610_v2  ;;  %v6019_v9 = vmul.f32 %v3433_v0, %v5763_v62  ;;  %v1120_v21 = vmul.f32 %v1119_v22, %v5750_v35  ;;  %v4968_v22 = vld [vmem:[%s9162_s3 + $0xc8] sm:$0xff] }
 0x106   : > { %9247 = vst [vmem:[#allocation10_spill] sm:$0xff] %v6007_v3  ;;  %v1158_v19 = vmul.f32 %v1157_v17, %v5799_v24  ;;  %v1232_v4 = vmul.f32 2.1237322e-06, %v5990_v12  ;;  %v6024_v42 = vadd.f32 1.0, %v1171_v30  ;;  %v6027_v8 = vmul.f32 0.5, %v5939_v46  ;;  %4003 = vmatpush.bf16.msrb.mxu3 %v4968_v22 }
 0x107   : > { %9248 = vst [vmem:[#allocation11_spill] sm:$0xff] %v6019_v9  ;;  %v6029_v11 = vmin.f32 %v1270_v20, 16.0  ;;  %v6032_v49 = vadd.f32 %v562_v27, %v5595_v57  ;;  %v1097_v62 = vadd.f32 %v5945_v26, %v1096_v15  ;;  %vm1098_vm4 = vweird.f32 %v5892_v1 }
 0x108   : > { %9249 = vst [vmem:[#allocation12_spill] sm:$0xff] %v6027_v8  ;;  %vm1099_vm5 = vweird.f32 %v5945_v26  ;;  %v1196_v35 = vmul.f32 %v1195_v14, %v5933_v39  ;;  %v6038_v16 = vpop.eup %5033  ;;  %v3434_v46 = vadd.f32 1.0, %v4710_v61  ;;  %vm6040_vm6 = vcmp.eq.f32.partialorder %v1102_v31, 8.507059e+37 }
 0x109   : > { %9250 = vst [vmem:[#allocation13_spill] sm:$0xff] %v6029_v11  ;;  %v1105_v25 = vor.u32 1.1754944e-38, %v1104_v32  ;;  %v6044_v47 = vmul.f32 0.70710677, %v708_v53  ;;  %v1121_v28 = vadd.f32 1.1283791, %v1120_v21  ;;  %v6047_v1 = vadd.f32 %v611_v29, %v5597_v59  ;;  %vm6049_vm7 = vmor %vm1098_vm4, %vm1099_vm5  ;;  %v663_v22 = vpop.f32.mrf.mxu2 }
 0x10a   : > { %v1159_v55 = vadd.f32 0.18741608, %v1158_v19  ;;  %v1233_v6 = vadd.f32 0.00028619796, %v1232_v4  ;;  %5035 = vrcp.f32 %v6024_v42  ;;  %v1272_v33 = vmul.f32 2.1237322e-06, %v6029_v11 }
 0x10b   : > { %v6056_v0 = vmul.f32 0.70710677, %v6032_v49  ;;  %v6059_v13 = vadd.f32 %v660_v44, %v5605_v63  ;;  %v1101_v17 = vsel %vm6049_vm7, %v5945_v26, %v1097_v62  ;;  %v1134_v43 = vmul.f32 %v6038_v16, %v5972_v51 }
 0x10c   : > { %v1197_v30 = vadd.f32 0.05243302, %v1196_v35  ;;  %v6070_v20 = vadd.f32 %v709_v7, %v5610_v2  ;;  %v6073_v15 = vmul.f32 %v3434_v46, %v5770_v5  ;;  %v1144_v14 = vand.u32 2147483648, %v5972_v51  ;;  %v565_v5 = vpop.f32.mrf.mxu0 }
 0x10d   : > { %v6077_v27 = vmul.f32 0.5, %v5962_v41  ;;  %v1310_v61 = vmul.f32 %v6044_v47, %v6044_v47  ;;  %v6082_v26 = vmul.f32 %v1121_v28, %v5718_v56  ;;  %v1160_v31 = vmul.f32 %v1159_v55, %v5799_v24  ;;  %v614_v55 = vpop.f32.mrf.mxu1 }
 0x10e   : > { %v1234_v32 = vmul.f32 %v1233_v6, %v5990_v12  ;;  %v6087_v54 = vmul.f32 0.70710677, %v6047_v1  ;;  %v1106_v45 = vsel %vm6040_vm6, %v1105_v25, %v1101_v17  ;;  %v1273_v41 = vadd.f32 0.00028619796, %v1272_v33 }
 0x10f   : > { %9255 = vst [vmem:[#allocation14_spill] sm:$0xff] %v6077_v27  ;;  %v1350_v21 = vmul.f32 %v6056_v0, %v6056_v0  ;;  %v6094_v19 = vmul.f32 0.70710677, %v6059_v13  ;;  %v1135_v56 = vsub.f32 1.0, %v1134_v43  ;;  %v1142_v4 = vand.u32 2147483647, %v5972_v51 }
 0x110   : > { %v1198_v24 = vmul.f32 %v1197_v30, %v5933_v39  ;;  %v6099_v29 = vmul.f32 0.70710677, %v6070_v20  ;;  %v6101_v62 = vpop.eup %5035  ;;  %v6103_v35 = vor.u32 1.1754944e-38, %v1144_v14  ;;  %v6105_v44 = vmul.f32 0.5, %v708_v53 }
 0x111   : > { %v6107_v46 = vmin.f32 %v1310_v61, 16.0  ;;  %v6110_v36 = vadd.f32 %v565_v5, %v5595_v57  ;;  %v1107_v25 = vmul.f32 %v1106_v45, %v6003_v34  ;;  %vm1138_vm8 = vweird.f32 %v5972_v51 }
 0x112   : > { %9256 = vst [vmem:[#allocation15_spill] sm:$0xff] %v6105_v44  ;;  %vm1139_vm9 = vweird.f32 %v6038_v16  ;;  %v1235_v7 = vadd.f32 0.0036580483, %v1234_v32  ;;  %v1390_v28 = vmul.f32 %v6087_v54, %v6087_v54  ;;  %v1161_v6 = vadd.f32 1.1283791, %v1160_v31 }
 0x113   : > { %9257 = vst [vmem:[#allocation16_spill] sm:$0xff] %v6107_v46  ;;  %v1274_v53 = vmul.f32 %v1273_v41, %v6029_v11  ;;  %v6118_v18 = vmin.f32 %v1350_v21, 16.0  ;;  %v1430_v33 = vmul.f32 %v6094_v19, %v6094_v19  ;;  %v1136_v34 = vmul.f32 %v6038_v16, %v1135_v56  ;;  %vm6182_vm12 = vmor %vm1138_vm8, %vm1139_vm9 }
 0x114   : > { %v1174_v17 = vmul.f32 %v6101_v62, %v6024_v42  ;;  %v1199_v43 = vadd.f32 0.18741608, %v1198_v24  ;;  %v1470_v30 = vmul.f32 %v6099_v29, %v6099_v29  ;;  %v1312_v14 = vmul.f32 2.1237322e-06, %v6107_v46 }
 0x115   : > { %9258 = vst [vmem:[#allocation17_spill] sm:$0xff] %v6118_v18  ;;  %v6129_v61 = vmul.f32 0.5, %v6032_v49  ;;  %v6132_v31 = vmul.f32 0.70710677, %v6110_v36  ;;  %v6135_v32 = vadd.f32 %v614_v55, %v5597_v59  ;;  %v4711_v5 = vclamps-f32 %v1107_v25, 1.0 }
 0x116   : > { %vm6137_vm10 = vcmp.eq.f32.partialorder %v1142_v4, 8.507059e+37  ;;  %v1236_v41 = vmul.f32 %v1235_v7, %v5990_v12  ;;  %v6142_v21 = vmin.f32 %v1390_v28, 16.0  ;;  %v6145_v56 = vadd.f32 %v663_v22, %v5605_v63  ;;  %v4959_v4 = vld [vmem:[%s9162_s3 + $0x80] sm:$0xff] }
 0x117   : > { %9259 = vst [vmem:[#allocation18_spill] sm:$0xff] %v6129_v61  ;;  %v6148_v49 = vmul.f32 %v1161_v6, %v5753_v37  ;;  %v1275_v24 = vadd.f32 0.0036580483, %v1274_v53  ;;  %v1352_v44 = vmul.f32 2.1237322e-06, %v6118_v18  ;;  %v6151_v55 = vmin.f32 %v1430_v33, 16.0  ;;  %3955 = vmatpush.bf16.msrb.mxu2 %v4959_v4 }
 0x118   : > { %9260 = vst [vmem:[#allocation19_spill] sm:$0xff] %v6132_v31  ;;  %v1137_v25 = vadd.f32 %v6038_v16, %v1136_v34  ;;  %v1175_v7 = vsub.f32 1.0, %v1174_v17  ;;  %v1182_v28 = vand.u32 2147483647, %v6024_v42  ;;  %v6158_v27 = vmin.f32 %v1470_v30, 16.0  ;;  %v4943_v37 = vld [vmem:[%s9162_s3] sm:$0xff]  ;;  %v712_v17 = vpop.f32.mrf.mxu3 }
 0x119   : > { %9263 = vst [vmem:[#allocation20_spill] sm:$0xff] %v6142_v21  ;;  %v4951_v6 = vld [vmem:[%s9162_s3 + $0x40] sm:$0xff]  ;;  %v1184_v53 = vand.u32 2147483648, %v6024_v42  ;;  %v1313_v33 = vadd.f32 0.00028619796, %v1312_v14  ;;  %v1510_v22 = vmul.f32 %v6132_v31, %v6132_v31  ;;  %vm1178_vm11 = vweird.f32 %v6024_v42  ;;  %3857 = vmatpush.bf16.msrb.mxu0 %v4943_v37 }
 0x11a   : > { %9264 = vst [vmem:[#allocation21_spill] sm:$0xff] %v6151_v55  ;;  %v6170_v34 = vmul.f32 0.70710677, %v6135_v32  ;;  %v1200_v30 = vmul.f32 %v1199_v43, %v5933_v39  ;;  %v1237_v8 = vadd.f32 0.05243302, %v1236_v41  ;;  %3906 = vmatpush.bf16.msrb.mxu1 %v4951_v6  ;;  %v3435_v14 = vadd.f32 1.0, %v4711_v5 }
 0x11b   : > { %9265 = vst [vmem:[#allocation22_spill] sm:$0xff] %v6158_v27  ;;  %v1392_v61 = vmul.f32 2.1237322e-06, %v6142_v21  ;;  %v6176_v3 = vmul.f32 0.70710677, %v6145_v56  ;;  %v1276_v4 = vmul.f32 %v1275_v24, %v6029_v11  ;;  %v1141_v39 = vsel %vm6182_vm12, %v6038_v16, %v1137_v25  ;;  %v567_v25 = vpop.f32.mrf.mxu0 }
 0x11c   : > { %9266 = vst [vmem:[#allocation23_spill] sm:$0xff] %v6170_v34  ;;  %v1353_v43 = vadd.f32 0.00028619796, %v1352_v44  ;;  %v1432_v41 = vmul.f32 2.1237322e-06, %v6151_v55  ;;  %v1176_v37 = vmul.f32 %v6101_v62, %v1175_v7  ;;  %v6194_v6 = vadd.f32 %v712_v17, %v5610_v2  ;;  %v4967_v7 = vld [vmem:[%s9162_s3 + $0xc0] sm:$0xff] }
 0x11d   : > { %9267 = vst [vmem:[#allocation24_spill] sm:$0xff] %v6176_v3  ;;  %v1472_v5 = vmul.f32 2.1237322e-06, %v6158_v27  ;;  %v1185_v51 = vor.u32 1.1754944e-38, %v1184_v53  ;;  %v1314_v48 = vmul.f32 %v1313_v33, %v6107_v46  ;;  %v6197_v10 = vmin.f32 %v1510_v22, 16.0  ;;  %4004 = vmatpush.bf16.msrb.mxu3 %v4967_v7 }
 0x11e   : > { %v1550_v44 = vmul.f32 %v6170_v34, %v6170_v34  ;;  %v1201_v24 = vadd.f32 1.1283791, %v1200_v30  ;;  %v1238_v31 = vmul.f32 %v1237_v8, %v5990_v12  ;;  %v1393_v9 = vadd.f32 0.00028619796, %v1392_v61 }
 0x11f   : > { %9270 = vst [vmem:[#allocation25_spill] sm:$0xff] %v6197_v10  ;;  %v1590_v16 = vmul.f32 %v6176_v3, %v6176_v3  ;;  %v1146_v53 = vsel %vm6137_vm10, %v6103_v35, %v1141_v39  ;;  %vm6210_vm13 = vcmp.eq.f32.partialorder %v1182_v28, 8.507059e+37  ;;  %v1277_v22 = vadd.f32 0.05243302, %v1276_v4 }
 0x120   : > { %v1354_v8 = vmul.f32 %v1353_v43, %v6118_v18  ;;  %v1433_v61 = vadd.f32 0.00028619796, %v1432_v41  ;;  %v1177_v17 = vadd.f32 %v6101_v62, %v1176_v37  ;;  %vm1179_vm14 = vweird.f32 %v6101_v62 }
 0x121   : > { %v1473_v30 = vadd.f32 0.00028619796, %v1472_v5  ;;  %v6218_v3 = vmul.f32 0.70710677, %v6194_v6  ;;  %v1315_v34 = vadd.f32 0.0036580483, %v1314_v48  ;;  %v6224_v45 = vadd.f32 %v567_v25, %v5595_v57  ;;  %vm6235_vm15 = vmor %vm1178_vm11, %vm1179_vm14 }
 0x122   : > { %v1512_v39 = vmul.f32 2.1237322e-06, %v6197_v10  ;;  %v6221_v35 = vmin.f32 %v1550_v44, 16.0  ;;  %v6227_v28 = vmul.f32 %v3435_v14, %v5774_v50  ;;  %v1147_v4 = vmul.f32 %v1146_v53, %v6082_v26  ;;  %v616_v50 = vpop.f32.mrf.mxu1 }
 0x123   : > { %v1394_v43 = vmul.f32 %v1393_v9, %v6142_v21  ;;  %v6231_v41 = vmin.f32 %v1590_v16, 16.0  ;;  %v1239_v37 = vadd.f32 0.18741608, %v1238_v31  ;;  %v1278_v5 = vmul.f32 %v1277_v22, %v6029_v11 }
 0x124   : > { %9273 = vst [vmem:[#allocation26_spill] sm:$0xff] %v6221_v35  ;;  %v1355_v44 = vadd.f32 0.0036580483, %v1354_v8  ;;  %v1434_v25 = vmul.f32 %v1433_v61, %v6151_v55  ;;  %v1181_v26 = vsel %vm6235_vm15, %v6101_v62, %v1177_v17  ;;  %v6245_v14 = vmul.f32 %v1201_v24, %v5880_v60 }
 0x125   : > { %9274 = vst [vmem:[#allocation27_spill] sm:$0xff] %v6231_v41  ;;  %v1474_v42 = vmul.f32 %v1473_v30, %v6158_v27  ;;  %v1630_v9 = vmul.f32 %v6218_v3, %v6218_v3  ;;  %v1316_v31 = vmul.f32 %v1315_v34, %v6107_v46  ;;  %v1513_v16 = vadd.f32 0.00028619796, %v1512_v39 }
 0x126   : > { %9277 = vst [vmem:[#allocation28_spill] sm:$0xff] %v6245_v14  ;;  %v1552_v7 = vmul.f32 2.1237322e-06, %v6221_v35  ;;  %v6253_v53 = vmul.f32 0.70710677, %v6224_v45  ;;  %v4712_v22 = vclamps-f32 %v1147_v4, 1.0  ;;  %v6257_v60 = vadd.f32 %v616_v50, %v5597_v59 }
 0x127   : > { %v1395_v8 = vadd.f32 0.0036580483, %v1394_v43  ;;  %v1592_v62 = vmul.f32 2.1237322e-06, %v6231_v41  ;;  %v1240_v24 = vmul.f32 %v1239_v37, %v5990_v12  ;;  %v1279_v61 = vadd.f32 0.18741608, %v1278_v5  ;;  %v570_v5 = vpop.f32.mrf.mxu0 }
 0x128   : > { %v1356_v17 = vmul.f32 %v1355_v44, %v6118_v18  ;;  %v1435_v30 = vadd.f32 0.0036580483, %v1434_v25  ;;  %v1186_v34 = vsel %vm6210_vm13, %v1185_v51, %v1181_v26  ;;  %v6264_v39 = vmul.f32 0.5, %v6047_v1 }
 0x129   : > { %v1475_v48 = vadd.f32 0.0036580483, %v1474_v42  ;;  %v6266_v4 = vmin.f32 %v1630_v9, 16.0  ;;  %v1317_v43 = vadd.f32 0.05243302, %v1316_v31  ;;  %v1514_v14 = vmul.f32 %v1513_v16, %v6197_v10 }
 0x12a   : > { %9278 = vst [vmem:[#allocation29_spill] sm:$0xff] %v6264_v39  ;;  %v1553_v50 = vadd.f32 0.00028619796, %v1552_v7  ;;  %v1670_v37 = vmul.f32 %v6253_v53, %v6253_v53  ;;  %v3436_v12 = vadd.f32 1.0, %v4712_v22  ;;  %v1396_v44 = vmul.f32 %v1395_v8, %v6142_v21 }
 0x12b   : > { %9279 = vst [vmem:[#allocation30_spill] sm:$0xff] %v6266_v4  ;;  %v1593_v25 = vadd.f32 0.00028619796, %v1592_v62  ;;  %v6273_v51 = vmul.f32 0.70710677, %v6257_v60  ;;  %v1280_v33 = vmul.f32 %v1279_v61, %v6029_v11  ;;  %v1436_v42 = vmul.f32 %v1435_v30, %v6151_v55  ;;  %v665_v61 = vpop.f32.mrf.mxu2 }
 0x12c   : > { %v1241_v1 = vadd.f32 1.1283791, %v1240_v24  ;;  %v1357_v26 = vadd.f32 0.05243302, %v1356_v17  ;;  %v1187_v9 = vmul.f32 %v1186_v34, %v6148_v49  ;;  %v6279_v31 = vmul.f32 0.5, %v6059_v13  ;;  %v6287_v17 = vpop.f32.mrf.mxu1 }
 0x12d   : > { %9280 = vst [vmem:[#allocation31_spill] sm:$0xff] %v6273_v51  ;;  %v1476_v16 = vmul.f32 %v1475_v48, %v6158_v27  ;;  %v1632_v7 = vmul.f32 2.1237322e-06, %v6266_v4  ;;  %v1318_v22 = vmul.f32 %v1317_v43, %v6107_v46  ;;  %v1515_v8 = vadd.f32 0.0036580483, %v1514_v14 }
 0x12e   : > { %9281 = vst [vmem:[#allocation32_spill] sm:$0xff] %v6279_v31  ;;  %v1554_v62 = vmul.f32 %v1553_v50, %v6221_v35  ;;  %v6285_v24 = vmin.f32 %v1670_v37, 16.0  ;;  %v6290_v30 = vmul.f32 %v3436_v12, %v5978_v23  ;;  %v1397_v49 = vadd.f32 0.05243302, %v1396_v44  ;;  %v714_v37 = vpop.f32.mrf.mxu3 }
 0x12f   : > { %v1594_v13 = vmul.f32 %v1593_v25, %v6231_v41  ;;  %v1710_v34 = vmul.f32 %v6273_v51, %v6273_v51  ;;  %v6296_v48 = vmul.f32 %v1241_v1, %v5954_v52  ;;  %v1281_v14 = vadd.f32 1.1283791, %v1280_v33 }
 0x130   : > { %9282 = vst [vmem:[#allocation33_spill] sm:$0xff] %v6285_v24  ;;  %v1358_v43 = vmul.f32 %v1357_v26, %v6118_v18  ;;  %v1437_v50 = vadd.f32 0.05243302, %v1436_v42  ;;  %v4713_v31 = vclamps-f32 %v1187_v9, 1.0  ;;  %v1477_v39 = vadd.f32 0.05243302, %v1476_v16 }
 0x131   : > { %9283 = vst [vmem:[#allocation34_spill] sm:$0xff] %v6296_v48  ;;  %v1633_v11 = vadd.f32 0.00028619796, %v1632_v7  ;;  %v6300_v23 = vadd.f32 %v665_v61, %v5605_v63  ;;  %v1319_v12 = vadd.f32 0.18741608, %v1318_v22  ;;  %v1516_v44 = vmul.f32 %v1515_v8, %v6197_v10  ;;  %v6317_v22 = vpop.f32.mrf.mxu0 }
 0x132   : > { %v1555_v25 = vadd.f32 0.0036580483, %v1554_v62  ;;  %v1672_v51 = vmul.f32 2.1237322e-06, %v6285_v24  ;;  %v1398_v52 = vmul.f32 %v1397_v49, %v6142_v21  ;;  %v1595_v1 = vadd.f32 0.0036580483, %v1594_v13 }
 0x133   : > { %v6305_v33 = vmin.f32 %v1710_v34, 16.0  ;;  %v6308_v26 = vadd.f32 %v714_v37, %v5610_v2  ;;  %v6311_v42 = vmul.f32 %v1281_v14, %v5975_v38  ;;  %v1359_v9 = vadd.f32 0.18741608, %v1358_v43 }
 0x134   : > { %v1438_v16 = vmul.f32 %v1437_v50, %v6151_v55  ;;  %v6315_v7 = vmul.f32 0.5, %v6070_v20  ;;  %v3437_v8 = vadd.f32 1.0, %v4713_v31  ;;  %v1478_v62 = vmul.f32 %v1477_v39, %v6158_v27 }
 0x135   : > { %9284 = vst [vmem:[#allocation35_spill] sm:$0xff] %v6305_v33  ;;  %v1634_v61 = vmul.f32 %v1633_v11, %v6266_v4  ;;  %v6322_v49 = vmul.f32 0.70710677, %v6300_v23  ;;  %v1320_v13 = vmul.f32 %v1319_v12, %v6107_v46  ;;  %v1517_v38 = vadd.f32 0.05243302, %v1516_v44  ;;  %v6338_v44 = vpop.f32.mrf.mxu1 }
 0x136   : > { %9285 = vst [vmem:[#allocation36_spill] sm:$0xff] %v6311_v42  ;;  %v1556_v34 = vmul.f32 %v1555_v25, %v6221_v35  ;;  %v1673_v14 = vadd.f32 0.00028619796, %v1672_v51  ;;  %v1399_v43 = vadd.f32 0.18741608, %v1398_v52  ;;  %v1596_v20 = vmul.f32 %v1595_v1, %v6231_v41 }
 0x137   : > { %9286 = vst [vmem:[#allocation37_spill] sm:$0xff] %v6315_v7  ;;  %v1712_v50 = vmul.f32 2.1237322e-06, %v6305_v33  ;;  %v6329_v31 = vmul.f32 0.70710677, %v6308_v26  ;;  %v1360_v39 = vmul.f32 %v1359_v9, %v6118_v18  ;;  %v6333_v37 = vmul.f32 0.5, %v6110_v36  ;;  %v6345_v7 = vpop.f32.mrf.mxu2 }
 0x138   : > { %v1439_v11 = vadd.f32 0.18741608, %v1438_v16  ;;  %v6336_v12 = vadd.f32 %v570_v5, %v5595_v57  ;;  %v6341_v51 = vmul.f32 %v3437_v8, %v5985_v40  ;;  %v1479_v25 = vadd.f32 0.18741608, %v1478_v62 }
 0x139   : > { %9287 = vst [vmem:[#allocation38_spill] sm:$0xff] %v6333_v37  ;;  %v1635_v52 = vadd.f32 0.0036580483, %v1634_v61  ;;  %v1750_v1 = vmul.f32 %v6322_v49, %v6322_v49  ;;  %v1321_v9 = vadd.f32 1.1283791, %v1320_v13  ;;  %v1518_v16 = vmul.f32 %v1517_v38, %v6197_v10 }
 0x13a   : > { %v1557_v36 = vadd.f32 0.05243302, %v1556_v34  ;;  %v1674_v37 = vmul.f32 %v1673_v14, %v6285_v24  ;;  %v1400_v5 = vmul.f32 %v1399_v43, %v6142_v21  ;;  %v1597_v42 = vadd.f32 0.05243302, %v1596_v20 }
 0x13b   : > { %v1713_v48 = vadd.f32 0.00028619796, %v1712_v50  ;;  %v1790_v40 = vmul.f32 %v6329_v31, %v6329_v31  ;;  %v1361_v8 = vadd.f32 1.1283791, %v1360_v39  ;;  %v1440_v62 = vmul.f32 %v1439_v11, %v6151_v55  ;;  %v6370_v11 = vpop.f32.mrf.mxu3 }
 0x13c   : > { %v6354_v61 = vmul.f32 0.5, %v6135_v32  ;;  %v6357_v13 = vmul.f32 0.70710677, %v6336_v12  ;;  %v1480_v38 = vmul.f32 %v1479_v25, %v6158_v27  ;;  %v6361_v34 = vmul.f32 0.5, %v6145_v56 }
 0x13d   : > { %v1636_v14 = vmul.f32 %v1635_v52, %v6266_v4  ;;  %v6364_v43 = vmin.f32 %v1750_v1, 16.0  ;;  %v6367_v20 = vmul.f32 %v1321_v9, %v6044_v47  ;;  %v1519_v50 = vadd.f32 0.18741608, %v1518_v16 }
 0x13e   : > { %9288 = vst [vmem:[#allocation39_spill] sm:$0xff] %v6354_v61  ;;  %v1558_v39 = vmul.f32 %v1557_v36, %v6221_v35  ;;  %v1675_v32 = vadd.f32 0.0036580483, %v1674_v37  ;;  %v575_v61 = vpop.f32.mrf.mxu0  ;;  %v1401_v46 = vadd.f32 1.1283791, %v1400_v5  ;;  %v1598_v25 = vmul.f32 %v1597_v42, %v6231_v41 }
 0x13f   : > { %9289 = vst [vmem:[#allocation40_spill] sm:$0xff] %v6361_v34  ;;  %v1714_v56 = vmul.f32 %v1713_v48, %v6305_v33  ;;  %v6374_v34 = vmin.f32 %v1790_v40, 16.0  ;;  %v6377_v52 = vmul.f32 %v1361_v8, %v6056_v0  ;;  %v1441_v1 = vadd.f32 1.1283791, %v1440_v62 }
 0x140   : > { %9290 = vst [vmem:[#allocation41_spill] sm:$0xff] %v6364_v43  ;;  %v6380_v47 = vmul.f32 0.5, %v6194_v6  ;;  %v1830_v37 = vmul.f32 %v6357_v13, %v6357_v13  ;;  %v1481_v9 = vadd.f32 1.1283791, %v1480_v38  ;;  %v1637_v16 = vadd.f32 0.05243302, %v1636_v14  ;;  %v624_v6 = vpop.f32.mrf.mxu1 }
 0x141   : > { %9291 = vst [vmem:[#allocation42_spill] sm:$0xff] %v6367_v20  ;;  %v1752_v36 = vmul.f32 2.1237322e-06, %v6364_v43  ;;  %v6386_v42 = vadd.f32 %v575_v61, %v5595_v57  ;;  %v1520_v48 = vmul.f32 %v1519_v50, %v6197_v10  ;;  %v1559_v5 = vadd.f32 0.18741608, %v1558_v39 }
 0x142   : > { %9292 = vst [vmem:[#allocation43_spill] sm:$0xff] %v6374_v34  ;;  %v1676_v0 = vmul.f32 %v1675_v32, %v6285_v24  ;;  %v620_v40 = vadd.f32 %v6287_v17, %v5597_v59  ;;  %v6393_v8 = vmul.f32 %v1401_v46, %v6087_v54  ;;  %v1599_v62 = vadd.f32 0.18741608, %v1598_v25 }
 0x143   : > { %9293 = vst [vmem:[#allocation44_spill] sm:$0xff] %v6377_v52  ;;  %v1715_v38 = vadd.f32 0.0036580483, %v1714_v56  ;;  %v1792_v14 = vmul.f32 2.1237322e-06, %v6374_v34  ;;  %v6399_v61 = vmul.f32 %v1441_v1, %v6094_v19  ;;  %v6402_v50 = vmul.f32 0.5, %v6224_v45 }
 0x144   : > { %9294 = vst [vmem:[#allocation45_spill] sm:$0xff] %v6380_v47  ;;  %v6396_v47 = vpop.f32.mrf.mxu2  ;;  %v6405_v39 = vmul.f32 0.5, %v6257_v60  ;;  %v6407_v17 = vmin.f32 %v1830_v37, 16.0  ;;  %v1638_v54 = vmul.f32 %v1637_v16, %v6266_v4  ;;  %v1753_v46 = vadd.f32 0.00028619796, %v1752_v36 }
 0x145   : > { %9295 = vst [vmem:[#allocation46_spill] sm:$0xff] %v6393_v8  ;;  %v6411_v32 = vmul.f32 0.70710677, %v6386_v42  ;;  %v6414_v25 = vadd.f32 %v624_v6, %v5597_v59  ;;  %v6417_v19 = vmul.f32 %v1481_v9, %v6099_v29  ;;  %v1521_v56 = vadd.f32 1.1283791, %v1520_v48  ;;  %v6430_v9 = vpop.f32.mrf.mxu3 }
 0x146   : > { %9296 = vst [vmem:[#allocation47_spill] sm:$0xff] %v6399_v61  ;;  %v1677_v45 = vadd.f32 0.05243302, %v1676_v0  ;;  %v6419_v1 = vmul.f32 0.70710677, %v620_v40  ;;  %v1560_v60 = vmul.f32 %v1559_v5, %v6221_v35  ;;  %v1600_v37 = vmul.f32 %v1599_v62, %v6231_v41 }
 0x147   : > { %9297 = vst [vmem:[#allocation48_spill] sm:$0xff] %v6402_v50  ;;  %v1716_v16 = vmul.f32 %v1715_v38, %v6305_v33  ;;  %v1793_v36 = vadd.f32 0.00028619796, %v1792_v14  ;;  %v1832_v6 = vmul.f32 2.1237322e-06, %v6407_v17  ;;  %v669_v29 = vadd.f32 %v6345_v7, %v5605_v63 }
 0x148   : > { %9298 = vst [vmem:[#allocation49_spill] sm:$0xff] %v6405_v39  ;;  %v6425_v39 = vmul.f32 0.5, %v6300_v23  ;;  %v3558_v48 = vpack.c.bf16 %v6073_v15, %v5982_v58  ;;  %v1639_v0 = vadd.f32 0.18741608, %v1638_v54  ;;  %v1754_v5 = vmul.f32 %v1753_v46, %v6364_v43  ;;  %v9302_v23 = vld [vmem:[#allocation19_spill] sm:$0xff] }
 0x149   : > { %9299 = vst [vmem:[#allocation50_spill] sm:$0xff] %v6407_v17  ;;  %v2150_v62 = vmul.f32 %v6411_v32, %v6411_v32  ;;  %v6438_v38 = vmul.f32 0.70710677, %v6414_v25  ;;  %v6441_v14 = vmul.f32 %v1521_v56, %v9302_v23  ;;  %v6445_v7 = vmul.f32 0.5, %v6308_v26  ;;  %v9306_v23 = vld [vmem:[#allocation7_spill] sm:$0xff] }
 0x14a   : > { %9300 = vst [vmem:[#allocation51_spill] sm:$0xff] %v6417_v19  ;;  %v1870_v58 = vmul.f32 %v6419_v1, %v6419_v1  ;;  %3858 = vmatmul.bf16.vlgmr.msrb.gmra.mxu0 %v3558_v48  ;;  %v1561_v15 = vadd.f32 1.1283791, %v1560_v60  ;;  %v1601_v54 = vadd.f32 1.1283791, %v1600_v37  ;;  %v1794_v50 = vmul.f32 %v1793_v36, %v6374_v34 }
 0x14b   : > { %9301 = vst [vmem:[#allocation52_spill] sm:$0xff] %v6425_v39  ;;  %v1678_v39 = vmul.f32 %v1677_v45, %v6285_v24  ;;  %v1717_v46 = vadd.f32 0.05243302, %v1716_v16  ;;  %v6451_v41 = vmul.f32 0.5, %v6336_v12  ;;  %v1833_v35 = vadd.f32 0.00028619796, %v1832_v6 }
 0x14c   : > { %9303 = vst [vmem:[#allocation19_spill] sm:$0xff] %v6441_v14  ;;  %v6453_v56 = vmul.f32 0.70710677, %v669_v29  ;;  %v3559_v45 = vpack.c.bf16 %v6227_v28, %v9306_v23  ;;  %v1640_v26 = vmul.f32 %v1639_v0, %v6266_v4  ;;  %v6458_v14 = vmin.f32 %v2150_v62, 16.0  ;;  %v673_v37 = vpop.f32.mrf.mxu2  ;;  %v9308_v28 = vld [vmem:[#allocation23_spill] sm:$0xff]  ;;  %v9310_v0 = vld [vmem:[#allocation24_spill] sm:$0xff] }
 0x14d   : > { %9304 = vst [vmem:[#allocation53_spill] sm:$0xff] %v6445_v7  ;;  %v1755_v7 = vadd.f32 0.0036580483, %v1754_v5  ;;  %v2190_v60 = vmul.f32 %v6438_v38, %v6438_v38  ;;  %v1679_v16 = vadd.f32 0.18741608, %v1678_v39  ;;  %v6462_v36 = vmin.f32 %v1870_v58, 16.0 }
 0x14e   : > { %9305 = vst [vmem:[#allocation54_spill] sm:$0xff] %v6451_v41  ;;  %v6466_v12 = vadd.f32 %v6370_v11, %v5610_v2  ;;  %v6470_v6 = vadd.f32 %v6317_v22, %v5595_v57  ;;  %3907 = vmatmul.bf16.vlgmr.msrb.gmra.mxu1 %v3559_v45  ;;  %v6473_v48 = vmul.f32 %v1561_v15, %v9308_v28  ;;  %v1795_v39 = vadd.f32 0.0036580483, %v1794_v50 }
 0x14f   : > { %9307 = vst [vmem:[#allocation7_spill] sm:$0xff] %v6462_v36  ;;  %v6476_v5 = vmul.f32 %v1601_v54, %v9310_v0  ;;  %v1718_v62 = vmul.f32 %v1717_v46, %v6305_v33  ;;  %v1834_v58 = vmul.f32 %v1833_v35, %v6407_v17  ;;  %v6480_v23 = vmul.f32 0.5, %v620_v40  ;;  %v722_v0 = vpop.f32.mrf.mxu3 }
 0x150   : > { %9309 = vst [vmem:[#allocation23_spill] sm:$0xff] %v6473_v48  ;;  %v1910_v11 = vmul.f32 %v6453_v56, %v6453_v56  ;;  %v6485_v22 = vadd.f32 %v673_v37, %v5605_v63  ;;  %v1641_v45 = vadd.f32 1.1283791, %v1640_v26  ;;  %v1756_v15 = vmul.f32 %v1755_v7, %v6364_v43 }
 0x151   : > { %9311 = vst [vmem:[#allocation24_spill] sm:$0xff] %v6476_v5  ;;  %v2163_v28 = vmul.f32 3.8918573e-05, %v6458_v14  ;;  %v6489_v54 = vmin.f32 %v2190_v60, 16.0  ;;  %v1680_v46 = vmul.f32 %v1679_v16, %v6285_v24  ;;  %v1872_v50 = vmul.f32 2.1237322e-06, %v6462_v36 }
 0x152   : > { %9312 = vst [vmem:[#allocation55_spill] sm:$0xff] %v6480_v23  ;;  %v6494_v35 = vmul.f32 0.70710677, %v6466_v12  ;;  %v6497_v40 = vmul.f32 0.70710677, %v6470_v6  ;;  %v1796_v26 = vmul.f32 %v1795_v39, %v6374_v34  ;;  %v6502_v7 = vadd.f32 %v6338_v44, %v5597_v59 }
 0x153   : > { %v1719_v37 = vadd.f32 0.18741608, %v1718_v62  ;;  %v6506_v60 = vadd.f32 %v6396_v47, %v5605_v63  ;;  %v1835_v16 = vadd.f32 0.0036580483, %v1834_v58  ;;  %v6508_v23 = vmul.f32 0.5, %v669_v29 }
 0x154   : > { %v6510_v41 = vmin.f32 %v1910_v11, 16.0  ;;  %v6513_v5 = vmul.f32 0.70710677, %v6485_v22  ;;  %v1757_v48 = vadd.f32 0.05243302, %v1756_v15  ;;  %v6517_v4 = vadd.f32 %v722_v0, %v5610_v2 }
 0x155   : > { %9313 = vst [vmem:[#allocation56_spill] sm:$0xff] %v6508_v23  ;;  %v2164_v62 = vadd.f32 0.001143296, %v2163_v28  ;;  %v2203_v39 = vmul.f32 3.8918573e-05, %v6489_v54  ;;  %v1950_v47 = vmul.f32 %v6494_v35, %v6494_v35  ;;  %v1990_v29 = vmul.f32 %v6497_v40, %v6497_v40 }
 0x156   : > { %9314 = vst [vmem:[#allocation57_spill] sm:$0xff] %v6510_v41  ;;  %v1873_v44 = vadd.f32 0.00028619796, %v1872_v50  ;;  %v2230_v58 = vmul.f32 %v6513_v5, %v6513_v5  ;;  %v6526_v11 = vmul.f32 %v1641_v45, %v6218_v3  ;;  %v1797_v15 = vadd.f32 0.05243302, %v1796_v26 }
 0x157   : > { %v6529_v28 = vmul.f32 0.70710677, %v6502_v7  ;;  %v6532_v0 = vmul.f32 0.70710677, %v6506_v60  ;;  %v1681_v50 = vadd.f32 1.1283791, %v1680_v46  ;;  %v1836_v23 = vmul.f32 %v1835_v16, %v6407_v17 }
 0x158   : > { %9315 = vst [vmem:[#allocation58_spill] sm:$0xff] %v6526_v11  ;;  %v1912_v24 = vmul.f32 2.1237322e-06, %v6510_v41  ;;  %v6538_v10 = vadd.f32 %v6430_v9, %v5610_v2  ;;  %v2165_v19 = vmul.f32 %v2164_v62, %v6458_v14  ;;  %v2204_v3 = vadd.f32 0.001143296, %v2203_v39 }
 0x159   : > { %v6541_v45 = vmin.f32 %v2230_v58, 16.0  ;;  %v6544_v26 = vmul.f32 0.70710677, %v6517_v4  ;;  %v1720_v11 = vmul.f32 %v1719_v37, %v6305_v33  ;;  %v1874_v46 = vmul.f32 %v1873_v44, %v6462_v36  ;;  %v9319_v44 = vld [vmem:[#allocation9_spill] sm:$0xff] }
 0x15a   : > { %v6548_v20 = vmin.f32 %v1950_v47, 16.0  ;;  %v6550_v16 = vmin.f32 %v1990_v29, 16.0  ;;  %v1758_v61 = vmul.f32 %v1757_v48, %v6364_v43  ;;  %v1798_v9 = vmul.f32 %v1797_v15, %v6374_v34 }
 0x15b   : > { %9316 = vst [vmem:[#allocation59_spill] sm:$0xff] %v6544_v26  ;;  %v2030_v62 = vmul.f32 %v6529_v28, %v6529_v28  ;;  %v2070_v39 = vmul.f32 %v6532_v0, %v6532_v0  ;;  %v1837_v58 = vadd.f32 0.05243302, %v1836_v23  ;;  %v1913_v27 = vadd.f32 0.00028619796, %v1912_v24 }
 0x15c   : > { %9317 = vst [vmem:[#allocation60_spill] sm:$0xff] %v6548_v20  ;;  %v6559_v37 = vmul.f32 0.70710677, %v6538_v10  ;;  %v3560_v47 = vpack.c.bf16 %v6290_v30, %v9319_v44  ;;  %v2166_v29 = vadd.f32 0.014752088, %v2165_v19  ;;  %v2205_v33 = vmul.f32 %v2204_v3, %v6489_v54 }
 0x15d   : > { %9318 = vst [vmem:[#allocation61_spill] sm:$0xff] %v6550_v16  ;;  %v2243_v48 = vmul.f32 3.8918573e-05, %v6541_v45  ;;  %v2270_v15 = vmul.f32 %v6544_v26, %v6544_v26  ;;  %v6568_v8 = vmul.f32 %v1681_v50, %v6253_v53  ;;  %v1875_v52 = vadd.f32 0.0036580483, %v1874_v46 }
 0x15e   : > { %v1952_v24 = vmul.f32 2.1237322e-06, %v6548_v20  ;;  %v1992_v23 = vmul.f32 2.1237322e-06, %v6550_v16  ;;  %3956 = vmatmul.bf16.vlgmr.msrb.gmra.mxu2 %v3560_v47  ;;  %v1721_v55 = vadd.f32 1.1283791, %v1720_v11  ;;  %v1838_v44 = vmul.f32 %v1837_v58, %v6407_v17 }
 0x15f   : > { %9320 = vst [vmem:[#allocation9_spill] sm:$0xff] %v6568_v8  ;;  %v1759_v21 = vadd.f32 0.18741608, %v1758_v61  ;;  %v6572_v30 = vmin.f32 %v2030_v62, 16.0  ;;  %v6574_v19 = vmin.f32 %v2070_v39, 16.0  ;;  %v1914_v18 = vmul.f32 %v1913_v27, %v6510_v41  ;;  %v9323_v39 = vld [vmem:[#allocation11_spill] sm:$0xff] }
 0x160   : > { %v1799_v3 = vadd.f32 0.18741608, %v1798_v9  ;;  %v2110_v53 = vmul.f32 %v6559_v37, %v6559_v37  ;;  %v2167_v50 = vmul.f32 %v2166_v29, %v6458_v14  ;;  %v2206_v46 = vadd.f32 0.014752088, %v2205_v33 }
 0x161   : > { %9321 = vst [vmem:[#allocation62_spill] sm:$0xff] %v6572_v30  ;;  %v2244_v8 = vadd.f32 0.001143296, %v2243_v48  ;;  %v6581_v26 = vmin.f32 %v2270_v15, 16.0  ;;  %v1876_v61 = vmul.f32 %v1875_v52, %v6462_v36  ;;  %v1953_v11 = vadd.f32 0.00028619796, %v1952_v24 }
 0x162   : > { %9322 = vst [vmem:[#allocation63_spill] sm:$0xff] %v6574_v19  ;;  %v1993_v62 = vadd.f32 0.00028619796, %v1992_v23  ;;  %v3561_v9 = vpack.c.bf16 %v6341_v51, %v9323_v39  ;;  %v6587_v58 = vmul.f32 0.5, %v6466_v12  ;;  %v6590_v27 = vmul.f32 0.5, %v6470_v6 }
 0x163   : > { %v2032_v47 = vmul.f32 2.1237322e-06, %v6572_v30  ;;  %v2072_v33 = vmul.f32 2.1237322e-06, %v6574_v19  ;;  %v1760_v29 = vmul.f32 %v1759_v21, %v6364_v43  ;;  %v1800_v48 = vmul.f32 %v1799_v3, %v6374_v34  ;;  %v9327_v21 = vld [vmem:[#allocation31_spill] sm:$0xff]  ;;  %v577_v34 = vpop.f32.mrf.mxu0 }
 0x164   : > { %9324 = vst [vmem:[#allocation11_spill] sm:$0xff] %v6587_v58  ;;  %v1839_v52 = vadd.f32 0.18741608, %v1838_v44  ;;  %v6596_v15 = vmin.f32 %v2110_v53, 16.0  ;;  %4005 = vmatmul.bf16.vlgmr.msrb.gmra.mxu3 %v3561_v9  ;;  %v2168_v24 = vadd.f32 0.112945676, %v2167_v50  ;;  %v2207_v51 = vmul.f32 %v2206_v46, %v6489_v54 }
 0x165   : > { %9325 = vst [vmem:[#allocation64_spill] sm:$0xff] %v6590_v27  ;;  %v2245_v12 = vmul.f32 %v2244_v8, %v6541_v45  ;;  %v2283_v6 = vmul.f32 3.8918573e-05, %v6581_v26  ;;  %v1877_v23 = vadd.f32 0.05243302, %v1876_v61  ;;  %v1954_v58 = vmul.f32 %v1953_v11, %v6548_v20 }
 0x166   : > { %9326 = vst [vmem:[#allocation65_spill] sm:$0xff] %v6596_v15  ;;  %v1915_v39 = vadd.f32 0.0036580483, %v1914_v18  ;;  %v1994_v27 = vmul.f32 %v1993_v62, %v6550_v16  ;;  %v6604_v43 = vmul.f32 %v1721_v55, %v9327_v21  ;;  %v2033_v3 = vadd.f32 0.00028619796, %v2032_v47 }
 0x167   : > { %v2073_v44 = vadd.f32 0.00028619796, %v2072_v33  ;;  %v2152_v53 = vmul.f32 2.1237322e-06, %v6458_v14  ;;  %v1761_v50 = vadd.f32 1.1283791, %v1760_v29  ;;  %v1840_v46 = vmul.f32 %v1839_v52, %v6407_v17 }
 0x168   : > { %9328 = vst [vmem:[#allocation31_spill] sm:$0xff] %v6604_v43  ;;  %v6609_v8 = vmul.f32 0.5, %v6502_v7  ;;  %v2112_v61 = vmul.f32 2.1237322e-06, %v6596_v15  ;;  %v2169_v18 = vmul.f32 %v2168_v24, %v6458_v14  ;;  %v2208_v11 = vadd.f32 0.112945676, %v2207_v51 }
 0x169   : > { %v2246_v9 = vadd.f32 0.014752088, %v2245_v12  ;;  %v2284_v62 = vadd.f32 0.001143296, %v2283_v6  ;;  %v1801_v55 = vadd.f32 1.1283791, %v1800_v48  ;;  %v1916_v47 = vmul.f32 %v1915_v39, %v6510_v41 }
 0x16a   : > { %9329 = vst [vmem:[#allocation66_spill] sm:$0xff] %v6609_v8  ;;  %v1955_v33 = vadd.f32 0.0036580483, %v1954_v58  ;;  %v1995_v21 = vadd.f32 0.0036580483, %v1994_v27  ;;  %v1878_v29 = vmul.f32 %v1877_v23, %v6462_v36  ;;  %v2034_v52 = vmul.f32 %v2033_v3, %v6572_v30 }
 0x16b   : > { %v2074_v7 = vmul.f32 %v2073_v44, %v6574_v19  ;;  %v2153_v8 = vadd.f32 0.00028619796, %v2152_v53  ;;  %v6618_v17 = vmul.f32 %v1761_v50, %v6322_v49  ;;  %v1841_v24 = vadd.f32 1.1283791, %v1840_v46 }
 0x16c   : > { %v2113_v51 = vadd.f32 0.00028619796, %v2112_v61  ;;  %v6621_v12 = vadd.f32 %v577_v34, %v5595_v57  ;;  %v2170_v48 = vadd.f32 0.4994258, %v2169_v18  ;;  %v2209_v6 = vmul.f32 %v2208_v11, %v6489_v54 }
 0x16d   : > { %9330 = vst [vmem:[#allocation67_spill] sm:$0xff] %v6618_v17  ;;  %v2247_v58 = vmul.f32 %v2246_v9, %v6541_v45  ;;  %v2285_v27 = vmul.f32 %v2284_v62, %v6581_v26  ;;  %v6627_v23 = vmul.f32 %v1801_v55, %v6329_v31  ;;  %v1917_v39 = vadd.f32 0.05243302, %v1916_v47 }
 0x16e   : > { %v1956_v3 = vmul.f32 %v1955_v33, %v6548_v20  ;;  %v1996_v49 = vmul.f32 %v1995_v21, %v6550_v16  ;;  %v1879_v44 = vadd.f32 0.18741608, %v1878_v29  ;;  %v2035_v53 = vadd.f32 0.0036580483, %v2034_v52 }
 0x16f   : > { %9331 = vst [vmem:[#allocation68_spill] sm:$0xff] %v6627_v23  ;;  %v2075_v50 = vadd.f32 0.0036580483, %v2074_v7  ;;  %v2154_v34 = vmul.f32 %v2153_v8, %v6458_v14  ;;  %v6633_v46 = vmul.f32 %v1841_v24, %v6357_v13  ;;  %v2114_v61 = vmul.f32 %v2113_v51, %v6596_v15 }
 0x170   : > { %v2192_v18 = vmul.f32 2.1237322e-06, %v6489_v54  ;;  %v6638_v31 = vmul.f32 0.70710677, %v6621_v12  ;;  %v2171_v11 = vmul.f32 %v2170_v48, %v6458_v14  ;;  %v2210_v9 = vadd.f32 0.4994258, %v2209_v6 }
 0x171   : > { %9332 = vst [vmem:[#allocation69_spill] sm:$0xff] %v6633_v46  ;;  %v2248_v62 = vadd.f32 0.112945676, %v2247_v58  ;;  %v2286_v55 = vadd.f32 0.014752088, %v2285_v27  ;;  %v1918_v47 = vmul.f32 %v1917_v39, %v6510_v41  ;;  %v6643_v8 = vmul.f32 0.5, %v6506_v60  ;;  %v626_v58 = vpop.f32.mrf.mxu1 }
 0x172   : > { %v1957_v33 = vadd.f32 0.05243302, %v1956_v3  ;;  %v1997_v21 = vadd.f32 0.05243302, %v1996_v49  ;;  %v1880_v13 = vmul.f32 %v1879_v44, %v6462_v36  ;;  %v2036_v29 = vmul.f32 %v2035_v53, %v6572_v30 }
 0x173   : > { %9333 = vst [vmem:[#allocation70_spill] sm:$0xff] %v6643_v8  ;;  %v2076_v52 = vmul.f32 %v2075_v50, %v6574_v19  ;;  %v2155_v7 = vadd.f32 0.0036580483, %v2154_v34  ;;  %v2115_v24 = vadd.f32 0.0036580483, %v2114_v61  ;;  %v2310_v6 = vmul.f32 %v6638_v31, %v6638_v31 }
 0x174   : > { %v2193_v51 = vadd.f32 0.00028619796, %v2192_v18  ;;  %v2232_v48 = vmul.f32 2.1237322e-06, %v6541_v45  ;;  %v6651_v27 = vadd.f32 1.0, %v2171_v11  ;;  %v2211_v60 = vmul.f32 %v2210_v9, %v6489_v54 }
 0x175   : > { %v2249_v39 = vmul.f32 %v2248_v62, %v6541_v45  ;;  %v2287_v3 = vmul.f32 %v2286_v55, %v6581_v26  ;;  %v1919_v49 = vadd.f32 0.18741608, %v1918_v47  ;;  %v1958_v44 = vmul.f32 %v1957_v33, %v6548_v20 }
 0x176   : > { %v1998_v53 = vmul.f32 %v1997_v21, %v6550_v16  ;;  %v6659_v50 = vmul.f32 0.5, %v6538_v10  ;;  %v2037_v34 = vadd.f32 0.05243302, %v2036_v29  ;;  %v2077_v61 = vadd.f32 0.05243302, %v2076_v52 }
 0x177   : > { %v2156_v18 = vmul.f32 %v2155_v7, %v6458_v14  ;;  %v6663_v11 = vadd.f32 %v626_v58, %v5597_v59  ;;  %v2116_v9 = vmul.f32 %v2115_v24, %v6596_v15  ;;  %v2194_v62 = vmul.f32 %v2193_v51, %v6489_v54 }
 0x178   : > { %9334 = vst [vmem:[#allocation71_spill] sm:$0xff] %v6659_v50  ;;  %v2233_v55 = vadd.f32 0.00028619796, %v2232_v48  ;;  %v6667_v47 = vmin.f32 %v2310_v6, 16.0  ;;  %5037 = vrcp.f32 %v6651_v27  ;;  %v6670_v33 = vadd.f32 1.0, %v2211_v60 }
 0x179   : > { %v2250_v10 = vadd.f32 0.4994258, %v2249_v39  ;;  %v2288_v21 = vadd.f32 0.112945676, %v2287_v3  ;;  %v1881_v29 = vadd.f32 1.1283791, %v1880_v13  ;;  %v1920_v52 = vmul.f32 %v1919_v49, %v6510_v41 }
 0x17a   : > { %v1959_v7 = vadd.f32 0.18741608, %v1958_v44  ;;  %v1999_v50 = vadd.f32 0.18741608, %v1998_v53  ;;  %v2038_v58 = vmul.f32 %v2037_v34, %v6572_v30  ;;  %v2078_v24 = vmul.f32 %v2077_v61, %v6574_v19 }
 0x17b   : > { %v2157_v8 = vadd.f32 0.05243302, %v2156_v18  ;;  %v6676_v51 = vmul.f32 0.70710677, %v6663_v11  ;;  %v2117_v48 = vadd.f32 0.05243302, %v2116_v9  ;;  %v2234_v60 = vmul.f32 %v2233_v55, %v6541_v45 }
 0x17c   : > { %v2195_v6 = vadd.f32 0.0036580483, %v2194_v62  ;;  %v2323_v39 = vmul.f32 3.8918573e-05, %v6667_v47  ;;  %5039 = vrcp.f32 %v6670_v33  ;;  %v2251_v13 = vmul.f32 %v2250_v10, %v6541_v45 }
 0x17d   : > { %v2272_v3 = vmul.f32 2.1237322e-06, %v6581_v26  ;;  %v2289_v49 = vmul.f32 %v2288_v21, %v6581_v26  ;;  %v1921_v44 = vadd.f32 1.1283791, %v1920_v52  ;;  %v1960_v53 = vmul.f32 %v1959_v7, %v6548_v20 }
 0x17e   : > { %v2000_v34 = vmul.f32 %v1999_v50, %v6550_v16  ;;  %v6687_v61 = vmul.f32 0.5, %v6386_v42  ;;  %v6689_v18 = vpop.eup %5037  ;;  %v2039_v9 = vadd.f32 0.18741608, %v2038_v58  ;;  %v2079_v62 = vadd.f32 0.18741608, %v2078_v24 }
 0x17f   : > { %v2158_v55 = vmul.f32 %v2157_v8, %v6458_v14  ;;  %v2350_v10 = vmul.f32 %v6676_v51, %v6676_v51  ;;  %v2118_v46 = vmul.f32 %v2117_v48, %v6596_v15  ;;  %v2196_v21 = vmul.f32 %v2195_v6, %v6489_v54 }
 0x180   : > { %v2235_v52 = vadd.f32 0.0036580483, %v2234_v60  ;;  %v2324_v7 = vadd.f32 0.001143296, %v2323_v39  ;;  %v6697_v50 = vmul.f32 %v1881_v29, %v6419_v1  ;;  %v6699_v42 = vadd.f32 1.0, %v2251_v13 }
 0x181   : > { %v2273_v20 = vadd.f32 0.00028619796, %v2272_v3  ;;  %v2290_v41 = vadd.f32 0.4994258, %v2289_v49  ;;  %v6702_v58 = vmul.f32 %v1921_v44, %v6453_v56  ;;  %v1961_v8 = vadd.f32 1.1283791, %v1960_v53 }
 0x182   : > { %9335 = vst [vmem:[#allocation72_spill] sm:$0xff] %v6697_v50  ;;  %v2001_v24 = vadd.f32 1.1283791, %v2000_v34  ;;  %v2174_v36 = vmul.f32 %v6689_v18, %v6651_v27  ;;  %v6706_v48 = vpop.eup %5039  ;;  %v2040_v6 = vmul.f32 %v2039_v9, %v6572_v30  ;;  %v2159_v60 = vadd.f32 0.18741608, %v2158_v55 }
 0x183   : > { %9336 = vst [vmem:[#allocation73_spill] sm:$0xff] %v6702_v58  ;;  %v6710_v1 = vmul.f32 0.5, %v6414_v25  ;;  %v6712_v29 = vmin.f32 %v2350_v10, 16.0  ;;  %v2080_v39 = vmul.f32 %v2079_v62, %v6574_v19  ;;  %v2119_v13 = vadd.f32 0.18741608, %v2118_v46 }
 0x184   : > { %v2197_v56 = vadd.f32 0.05243302, %v2196_v21  ;;  %v2325_v3 = vmul.f32 %v2324_v7, %v6667_v47  ;;  %v2236_v49 = vmul.f32 %v2235_v52, %v6541_v45  ;;  %5041 = vrcp.f32 %v6699_v42 }
 0x185   : > { %v2274_v44 = vmul.f32 %v2273_v20, %v6581_v26  ;;  %v2291_v53 = vmul.f32 %v2290_v41, %v6581_v26  ;;  %v6721_v34 = vmul.f32 %v1961_v8, %v6494_v35  ;;  %v6724_v25 = vmul.f32 %v2001_v24, %v6497_v40  ;;  %v675_v20 = vpop.f32.mrf.mxu2 }
 0x186   : > { %v2175_v9 = vsub.f32 1.0, %v2174_v36  ;;  %v2214_v46 = vmul.f32 %v6706_v48, %v6670_v33  ;;  %v2041_v62 = vadd.f32 1.1283791, %v2040_v6  ;;  %v2160_v55 = vmul.f32 %v2159_v60, %v6458_v14 }
 0x187   : > { %9337 = vst [vmem:[#allocation74_spill] sm:$0xff] %v6721_v34  ;;  %v2312_v10 = vmul.f32 2.1237322e-06, %v6667_v47  ;;  %v2363_v21 = vmul.f32 3.8918573e-05, %v6712_v29  ;;  %v2120_v41 = vmul.f32 %v2119_v13, %v6596_v15  ;;  %v2198_v35 = vmul.f32 %v2197_v56, %v6489_v54 }
 0x188   : > { %9338 = vst [vmem:[#allocation75_spill] sm:$0xff] %v6724_v25  ;;  %v2081_v52 = vadd.f32 1.1283791, %v2080_v39  ;;  %v2326_v7 = vadd.f32 0.014752088, %v2325_v3  ;;  %v6734_v40 = vmul.f32 0.5, %v6485_v22  ;;  %v2176_v14 = vmul.f32 %v6689_v18, %v2175_v9 }
 0x189   : > { %v2237_v36 = vadd.f32 0.05243302, %v2236_v49  ;;  %v2275_v8 = vadd.f32 0.0036580483, %v2274_v44  ;;  %v6736_v24 = vadd.f32 1.0, %v2291_v53  ;;  %v2215_v6 = vsub.f32 1.0, %v2214_v46 }
 0x18a   : > { %v6740_v60 = vmul.f32 0.5, %v6517_v4  ;;  %v6743_v39 = vadd.f32 %v675_v20, %v5605_v63  ;;  %v6745_v13 = vpop.eup %5041  ;;  %v6748_v56 = vmul.f32 %v2041_v62, %v6529_v28  ;;  %v2161_v22 = vadd.f32 1.1283791, %v2160_v55 }
 0x18b   : > { %v2313_v3 = vadd.f32 0.00028619796, %v2312_v10  ;;  %v2364_v49 = vadd.f32 0.001143296, %v2363_v21  ;;  %v6751_v44 = vmul.f32 %v2081_v52, %v6532_v0  ;;  %v2121_v53 = vadd.f32 1.1283791, %v2120_v41 }
 0x18c   : > { %9339 = vst [vmem:[#allocation76_spill] sm:$0xff] %v6748_v56  ;;  %v2199_v9 = vadd.f32 0.18741608, %v2198_v35  ;;  %v2327_v46 = vmul.f32 %v2326_v7, %v6667_v47  ;;  %vm2179_vm0 = vweird.f32 %v6689_v18  ;;  %v2238_v4 = vmul.f32 %v2237_v36, %v6541_v45 }
 0x18d   : > { %9340 = vst [vmem:[#allocation77_spill] sm:$0xff] %v6751_v44  ;;  %v2276_v20 = vmul.f32 %v2275_v8, %v6581_v26  ;;  %5043 = vrcp.f32 %v6736_v24  ;;  %v2177_v28 = vadd.f32 %v6689_v18, %v2176_v14  ;;  %v2216_v62 = vmul.f32 %v6706_v48, %v2215_v6 }
 0x18e   : > { %v2254_v0 = vmul.f32 %v6745_v13, %v6699_v42  ;;  %v6763_v55 = vmul.f32 0.70710677, %v6743_v39  ;;  %v2162_v10 = vmul.f32 %v2161_v22, %v6411_v32  ;;  %v2184_v21 = vand.u32 2147483648, %v6651_v27 }
 0x18f   : > { %v2314_v52 = vmul.f32 %v2313_v3, %v6667_v47  ;;  %v2365_v41 = vmul.f32 %v2364_v49, %v6712_v29  ;;  %vm2178_vm1 = vweird.f32 %v6651_v27  ;;  %v2182_v35 = vand.u32 2147483647, %v6651_v27 }
 0x190   : > { %v2200_v7 = vmul.f32 %v2199_v9, %v6489_v54  ;;  %v2328_v36 = vadd.f32 0.112945676, %v2327_v46  ;;  %vm6774_vm2 = vmor %vm2178_vm1, %vm2179_vm0  ;;  %vm2219_vm3 = vweird.f32 %v6706_v48  ;;  %v2239_v32 = vadd.f32 0.18741608, %v2238_v4 }
 0x191   : > { %v2277_v14 = vadd.f32 0.05243302, %v2276_v20  ;;  %v2352_v6 = vmul.f32 2.1237322e-06, %v6712_v29  ;;  %v2181_v22 = vsel %vm6774_vm2, %v6689_v18, %v2177_v28  ;;  %v2217_v27 = vadd.f32 %v6706_v48, %v2216_v62 }
 0x192   : > { %v2255_v54 = vsub.f32 1.0, %v2254_v0  ;;  %v2390_v3 = vmul.f32 %v6763_v55, %v6763_v55  ;;  %v2185_v9 = vor.u32 1.1754944e-38, %v2184_v21  ;;  %v2224_v46 = vand.u32 2147483648, %v6670_v33 }
 0x193   : > { %v6786_v49 = vpop.eup %5043  ;;  %v2315_v34 = vadd.f32 0.0036580483, %v2314_v52  ;;  %v2366_v4 = vadd.f32 0.014752088, %v2365_v41  ;;  %vm2183_vm4 = vcmp.eq.f32.partialorder %v2182_v35, 8.507059e+37  ;;  %vm2218_vm5 = vweird.f32 %v6670_v33 }
 0x194   : > { %v2222_v20 = vand.u32 2147483647, %v6670_v33  ;;  %v2329_v18 = vmul.f32 %v2328_v36, %v6667_v47  ;;  %v2186_v28 = vsel %vm2183_vm4, %v2185_v9, %v2181_v22  ;;  %vm6794_vm6 = vmor %vm2218_vm5, %vm2219_vm3  ;;  %v2240_v0 = vmul.f32 %v2239_v32, %v6541_v45 }
 0x195   : > { %v2278_v21 = vmul.f32 %v2277_v14, %v6581_v26  ;;  %v2353_v52 = vadd.f32 0.00028619796, %v2352_v6  ;;  %v2221_v41 = vsel %vm6794_vm6, %v6706_v48, %v2217_v27  ;;  %v2256_v33 = vmul.f32 %v6745_v13, %v2255_v54 }
 0x196   : > { %v2294_v35 = vmul.f32 %v6786_v49, %v6736_v24  ;;  %v6806_v36 = vmin.f32 %v2390_v3, 16.0  ;;  %v2201_v8 = vadd.f32 1.1283791, %v2200_v7  ;;  %v2225_v22 = vor.u32 1.1754944e-38, %v2224_v46 }
 0x197   : > { %v2316_v9 = vmul.f32 %v2315_v34, %v6667_v47  ;;  %v2367_v45 = vmul.f32 %v2366_v4, %v6712_v29  ;;  %v6811_v32 = vmul.f32 %v2121_v53, %v6559_v37  ;;  %v2187_v14 = vmul.f32 %v2186_v28, %v2162_v10 }
 0x198   : > { %vm2223_vm7 = vcmp.eq.f32.partialorder %v2222_v20, 8.507059e+37  ;;  %v2330_v6 = vadd.f32 0.4994258, %v2329_v18  ;;  %v2241_v27 = vadd.f32 1.1283791, %v2240_v0  ;;  %v2354_v62 = vmul.f32 %v2353_v52, %v6712_v29 }
 0x199   : > { %9345 = vst [vmem:[#allocation78_spill] sm:$0xff] %v6811_v32  ;;  %v2226_v48 = vsel %vm2223_vm7, %v2225_v22, %v2221_v41  ;;  %v2279_v54 = vadd.f32 0.18741608, %v2278_v21  ;;  %v2257_v3 = vadd.f32 %v6745_v13, %v2256_v33  ;;  %vm2259_vm8 = vweird.f32 %v6745_v13 }
 0x19a   : > { %v2295_v7 = vsub.f32 1.0, %v2294_v35  ;;  %v2392_v34 = vmul.f32 2.1237322e-06, %v6806_v36  ;;  %v2202_v46 = vmul.f32 %v2201_v8, %v6438_v38  ;;  %v2264_v37 = vand.u32 2147483648, %v6699_v42 }
 0x19b   : > { %v2317_v53 = vadd.f32 0.05243302, %v2316_v9  ;;  %v2368_v10 = vadd.f32 0.112945676, %v2367_v45  ;;  %v4738_v4 = vclamps-f32 %v2187_v14, 1.0  ;;  %vm2258_vm9 = vweird.f32 %v6699_v42  ;;  %v724_v14 = vpop.f32.mrf.mxu3 }
 0x19c   : > { %v2262_v20 = vand.u32 2147483647, %v6699_v42  ;;  %v2331_v18 = vmul.f32 %v2330_v6, %v6667_v47  ;;  %v2227_v28 = vmul.f32 %v2226_v48, %v2202_v46  ;;  %v2242_v0 = vmul.f32 %v2241_v27, %v6513_v5  ;;  %vm6823_vm10 = vmor %vm2258_vm9, %vm2259_vm8  ;;  %v9348_v6 = vld [vmem:[#allocation6_spill] sm:$0xff] }
 0x19d   : > { %v6828_v38 = vmul.f32 0.5, %v6621_v12  ;;  %v2355_v52 = vadd.f32 0.0036580483, %v2354_v62  ;;  %v2261_v41 = vsel %vm6823_vm10, %v6745_v13, %v2257_v3  ;;  %v2296_v33 = vmul.f32 %v6786_v49, %v2295_v7 }
 0x19e   : > { %v2393_v42 = vadd.f32 0.00028619796, %v2392_v34  ;;  %v2403_v35 = vmul.f32 3.8918573e-05, %v6806_v36  ;;  %v2265_v8 = vor.u32 1.1754944e-38, %v2264_v37  ;;  %v2280_v5 = vmul.f32 %v2279_v54, %v6581_v26 }
 0x19f   : > { %v2318_v22 = vmul.f32 %v2317_v53, %v6667_v47  ;;  %v2369_v9 = vmul.f32 %v2368_v10, %v6712_v29  ;;  %v3462_v45 = vadd.f32 1.0, %v4738_v4  ;;  %vm2263_vm11 = vcmp.eq.f32.partialorder %v2262_v20, 8.507059e+37 }
 0x1a0   : > { %v6838_v12 = vadd.f32 1.0, %v2331_v18  ;;  %v1203_v48 = vmul.f32 3.8918573e-05, %v9348_v6  ;;  %v4739_v13 = vclamps-f32 %v2227_v28, 1.0  ;;  %v2266_v27 = vsel %vm2263_vm11, %v2265_v8, %v2261_v41  ;;  %v580_v41 = vpop.f32.mrf.mxu0 }
 0x1a1   : > { %vm2298_vm12 = vweird.f32 %v6736_v24  ;;  %v2356_v62 = vmul.f32 %v2355_v52, %v6712_v29  ;;  %v2297_v3 = vadd.f32 %v6786_v49, %v2296_v33  ;;  %vm2299_vm13 = vweird.f32 %v6786_v49 }
 0x1a2   : > { %v2394_v26 = vmul.f32 %v2393_v42, %v6806_v36  ;;  %v2404_v54 = vadd.f32 0.001143296, %v2403_v35  ;;  %v2304_v7 = vand.u32 2147483648, %v6736_v24  ;;  %v2319_v34 = vadd.f32 0.18741608, %v2318_v22  ;;  %vm6852_vm14 = vmor %vm2298_vm12, %vm2299_vm13 }
 0x1a3   : > { %v2370_v46 = vadd.f32 0.4994258, %v2369_v9  ;;  %v725_v37 = vadd.f32 %v724_v14, %v5610_v2  ;;  %v2267_v53 = vmul.f32 %v2266_v27, %v2242_v0  ;;  %v2302_v10 = vand.u32 2147483647, %v6736_v24 }
 0x1a4   : > { %5045 = vrcp.f32 %v6838_v12  ;;  %v1204_v4 = vadd.f32 0.001143296, %v1203_v48  ;;  %v3463_v20 = vadd.f32 1.0, %v4739_v13  ;;  %v2281_v18 = vadd.f32 1.1283791, %v2280_v5 }
 0x1a5   : > { %v6857_v21 = vmul.f32 0.5, %v6663_v11  ;;  %v2357_v52 = vadd.f32 0.05243302, %v2356_v62  ;;  %v6860_v0 = vmul.f32 %v3462_v45, %v6687_v61  ;;  %v2301_v33 = vsel %vm6852_vm14, %v6786_v49, %v2297_v3  ;;  %v9353_v49 = vld [vmem:[#allocation59_spill] sm:$0xff] }
 0x1a6   : > { %v2395_v42 = vadd.f32 0.0036580483, %v2394_v26  ;;  %v2405_v35 = vmul.f32 %v2404_v54, %v6806_v36  ;;  %v2305_v24 = vor.u32 1.1754944e-38, %v2304_v7  ;;  %v2320_v8 = vmul.f32 %v2319_v34, %v6667_v47  ;;  %v9354_v26 = vld [vmem:[#allocation17_spill] sm:$0xff] }
 0x1a7   : > { %9351 = vst [vmem:[#allocation6_spill] sm:$0xff] %v6860_v0  ;;  %v2371_v5 = vmul.f32 %v2370_v46, %v6712_v29  ;;  %v6868_v22 = vmul.f32 0.70710677, %v725_v37  ;;  %v4740_v11 = vclamps-f32 %v2267_v53, 1.0  ;;  %vm2303_vm15 = vcmp.eq.f32.partialorder %v2302_v10, 8.507059e+37 }
 0x1a8   : > { %v6871_v9 = vadd.f32 %v580_v41, %v5595_v57  ;;  %v1205_v61 = vmul.f32 %v1204_v4, %v9348_v6  ;;  %v6875_v45 = vmul.f32 %v3463_v20, %v6710_v1  ;;  %v2282_v14 = vmul.f32 %v2281_v18, %v9353_v49 }
 0x1a9   : > { %v2306_v48 = vsel %vm2303_vm15, %v2305_v24, %v2301_v33  ;;  %v2358_v13 = vmul.f32 %v2357_v52, %v6712_v29  ;;  %v2396_v27 = vmul.f32 %v2395_v42, %v6806_v36  ;;  %v2406_v62 = vadd.f32 0.014752088, %v2405_v35 }
 0x1aa   : > { %9352 = vst [vmem:[#allocation79_spill] sm:$0xff] %v6875_v45  ;;  %v6879_v47 = vpop.eup %5045  ;;  %v1206_v3 = vadd.f32 0.014752088, %v1205_v61  ;;  %v1363_v54 = vmul.f32 3.8918573e-05, %v9354_v26  ;;  %v6883_v34 = vadd.f32 1.0, %v2371_v5  ;;  %v2430_v1 = vmul.f32 %v6868_v22, %v6868_v22 }
 0x1ab   : > { %v2321_v7 = vadd.f32 1.1283791, %v2320_v8  ;;  %v6886_v46 = vmul.f32 0.5, %v6743_v39  ;;  %v3464_v53 = vadd.f32 1.0, %v4740_v11  ;;  %v6891_v10 = vmul.f32 0.70710677, %v6871_v9 }
 0x1ac   : > { %v1207_v4 = vmul.f32 %v1206_v3, %v9348_v6  ;;  %v1364_v20 = vadd.f32 0.001143296, %v1363_v54  ;;  %v2307_v18 = vmul.f32 %v2306_v48, %v2282_v14  ;;  %v2334_v28 = vmul.f32 %v6879_v47, %v6838_v12  ;;  %v9355_v5 = vld [vmem:[#allocation8_spill] sm:$0xff] }
 0x1ad   : > { %v2359_v52 = vadd.f32 0.18741608, %v2358_v13  ;;  %v6896_v41 = vmul.f32 0.5, %v725_v37  ;;  %v2397_v33 = vadd.f32 0.05243302, %v2396_v27  ;;  %v2407_v39 = vmul.f32 %v2406_v62, %v6806_v36 }
 0x1ae   : > { %v1208_v42 = vadd.f32 0.112945676, %v1207_v4  ;;  %v1365_v35 = vmul.f32 %v1364_v20, %v9354_v26  ;;  %v6901_v24 = vmul.f32 %v2321_v7, %v6638_v31  ;;  %5047 = vrcp.f32 %v6883_v34  ;;  %v9357_v7 = vld [vmem:[#allocation20_spill] sm:$0xff] }
 0x1af   : > { %v6904_v8 = vmin.f32 %v2430_v1, 16.0  ;;  %v1243_v11 = vmul.f32 3.8918573e-05, %v9355_v5  ;;  %v6908_v61 = vmul.f32 %v3464_v53, %v6734_v40  ;;  %v2344_v37 = vand.u32 2147483648, %v6838_v12 }
 0x1b0   : > { %v2470_v49 = vmul.f32 %v6891_v10, %v6891_v10  ;;  %v1209_v14 = vmul.f32 %v1208_v42, %v9348_v6  ;;  %v4741_v48 = vclamps-f32 %v2307_v18, 1.0  ;;  %v2335_v13 = vsub.f32 1.0, %v2334_v28 }
 0x1b1   : > { %9356 = vst [vmem:[#allocation59_spill] sm:$0xff] %v6908_v61  ;;  %v2360_v31 = vmul.f32 %v2359_v52, %v6712_v29  ;;  %v1366_v27 = vadd.f32 0.014752088, %v1365_v35  ;;  %v2398_v62 = vmul.f32 %v2397_v33, %v6806_v36  ;;  %v2408_v3 = vadd.f32 0.112945676, %v2407_v39 }
 0x1b2   : > { %v1210_v54 = vadd.f32 0.4994258, %v1209_v14  ;;  %v1403_v1 = vmul.f32 3.8918573e-05, %v9357_v7  ;;  %vm2338_vm0 = vweird.f32 %v6838_v12  ;;  %v2342_v40 = vand.u32 2147483647, %v6838_v12 }
 0x1b3   : > { %v2432_v53 = vmul.f32 2.1237322e-06, %v6904_v8  ;;  %v1367_v4 = vmul.f32 %v1366_v27, %v9354_v26  ;;  %v1244_v20 = vadd.f32 0.001143296, %v1243_v11  ;;  %v2345_v18 = vor.u32 1.1754944e-38, %v2344_v37 }
 0x1b4   : > { %v2443_v28 = vmul.f32 3.8918573e-05, %v6904_v8  ;;  %v6922_v29 = vmin.f32 %v2470_v49, 16.0  ;;  %v1211_v52 = vmul.f32 %v1210_v54, %v9348_v6  ;;  %v6925_v33 = vpop.eup %5047  ;;  %v3465_v39 = vadd.f32 1.0, %v4741_v48 }
 0x1b5   : > { %v2336_v42 = vmul.f32 %v6879_v47, %v2335_v13  ;;  %v1368_v35 = vadd.f32 0.112945676, %v1367_v4  ;;  %v1245_v14 = vmul.f32 %v1244_v20, %v9355_v5  ;;  %v2361_v32 = vadd.f32 1.1283791, %v2360_v31 }
 0x1b6   : > { %v2399_v61 = vadd.f32 0.18741608, %v2398_v62  ;;  %v2409_v27 = vmul.f32 %v2408_v3, %v6806_v36  ;;  %v1404_v11 = vadd.f32 0.001143296, %v1403_v1  ;;  %vm6930_vm1 = vcmp.eq.f32.partialorder %v2342_v40, 8.507059e+37  ;;  %v629_v1 = vpop.f32.mrf.mxu1 }
 0x1b7   : > { %v2384_v49 = vand.u32 2147483648, %v6883_v34  ;;  %v2433_v6 = vadd.f32 0.00028619796, %v2432_v53  ;;  %v6936_v54 = vmul.f32 0.5, %v6871_v9  ;;  %v6938_v48 = vadd.f32 1.0, %v1211_v52  ;;  %v9360_v52 = vld [vmem:[#allocation13_spill] sm:$0xff] }
 0x1b8   : > { %vm2339_vm2 = vweird.f32 %v6879_v47  ;;  %v2374_v13 = vmul.f32 %v6925_v33, %v6883_v34  ;;  %v2444_v31 = vadd.f32 0.001143296, %v2443_v28  ;;  %v2472_v62 = vmul.f32 2.1237322e-06, %v6922_v29 }
 0x1b9   : > { %v2337_v3 = vadd.f32 %v6879_v47, %v2336_v42  ;;  %5049 = vrcp.f32 %v6938_v48  ;;  %v1369_v40 = vmul.f32 %v1368_v35, %v9354_v26  ;;  %v1246_v53 = vadd.f32 0.014752088, %v1245_v14  ;;  %vm6962_vm3 = vmor %vm2338_vm0, %vm2339_vm2 }
 0x1ba   : > { %v2400_v9 = vmul.f32 %v2399_v61, %v6806_v36  ;;  %v2410_v4 = vadd.f32 0.4994258, %v2409_v27  ;;  %v1405_v20 = vmul.f32 %v1404_v11, %v9357_v7  ;;  %v1283_v45 = vmul.f32 3.8918573e-05, %v9360_v52 }
 0x1bb   : > { %v6951_v0 = vmul.f32 %v3465_v39, %v6740_v60  ;;  %v6954_v28 = vmul.f32 %v2361_v32, %v6676_v51  ;;  %v2382_v42 = vand.u32 2147483647, %v6883_v34  ;;  %v2434_v44 = vmul.f32 %v2433_v6, %v6904_v8 }
 0x1bc   : > { %v6966_v35 = vor.u32 1.1754944e-38, %v2384_v49  ;;  %v2445_v60 = vmul.f32 %v2444_v31, %v6904_v8  ;;  %v2473_v39 = vadd.f32 0.00028619796, %v2472_v62  ;;  %v6970_v51 = vadd.f32 %v629_v1, %v5597_v59 }
 0x1bd   : > { %9361 = vst [vmem:[#allocation17_spill] sm:$0xff] %v6951_v0  ;;  %v2341_v32 = vsel %vm6962_vm3, %v6879_v47, %v2337_v3  ;;  %v2375_v14 = vsub.f32 1.0, %v2374_v13  ;;  %v1370_v27 = vadd.f32 0.4994258, %v1369_v40  ;;  %v1247_v12 = vmul.f32 %v1246_v53, %v9355_v5 }
 0x1be   : > { %v2401_v11 = vadd.f32 1.1283791, %v2400_v9  ;;  %v2411_v6 = vmul.f32 %v2410_v4, %v6806_v36  ;;  %v1406_v0 = vadd.f32 0.014752088, %v1405_v20  ;;  %v1284_v49 = vadd.f32 0.001143296, %v1283_v45 }
 0x1bf   : > { %v5050_v58 = vpop.eup %5049  ;;  %v2435_v15 = vadd.f32 0.0036580483, %v2434_v44  ;;  %v6978_v31 = vmul.f32 3.8918573e-05, %v6922_v29  ;;  %v1371_v62 = vmul.f32 %v1370_v27, %v9354_v26  ;;  %v1248_v1 = vadd.f32 0.112945676, %v1247_v12 }
 0x1c0   : > { %v2346_v47 = vsel %vm6930_vm1, %v2345_v18, %v2341_v32  ;;  %vm2379_vm4 = vweird.f32 %v6925_v33  ;;  %v2446_v13 = vadd.f32 0.014752088, %v2445_v60  ;;  %v2474_v3 = vmul.f32 %v2473_v39, %v6922_v29  ;;  %v9364_v27 = vld [vmem:[#allocation21_spill] sm:$0xff] }
 0x1c1   : > { %v1214_v36 = vmul.f32 %v5050_v58, %v6938_v48  ;;  %v6986_v40 = vadd.f32 1.0, %v1371_v62  ;;  %v1249_v44 = vmul.f32 %v1248_v1, %v9355_v5  ;;  %v1407_v45 = vmul.f32 %v1406_v0, %v9357_v7  ;;  %v9374_v62 = vld [vmem:[#allocation34_spill] sm:$0xff] }
 0x1c2   : > { %v1285_v53 = vmul.f32 %v1284_v49, %v9360_v52  ;;  %v2376_v26 = vmul.f32 %v6925_v33, %v2375_v14  ;;  %vm2378_vm5 = vweird.f32 %v6883_v34  ;;  %v6994_v18 = vmul.f32 %v2401_v11, %v6763_v55 }
 0x1c3   : > { %v6996_v37 = vadd.f32 1.0, %v2411_v6  ;;  %v1215_v9 = vsub.f32 1.0, %v1214_v36  ;;  %v2347_v4 = vmul.f32 %v2346_v47, %v6901_v24  ;;  %v2436_v20 = vmul.f32 %v2435_v15, %v6904_v8  ;;  %vm7024_vm11 = vmor %vm2378_vm5, %vm2379_vm4 }
 0x1c4   : > { %v1222_v61 = vand.u32 2147483647, %v6938_v48  ;;  %5051 = vrcp.f32 %v6986_v40  ;;  %vm1219_vm6 = vweird.f32 %v5050_v58  ;;  %v1224_v60 = vand.u32 2147483648, %v6938_v48 }
 0x1c5   : > { %v1216_v0 = vmul.f32 %v5050_v58, %v1215_v9  ;;  %v1250_v39 = vadd.f32 0.4994258, %v1249_v44  ;;  %v2447_v32 = vmul.f32 %v2446_v13, %v6904_v8  ;;  %v1408_v55 = vadd.f32 0.112945676, %v1407_v45 }
 0x1c6   : > { %v1286_v14 = vadd.f32 0.014752088, %v1285_v53  ;;  %v1443_v12 = vmul.f32 3.8918573e-05, %v9364_v27  ;;  %vm7005_vm7 = vcmp.eq.f32.partialorder %v2382_v42, 8.507059e+37  ;;  %vm1218_vm8 = vweird.f32 %v6938_v48 }
 0x1c7   : > { %v2475_v15 = vadd.f32 0.0036580483, %v2474_v3  ;;  %v1217_v24 = vadd.f32 %v5050_v58, %v1216_v0  ;;  %v1251_v6 = vmul.f32 %v1250_v39, %v9355_v5  ;;  %v2377_v49 = vadd.f32 %v6925_v33, %v2376_v26  ;;  %vm1220_vm9 = vmor %vm1218_vm8, %vm1219_vm6 }
 0x1c8   : > { %v1409_v1 = vmul.f32 %v1408_v55, %v9357_v7  ;;  %v1287_v47 = vmul.f32 %v1286_v14, %v9360_v52  ;;  %vm1223_vm10 = vcmp.eq.f32.partialorder %v1222_v61, 8.507059e+37  ;;  %v1225_v42 = vor.u32 1.1754944e-38, %v1224_v60  ;;  %v9369_v14 = vld [vmem:[#allocation28_spill] sm:$0xff] }
 0x1c9   : > { %v1221_v13 = vsel %vm1220_vm9, %v5050_v58, %v1217_v24  ;;  %v7015_v36 = vadd.f32 1.0, %v1251_v6  ;;  %5053 = vrcp.f32 %v6996_v37  ;;  %v1444_v5 = vadd.f32 0.001143296, %v1443_v12 }
 0x1ca   : > { %v5052_v3 = vpop.eup %5051  ;;  %v1410_v48 = vadd.f32 0.4994258, %v1409_v1  ;;  %v1288_v44 = vadd.f32 0.112945676, %v1287_v47  ;;  %v4742_v45 = vclamps-f32 %v2347_v4, 1.0  ;;  %v2424_v53 = vand.u32 2147483648, %v6996_v37 }
 0x1cb   : > { %v1226_v26 = vsel %vm1223_vm10, %v1225_v42, %v1221_v13  ;;  %v1374_v9 = vmul.f32 %v5052_v3, %v6986_v40  ;;  %v2437_v61 = vadd.f32 0.05243302, %v2436_v20  ;;  %v2448_v0 = vadd.f32 0.112945676, %v2447_v32 }
 0x1cc   : > { %v7029_v60 = vmul.f32 0.70710677, %v6970_v51  ;;  %5055 = vrcp.f32 %v7015_v36  ;;  %v2381_v4 = vsel %vm7024_vm11, %v6925_v33, %v2377_v49  ;;  %v7036_v39 = vmul.f32 %v2475_v15, %v6922_v29 }
 0x1cd   : > { %v1375_v55 = vsub.f32 1.0, %v1374_v9  ;;  %v1384_v34 = vand.u32 2147483648, %v6986_v40  ;;  %v1227_v12 = vmul.f32 %v1226_v26, %v9369_v14  ;;  %v1411_v20 = vmul.f32 %v1410_v48, %v9357_v7  ;;  %v9370_v14 = vld [vmem:[#allocation44_spill] sm:$0xff] }
 0x1ce   : > { %v1289_v32 = vmul.f32 %v1288_v44, %v9360_v52  ;;  %v1445_v24 = vmul.f32 %v1444_v5, %v9364_v27  ;;  %v2484_v6 = vadd.f32 0.001143296, %v6978_v31  ;;  %vm1379_vm12 = vweird.f32 %v5052_v3 }
 0x1cf   : > { %v1376_v1 = vmul.f32 %v5052_v3, %v1375_v55  ;;  %v1382_v33 = vand.u32 2147483647, %v6986_v40  ;;  %v7045_v49 = vpop.eup %5053  ;;  %v7047_v15 = vadd.f32 1.0, %v4742_v45  ;;  %v7052_v47 = vsel %vm7005_vm7, %v6966_v35, %v2381_v4 }
 0x1d0   : > { %v2510_v7 = vmul.f32 %v7029_v60, %v7029_v60  ;;  %v7056_v13 = vadd.f32 1.0, %v1411_v20  ;;  %v7058_v42 = vor.u32 1.1754944e-38, %v2424_v53  ;;  %vm1378_vm13 = vweird.f32 %v6986_v40  ;;  %v678_v53 = vpop.f32.mrf.mxu2 }
 0x1d1   : > { %v1377_v31 = vadd.f32 %v5052_v3, %v1376_v1  ;;  %v1290_v48 = vadd.f32 0.4994258, %v1289_v32  ;;  %v4714_v5 = vclamps-f32 %v1227_v12, 1.0  ;;  %vm1380_vm14 = vmor %vm1378_vm13, %vm1379_vm12  ;;  %v1385_v45 = vor.u32 1.1754944e-38, %v1384_v34 }
 0x1d2   : > { %v5056_v44 = vpop.eup %5055  ;;  %5057 = vrcp.f32 %v7056_v13  ;;  %v1446_v11 = vadd.f32 0.014752088, %v1445_v24  ;;  %v7063_v35 = vmul.f32 %v2437_v61, %v6904_v8  ;;  %vm1383_vm15 = vcmp.eq.f32.partialorder %v1382_v33, 8.507059e+37  ;;  %v727_v24 = vpop.f32.mrf.mxu3 }
 0x1d3   : > { %v1381_v26 = vsel %vm1380_vm14, %v5052_v3, %v1377_v31  ;;  %v1254_v9 = vmul.f32 %v5056_v44, %v7015_v36  ;;  %v2449_v58 = vmul.f32 %v2448_v0, %v6904_v8  ;;  %v7067_v4 = vmin.f32 %v2510_v7, 16.0 }
 0x1d4   : > { %v1386_v40 = vsel %vm1383_vm15, %v1385_v45, %v1381_v26  ;;  %v1262_v55 = vand.u32 2147483647, %v7015_v36  ;;  %v1264_v20 = vand.u32 2147483648, %v7015_v36  ;;  %v1291_v61 = vmul.f32 %v1290_v48, %v9360_v52 }
 0x1d5   : > { %v1387_v34 = vmul.f32 %v1386_v40, %v9370_v14  ;;  %v1255_v12 = vsub.f32 1.0, %v1254_v9  ;;  %v3438_v32 = vadd.f32 1.0, %v4714_v5  ;;  %vm1259_vm0 = vweird.f32 %v5056_v44 }
 0x1d6   : > { %v7074_v3 = vadd.f32 %v678_v53, %v5605_v63  ;;  %v1447_v0 = vmul.f32 %v1446_v11, %v9364_v27  ;;  %v7078_v7 = vadd.f32 %v727_v24, %v5610_v2  ;;  %v7080_v31 = vadd.f32 1.0, %v1291_v61  ;;  %v9371_v53 = vld [vmem:[#allocation10_spill] sm:$0xff] }
 0x1d7   : > { %v4718_v1 = vclamps-f32 %v1387_v34, 1.0  ;;  %v1256_v33 = vmul.f32 %v5056_v44, %v1255_v12  ;;  %v2485_v26 = vmul.f32 %v2484_v6, %v6922_v29  ;;  %v2523_v52 = vmul.f32 3.8918573e-05, %v7067_v4  ;;  %v9372_v34 = vld [vmem:[#allocation18_spill] sm:$0xff] }
 0x1d8   : > { %v5058_v45 = vpop.eup %5057  ;;  %vm1258_vm1 = vweird.f32 %v7015_v36  ;;  %vm1263_vm2 = vcmp.eq.f32.partialorder %v1262_v55, 8.507059e+37  ;;  %v1265_v9 = vor.u32 1.1754944e-38, %v1264_v20  ;;  %v3502_v40 = vmul.f32 %v3438_v32, %v9371_v53 }
 0x1d9   : > { %v3442_v48 = vadd.f32 1.0, %v4718_v1  ;;  %v1257_v5 = vadd.f32 %v5056_v44, %v1256_v33  ;;  %v1414_v11 = vmul.f32 %v5058_v45, %v7056_v13  ;;  %vm1260_vm3 = vmor %vm1258_vm1, %vm1259_vm0  ;;  %v7089_v14 = vmul.f32 0.70710677, %v7074_v3  ;;  %v9373_v1 = vld [vmem:[#allocation16_spill] sm:$0xff] }
 0x1da   : > { %5059 = vrcp.f32 %v7080_v31  ;;  %v1448_v6 = vadd.f32 0.112945676, %v1447_v0  ;;  %v7094_v55 = vmul.f32 0.70710677, %v7078_v7  ;;  %v1422_v24 = vand.u32 2147483647, %v7056_v13 }
 0x1db   : > { %v3506_v12 = vmul.f32 %v3442_v48, %v9372_v34  ;;  %v1261_v61 = vsel %vm1260_vm3, %v5056_v44, %v1257_v5  ;;  %v1415_v36 = vsub.f32 1.0, %v1414_v11  ;;  %v1424_v32 = vand.u32 2147483648, %v7056_v13 }
 0x1dc   : > { %v1266_v20 = vsel %vm1263_vm2, %v1265_v9, %v1261_v61  ;;  %v1323_v33 = vmul.f32 3.8918573e-05, %v9373_v1  ;;  %vm1419_vm4 = vweird.f32 %v5058_v45  ;;  %v2450_v0 = vadd.f32 0.4994258, %v2449_v58 }
 0x1dd   : > { %v3562_v53 = vpack.c.bf16 %v3506_v12, %v3502_v40  ;;  %v1267_v56 = vmul.f32 %v1266_v20, %v9374_v62  ;;  %v1416_v50 = vmul.f32 %v5058_v45, %v1415_v36  ;;  %v2477_v48 = vadd.f32 0.05243302, %v7036_v39 }
 0x1de   : > { %v2550_v44 = vmul.f32 %v7089_v14, %v7089_v14  ;;  %v1449_v5 = vmul.f32 %v1448_v6, %v9364_v27  ;;  %v2486_v9 = vadd.f32 0.014752088, %v2485_v26  ;;  %vm1418_vm5 = vweird.f32 %v7056_v13 }
 0x1df   : > { %3863 = vmatmul.bf16.gmra.mxu0 %v3562_v53  ;;  %v1417_v11 = vadd.f32 %v5058_v45, %v1416_v50  ;;  %v2590_v40 = vmul.f32 %v7094_v55, %v7094_v55  ;;  %v7111_v62 = vmul.f32 %v7052_v47, %v6954_v28  ;;  %v2524_v39 = vadd.f32 0.001143296, %v2523_v52  ;;  %vm1420_vm6 = vmor %vm1418_vm5, %vm1419_vm4  ;;  %v9375_v28 = vld [vmem:[#allocation46_spill] sm:$0xff] }
 0x1e0   : > { %v7107_v34 = vpop.eup %5059  ;;  %v1425_v58 = vor.u32 1.1754944e-38, %v1424_v32  ;;  %v1324_v12 = vadd.f32 0.001143296, %v1323_v33  ;;  %v4715_v61 = vclamps-f32 %v1267_v56, 1.0  ;;  %vm1423_vm7 = vcmp.eq.f32.partialorder %v1422_v24, 8.507059e+37  ;;  %v9376_v56 = vld [vmem:[#allocation12_spill] sm:$0xff] }
 0x1e1   : > { %v1421_v6 = vsel %vm1420_vm6, %v5058_v45, %v1417_v11  ;;  %v1294_v50 = vmul.f32 %v7107_v34, %v7080_v31  ;;  %v2478_v13 = vmul.f32 %v2477_v48, %v6922_v29  ;;  %v7116_v36 = vmin.f32 %v2550_v44, 16.0 }
 0x1e2   : > { %v1426_v26 = vsel %vm1423_vm7, %v1425_v58, %v1421_v6  ;;  %v1450_v20 = vadd.f32 0.4994258, %v1449_v5  ;;  %v2439_v53 = vadd.f32 0.18741608, %v7063_v35  ;;  %v7120_v52 = vmin.f32 %v2590_v40, 16.0 }
 0x1e3   : > { %v1427_v47 = vmul.f32 %v1426_v26, %v9375_v28  ;;  %v1295_v32 = vsub.f32 1.0, %v1294_v50  ;;  %v2414_v45 = vmul.f32 %v7045_v49, %v6996_v37  ;;  %v2451_v24 = vmul.f32 %v2450_v0, %v6904_v8 }
 0x1e4   : > { %v1325_v33 = vmul.f32 %v1324_v12, %v9373_v1  ;;  %v2487_v48 = vmul.f32 %v2486_v9, %v6922_v29  ;;  %v2525_v44 = vmul.f32 %v2524_v39, %v7067_v4  ;;  %v3439_v35 = vadd.f32 1.0, %v4715_v61 }
 0x1e5   : > { %v4719_v5 = vclamps-f32 %v1427_v47, 1.0  ;;  %v2479_v11 = vadd.f32 0.18741608, %v2478_v13  ;;  %v2512_v40 = vmul.f32 2.1237322e-06, %v7067_v4  ;;  %v1451_v6 = vmul.f32 %v1450_v20, %v9364_v27  ;;  %v9377_v27 = vld [vmem:[#allocation29_spill] sm:$0xff] }
 0x1e6   : > { %v2563_v58 = vmul.f32 3.8918573e-05, %v7116_v36  ;;  %v2440_v50 = vmul.f32 %v2439_v53, %v6904_v8  ;;  %v2603_v0 = vmul.f32 3.8918573e-05, %v7120_v52  ;;  %v1296_v12 = vmul.f32 %v7107_v34, %v1295_v32 }
 0x1e7   : > { %v3443_v26 = vadd.f32 1.0, %v4719_v5  ;;  %v2415_v28 = vsub.f32 1.0, %v2414_v45  ;;  %vm2419_vm8 = vweird.f32 %v7045_v49  ;;  %v7136_v9 = vadd.f32 1.0, %v2451_v24 }
 0x1e8   : > { %v7138_v39 = vadd.f32 1.0, %v1451_v6  ;;  %v1326_v61 = vadd.f32 0.014752088, %v1325_v33  ;;  %v2488_v13 = vadd.f32 0.112945676, %v2487_v48  ;;  %v3503_v25 = vmul.f32 %v3439_v35, %v9376_v56 }
 0x1e9   : > { %v2526_v47 = vadd.f32 0.014752088, %v2525_v44  ;;  %v3507_v20 = vmul.f32 %v3443_v26, %v9377_v27  ;;  %vm2418_vm9 = vweird.f32 %v6996_v37  ;;  %v2480_v8 = vmul.f32 %v2479_v11, %v6922_v29  ;;  %v9378_v44 = vld [vmem:[#allocation22_spill] sm:$0xff] }
 0x1ea   : > { %v2513_v53 = vadd.f32 0.00028619796, %v2512_v40  ;;  %v2564_v32 = vadd.f32 0.001143296, %v2563_v58  ;;  %vm1299_vm10 = vweird.f32 %v7107_v34  ;;  %v2604_v24 = vadd.f32 0.001143296, %v2603_v0  ;;  %vm7174_vm14 = vmor %vm2418_vm9, %vm2419_vm8 }
 0x1eb   : > { %v3563_v45 = vpack.c.bf16 %v3507_v20, %v3503_v25  ;;  %v1297_v5 = vadd.f32 %v7107_v34, %v1296_v12  ;;  %5061 = vrcp.f32 %v7138_v39  ;;  %v2416_v33 = vmul.f32 %v7045_v49, %v2415_v28 }
 0x1ec   : > { %v1304_v56 = vand.u32 2147483648, %v7080_v31  ;;  %v1327_v48 = vmul.f32 %v1326_v61, %v9373_v1  ;;  %v1483_v35 = vmul.f32 3.8918573e-05, %v9378_v44  ;;  %v2489_v11 = vmul.f32 %v2488_v13, %v6922_v29 }
 0x1ed   : > { %v2527_v40 = vmul.f32 %v2526_v47, %v7067_v4  ;;  %3912 = vmatmul.bf16.gmra.mxu1 %v3563_v45  ;;  %vm1298_vm11 = vweird.f32 %v7080_v31  ;;  %v1302_v25 = vand.u32 2147483647, %v7080_v31  ;;  %v2441_v58 = vadd.f32 1.1283791, %v2440_v50 }
 0x1ee   : > { %5063 = vrcp.f32 %v7136_v9  ;;  %v7157_v26 = vadd.f32 1.1283791, %v2480_v8  ;;  %vm1300_vm12 = vmor %vm1298_vm11, %vm1299_vm10  ;;  %v2514_v0 = vmul.f32 %v2513_v53, %v7067_v4  ;;  %v2565_v12 = vmul.f32 %v2564_v32, %v7116_v36 }
 0x1ef   : > { %v2605_v28 = vmul.f32 %v2604_v24, %v7120_v52  ;;  %v1301_v61 = vsel %vm1300_vm12, %v7107_v34, %v1297_v5  ;;  %v2417_v31 = vadd.f32 %v7045_v49, %v2416_v33  ;;  %v1305_v50 = vor.u32 1.1754944e-38, %v1304_v56 }
 0x1f0   : > { %v1328_v13 = vadd.f32 0.112945676, %v1327_v48  ;;  %v1484_v47 = vadd.f32 0.001143296, %v1483_v35  ;;  %v2464_v20 = vand.u32 2147483648, %v7136_v9  ;;  %vm1303_vm13 = vcmp.eq.f32.partialorder %v1302_v25, 8.507059e+37 }
 0x1f1   : > { %v5062_v27 = vpop.eup %5061  ;;  %v2490_v8 = vadd.f32 0.4994258, %v2489_v11  ;;  %v2528_v45 = vadd.f32 0.112945676, %v2527_v40  ;;  %v1306_v6 = vsel %vm1303_vm13, %v1305_v50, %v1301_v61  ;;  %v7179_v5 = vmul.f32 %v2441_v58, %v6868_v22 }
 0x1f2   : > { %v1454_v53 = vmul.f32 %v5062_v27, %v7138_v39  ;;  %v1329_v32 = vmul.f32 %v1328_v13, %v9373_v1  ;;  %v1485_v24 = vmul.f32 %v1484_v47, %v9378_v44  ;;  %v2515_v33 = vadd.f32 0.0036580483, %v2514_v0  ;;  %v9384_v0 = vld [vmem:[#allocation36_spill] sm:$0xff] }
 0x1f3   : > { %v2566_v56 = vadd.f32 0.014752088, %v2565_v12  ;;  %v2606_v48 = vadd.f32 0.014752088, %v2605_v28  ;;  %v2421_v11 = vsel %vm7174_vm14, %v7045_v49, %v2417_v31  ;;  %v9381_v40 = vand.u32 2147483647, %v6996_v37 }
 0x1f4   : > { %v7181_v35 = vpop.eup %5063  ;;  %v1455_v61 = vsub.f32 1.0, %v1454_v53  ;;  %v1330_v50 = vadd.f32 0.4994258, %v1329_v32  ;;  %v1486_v13 = vadd.f32 0.014752088, %v1485_v24  ;;  %v2491_v22 = vmul.f32 %v2490_v8, %v6922_v29 }
 0x1f5   : > { %vm7188_vm15 = vcmp.eq.f32.partialorder %v9381_v40, 8.507059e+37  ;;  %v2529_v58 = vmul.f32 %v2528_v45, %v7067_v4  ;;  %v1307_v12 = vmul.f32 %v1306_v6, %v9384_v0  ;;  %v1464_v28 = vand.u32 2147483648, %v7138_v39 }
 0x1f6   : > { %v1456_v47 = vmul.f32 %v5062_v27, %v1455_v61  ;;  %vm1459_vm0 = vweird.f32 %v5062_v27  ;;  %v1462_v49 = vand.u32 2147483647, %v7138_v39  ;;  %v1331_v37 = vmul.f32 %v1330_v50, %v9373_v1 }
 0x1f7   : > { %v2454_v31 = vmul.f32 %v7181_v35, %v7136_v9  ;;  %v2516_v53 = vmul.f32 %v2515_v33, %v7067_v4  ;;  %v2567_v32 = vmul.f32 %v2566_v56, %v7116_v36  ;;  %v1487_v29 = vmul.f32 %v1486_v13, %v9378_v44 }
 0x1f8   : > { %v2607_v8 = vmul.f32 %v2606_v48, %v7120_v52  ;;  %v1457_v6 = vadd.f32 %v5062_v27, %v1456_v47  ;;  %vm1458_vm1 = vweird.f32 %v7138_v39  ;;  %v7205_v45 = vadd.f32 1.0, %v1331_v37 }
 0x1f9   : > { %v7207_v24 = vadd.f32 1.0, %v2491_v22  ;;  %v2530_v34 = vadd.f32 0.4994258, %v2529_v58  ;;  %vm1460_vm2 = vmor %vm1458_vm1, %vm1459_vm0  ;;  %v1465_v1 = vor.u32 1.1754944e-38, %v1464_v28  ;;  %v1488_v40 = vadd.f32 0.112945676, %v1487_v29 }
 0x1fa   : > { %v4716_v61 = vclamps-f32 %v1307_v12, 1.0  ;;  %v1461_v50 = vsel %vm1460_vm2, %v5062_v27, %v1457_v6  ;;  %vm1463_vm3 = vcmp.eq.f32.partialorder %v1462_v49, 8.507059e+37  ;;  %5065 = vrcp.f32 %v7205_v45  ;;  %v9385_v22 = vld [vmem:[#allocation47_spill] sm:$0xff] }
 0x1fb   : > { %v2455_v33 = vsub.f32 1.0, %v2454_v31  ;;  %v2517_v56 = vadd.f32 0.05243302, %v2516_v53  ;;  %v1466_v13 = vsel %vm1463_vm3, %v1465_v1, %v1461_v50  ;;  %v1489_v48 = vmul.f32 %v1488_v40, %v9378_v44  ;;  %v582_v53 = vpop.f32.mrf.mxu0  ;;  %v9389_v50 = vld [vmem:[#allocation14_spill] sm:$0xff] }
 0x1fc   : > { %v7211_v0 = vor.u32 1.1754944e-38, %v2464_v20  ;;  %v2568_v39 = vadd.f32 0.112945676, %v2567_v32  ;;  %v2608_v47 = vadd.f32 0.112945676, %v2607_v8  ;;  %v1467_v37 = vmul.f32 %v1466_v13, %v9385_v22 }
 0x1fd   : > { %v2426_v58 = vsel %vm7188_vm15, %v7058_v42, %v2421_v11  ;;  %v7219_v27 = vmul.f32 %v7157_v26, %v6891_v10  ;;  %v2531_v12 = vmul.f32 %v2530_v34, %v7067_v4  ;;  %v1490_v28 = vadd.f32 0.4994258, %v1489_v48 }
 0x1fe   : > { %vm2458_vm4 = vweird.f32 %v7136_v9  ;;  %5067 = vrcp.f32 %v7207_v24  ;;  %v2552_v20 = vmul.f32 2.1237322e-06, %v7116_v36  ;;  %v4720_v49 = vclamps-f32 %v1467_v37, 1.0 }
 0x1ff   : > { %v3440_v31 = vadd.f32 1.0, %v4716_v61  ;;  %v2456_v32 = vmul.f32 %v7181_v35, %v2455_v33  ;;  %v2518_v42 = vmul.f32 %v2517_v56, %v7067_v4  ;;  %v1491_v11 = vmul.f32 %v1490_v28, %v9378_v44  ;;  %v9390_v56 = vld [vmem:[#allocation32_spill] sm:$0xff]  ;;  %v680_v61 = vpop.f32.mrf.mxu2 }
 0x200   : > { %v7229_v10 = vadd.f32 %v582_v53, %v5595_v57  ;;  %v5066_v26 = vpop.eup %5065  ;;  %v7232_v25 = vmul.f32 %v2426_v58, %v6994_v18  ;;  %v2569_v29 = vmul.f32 %v2568_v39, %v7116_v36  ;;  %v2609_v8 = vmul.f32 %v2608_v47, %v7120_v52  ;;  %v631_v39 = vpop.f32.mrf.mxu1 }
 0x201   : > { %v3444_v6 = vadd.f32 1.0, %v4720_v49  ;;  %vm2459_vm5 = vweird.f32 %v7181_v35  ;;  %v7237_v34 = vadd.f32 1.0, %v2531_v12  ;;  %v1334_v1 = vmul.f32 %v5066_v26, %v7205_v45 }
 0x202   : > { %v7240_v40 = vadd.f32 1.0, %v1491_v11  ;;  %v9386_v44 = vand.u32 2147483647, %v7136_v9  ;;  %v2553_v18 = vadd.f32 0.00028619796, %v2552_v20  ;;  %v3504_v33 = vmul.f32 %v3440_v31, %v9389_v50  ;;  %vm7271_vm8 = vmor %vm2458_vm4, %vm2459_vm5 }
 0x203   : > { %v3508_v13 = vmul.f32 %v3444_v6, %v9390_v56  ;;  %v7251_v48 = vmul.f32 0.70710677, %v7229_v10  ;;  %v2457_v47 = vadd.f32 %v7181_v35, %v2456_v32  ;;  %v2519_v22 = vadd.f32 0.18741608, %v2518_v42 }
 0x204   : > { %vm7244_vm6 = vcmp.eq.f32.partialorder %v9386_v44, 8.507059e+37  ;;  %v1335_v37 = vsub.f32 1.0, %v1334_v1  ;;  %5069 = vrcp.f32 %v7240_v40  ;;  %v7255_v58 = vpop.eup %5067  ;;  %v2570_v12 = vadd.f32 0.4994258, %v2569_v29 }
 0x205   : > { %v2610_v28 = vadd.f32 0.4994258, %v2609_v8  ;;  %v3564_v49 = vpack.c.bf16 %v3508_v13, %v3504_v33  ;;  %v1344_v20 = vand.u32 2147483648, %v7205_v45  ;;  %vm1339_vm7 = vweird.f32 %v5066_v26 }
 0x206   : > { %v1336_v31 = vmul.f32 %v5066_v26, %v1335_v37  ;;  %v2630_v53 = vmul.f32 %v7251_v48, %v7251_v48  ;;  %v7261_v11 = vadd.f32 %v631_v39, %v5597_v59  ;;  %5071 = vrcp.f32 %v7237_v34 }
 0x207   : > { %v2554_v32 = vmul.f32 %v2553_v18, %v7116_v36  ;;  %v2592_v42 = vmul.f32 2.1237322e-06, %v7120_v52  ;;  %3961 = vmatmul.bf16.gmra.mxu2 %v3564_v49  ;;  %v1342_v29 = vand.u32 2147483647, %v7205_v45  ;;  %vm1338_vm9 = vweird.f32 %v7205_v45 }
 0x208   : > { %v1337_v6 = vadd.f32 %v5066_v26, %v1336_v31  ;;  %v7276_v1 = vmin.f32 %v2630_v53, 16.0  ;;  %v7279_v44 = vmul.f32 0.70710677, %v7261_v11  ;;  %v2461_v18 = vsel %vm7271_vm8, %v7181_v35, %v2457_v47  ;;  %vm1340_vm10 = vmor %vm1338_vm9, %vm1339_vm7 }
 0x209   : > { %v2494_v50 = vmul.f32 %v7255_v58, %v7207_v24  ;;  %v2571_v9 = vmul.f32 %v2570_v12, %v7116_v36  ;;  %v2611_v33 = vmul.f32 %v2610_v28, %v7120_v52  ;;  %v1345_v13 = vor.u32 1.1754944e-38, %v1344_v20 }
 0x20a   : > { %v5070_v56 = vpop.eup %5069  ;;  %v1341_v45 = vsel %vm1340_vm10, %v5066_v26, %v1337_v6  ;;  %v2643_v39 = vmul.f32 3.8918573e-05, %v7276_v1  ;;  %v2670_v37 = vmul.f32 %v7279_v44, %v7279_v44  ;;  %v2502_v49 = vand.u32 2147483647, %v7207_v24 }
 0x20b   : > { %v2504_v35 = vand.u32 2147483648, %v7207_v24  ;;  %vm1343_vm11 = vcmp.eq.f32.partialorder %v1342_v29, 8.507059e+37  ;;  %v1494_v47 = vmul.f32 %v5070_v56, %v7240_v40  ;;  %v2466_v12 = vsel %vm7244_vm6, %v7211_v0, %v2461_v18  ;;  %v9393_v0 = vld [vmem:[#allocation42_spill] sm:$0xff] }
 0x20c   : > { %v2555_v28 = vadd.f32 0.0036580483, %v2554_v32  ;;  %v2593_v31 = vadd.f32 0.00028619796, %v2592_v42  ;;  %v1346_v26 = vsel %vm1343_vm11, %v1345_v13, %v1341_v45  ;;  %v7298_v20 = vpop.eup %5071  ;;  %v2520_v53 = vmul.f32 %v2519_v22, %v7067_v4 }
 0x20d   : > { %v1495_v8 = vsub.f32 1.0, %v1494_v47  ;;  %v2644_v6 = vadd.f32 0.001143296, %v2643_v39  ;;  %v7301_v19 = vmin.f32 %v2670_v37, 16.0  ;;  %v2495_v30 = vsub.f32 1.0, %v2494_v50 }
 0x20e   : > { %v7303_v16 = vadd.f32 1.0, %v2571_v9  ;;  %v7305_v29 = vadd.f32 1.0, %v2611_v33  ;;  %v1504_v23 = vand.u32 2147483648, %v7240_v40  ;;  %v1347_v32 = vmul.f32 %v1346_v26, %v9393_v0 }
 0x20f   : > { %v1496_v42 = vmul.f32 %v5070_v56, %v1495_v8  ;;  %vm1499_vm12 = vweird.f32 %v5070_v56  ;;  %v1502_v18 = vand.u32 2147483647, %v7240_v40  ;;  %v2534_v4 = vmul.f32 %v7298_v20, %v7237_v34 }
 0x210   : > { %v2556_v22 = vmul.f32 %v2555_v28, %v7116_v36  ;;  %v2594_v50 = vmul.f32 %v2593_v31, %v7120_v52  ;;  %vm1498_vm13 = vweird.f32 %v7240_v40  ;;  %v2645_v33 = vmul.f32 %v2644_v6, %v7276_v1 }
 0x211   : > { %v1497_v9 = vadd.f32 %v5070_v56, %v1496_v42  ;;  %v2683_v45 = vmul.f32 3.8918573e-05, %v7301_v19  ;;  %v7318_v13 = vadd.f32 %v680_v61, %v5605_v63  ;;  %v7321_v39 = vmul.f32 %v2466_v12, %v7179_v5  ;;  %vm1500_vm14 = vmor %vm1498_vm13, %vm1499_vm12  ;;  %v9394_v61 = vld [vmem:[#allocation51_spill] sm:$0xff] }
 0x212   : > { %v2496_v37 = vmul.f32 %v7255_v58, %v2495_v30  ;;  %5073 = vrcp.f32 %v7303_v16  ;;  %v1505_v47 = vor.u32 1.1754944e-38, %v1504_v23  ;;  %v4717_v40 = vclamps-f32 %v1347_v32, 1.0 }
 0x213   : > { %5075 = vrcp.f32 %v7305_v29  ;;  %v1501_v28 = vsel %vm1500_vm14, %v5070_v56, %v1497_v9  ;;  %vm1503_vm15 = vcmp.eq.f32.partialorder %v1502_v18, 8.507059e+37  ;;  %v2535_v31 = vsub.f32 1.0, %v2534_v4 }
 0x214   : > { %v2557_v26 = vadd.f32 0.05243302, %v2556_v22  ;;  %v2595_v8 = vadd.f32 0.0036580483, %v2594_v50  ;;  %v1506_v6 = vsel %vm1503_vm15, %v1505_v47, %v1501_v28  ;;  %v2646_v42 = vadd.f32 0.014752088, %v2645_v33 }
 0x215   : > { %v1507_v0 = vmul.f32 %v1506_v6, %v9394_v61  ;;  %v2684_v5 = vadd.f32 0.001143296, %v2683_v45  ;;  %v7328_v12 = vmul.f32 0.70710677, %v7318_v13  ;;  %v2497_v23 = vadd.f32 %v7255_v58, %v2496_v37  ;;  %v9401_v61 = vld [vmem:[#allocation15_spill] sm:$0xff] }
 0x216   : > { %vm2498_vm0 = vweird.f32 %v7207_v24  ;;  %vm2499_vm1 = vweird.f32 %v7255_v58  ;;  %vm7334_vm2 = vcmp.eq.f32.partialorder %v2502_v49, 8.507059e+37  ;;  %v2505_v32 = vor.u32 1.1754944e-38, %v2504_v35 }
 0x217   : > { %9395 = vst [vmem:[#allocation8_spill] sm:$0xff] %v7328_v12  ;;  %v2521_v18 = vadd.f32 1.1283791, %v2520_v53  ;;  %v4721_v4 = vclamps-f32 %v1507_v0, 1.0  ;;  %v3441_v22 = vadd.f32 1.0, %v4717_v40  ;;  %v2536_v33 = vmul.f32 %v7298_v20, %v2535_v31  ;;  %vm7346_vm3 = vmor %vm2498_vm0, %vm2499_vm1 }
 0x218   : > { %v7338_v50 = vpop.eup %5073  ;;  %v2558_v45 = vmul.f32 %v2557_v26, %v7116_v36  ;;  %v2596_v24 = vmul.f32 %v2595_v8, %v7120_v52  ;;  %v2647_v53 = vmul.f32 %v2646_v42, %v7276_v1  ;;  %v2685_v47 = vmul.f32 %v2684_v5, %v7301_v19  ;;  %v9400_v26 = vld [vmem:[#allocation25_spill] sm:$0xff] }
 0x219   : > { %v7344_v37 = vpop.eup %5075  ;;  %v3445_v35 = vadd.f32 1.0, %v4721_v4  ;;  %v2710_v40 = vmul.f32 %v7328_v12, %v7328_v12  ;;  %v2501_v28 = vsel %vm7346_vm3, %v7255_v58, %v2497_v23  ;;  %vm2539_vm4 = vweird.f32 %v7298_v20  ;;  %v9402_v42 = vld [vmem:[#allocation37_spill] sm:$0xff]  ;;  %v729_v23 = vpop.f32.mrf.mxu3 }
 0x21a   : > { %v2542_v31 = vand.u32 2147483647, %v7237_v34  ;;  %v1523_v8 = vmul.f32 3.8918573e-05, %v9400_v26  ;;  %v2574_v6 = vmul.f32 %v7338_v50, %v7303_v16  ;;  %v3505_v0 = vmul.f32 %v3441_v22, %v9401_v61 }
 0x21b   : > { %v3509_v5 = vmul.f32 %v3445_v35, %v9402_v42  ;;  %v2632_v4 = vmul.f32 2.1237322e-06, %v7276_v1  ;;  %v2537_v9 = vadd.f32 %v7298_v20, %v2536_v33  ;;  %v2559_v30 = vadd.f32 0.18741608, %v2558_v45 }
 0x21c   : > { %v2597_v49 = vadd.f32 0.05243302, %v2596_v24  ;;  %v2614_v58 = vmul.f32 %v7344_v37, %v7305_v29  ;;  %v2648_v43 = vadd.f32 0.112945676, %v2647_v53  ;;  %v2686_v63 = vadd.f32 0.014752088, %v2685_v47 }
 0x21d   : > { %v3565_v17 = vpack.c.bf16 %v3509_v5, %v3505_v0  ;;  %v7368_v12 = vmin.f32 %v2710_v40, 16.0  ;;  %vm2538_vm5 = vweird.f32 %v7237_v34  ;;  %v2544_v22 = vand.u32 2147483648, %v7237_v34 }
 0x21e   : > { %v2672_v35 = vmul.f32 2.1237322e-06, %v7301_v19  ;;  %v1524_v61 = vadd.f32 0.001143296, %v1523_v8  ;;  %v7374_v33 = vmul.f32 %v2521_v18, %v7029_v60  ;;  %vm7378_vm6 = vmor %vm2538_vm5, %vm2539_vm4  ;;  %v2575_v24 = vsub.f32 1.0, %v2574_v6 }
 0x21f   : > { %4010 = vmatmul.bf16.gmra.mxu3 %v3565_v17  ;;  %v2633_v53 = vadd.f32 0.00028619796, %v2632_v4  ;;  %v7383_v47 = vadd.f32 %v729_v23, %v5610_v2  ;;  %v2506_v34 = vsel %vm7334_vm2, %v2505_v32, %v2501_v28  ;;  %v2541_v60 = vsel %vm7378_vm6, %v7298_v20, %v2537_v9 }
 0x220   : > { %v2560_v18 = vmul.f32 %v2559_v30, %v7116_v36  ;;  %v2598_v40 = vmul.f32 %v2597_v49, %v7120_v52  ;;  %v2615_v8 = vsub.f32 1.0, %v2614_v58  ;;  %v2649_v0 = vmul.f32 %v2648_v43, %v7276_v1 }
 0x221   : > { %v2687_v17 = vmul.f32 %v2686_v63, %v7301_v19  ;;  %v2723_v6 = vmul.f32 3.8918573e-05, %v7368_v12  ;;  %vm2543_vm7 = vcmp.eq.f32.partialorder %v2542_v31, 8.507059e+37  ;;  %v2545_v42 = vor.u32 1.1754944e-38, %v2544_v22 }
 0x222   : > { %v2673_v5 = vadd.f32 0.00028619796, %v2672_v35  ;;  %v1525_v56 = vmul.f32 %v1524_v61, %v9400_v26  ;;  %v7397_v32 = vmul.f32 %v2506_v34, %v7219_v27  ;;  %v2576_v20 = vmul.f32 %v7338_v50, %v2575_v24 }
 0x223   : > { %v2634_v36 = vmul.f32 %v2633_v53, %v7276_v1  ;;  %v7402_v30 = vmul.f32 0.70710677, %v7383_v47  ;;  %v2546_v43 = vsel %vm2543_vm7, %v2545_v42, %v2541_v60  ;;  %v2561_v9 = vadd.f32 1.1283791, %v2560_v18 }
 0x224   : > { %v2599_v63 = vadd.f32 0.18741608, %v2598_v40  ;;  %v2712_v28 = vmul.f32 2.1237322e-06, %v7368_v12  ;;  %v2616_v31 = vmul.f32 %v7344_v37, %v2615_v8  ;;  %v2650_v4 = vadd.f32 0.4994258, %v2649_v0 }
 0x225   : > { %v2688_v49 = vadd.f32 0.112945676, %v2687_v17  ;;  %v2724_v58 = vadd.f32 0.001143296, %v2723_v6  ;;  %vm2578_vm8 = vweird.f32 %v7303_v16  ;;  %v2582_v27 = vand.u32 2147483647, %v7303_v16 }
 0x226   : > { %v2674_v23 = vmul.f32 %v2673_v5, %v7301_v19  ;;  %v1526_v22 = vadd.f32 0.014752088, %v1525_v56  ;;  %v2577_v35 = vadd.f32 %v7338_v50, %v2576_v20  ;;  %vm2579_vm9 = vweird.f32 %v7338_v50 }
 0x227   : > { %v2635_v61 = vadd.f32 0.0036580483, %v2634_v36  ;;  %v2750_v45 = vmul.f32 %v7402_v30, %v7402_v30  ;;  %v2584_v24 = vand.u32 2147483648, %v7303_v16  ;;  %v2600_v53 = vmul.f32 %v2599_v63, %v7120_v52  ;;  %vm7422_vm11 = vmor %vm2578_vm8, %vm2579_vm9 }
 0x228   : > { %vm2619_vm10 = vweird.f32 %v7344_v37  ;;  %v2713_v34 = vadd.f32 0.00028619796, %v2712_v28  ;;  %v2617_v60 = vadd.f32 %v7344_v37, %v2616_v31  ;;  %v2651_v18 = vmul.f32 %v2650_v4, %v7276_v1 }
 0x229   : > { %v2689_v40 = vmul.f32 %v2688_v49, %v7301_v19  ;;  %v2725_v8 = vmul.f32 %v2724_v58, %v7368_v12  ;;  %vm2618_vm12 = vweird.f32 %v7305_v29  ;;  %v2624_v52 = vand.u32 2147483648, %v7305_v29 }
 0x22a   : > { %v2675_v17 = vadd.f32 0.0036580483, %v2674_v23  ;;  %v1527_v6 = vmul.f32 %v1526_v22, %v9400_v26  ;;  %v2581_v42 = vsel %vm7422_vm11, %v7338_v50, %v2577_v35  ;;  %v2622_v5 = vand.u32 2147483647, %v7305_v29  ;;  %vm7438_vm14 = vmor %vm2618_vm12, %vm2619_vm10 }
 0x22b   : > { %v2636_v56 = vmul.f32 %v2635_v61, %v7276_v1  ;;  %v7434_v16 = vmin.f32 %v2750_v45, 16.0  ;;  %vm2583_vm13 = vcmp.eq.f32.partialorder %v2582_v27, 8.507059e+37  ;;  %v2585_v20 = vor.u32 1.1754944e-38, %v2584_v24 }
 0x22c   : > { %v2601_v36 = vadd.f32 1.1283791, %v2600_v53  ;;  %v2714_v28 = vmul.f32 %v2713_v34, %v7368_v12  ;;  %v2621_v50 = vsel %vm7438_vm14, %v7344_v37, %v2617_v60  ;;  %v7446_v29 = vadd.f32 1.0, %v2651_v18 }
 0x22d   : > { %v2690_v31 = vadd.f32 0.4994258, %v2689_v40  ;;  %v2726_v4 = vadd.f32 0.014752088, %v2725_v8  ;;  %v2586_v49 = vsel %vm2583_vm13, %v2585_v20, %v2581_v42  ;;  %v2625_v58 = vor.u32 1.1754944e-38, %v2624_v52 }
 0x22e   : > { %v2676_v27 = vmul.f32 %v2675_v17, %v7301_v19  ;;  %v1528_v23 = vadd.f32 0.112945676, %v1527_v6  ;;  %v2562_v22 = vmul.f32 %v2561_v9, %v7089_v14  ;;  %vm2623_vm15 = vcmp.eq.f32.partialorder %v2622_v5, 8.507059e+37 }
 0x22f   : > { %v2637_v35 = vadd.f32 0.05243302, %v2636_v56  ;;  %v2752_v61 = vmul.f32 2.1237322e-06, %v7434_v16  ;;  %v2547_v45 = vmul.f32 %v2546_v43, %v7374_v33  ;;  %v2602_v24 = vmul.f32 %v2601_v36, %v7094_v55 }
 0x230   : > { %v2626_v37 = vsel %vm2623_vm15, %v2625_v58, %v2621_v50  ;;  %v2715_v53 = vadd.f32 0.0036580483, %v2714_v28  ;;  %v2587_v34 = vmul.f32 %v2586_v49, %v2562_v22  ;;  %5077 = vrcp.f32 %v7446_v29 }
 0x231   : > { %v2691_v60 = vmul.f32 %v2690_v31, %v7301_v19  ;;  %v2727_v18 = vmul.f32 %v2726_v4, %v7368_v12  ;;  %v7458_v14 = vmul.f32 %v7047_v15, %v6828_v38  ;;  %v4746_v9 = vclamps-f32 %v7397_v32, 1.0 }
 0x232   : > { %v2677_v40 = vadd.f32 0.05243302, %v2676_v27  ;;  %v1529_v33 = vmul.f32 %v1528_v23, %v9400_v26  ;;  %v9409_v55 = vclamps-f32 %v7111_v62, 1.0  ;;  %v2627_v8 = vmul.f32 %v2626_v37, %v2602_v24 }
 0x233   : > { %v2638_v0 = vmul.f32 %v2637_v35, %v7276_v1  ;;  %v2753_v52 = vadd.f32 0.00028619796, %v2752_v61  ;;  %v9410_v17 = vclamps-f32 %v7232_v25, 1.0  ;;  %v9411_v42 = vclamps-f32 %v7321_v39, 1.0 }
 0x234   : > { %v3467_v43 = vadd.f32 1.0, %v9409_v55  ;;  %v4747_v38 = vclamps-f32 %v2547_v45, 1.0  ;;  %v2716_v15 = vmul.f32 %v2715_v53, %v7368_v12  ;;  %v4748_v32 = vclamps-f32 %v2587_v34, 1.0 }
 0x235   : > { %v3468_v6 = vadd.f32 1.0, %v9410_v17  ;;  %v3469_v5 = vadd.f32 1.0, %v9411_v42  ;;  %v7470_v56 = vadd.f32 1.0, %v2691_v60  ;;  %v2728_v20 = vadd.f32 0.112945676, %v2727_v18 }
 0x236   : > { %v2763_v62 = vmul.f32 3.8918573e-05, %v7434_v16  ;;  %v3470_v36 = vadd.f32 1.0, %v4746_v9  ;;  %v783_v63 = vmul.f32 0.5, %v6970_v51  ;;  %v2678_v28 = vmul.f32 %v2677_v40, %v7301_v19  ;;  %v7475_v25 = vpop.eup %5077 }
 0x237   : > { %v1530_v50 = vadd.f32 0.4994258, %v1529_v33  ;;  %v7478_v39 = vmul.f32 %v3467_v43, %v6857_v21  ;;  %v4749_v31 = vclamps-f32 %v2627_v8, 1.0  ;;  %v2639_v4 = vadd.f32 0.18741608, %v2638_v0  ;;  %v585_v21 = vpop.f32.mrf.mxu0 }
 0x238   : > { %v2754_v49 = vmul.f32 %v2753_v52, %v7434_v16  ;;  %v7482_v58 = vmul.f32 %v3468_v6, %v6886_v46  ;;  %v7485_v27 = vmul.f32 %v3469_v5, %v6896_v41  ;;  %v3471_v23 = vadd.f32 1.0, %v4747_v38 }
 0x239   : > { %v2717_v51 = vadd.f32 0.05243302, %v2716_v15  ;;  %v3472_v22 = vadd.f32 1.0, %v4748_v32  ;;  %5079 = vrcp.f32 %v7470_v56  ;;  %v2729_v35 = vmul.f32 %v2728_v20, %v7368_v12 }
 0x23a   : > { %9412 = vst [vmem:[#allocation20_spill] sm:$0xff] %v7485_v27  ;;  %v2764_v61 = vadd.f32 0.001143296, %v2763_v62  ;;  %v7490_v45 = vmul.f32 %v3470_v36, %v6936_v54  ;;  %v2654_v24 = vmul.f32 %v7475_v25, %v7446_v29  ;;  %v2679_v46 = vadd.f32 0.18741608, %v2678_v28  ;;  %v9417_v28 = vld [vmem:[#allocation33_spill] sm:$0xff] }
 0x23b   : > { %v1531_v37 = vmul.f32 %v1530_v50, %v9400_v26  ;;  %v784_v41 = vmul.f32 0.5, %v7074_v3  ;;  %v3473_v53 = vadd.f32 1.0, %v4749_v31  ;;  %v2640_v34 = vmul.f32 %v2639_v4, %v7276_v1  ;;  %v9418_v31 = vld [vmem:[#allocation26_spill] sm:$0xff] }
 0x23c   : > { %9413 = vst [vmem:[#allocation13_spill] sm:$0xff] %v7490_v45  ;;  %v2755_v60 = vadd.f32 0.0036580483, %v2754_v49  ;;  %v7497_v18 = vmul.f32 %v3471_v23, %v783_v63  ;;  %v785_v9 = vmul.f32 0.5, %v7078_v7  ;;  %v2718_v40 = vmul.f32 %v2717_v51, %v7368_v12 }
 0x23d   : > { %v586_v54 = vadd.f32 %v585_v21, %v5595_v57  ;;  %v7502_v33 = vmul.f32 %v3472_v22, %v784_v41  ;;  %v7505_v55 = vmul.f32 0.5, %v7229_v10  ;;  %v2730_v26 = vadd.f32 0.4994258, %v2729_v35 }
 0x23e   : > { %9414 = vst [vmem:[#allocation21_spill] sm:$0xff] %v7497_v18  ;;  %v2765_v3 = vmul.f32 %v2764_v61, %v7434_v16  ;;  %v2655_v43 = vsub.f32 1.0, %v2654_v24  ;;  %v7509_v1 = vmul.f32 0.5, %v7261_v11  ;;  %v2680_v8 = vmul.f32 %v2679_v46, %v7301_v19  ;;  %v9472_v18 = vld [vmem:[#allocation68_spill] sm:$0xff] }
 0x23f   : > { %9415 = vst [vmem:[#allocation28_spill] sm:$0xff] %v7502_v33  ;;  %v7512_v0 = vadd.f32 1.0, %v1531_v37  ;;  %v7514_v7 = vpop.eup %5079  ;;  %v7516_v52 = vmul.f32 %v3473_v53, %v785_v9  ;;  %v2641_v17 = vadd.f32 1.1283791, %v2640_v34  ;;  %v7519_v6 = vmul.f32 0.5, %v7318_v13  ;;  %v634_v37 = vpop.f32.mrf.mxu1 }
 0x240   : > { %v2756_v10 = vmul.f32 %v2755_v60, %v7434_v16  ;;  %v2719_v42 = vadd.f32 0.18741608, %v2718_v40  ;;  %v7523_v5 = vmul.f32 0.5, %v7383_v47  ;;  %v7525_v11 = vmul.f32 0.5, %v586_v54 }
 0x241   : > { %9416 = vst [vmem:[#allocation44_spill] sm:$0xff] %v7516_v52  ;;  %v7527_v38 = vmul.f32 0.70710677, %v586_v54  ;;  %v2662_v19 = vand.u32 2147483647, %v7446_v29  ;;  %v2664_v15 = vand.u32 2147483648, %v7446_v29  ;;  %v2731_v32 = vmul.f32 %v2730_v26, %v7368_v12 }
 0x242   : > { %v2766_v20 = vadd.f32 0.014752088, %v2765_v3  ;;  %v2656_v13 = vmul.f32 %v7475_v25, %v2655_v43  ;;  %v2681_v62 = vadd.f32 1.1283791, %v2680_v8  ;;  %v2694_v36 = vmul.f32 %v7514_v7, %v7470_v56 }
 0x243   : > { %5081 = vrcp.f32 %v7512_v0  ;;  %v2642_v47 = vmul.f32 %v2641_v17, %v7251_v48  ;;  %v2757_v63 = vadd.f32 0.05243302, %v2756_v10  ;;  %v1683_v50 = vmul.f32 3.8918573e-05, %v9417_v28 }
 0x244   : > { %v1563_v4 = vmul.f32 3.8918573e-05, %v9418_v31  ;;  %vm2658_vm0 = vweird.f32 %v7446_v29  ;;  %v2704_v49 = vand.u32 2147483648, %v7470_v56  ;;  %v2720_v23 = vmul.f32 %v2719_v42, %v7368_v12 }
 0x245   : > { %v2790_v51 = vmul.f32 %v7527_v38, %v7527_v38  ;;  %v7544_v22 = vadd.f32 1.0, %v2731_v32  ;;  %v2767_v35 = vmul.f32 %v2766_v20, %v7434_v16  ;;  %v1684_v61 = vadd.f32 0.001143296, %v1683_v50  ;;  %v9423_v20 = vld [vmem:[#allocation35_spill] sm:$0xff] }
 0x246   : > { %v1564_v48 = vadd.f32 0.001143296, %v1563_v4  ;;  %v2657_v21 = vadd.f32 %v7475_v25, %v2656_v13  ;;  %vm2659_vm1 = vweird.f32 %v7475_v25  ;;  %vm7549_vm2 = vcmp.eq.f32.partialorder %v2662_v19, 8.507059e+37  ;;  %v9424_v50 = vld [vmem:[#allocation27_spill] sm:$0xff] }
 0x247   : > { %v2695_v46 = vsub.f32 1.0, %v2694_v36  ;;  %v2665_v12 = vor.u32 1.1754944e-38, %v2664_v15  ;;  %v7554_v41 = vmul.f32 %v2681_v62, %v7279_v44  ;;  %v2702_v53 = vand.u32 2147483647, %v7470_v56  ;;  %vm7567_vm4 = vmor %vm2658_vm0, %vm2659_vm1 }
 0x248   : > { %v2758_v34 = vmul.f32 %v2757_v63, %v7434_v16  ;;  %vm2698_vm3 = vweird.f32 %v7470_v56  ;;  %v2705_v9 = vor.u32 1.1754944e-38, %v2704_v49  ;;  %v7561_v40 = vmin.f32 %v2790_v51, 16.0 }
 0x249   : > { %v7558_v60 = vpop.eup %5081  ;;  %v1685_v54 = vmul.f32 %v1684_v61, %v9417_v28  ;;  %v1565_v26 = vmul.f32 %v1564_v48, %v9418_v31  ;;  %v2721_v3 = vadd.f32 1.1283791, %v2720_v23  ;;  %5083 = vrcp.f32 %v7544_v22  ;;  %v9427_v23 = vld [vmem:[#allocation8_spill] sm:$0xff] }
 0x24a   : > { %v2768_v43 = vadd.f32 0.112945676, %v2767_v35  ;;  %v635_v8 = vadd.f32 %v634_v37, %v5597_v59  ;;  %v2661_v17 = vsel %vm7567_vm4, %v7475_v25, %v2657_v21  ;;  %v2696_v10 = vmul.f32 %v7514_v7, %v2695_v46 }
 0x24b   : > { %v1686_v42 = vadd.f32 0.014752088, %v1685_v54  ;;  %v1566_v19 = vadd.f32 0.014752088, %v1565_v26  ;;  %v2759_v15 = vadd.f32 0.18741608, %v2758_v34  ;;  %v1534_v32 = vmul.f32 %v7558_v60, %v7512_v0 }
 0x24c   : > { %v7577_v29 = vmul.f32 0.5, %v635_v8  ;;  %v1723_v13 = vmul.f32 3.8918573e-05, %v9423_v20  ;;  %v2792_v62 = vmul.f32 2.1237322e-06, %v7561_v40  ;;  %v2666_v4 = vsel %vm7549_vm2, %v2665_v12, %v2661_v17 }
 0x24d   : > { %v1687_v36 = vmul.f32 %v1686_v42, %v9417_v28  ;;  %v1567_v63 = vmul.f32 %v1566_v19, %v9418_v31  ;;  %v1603_v25 = vmul.f32 3.8918573e-05, %v9424_v50  ;;  %vm2699_vm5 = vweird.f32 %v7514_v7 }
 0x24e   : > { %vm7589_vm6 = vcmp.eq.f32.partialorder %v2702_v53, 8.507059e+37  ;;  %v7594_v51 = vmul.f32 %v2721_v3, %v9427_v23  ;;  %v2769_v35 = vmul.f32 %v2768_v43, %v7434_v16  ;;  %v2697_v61 = vadd.f32 %v7514_v7, %v2696_v10  ;;  %vm7609_vm7 = vmor %vm2698_vm3, %vm2699_vm5 }
 0x24f   : > { %v2803_v48 = vmul.f32 3.8918573e-05, %v7561_v40  ;;  %v1688_v21 = vadd.f32 0.112945676, %v1687_v36  ;;  %v1568_v46 = vadd.f32 0.112945676, %v1567_v63  ;;  %v7599_v37 = vpop.eup %5083  ;;  %v2667_v54 = vmul.f32 %v2666_v4, %v2642_v47 }
 0x250   : > { %v2744_v24 = vand.u32 2147483648, %v7544_v22  ;;  %v1535_v12 = vsub.f32 1.0, %v1534_v32  ;;  %v1724_v53 = vadd.f32 0.001143296, %v1723_v13  ;;  %v1604_v34 = vadd.f32 0.001143296, %v1603_v25 }
 0x251   : > { %v2760_v26 = vmul.f32 %v2759_v15, %v7434_v16  ;;  %v2793_v44 = vadd.f32 0.00028619796, %v2792_v62  ;;  %v7603_v3 = vmul.f32 0.70710677, %v635_v8  ;;  %v2770_v17 = vadd.f32 0.4994258, %v2769_v35 }
 0x252   : > { %v1689_v10 = vmul.f32 %v1688_v21, %v9417_v28  ;;  %v1569_v42 = vmul.f32 %v1568_v46, %v9418_v31  ;;  %v1725_v47 = vmul.f32 %v1724_v53, %v9423_v20  ;;  %v2701_v8 = vsel %vm7609_vm7, %v7514_v7, %v2697_v61 }
 0x253   : > { %v2734_v19 = vmul.f32 %v7599_v37, %v7544_v22  ;;  %v2804_v15 = vadd.f32 0.001143296, %v2803_v48  ;;  %v1605_v56 = vmul.f32 %v1604_v34, %v9424_v50  ;;  %v1536_v32 = vmul.f32 %v7558_v60, %v1535_v12 }
 0x254   : > { %v1690_v13 = vadd.f32 0.4994258, %v1689_v10  ;;  %v1570_v62 = vadd.f32 0.4994258, %v1569_v42  ;;  %v1726_v36 = vadd.f32 0.014752088, %v1725_v47  ;;  %v2794_v4 = vmul.f32 %v2793_v44, %v7561_v40 }
 0x255   : > { %v4750_v63 = vclamps-f32 %v2667_v54, 1.0  ;;  %v2761_v25 = vadd.f32 1.1283791, %v2760_v26  ;;  %v1606_v23 = vadd.f32 0.014752088, %v1605_v56  ;;  %v2771_v35 = vmul.f32 %v2770_v17, %v7434_v16 }
 0x256   : > { %v1691_v7 = vmul.f32 %v1690_v13, %v9417_v28  ;;  %v1571_v61 = vmul.f32 %v1570_v62, %v9418_v31  ;;  %v1727_v48 = vmul.f32 %v1726_v36, %v9423_v20  ;;  %v2706_v21 = vsel %vm7589_vm6, %v2705_v9, %v2701_v8 }
 0x257   : > { %v2735_v46 = vsub.f32 1.0, %v2734_v19  ;;  %v2805_v12 = vmul.f32 %v2804_v15, %v7561_v40  ;;  %v1607_v53 = vmul.f32 %v1606_v23, %v9424_v50  ;;  %v2830_v34 = vmul.f32 %v7603_v3, %v7603_v3 }
 0x258   : > { %v1537_v54 = vadd.f32 %v7558_v60, %v1536_v32  ;;  %vm1539_vm8 = vweird.f32 %v7558_v60  ;;  %v7636_v16 = vadd.f32 1.0, %v1691_v7  ;;  %v1544_v28 = vand.u32 2147483648, %v7512_v0 }
 0x259   : > { %v7639_v31 = vadd.f32 1.0, %v1571_v61  ;;  %v1728_v49 = vadd.f32 0.112945676, %v1727_v48  ;;  %v1608_v9 = vadd.f32 0.112945676, %v1607_v53  ;;  %v3474_v26 = vadd.f32 1.0, %v4750_v63 }
 0x25a   : > { %vm1538_vm9 = vweird.f32 %v7512_v0  ;;  %v1542_v44 = vand.u32 2147483647, %v7512_v0  ;;  %5085 = vrcp.f32 %v7636_v16  ;;  %v7645_v43 = vmul.f32 %v2706_v21, %v7554_v41  ;;  %v9432_v53 = vld [vmem:[#allocation19_spill] sm:$0xff] }
 0x25b   : > { %v2795_v10 = vadd.f32 0.0036580483, %v2794_v4  ;;  %vm1540_vm10 = vmor %vm1538_vm9, %vm1539_vm8  ;;  %5087 = vrcp.f32 %v7639_v31  ;;  %v2736_v42 = vmul.f32 %v7599_v37, %v2735_v46  ;;  %v7650_v47 = vadd.f32 1.0, %v2771_v35 }
 0x25c   : > { %v2806_v8 = vadd.f32 0.014752088, %v2805_v12  ;;  %v1541_v19 = vsel %vm1540_vm10, %v7558_v60, %v1537_v54  ;;  %v7653_v15 = vmin.f32 %v2830_v34, 16.0  ;;  %v1545_v0 = vor.u32 1.1754944e-38, %v1544_v28  ;;  %v9431_v60 = vld [vmem:[#allocation41_spill] sm:$0xff] }
 0x25d   : > { %v1729_v56 = vmul.f32 %v1728_v49, %v9423_v20  ;;  %v1609_v41 = vmul.f32 %v1608_v9, %v9424_v50  ;;  %v7658_v32 = vmul.f32 %v3474_v26, %v7505_v55  ;;  %v7660_v13 = vor.u32 1.1754944e-38, %v2744_v24  ;;  %v9433_v28 = vld [vmem:[#allocation5_spill] sm:$0xff] }
 0x25e   : > { %v7663_v62 = vmul.f32 %v2761_v25, %v7402_v30  ;;  %vm1543_vm11 = vcmp.eq.f32.partialorder %v1542_v44, 8.507059e+37  ;;  %v1763_v23 = vmul.f32 3.8918573e-05, %v9431_v60  ;;  %v7668_v61 = vadd.f32 %v7599_v37, %v2736_v42  ;;  %v683_v30 = vpop.f32.mrf.mxu2 }
 0x25f   : > { %9430 = vst [vmem:[#allocation10_spill] sm:$0xff] %v7658_v32  ;;  %v1546_v36 = vsel %vm1543_vm11, %v1545_v0, %v1541_v19  ;;  %v1730_v63 = vadd.f32 0.4994258, %v1729_v56  ;;  %v1610_v4 = vadd.f32 0.4994258, %v1609_v41  ;;  %vm2739_vm12 = vweird.f32 %v7599_v37  ;;  %v9434_v19 = vld [vmem:[#allocation30_spill] sm:$0xff] }
 0x260   : > { %v5086_v35 = vpop.eup %5085  ;;  %5089 = vrcp.f32 %v7650_v47  ;;  %v7673_v55 = vmul.f32 %v2795_v10, %v7561_v40  ;;  %v2807_v25 = vmul.f32 %v2806_v8, %v7561_v40  ;;  %v2832_v48 = vmul.f32 2.1237322e-06, %v7653_v15 }
 0x261   : > { %v5088_v24 = vpop.eup %5087  ;;  %v1694_v21 = vmul.f32 %v5086_v35, %v7636_v16  ;;  %v1731_v46 = vmul.f32 %v1730_v63, %v9423_v20  ;;  %vm2738_vm13 = vweird.f32 %v7544_v22  ;;  %v2843_v12 = vmul.f32 3.8918573e-05, %v7653_v15 }
 0x262   : > { %v1547_v34 = vmul.f32 %v1546_v36, %v9432_v53  ;;  %v1574_v54 = vmul.f32 %v5088_v24, %v7639_v31  ;;  %v7684_v49 = vadd.f32 %v683_v30, %v9433_v28  ;;  %v1611_v44 = vmul.f32 %v1610_v4, %v9424_v50  ;;  %vm7720_vm5 = vmor %vm2738_vm13, %vm2739_vm12 }
 0x263   : > { %v1695_v9 = vsub.f32 1.0, %v1694_v21  ;;  %v7686_v26 = vadd.f32 1.0, %v1731_v46  ;;  %v1764_v10 = vadd.f32 0.001143296, %v1763_v23  ;;  %v1704_v42 = vand.u32 2147483648, %v7636_v16 }
 0x264   : > { %v1575_v20 = vsub.f32 1.0, %v1574_v54  ;;  %v7691_v8 = vmul.f32 0.70710677, %v7684_v49  ;;  %v1643_v0 = vmul.f32 3.8918573e-05, %v9434_v19  ;;  %vm1699_vm14 = vweird.f32 %v5086_v35 }
 0x265   : > { %v1696_v56 = vmul.f32 %v5086_v35, %v1695_v9  ;;  %v1702_v41 = vand.u32 2147483647, %v7636_v16  ;;  %5091 = vrcp.f32 %v7686_v26  ;;  %vm1579_vm15 = vweird.f32 %v5088_v24  ;;  %v732_v9 = vpop.f32.mrf.mxu3 }
 0x266   : > { %v7696_v36 = vpop.eup %5089  ;;  %v1576_v63 = vmul.f32 %v5088_v24, %v1575_v20  ;;  %v1584_v50 = vand.u32 2147483648, %v7639_v31  ;;  %v2870_v4 = vmul.f32 %v7691_v8, %v7691_v8  ;;  %vm1698_vm0 = vweird.f32 %v7636_v16 }
 0x267   : > { %v1697_v23 = vadd.f32 %v5086_v35, %v1696_v56  ;;  %v7702_v30 = vadd.f32 1.0, %v1611_v44  ;;  %v1765_v21 = vmul.f32 %v1764_v10, %v9431_v60  ;;  %vm1700_vm1 = vmor %vm1698_vm0, %vm1699_vm14  ;;  %v1705_v46 = vor.u32 1.1754944e-38, %v1704_v42 }
 0x268   : > { %v1577_v53 = vadd.f32 %v5088_v24, %v1576_v63  ;;  %vm1578_vm2 = vweird.f32 %v7639_v31  ;;  %v1582_v54 = vand.u32 2147483647, %v7639_v31  ;;  %v4722_v20 = vclamps-f32 %v1547_v34, 1.0  ;;  %v9444_v31 = vld [vmem:[#allocation23_spill] sm:$0xff] }
 0x269   : > { %v1701_v7 = vsel %vm1700_vm1, %v5086_v35, %v1697_v23  ;;  %vm1703_vm3 = vcmp.eq.f32.partialorder %v1702_v41, 8.507059e+37  ;;  %vm7708_vm4 = vmor %vm1578_vm2, %vm1579_vm15  ;;  %v1644_v16 = vadd.f32 0.001143296, %v1643_v0  ;;  %v1585_v42 = vor.u32 1.1754944e-38, %v1584_v50  ;;  %v9439_v35 = vld [vmem:[#allocation9_spill] sm:$0xff] }
 0x26a   : > { %v1706_v44 = vsel %vm1703_vm3, %v1705_v46, %v1701_v7  ;;  %v1581_v10 = vsel %vm7708_vm4, %v5088_v24, %v1577_v53  ;;  %v7714_v63 = vmin.f32 %v2870_v4, 16.0  ;;  %v7726_v0 = vadd.f32 %v732_v9, %v5610_v2 }
 0x26b   : > { %v5092_v17 = vpop.eup %5091  ;;  %v1707_v34 = vmul.f32 %v1706_v44, %v9439_v35  ;;  %5093 = vrcp.f32 %v7702_v30  ;;  %v1766_v7 = vadd.f32 0.014752088, %v1765_v21  ;;  %v2741_v24 = vsel %vm7720_vm5, %v7599_v37, %v7668_v61 }
 0x26c   : > { %9440 = vst [vmem:[#allocation18_spill] sm:$0xff] %v7726_v0  ;;  %v2808_v41 = vadd.f32 0.112945676, %v2807_v25  ;;  %vm1583_vm6 = vcmp.eq.f32.partialorder %v1582_v54, 8.507059e+37  ;;  %v1734_v50 = vmul.f32 %v5092_v17, %v7686_v26  ;;  %v9441_v4 = vand.u32 2147483647, %v7544_v22 }
 0x26d   : > { %v2844_v46 = vadd.f32 0.001143296, %v2843_v12  ;;  %v4726_v53 = vclamps-f32 %v1707_v34, 1.0  ;;  %v3446_v9 = vadd.f32 1.0, %v4722_v20  ;;  %v1586_v56 = vsel %vm1583_vm6, %v1585_v42, %v1581_v10  ;;  %v9445_v42 = vld [vmem:[#allocation38_spill] sm:$0xff] }
 0x26e   : > { %vm7736_vm7 = vcmp.eq.f32.partialorder %v9441_v4, 8.507059e+37  ;;  %v2833_v21 = vadd.f32 0.00028619796, %v2832_v48  ;;  %v1735_v44 = vsub.f32 1.0, %v1734_v50  ;;  %v2883_v35 = vmul.f32 3.8918573e-05, %v7714_v63 }
 0x26f   : > { %v1645_v37 = vmul.f32 %v1644_v16, %v9434_v19  ;;  %v3450_v61 = vadd.f32 1.0, %v4726_v53  ;;  %v1744_v25 = vand.u32 2147483648, %v7686_v26  ;;  %v7744_v54 = vmul.f32 0.70710677, %v7726_v0  ;;  %v9446_v50 = vld [vmem:[#allocation48_spill] sm:$0xff] }
 0x270   : > { %v1767_v22 = vmul.f32 %v1766_v7, %v9431_v60  ;;  %v1587_v4 = vmul.f32 %v1586_v56, %v9444_v31  ;;  %v1736_v12 = vmul.f32 %v5092_v17, %v1735_v44  ;;  %vm1739_vm8 = vweird.f32 %v5092_v17 }
 0x271   : > { %v1742_v20 = vand.u32 2147483647, %v7686_v26  ;;  %v7749_v48 = vpop.eup %5093  ;;  %v2809_v10 = vmul.f32 %v2808_v41, %v7561_v40  ;;  %v2845_v16 = vmul.f32 %v2844_v46, %v7653_v15  ;;  %v3510_v34 = vmul.f32 %v3446_v9, %v9445_v42 }
 0x272   : > { %v3514_v53 = vmul.f32 %v3450_v61, %v9446_v50  ;;  %v1737_v0 = vadd.f32 %v5092_v17, %v1736_v12  ;;  %vm1738_vm9 = vweird.f32 %v7686_v26  ;;  %v2884_v7 = vadd.f32 0.001143296, %v2883_v35 }
 0x273   : > { %v1646_v52 = vadd.f32 0.014752088, %v1645_v37  ;;  %vm1740_vm10 = vmor %vm1738_vm9, %vm1739_vm8  ;;  %v1745_v44 = vor.u32 1.1754944e-38, %v1744_v25  ;;  %v2910_v31 = vmul.f32 %v7744_v54, %v7744_v54  ;;  %v1768_v27 = vadd.f32 0.112945676, %v1767_v22  ;;  %v9447_v22 = vld [vmem:[#allocation31_spill] sm:$0xff] }
 0x274   : > { %v3566_v56 = vpack.c.bf16 %v3514_v53, %v3510_v34  ;;  %v4723_v33 = vclamps-f32 %v1587_v4, 1.0  ;;  %v1741_v41 = vsel %vm1740_vm10, %v5092_v17, %v1737_v0  ;;  %vm1743_vm11 = vcmp.eq.f32.partialorder %v1742_v20, 8.507059e+37 }
 0x275   : > { %v1614_v46 = vmul.f32 %v7749_v48, %v7702_v30  ;;  %v2774_v9 = vmul.f32 %v7696_v36, %v7650_v47  ;;  %v2797_v26 = vadd.f32 0.05243302, %v7673_v55  ;;  %v2846_v35 = vadd.f32 0.014752088, %v2845_v16 }
 0x276   : > { %3868 = vmatmul.bf16.gmra.mxu0 %v3566_v56  ;;  %v1746_v37 = vsel %vm1743_vm11, %v1745_v44, %v1741_v41  ;;  %v2746_v61 = vsel %vm7736_vm7, %v7660_v13, %v2741_v24  ;;  %v2782_v25 = vand.u32 2147483647, %v7650_v47  ;;  %v2885_v0 = vmul.f32 %v2884_v7, %v7714_v63 }
 0x277   : > { %v1747_v17 = vmul.f32 %v1746_v37, %v9447_v22  ;;  %v2810_v4 = vadd.f32 0.4994258, %v2809_v10  ;;  %v2834_v12 = vmul.f32 %v2833_v21, %v7653_v15  ;;  %v7770_v20 = vmin.f32 %v2910_v31, 16.0  ;;  %v9448_v31 = vld [vmem:[#allocation39_spill] sm:$0xff] }
 0x278   : > { %v1769_v55 = vmul.f32 %v1768_v27, %v9431_v60  ;;  %v3447_v42 = vadd.f32 1.0, %v4723_v33  ;;  %v1615_v34 = vsub.f32 1.0, %v1614_v46  ;;  %v1647_v50 = vmul.f32 %v1646_v52, %v9434_v19  ;;  %v9449_v46 = vld [vmem:[#allocation49_spill] sm:$0xff] }
 0x279   : > { %v4727_v16 = vclamps-f32 %v1747_v17, 1.0  ;;  %v2775_v23 = vsub.f32 1.0, %v2774_v9  ;;  %v2784_v13 = vand.u32 2147483648, %v7650_v47  ;;  %v2798_v24 = vmul.f32 %v2797_v26, %v7561_v40 }
 0x27a   : > { %v2847_v53 = vmul.f32 %v2846_v35, %v7653_v15  ;;  %v2747_v10 = vmul.f32 %v2746_v61, %v7594_v51  ;;  %v2886_v21 = vadd.f32 0.014752088, %v2885_v0  ;;  %v1770_v56 = vadd.f32 0.4994258, %v1769_v55 }
 0x27b   : > { %v3451_v7 = vadd.f32 1.0, %v4727_v16  ;;  %vm2778_vm12 = vweird.f32 %v7650_v47  ;;  %v2811_v27 = vmul.f32 %v2810_v4, %v7561_v40  ;;  %v2835_v33 = vadd.f32 0.0036580483, %v2834_v12 }
 0x27c   : > { %v2923_v44 = vmul.f32 3.8918573e-05, %v7770_v20  ;;  %v1648_v52 = vadd.f32 0.112945676, %v1647_v50  ;;  %v3511_v41 = vmul.f32 %v3447_v42, %v9448_v31  ;;  %v1616_v26 = vmul.f32 %v7749_v48, %v1615_v34  ;;  %v9453_v34 = vld [vmem:[#allocation43_spill] sm:$0xff] }
 0x27d   : > { %v3515_v9 = vmul.f32 %v3451_v7, %v9449_v46  ;;  %v1771_v35 = vmul.f32 %v1770_v56, %v9431_v60  ;;  %v9450_v51 = vclamps-f32 %v7645_v43, 1.0  ;;  %v2776_v61 = vmul.f32 %v7696_v36, %v2775_v23 }
 0x27e   : > { %v2799_v22 = vadd.f32 0.18741608, %v2798_v24  ;;  %v2848_v17 = vadd.f32 0.112945676, %v2847_v53  ;;  %v2887_v4 = vmul.f32 %v2886_v21, %v7714_v63  ;;  %v1649_v55 = vmul.f32 %v1648_v52, %v9434_v19 }
 0x27f   : > { %v3475_v37 = vadd.f32 1.0, %v9450_v51  ;;  %v3567_v0 = vpack.c.bf16 %v3515_v9, %v3511_v41  ;;  %v7789_v12 = vadd.f32 1.0, %v1771_v35  ;;  %v4752_v16 = vclamps-f32 %v2747_v10, 1.0 }
 0x280   : > { %vm7792_vm13 = vcmp.eq.f32.partialorder %v2782_v25, 8.507059e+37  ;;  %v7796_v60 = vadd.f32 1.0, %v2811_v27  ;;  %v2836_v43 = vmul.f32 %v2835_v33, %v7653_v15  ;;  %v1803_v50 = vmul.f32 3.8918573e-05, %v9453_v34 }
 0x281   : > { %3917 = vmatmul.bf16.gmra.mxu1 %v3567_v0  ;;  %v2924_v23 = vadd.f32 0.001143296, %v2923_v44  ;;  %v1617_v24 = vadd.f32 %v7749_v48, %v1616_v26  ;;  %vm1619_vm14 = vweird.f32 %v7749_v48  ;;  %5095 = vrcp.f32 %v7789_v12 }
 0x282   : > { %v2777_v53 = vadd.f32 %v7696_v36, %v2776_v61  ;;  %vm2779_vm15 = vweird.f32 %v7696_v36  ;;  %v2849_v25 = vmul.f32 %v2848_v17, %v7653_v15  ;;  %v1624_v10 = vand.u32 2147483648, %v7702_v30 }
 0x283   : > { %v2888_v7 = vadd.f32 0.112945676, %v2887_v4  ;;  %vm1618_vm0 = vweird.f32 %v7702_v30  ;;  %v1622_v21 = vand.u32 2147483647, %v7702_v30  ;;  %v1650_v56 = vadd.f32 0.4994258, %v1649_v55  ;;  %vm7816_vm2 = vmor %vm2778_vm12, %vm2779_vm15 }
 0x284   : > { %v3476_v27 = vadd.f32 1.0, %v4752_v16  ;;  %v2800_v33 = vmul.f32 %v2799_v22, %v7561_v40  ;;  %v2837_v44 = vadd.f32 0.05243302, %v2836_v43  ;;  %vm7810_vm1 = vmor %vm1618_vm0, %vm1619_vm14  ;;  %v1804_v31 = vadd.f32 0.001143296, %v1803_v50 }
 0x285   : > { %5097 = vrcp.f32 %v7796_v60  ;;  %v2925_v30 = vmul.f32 %v2924_v23, %v7770_v20  ;;  %v1621_v40 = vsel %vm7810_vm1, %v7749_v48, %v1617_v24  ;;  %v1651_v46 = vmul.f32 %v1650_v56, %v9434_v19  ;;  %v9460_v24 = vld [vmem:[#allocation24_spill] sm:$0xff] }
 0x286   : > { %v2781_v9 = vsel %vm7816_vm2, %v7696_v36, %v2777_v53  ;;  %v2850_v26 = vadd.f32 0.4994258, %v2849_v25  ;;  %v1625_v47 = vor.u32 1.1754944e-38, %v1624_v10  ;;  %v1805_v35 = vmul.f32 %v1804_v31, %v9453_v34 }
 0x287   : > { %v5096_v51 = vpop.eup %5095  ;;  %v7831_v61 = vmul.f32 %v3475_v37, %v7509_v1  ;;  %v2785_v22 = vor.u32 1.1754944e-38, %v2784_v13  ;;  %v2889_v17 = vmul.f32 %v2888_v7, %v7714_v63  ;;  %vm1623_vm3 = vcmp.eq.f32.partialorder %v1622_v21, 8.507059e+37 }
 0x288   : > { %v7835_v48 = vmul.f32 %v3476_v27, %v7519_v6  ;;  %v2801_v19 = vadd.f32 1.1283791, %v2800_v33  ;;  %v1626_v0 = vsel %vm1623_vm3, %v1625_v47, %v1621_v40  ;;  %v1774_v4 = vmul.f32 %v5096_v51, %v7789_v12 }
 0x289   : > { %9458 = vst [vmem:[#allocation16_spill] sm:$0xff] %v7831_v61  ;;  %v2786_v36 = vsel %vm7792_vm13, %v2785_v22, %v2781_v9  ;;  %v2926_v55 = vadd.f32 0.014752088, %v2925_v30  ;;  %v7840_v16 = vadd.f32 1.0, %v1651_v46  ;;  %v1806_v43 = vadd.f32 0.014752088, %v1805_v35 }
 0x28a   : > { %9459 = vst [vmem:[#allocation34_spill] sm:$0xff] %v7835_v48  ;;  %v2838_v1 = vmul.f32 %v2837_v44, %v7653_v15  ;;  %v2851_v13 = vmul.f32 %v2850_v26, %v7653_v15  ;;  %v2872_v37 = vmul.f32 2.1237322e-06, %v7714_v63  ;;  %v1775_v50 = vsub.f32 1.0, %v1774_v4 }
 0x28b   : > { %v7845_v6 = vpop.eup %5097  ;;  %v2890_v23 = vadd.f32 0.4994258, %v2889_v17  ;;  %v1627_v53 = vmul.f32 %v1626_v0, %v9460_v24  ;;  %v1784_v25 = vand.u32 2147483648, %v7789_v12  ;;  %5099 = vrcp.f32 %v7840_v16  ;;  %v9461_v0 = vld [vmem:[#allocation67_spill] sm:$0xff] }
 0x28c   : > { %v1776_v42 = vmul.f32 %v5096_v51, %v1775_v50  ;;  %vm1779_vm4 = vweird.f32 %v5096_v51  ;;  %v1782_v10 = vand.u32 2147483647, %v7789_v12  ;;  %v1807_v7 = vmul.f32 %v1806_v43, %v9453_v34 }
 0x28d   : > { %v2787_v21 = vmul.f32 %v2786_v36, %v7663_v62  ;;  %v7854_v56 = vmul.f32 %v2801_v19, %v7527_v38  ;;  %v2822_v27 = vand.u32 2147483647, %v7796_v60  ;;  %v2927_v33 = vmul.f32 %v2926_v55, %v7770_v20 }
 0x28e   : > { %v2814_v44 = vmul.f32 %v7845_v6, %v7796_v60  ;;  %v2839_v52 = vadd.f32 0.18741608, %v2838_v1  ;;  %v1777_v31 = vadd.f32 %v5096_v51, %v1776_v42  ;;  %vm1778_vm5 = vweird.f32 %v7789_v12 }
 0x28f   : > { %v7861_v41 = vadd.f32 1.0, %v2851_v13  ;;  %v2873_v30 = vadd.f32 0.00028619796, %v2872_v37  ;;  %vm1780_vm6 = vmor %vm1778_vm5, %vm1779_vm4  ;;  %v1785_v40 = vor.u32 1.1754944e-38, %v1784_v25  ;;  %v1808_v62 = vadd.f32 0.112945676, %v1807_v7 }
 0x290   : > { %v2891_v38 = vmul.f32 %v2890_v23, %v7714_v63  ;;  %v4724_v46 = vclamps-f32 %v1627_v53, 1.0  ;;  %v1781_v9 = vsel %vm1780_vm6, %v5096_v51, %v1777_v31  ;;  %vm1783_vm7 = vcmp.eq.f32.partialorder %v1782_v10, 8.507059e+37  ;;  %v587_v23 = vpop.f32.mrf.mxu0 }
 0x291   : > { %v7864_v26 = vpop.eup %5099  ;;  %v2824_v47 = vand.u32 2147483648, %v7796_v60  ;;  %v2928_v35 = vadd.f32 0.112945676, %v2927_v33  ;;  %v1786_v22 = vsel %vm1783_vm7, %v1785_v40, %v1781_v9  ;;  %v1809_v17 = vmul.f32 %v1808_v62, %v9453_v34 }
 0x292   : > { %v4753_v12 = vclamps-f32 %v2787_v21, 1.0  ;;  %v2840_v19 = vmul.f32 %v2839_v52, %v7653_v15  ;;  %v1787_v4 = vmul.f32 %v1786_v22, %v9461_v0  ;;  %v1654_v36 = vmul.f32 %v7864_v26, %v7840_v16 }
 0x293   : > { %v2815_v55 = vsub.f32 1.0, %v2814_v44  ;;  %5101 = vrcp.f32 %v7861_v41  ;;  %v2874_v51 = vmul.f32 %v2873_v30, %v7714_v63  ;;  %v1810_v43 = vadd.f32 0.4994258, %v1809_v17  ;;  %v9463_v30 = vld [vmem:[#allocation52_spill] sm:$0xff] }
 0x294   : > { %v7874_v1 = vadd.f32 1.0, %v2891_v38  ;;  %v4728_v13 = vclamps-f32 %v1787_v4, 1.0  ;;  %v3448_v37 = vadd.f32 1.0, %v4724_v46  ;;  %v1655_v50 = vsub.f32 1.0, %v1654_v36  ;;  %v636_v38 = vpop.f32.mrf.mxu1 }
 0x295   : > { %v2912_v24 = vmul.f32 2.1237322e-06, %v7770_v20  ;;  %v2929_v15 = vmul.f32 %v2928_v35, %v7770_v20  ;;  %v1811_v53 = vmul.f32 %v1810_v43, %v9453_v34  ;;  %v7880_v25 = vadd.f32 %v587_v23, %v5595_v57  ;;  %v9462_v34 = vld [vmem:[#allocation40_spill] sm:$0xff] }
 0x296   : > { %v7882_v42 = vadd.f32 1.0, %v4753_v12  ;;  %vm2818_vm8 = vweird.f32 %v7796_v60  ;;  %v7885_v10 = vor.u32 1.1754944e-38, %v2824_v47  ;;  %v3452_v7 = vadd.f32 1.0, %v4728_v13  ;;  %v685_v13 = vpop.f32.mrf.mxu2  ;;  %v9470_v60 = vld [vmem:[#allocation58_spill] sm:$0xff] }
 0x297   : > { %v1656_v21 = vmul.f32 %v7864_v26, %v1655_v50  ;;  %v2816_v33 = vmul.f32 %v7845_v6, %v2815_v55  ;;  %vm2819_vm9 = vweird.f32 %v7845_v6  ;;  %v2841_v44 = vadd.f32 1.1283791, %v2840_v19 }
 0x298   : > { %v7890_v52 = vadd.f32 1.0, %v1811_v53  ;;  %5103 = vrcp.f32 %v7874_v1  ;;  %v3512_v31 = vmul.f32 %v3448_v37, %v9462_v34  ;;  %v3516_v40 = vmul.f32 %v3452_v7, %v9463_v30  ;;  %vm7945_vm13 = vmor %vm2818_vm8, %vm2819_vm9 }
 0x299   : > { %v7896_v62 = vmul.f32 0.70710677, %v7880_v25  ;;  %v7898_v46 = vpop.eup %5101  ;;  %v2875_v9 = vadd.f32 0.0036580483, %v2874_v51  ;;  %v2913_v47 = vadd.f32 0.00028619796, %v2912_v24  ;;  %v1657_v17 = vadd.f32 %v7864_v26, %v1656_v21 }
 0x29a   : > { %v2930_v35 = vadd.f32 0.4994258, %v2929_v15  ;;  %5105 = vrcp.f32 %v7890_v52  ;;  %v3568_v22 = vpack.c.bf16 %v3516_v40, %v3512_v31  ;;  %vm1659_vm10 = vweird.f32 %v7864_v26 }
 0x29b   : > { %v2950_v12 = vmul.f32 %v7896_v62, %v7896_v62  ;;  %v7906_v19 = vadd.f32 %v7845_v6, %v2816_v33  ;;  %v7909_v0 = vmul.f32 %v2841_v44, %v7603_v3  ;;  %v1664_v4 = vand.u32 2147483648, %v7840_v16 }
 0x29c   : > { %v7913_v36 = vadd.f32 %v636_v38, %v5597_v59  ;;  %v2854_v55 = vmul.f32 %v7898_v46, %v7861_v41  ;;  %3966 = vmatmul.bf16.gmra.mxu2 %v3568_v22  ;;  %vm1658_vm11 = vweird.f32 %v7840_v16  ;;  %v1662_v51 = vand.u32 2147483647, %v7840_v16 }
 0x29d   : > { %v7919_v43 = vmin.f32 %v2950_v12, 16.0  ;;  %v2931_v3 = vmul.f32 %v2930_v35, %v7770_v20  ;;  %vm7923_vm12 = vmor %vm1658_vm11, %vm1659_vm10  ;;  %v7931_v24 = vadd.f32 %v685_v13, %v9433_v28  ;;  %v2876_v16 = vmul.f32 %v2875_v9, %v7714_v63 }
 0x29e   : > { %v7928_v23 = vmul.f32 0.70710677, %v7913_v36  ;;  %v7933_v15 = vpop.eup %5103  ;;  %v2914_v53 = vmul.f32 %v2913_v47, %v7770_v20  ;;  %v1661_v7 = vsel %vm7923_vm12, %v7864_v26, %v1657_v17  ;;  %v2864_v34 = vand.u32 2147483648, %v7861_v41 }
 0x29f   : > { %v2963_v21 = vmul.f32 3.8918573e-05, %v7919_v43  ;;  %v1665_v31 = vor.u32 1.1754944e-38, %v1664_v4  ;;  %v7953_v40 = vmul.f32 0.70710677, %v7931_v24  ;;  %v2821_v26 = vsel %vm7945_vm13, %v7845_v6, %v7906_v19 }
 0x2a0   : > { %v5106_v33 = vpop.eup %5105  ;;  %v2990_v30 = vmul.f32 %v7928_v23, %v7928_v23  ;;  %v2855_v38 = vsub.f32 1.0, %v2854_v55  ;;  %vm1663_vm14 = vcmp.eq.f32.partialorder %v1662_v51, 8.507059e+37  ;;  %v7960_v47 = vadd.f32 1.0, %v2931_v3 }
 0x2a1   : > { %v1814_v9 = vmul.f32 %v5106_v33, %v7890_v52  ;;  %v1666_v35 = vsel %vm1663_vm14, %v1665_v31, %v1661_v7  ;;  %v2964_v22 = vadd.f32 0.001143296, %v2963_v21  ;;  %vm7966_vm15 = vcmp.eq.f32.partialorder %v2822_v27, 8.507059e+37 }
 0x2a2   : > { %v7962_v17 = vmin.f32 %v2990_v30, 16.0  ;;  %v2877_v4 = vadd.f32 0.05243302, %v2876_v16  ;;  %v2915_v13 = vadd.f32 0.0036580483, %v2914_v53  ;;  %v3030_v6 = vmul.f32 %v7953_v40, %v7953_v40 }
 0x2a3   : > { %v1815_v50 = vsub.f32 1.0, %v1814_v9  ;;  %v2894_v19 = vmul.f32 %v7933_v15, %v7874_v1  ;;  %v1824_v55 = vand.u32 2147483648, %v7890_v52  ;;  %v2965_v51 = vmul.f32 %v2964_v22, %v7919_v43 }
 0x2a4   : > { %v3003_v3 = vmul.f32 3.8918573e-05, %v7962_v17  ;;  %v1667_v27 = vmul.f32 %v1666_v35, %v9470_v60  ;;  %vm1819_vm0 = vweird.f32 %v5106_v33  ;;  %v1822_v16 = vand.u32 2147483647, %v7890_v52  ;;  %v734_v35 = vpop.f32.mrf.mxu3  ;;  %v9471_v60 = vld [vmem:[#allocation50_spill] sm:$0xff] }
 0x2a5   : > { %v1816_v7 = vmul.f32 %v5106_v33, %v1815_v50  ;;  %v2856_v53 = vmul.f32 %v7898_v46, %v2855_v38  ;;  %vm2858_vm1 = vweird.f32 %v7861_v41  ;;  %5107 = vrcp.f32 %v7960_v47 }
 0x2a6   : > { %v2966_v21 = vadd.f32 0.014752088, %v2965_v51  ;;  %v3004_v44 = vadd.f32 0.001143296, %v3003_v3  ;;  %v2878_v31 = vmul.f32 %v2877_v4, %v7714_v63  ;;  %vm1818_vm2 = vweird.f32 %v7890_v52 }
 0x2a7   : > { %v1817_v30 = vadd.f32 %v5106_v33, %v1816_v7  ;;  %v7984_v9 = vmin.f32 %v3030_v6, 16.0  ;;  %v2916_v22 = vmul.f32 %v2915_v13, %v7770_v20  ;;  %vm1820_vm3 = vmor %vm1818_vm2, %vm1819_vm0  ;;  %v1825_v50 = vor.u32 1.1754944e-38, %v1824_v55 }
 0x2a8   : > { %v2967_v38 = vmul.f32 %v2966_v21, %v7919_v43  ;;  %v1843_v37 = vmul.f32 3.8918573e-05, %v9471_v60  ;;  %v2895_v48 = vsub.f32 1.0, %v2894_v19  ;;  %v4725_v61 = vclamps-f32 %v1667_v27, 1.0 }
 0x2a9   : > { %v1821_v51 = vsel %vm1820_vm3, %v5106_v33, %v1817_v30  ;;  %vm1823_vm4 = vcmp.eq.f32.partialorder %v1822_v16, 8.507059e+37  ;;  %v3005_v7 = vmul.f32 %v3004_v44, %v7962_v17  ;;  %v7991_v52 = vadd.f32 %v734_v35, %v5610_v2 }
 0x2aa   : > { %v1826_v3 = vsel %vm1823_vm4, %v1825_v50, %v1821_v51  ;;  %v2968_v4 = vadd.f32 0.112945676, %v2967_v38  ;;  %v2865_v6 = vor.u32 1.1754944e-38, %v2864_v34  ;;  %v2952_v55 = vmul.f32 2.1237322e-06, %v7919_v43 }
 0x2ab   : > { %v1827_v13 = vmul.f32 %v1826_v3, %v9472_v18  ;;  %v3043_v21 = vmul.f32 3.8918573e-05, %v7984_v9  ;;  %v7996_v32 = vpop.eup %5107  ;;  %v2826_v33 = vsel %vm7966_vm15, %v7885_v10, %v2821_v26  ;;  %v2857_v19 = vadd.f32 %v7898_v46, %v2856_v53 }
 0x2ac   : > { %vm2859_vm5 = vweird.f32 %v7898_v46  ;;  %v2969_v27 = vmul.f32 %v2968_v4, %v7919_v43  ;;  %v9473_v34 = vand.u32 2147483647, %v7861_v41  ;;  %v2879_v16 = vadd.f32 0.18741608, %v2878_v31 }
 0x2ad   : > { %v2917_v44 = vadd.f32 0.05243302, %v2916_v22  ;;  %v4729_v30 = vclamps-f32 %v1827_v13, 1.0  ;;  %v3449_v35 = vadd.f32 1.0, %v4725_v61  ;;  %v2896_v50 = vmul.f32 %v7933_v15, %v2895_v48  ;;  %vm8016_vm7 = vmor %vm2858_vm1, %vm2859_vm5 }
 0x2ae   : > { %vm8006_vm6 = vcmp.eq.f32.partialorder %v9473_v34, 8.507059e+37  ;;  %v3006_v12 = vadd.f32 0.014752088, %v3005_v7  ;;  %v8012_v10 = vmul.f32 0.70710677, %v7991_v52  ;;  %v2934_v38 = vmul.f32 %v7996_v32, %v7960_v47  ;;  %v9478_v7 = vld [vmem:[#allocation45_spill] sm:$0xff] }
 0x2af   : > { %v1844_v26 = vadd.f32 0.001143296, %v1843_v37  ;;  %v3453_v31 = vadd.f32 1.0, %v4729_v30  ;;  %v2953_v22 = vadd.f32 0.00028619796, %v2952_v55  ;;  %v2861_v61 = vsel %vm8016_vm7, %v7898_v46, %v2857_v19  ;;  %v9479_v34 = vld [vmem:[#allocation53_spill] sm:$0xff] }
 0x2b0   : > { %v3044_v51 = vadd.f32 0.001143296, %v3043_v21  ;;  %v2970_v48 = vadd.f32 0.4994258, %v2969_v27  ;;  %v2992_v3 = vmul.f32 2.1237322e-06, %v7962_v17  ;;  %v2880_v41 = vmul.f32 %v2879_v16, %v7714_v63 }
 0x2b1   : > { %v3032_v37 = vmul.f32 2.1237322e-06, %v7984_v9  ;;  %v2918_v4 = vmul.f32 %v2917_v44, %v7770_v20  ;;  %v3513_v13 = vmul.f32 %v3449_v35, %v9478_v7  ;;  %v3517_v45 = vmul.f32 %v3453_v31, %v9479_v34 }
 0x2b2   : > { %vm2899_vm8 = vweird.f32 %v7933_v15  ;;  %v3007_v55 = vmul.f32 %v3006_v12, %v7962_v17  ;;  %v3070_v46 = vmul.f32 %v8012_v10, %v8012_v10  ;;  %v1845_v21 = vmul.f32 %v1844_v26, %v9471_v60 }
 0x2b3   : > { %v2897_v19 = vadd.f32 %v7933_v15, %v2896_v50  ;;  %v2935_v27 = vsub.f32 1.0, %v2934_v38  ;;  %v3569_v30 = vpack.c.bf16 %v3517_v45, %v3513_v13  ;;  %v3045_v63 = vmul.f32 %v3044_v51, %v7984_v9 }
 0x2b4   : > { %v2954_v16 = vmul.f32 %v2953_v22, %v7919_v43  ;;  %v2971_v44 = vmul.f32 %v2970_v48, %v7919_v43  ;;  %v2993_v35 = vadd.f32 0.00028619796, %v2992_v3  ;;  %v3033_v53 = vadd.f32 0.00028619796, %v3032_v37 }
 0x2b5   : > { %vm2898_vm9 = vweird.f32 %v7874_v1  ;;  %v2902_v12 = vand.u32 2147483647, %v7874_v1  ;;  %v2904_v31 = vand.u32 2147483648, %v7874_v1  ;;  %v2919_v7 = vadd.f32 0.18741608, %v2918_v4  ;;  %4015 = vmatmul.bf16.gmra.mxu3 %v3569_v30 }
 0x2b6   : > { %v8044_v50 = vmul.f32 %v2826_v33, %v7854_v56  ;;  %v2866_v45 = vsel %vm8006_vm6, %v2865_v6, %v2861_v61  ;;  %vm8050_vm10 = vmor %vm2898_vm9, %vm2899_vm8  ;;  %v3008_v38 = vadd.f32 0.112945676, %v3007_v55  ;;  %v8054_v22 = vmin.f32 %v3070_v46, 16.0  ;;  %v590_v55 = vpop.f32.mrf.mxu0 }
 0x2b7   : > { %v2901_v1 = vsel %vm8050_vm10, %v7933_v15, %v2897_v19  ;;  %v2936_v51 = vmul.f32 %v7996_v32, %v2935_v27  ;;  %v3046_v56 = vadd.f32 0.014752088, %v3045_v63  ;;  %v1846_v33 = vadd.f32 0.014752088, %v1845_v21 }
 0x2b8   : > { %v2955_v48 = vadd.f32 0.0036580483, %v2954_v16  ;;  %v8060_v18 = vadd.f32 1.0, %v2971_v44  ;;  %v2994_v6 = vmul.f32 %v2993_v35, %v7962_v17  ;;  %v3034_v61 = vmul.f32 %v3033_v53, %v7984_v9 }
 0x2b9   : > { %v2881_v3 = vadd.f32 1.1283791, %v2880_v41  ;;  %vm2903_vm11 = vcmp.eq.f32.partialorder %v2902_v12, 8.507059e+37  ;;  %v2905_v37 = vor.u32 1.1754944e-38, %v2904_v31  ;;  %v2920_v4 = vmul.f32 %v2919_v7, %v7770_v20 }
 0x2ba   : > { %vm2939_vm12 = vweird.f32 %v7996_v32  ;;  %v2944_v15 = vand.u32 2147483648, %v7960_v47  ;;  %v3009_v13 = vmul.f32 %v3008_v38, %v7962_v17  ;;  %v3072_v34 = vmul.f32 2.1237322e-06, %v8054_v22 }
 0x2bb   : > { %v2906_v46 = vsel %vm2903_vm11, %v2905_v37, %v2901_v1  ;;  %v2937_v21 = vadd.f32 %v7996_v32, %v2936_v51  ;;  %v3047_v19 = vmul.f32 %v3046_v56, %v7984_v9  ;;  %v1847_v41 = vmul.f32 %v1846_v33, %v9471_v60 }
 0x2bc   : > { %v2956_v27 = vmul.f32 %v2955_v48, %v7919_v43  ;;  %5109 = vrcp.f32 %v8060_v18  ;;  %v2995_v20 = vadd.f32 0.0036580483, %v2994_v6  ;;  %v3035_v30 = vadd.f32 0.0036580483, %v3034_v61 }
 0x2bd   : > { %v2882_v63 = vmul.f32 %v2881_v3, %v7691_v8  ;;  %vm2938_vm13 = vweird.f32 %v7960_v47  ;;  %v2942_v16 = vand.u32 2147483647, %v7960_v47  ;;  %v8078_v44 = vadd.f32 %v590_v55, %v5595_v57 }
 0x2be   : > { %v2867_v35 = vmul.f32 %v2866_v45, %v7909_v0  ;;  %v2921_v53 = vadd.f32 1.1283791, %v2920_v4  ;;  %vm8083_vm14 = vmor %vm2938_vm13, %vm2939_vm12  ;;  %v3010_v31 = vadd.f32 0.4994258, %v3009_v13  ;;  %v3073_v7 = vadd.f32 0.00028619796, %v3072_v34 }
 0x2bf   : > { %v2907_v26 = vmul.f32 %v2906_v46, %v2882_v63  ;;  %v2941_v8 = vsel %vm8083_vm14, %v7996_v32, %v2937_v21  ;;  %v2945_v47 = vor.u32 1.1754944e-38, %v2944_v15  ;;  %v3048_v38 = vadd.f32 0.112945676, %v3047_v19  ;;  %v639_v21 = vpop.f32.mrf.mxu1 }
 0x2c0   : > { %v2957_v1 = vadd.f32 0.05243302, %v2956_v27  ;;  %v2996_v51 = vmul.f32 %v2995_v20, %v7962_v17  ;;  %v3036_v0 = vmul.f32 %v3035_v30, %v7984_v9  ;;  %v1848_v45 = vadd.f32 0.112945676, %v1847_v41 }
 0x2c1   : > { %v4754_v56 = vclamps-f32 %v8044_v50, 1.0  ;;  %vm2943_vm15 = vcmp.eq.f32.partialorder %v2942_v16, 8.507059e+37  ;;  %v3083_v33 = vmul.f32 3.8918573e-05, %v8054_v22  ;;  %v8095_v48 = vmul.f32 0.70710677, %v8078_v44 }
 0x2c2   : > { %v8097_v6 = vpop.eup %5109  ;;  %v4755_v61 = vclamps-f32 %v2867_v35, 1.0  ;;  %v2946_v32 = vsel %vm2943_vm15, %v2945_v47, %v2941_v8  ;;  %v3011_v3 = vmul.f32 %v3010_v31, %v7962_v17  ;;  %v3074_v37 = vmul.f32 %v3073_v7, %v8054_v22 }
 0x2c3   : > { %v8103_v4 = vmul.f32 %v7882_v42, %v7523_v5  ;;  %v4756_v15 = vclamps-f32 %v2907_v26, 1.0  ;;  %v2922_v50 = vmul.f32 %v2921_v53, %v7744_v54  ;;  %v3049_v13 = vmul.f32 %v3048_v38, %v7984_v9 }
 0x2c4   : > { %v2958_v34 = vmul.f32 %v2957_v1, %v7919_v43  ;;  %v2997_v55 = vadd.f32 0.05243302, %v2996_v51  ;;  %v3037_v46 = vadd.f32 0.05243302, %v3036_v0  ;;  %v1849_v19 = vmul.f32 %v1848_v45, %v9471_v60 }
 0x2c5   : > { %v2947_v41 = vmul.f32 %v2946_v32, %v2922_v50  ;;  %v2974_v27 = vmul.f32 %v8097_v6, %v8060_v18  ;;  %v3084_v20 = vadd.f32 0.001143296, %v3083_v33  ;;  %v3110_v5 = vmul.f32 %v8095_v48, %v8095_v48 }
 0x2c6   : > { %v3478_v42 = vadd.f32 1.0, %v4754_v56  ;;  %v3479_v30 = vadd.f32 1.0, %v4755_v61  ;;  %v8113_v54 = vadd.f32 1.0, %v3011_v3  ;;  %v3075_v63 = vadd.f32 0.0036580483, %v3074_v37 }
 0x2c7   : > { %v792_v16 = vmul.f32 0.5, %v7684_v49  ;;  %v3480_v35 = vadd.f32 1.0, %v4756_v15  ;;  %v3050_v53 = vadd.f32 0.4994258, %v3049_v13  ;;  %v640_v12 = vadd.f32 %v639_v21, %v5597_v59 }
 0x2c8   : > { %v2959_v31 = vadd.f32 0.18741608, %v2958_v34  ;;  %v2998_v7 = vmul.f32 %v2997_v55, %v7962_v17  ;;  %v3038_v26 = vmul.f32 %v3037_v46, %v7984_v9  ;;  %v1850_v8 = vadd.f32 0.4994258, %v1849_v19 }
 0x2c9   : > { %v4757_v47 = vclamps-f32 %v2947_v41, 1.0  ;;  %v2975_v38 = vsub.f32 1.0, %v2974_v27  ;;  %v3085_v1 = vmul.f32 %v3084_v20, %v8054_v22  ;;  %v8120_v51 = vmin.f32 %v3110_v5, 16.0 }
 0x2ca   : > { %v8123_v0 = vmul.f32 %v3478_v42, %v7525_v11  ;;  %v8126_v49 = vmul.f32 %v3479_v30, %v7577_v29  ;;  %5111 = vrcp.f32 %v8113_v54  ;;  %v3076_v45 = vmul.f32 %v3075_v63, %v8054_v22 }
 0x2cb   : > { %v8130_v56 = vmul.f32 %v3480_v35, %v792_v16  ;;  %v8133_v33 = vmul.f32 0.5, %v7880_v25  ;;  %v3051_v61 = vmul.f32 %v3050_v53, %v7984_v9  ;;  %v8136_v32 = vmul.f32 0.70710677, %v640_v12 }
 0x2cc   : > { %v2960_v3 = vmul.f32 %v2959_v31, %v7919_v43  ;;  %v2999_v11 = vadd.f32 0.18741608, %v2998_v7  ;;  %v3039_v37 = vadd.f32 0.18741608, %v3038_v26  ;;  %v1851_v29 = vmul.f32 %v1850_v8, %v9471_v60 }
 0x2cd   : > { %v8140_v15 = vadd.f32 1.0, %v4757_v47  ;;  %v2976_v50 = vmul.f32 %v8097_v6, %v2975_v38  ;;  %v3086_v13 = vadd.f32 0.014752088, %v3085_v1  ;;  %v3123_v34 = vmul.f32 3.8918573e-05, %v8120_v51 }
 0x2ce   : > { %v8145_v25 = vmul.f32 0.5, %v7913_v36  ;;  %v8148_v55 = vmul.f32 0.5, %v7931_v24  ;;  %v8151_v46 = vmul.f32 0.5, %v7991_v52  ;;  %v3077_v43 = vadd.f32 0.05243302, %v3076_v45 }
 0x2cf   : > { %9484 = vst [vmem:[#allocation46_spill] sm:$0xff] %v8140_v15  ;;  %v8153_v21 = vadd.f32 1.0, %v3051_v61  ;;  %v8156_v60 = vmul.f32 0.5, %v8078_v44  ;;  %v3112_v19 = vmul.f32 2.1237322e-06, %v8120_v51  ;;  %v3150_v41 = vmul.f32 %v8136_v32, %v8136_v32 }
 0x2d0   : > { %v8161_v27 = vpop.eup %5111  ;;  %v2961_v36 = vadd.f32 1.1283791, %v2960_v3  ;;  %v3000_v24 = vmul.f32 %v2999_v11, %v7962_v17  ;;  %v3040_v20 = vmul.f32 %v3039_v37, %v7984_v9  ;;  %v8165_v52 = vadd.f32 1.0, %v1851_v29  ;;  %v9487_v37 = vld [vmem:[#allocation61_spill] sm:$0xff] }
 0x2d1   : > { %v2977_v5 = vadd.f32 %v8097_v6, %v2976_v50  ;;  %vm2979_vm0 = vweird.f32 %v8097_v6  ;;  %v3087_v44 = vmul.f32 %v3086_v13, %v8054_v22  ;;  %v3124_v42 = vadd.f32 0.001143296, %v3123_v34  ;;  %v9488_v34 = vld [vmem:[#allocation7_spill] sm:$0xff] }
 0x2d2   : > { %vm2978_vm1 = vweird.f32 %v8060_v18  ;;  %v2982_v30 = vand.u32 2147483647, %v8060_v18  ;;  %v2984_v63 = vand.u32 2147483648, %v8060_v18  ;;  %v3078_v16 = vmul.f32 %v3077_v43, %v8054_v22 }
 0x2d3   : > { %v3014_v17 = vmul.f32 %v8161_v27, %v8113_v54  ;;  %5113 = vrcp.f32 %v8153_v21  ;;  %v3113_v9 = vadd.f32 0.00028619796, %v3112_v19  ;;  %v8177_v35 = vmin.f32 %v3150_v41, 16.0  ;;  %vm8180_vm2 = vmor %vm2978_vm1, %vm2979_vm0 }
 0x2d4   : > { %v2962_v53 = vmul.f32 %v2961_v36, %v7896_v62  ;;  %v3001_v7 = vadd.f32 1.1283791, %v3000_v24  ;;  %v3024_v26 = vand.u32 2147483648, %v8113_v54  ;;  %5115 = vrcp.f32 %v8165_v52 }
 0x2d5   : > { %v2981_v18 = vsel %vm8180_vm2, %v8097_v6, %v2977_v5  ;;  %v3041_v8 = vadd.f32 1.1283791, %v3040_v20  ;;  %v3088_v47 = vadd.f32 0.112945676, %v3087_v44  ;;  %v3125_v38 = vmul.f32 %v3124_v42, %v8120_v51 }
 0x2d6   : > { %vm2983_vm3 = vcmp.eq.f32.partialorder %v2982_v30, 8.507059e+37  ;;  %v2985_v1 = vor.u32 1.1754944e-38, %v2984_v63  ;;  %v3079_v62 = vadd.f32 0.18741608, %v3078_v16  ;;  %v8190_v45 = vmul.f32 0.5, %v640_v12 }
 0x2d7   : > { %v3015_v61 = vsub.f32 1.0, %v3014_v17  ;;  %v3114_v3 = vmul.f32 %v3113_v9, %v8120_v51  ;;  %v3163_v11 = vmul.f32 3.8918573e-05, %v8177_v35  ;;  %v2003_v29 = vmul.f32 3.8918573e-05, %v9487_v37 }
 0x2d8   : > { %v2986_v50 = vsel %vm2983_vm3, %v2985_v1, %v2981_v18  ;;  %v8196_v13 = vmul.f32 %v3001_v7, %v7928_v23  ;;  %v3022_v6 = vand.u32 2147483647, %v8113_v54  ;;  %v1883_v43 = vmul.f32 3.8918573e-05, %v9488_v34  ;;  %v9489_v7 = vld [vmem:[#allocation62_spill] sm:$0xff] }
 0x2d9   : > { %v8200_v19 = vpop.eup %5113  ;;  %vm3018_vm4 = vweird.f32 %v8113_v54  ;;  %v3025_v12 = vor.u32 1.1754944e-38, %v3024_v26  ;;  %v8204_v41 = vmul.f32 %v3041_v8, %v7953_v40  ;;  %v3089_v36 = vmul.f32 %v3088_v47, %v8054_v22 }
 0x2da   : > { %v3126_v24 = vadd.f32 0.014752088, %v3125_v38  ;;  %v8207_v20 = vpop.eup %5115  ;;  %v3062_v23 = vand.u32 2147483647, %v8153_v21  ;;  %v3064_v5 = vand.u32 2147483648, %v8153_v21  ;;  %v3080_v44 = vmul.f32 %v3079_v62, %v8054_v22 }
 0x2db   : > { %v2004_v42 = vadd.f32 0.001143296, %v2003_v29  ;;  %v2987_v30 = vmul.f32 %v2986_v50, %v2962_v53  ;;  %v3016_v63 = vmul.f32 %v8161_v27, %v3015_v61  ;;  %v3115_v16 = vadd.f32 0.0036580483, %v3114_v3  ;;  %v9492_v61 = vld [vmem:[#allocation57_spill] sm:$0xff] }
 0x2dc   : > { %v3164_v17 = vadd.f32 0.001143296, %v3163_v11  ;;  %v3054_v40 = vmul.f32 %v8200_v19, %v8153_v21  ;;  %v1884_v31 = vadd.f32 0.001143296, %v1883_v43  ;;  %v2043_v26 = vmul.f32 3.8918573e-05, %v9489_v7 }
 0x2dd   : > { %v2005_v9 = vmul.f32 %v2004_v42, %v9487_v37  ;;  %vm3019_vm5 = vweird.f32 %v8161_v27  ;;  %vm8218_vm6 = vcmp.eq.f32.partialorder %v3022_v6, 8.507059e+37  ;;  %v3090_v8 = vadd.f32 0.4994258, %v3089_v36 }
 0x2de   : > { %v3127_v53 = vmul.f32 %v3126_v24, %v8120_v51  ;;  %v1854_v47 = vmul.f32 %v8207_v20, %v8165_v52  ;;  %v1885_v1 = vmul.f32 %v1884_v31, %v9488_v34  ;;  %v2044_v62 = vadd.f32 0.001143296, %v2043_v26  ;;  %vm8239_vm8 = vmor %vm3018_vm4, %vm3019_vm5 }
 0x2df   : > { %v2006_v38 = vadd.f32 0.014752088, %v2005_v9  ;;  %v1923_v3 = vmul.f32 3.8918573e-05, %v9492_v61  ;;  %v3017_v11 = vadd.f32 %v8161_v27, %v3016_v63  ;;  %v8228_v29 = vadd.f32 1.1283791, %v3080_v44 }
 0x2e0   : > { %v3116_v50 = vmul.f32 %v3115_v16, %v8120_v51  ;;  %v3165_v6 = vmul.f32 %v3164_v17, %v8177_v35  ;;  %v4758_v43 = vclamps-f32 %v2987_v30, 1.0  ;;  %v3055_v36 = vsub.f32 1.0, %v3054_v40 }
 0x2e1   : > { %v2007_v24 = vmul.f32 %v2006_v38, %v9487_v37  ;;  %v1886_v42 = vadd.f32 0.014752088, %v1885_v1  ;;  %vm3059_vm7 = vweird.f32 %v8200_v19  ;;  %v1855_v9 = vsub.f32 1.0, %v1854_v47 }
 0x2e2   : > { %v2045_v31 = vmul.f32 %v2044_v62, %v9489_v7  ;;  %v1924_v26 = vadd.f32 0.001143296, %v1923_v3  ;;  %vm3058_vm9 = vweird.f32 %v8153_v21  ;;  %v3091_v30 = vmul.f32 %v3090_v8, %v8054_v22 }
 0x2e3   : > { %v3128_v63 = vadd.f32 0.112945676, %v3127_v53  ;;  %v2008_v16 = vadd.f32 0.112945676, %v2007_v24  ;;  %v1887_v17 = vmul.f32 %v1886_v42, %v9488_v34  ;;  %v3021_v40 = vsel %vm8239_vm8, %v8161_v27, %v3017_v11  ;;  %vm8281_vm13 = vmor %vm3058_vm9, %vm3059_vm7 }
 0x2e4   : > { %v3166_v47 = vadd.f32 0.014752088, %v3165_v6  ;;  %vm1858_vm10 = vweird.f32 %v8165_v52  ;;  %v2046_v54 = vadd.f32 0.014752088, %v2045_v31  ;;  %v1925_v38 = vmul.f32 %v1924_v26, %v9492_v61 }
 0x2e5   : > { %v3482_v1 = vadd.f32 1.0, %v4758_v43  ;;  %v3056_v62 = vmul.f32 %v8200_v19, %v3055_v36  ;;  %v3117_v3 = vadd.f32 0.05243302, %v3116_v50  ;;  %v3152_v22 = vmul.f32 2.1237322e-06, %v8177_v35 }
 0x2e6   : > { %v1856_v8 = vmul.f32 %v8207_v20, %v1855_v9  ;;  %v2009_v53 = vmul.f32 %v2008_v16, %v9487_v37  ;;  %v1888_v24 = vadd.f32 0.112945676, %v1887_v17  ;;  %v2047_v42 = vmul.f32 %v2046_v54, %v9489_v7 }
 0x2e7   : > { %v3026_v27 = vsel %vm8218_vm6, %v3025_v12, %v3021_v40  ;;  %v8258_v11 = vadd.f32 1.0, %v3091_v30  ;;  %v3129_v6 = vmul.f32 %v3128_v63, %v8120_v51  ;;  %v1926_v43 = vadd.f32 0.014752088, %v1925_v38 }
 0x2e8   : > { %v3167_v36 = vmul.f32 %v3166_v47, %v8177_v35  ;;  %v2010_v50 = vadd.f32 0.4994258, %v2009_v53  ;;  %v1889_v31 = vmul.f32 %v1888_v24, %v9488_v34  ;;  %v2048_v26 = vadd.f32 0.112945676, %v2047_v42 }
 0x2e9   : > { %v3057_v9 = vadd.f32 %v8200_v19, %v3056_v62  ;;  %vm8264_vm11 = vcmp.eq.f32.partialorder %v3062_v23, 8.507059e+37  ;;  %v3153_v16 = vadd.f32 0.00028619796, %v3152_v22  ;;  %vm1859_vm12 = vweird.f32 %v8207_v20 }
 0x2ea   : > { %v1927_v12 = vmul.f32 %v1926_v43, %v9492_v61  ;;  %v1857_v18 = vadd.f32 %v8207_v20, %v1856_v8  ;;  %v2011_v30 = vmul.f32 %v2010_v50, %v9487_v37  ;;  %v1890_v63 = vadd.f32 0.4994258, %v1889_v31  ;;  %vm8297_vm14 = vmor %vm1858_vm10, %vm1859_vm12 }
 0x2eb   : > { %v2049_v17 = vmul.f32 %v2048_v26, %v9489_v7  ;;  %v8274_v40 = vmul.f32 %v3026_v27, %v8196_v13  ;;  %v3130_v47 = vadd.f32 0.4994258, %v3129_v6  ;;  %v1864_v23 = vand.u32 2147483648, %v8165_v52  ;;  %v9501_v6 = vld [vmem:[#allocation63_spill] sm:$0xff] }
 0x2ec   : > { %v1928_v54 = vadd.f32 0.112945676, %v1927_v12  ;;  %5117 = vrcp.f32 %v8258_v11  ;;  %v3168_v37 = vadd.f32 0.112945676, %v3167_v36  ;;  %v1862_v62 = vand.u32 2147483647, %v8165_v52 }
 0x2ed   : > { %v8287_v22 = vadd.f32 1.0, %v2011_v30  ;;  %v3061_v13 = vsel %vm8281_vm13, %v8200_v19, %v3057_v9  ;;  %v3154_v8 = vmul.f32 %v3153_v16, %v8177_v35  ;;  %v1891_v24 = vmul.f32 %v1890_v63, %v9488_v34 }
 0x2ee   : > { %v2050_v42 = vadd.f32 0.4994258, %v2049_v17  ;;  %v1861_v27 = vsel %vm8297_vm14, %v8207_v20, %v1857_v18  ;;  %v1929_v19 = vmul.f32 %v1928_v54, %v9492_v61  ;;  %v2083_v43 = vmul.f32 3.8918573e-05, %v9501_v6  ;;  %v688_v18 = vpop.f32.mrf.mxu2  ;;  %v9502_v54 = vld [vmem:[#allocation69_spill] sm:$0xff] }
 0x2ef   : > { %5119 = vrcp.f32 %v8287_v22  ;;  %v3131_v36 = vmul.f32 %v3130_v47, %v8120_v51  ;;  %v1865_v52 = vor.u32 1.1754944e-38, %v1864_v23  ;;  %v8309_v50 = vadd.f32 1.0, %v1891_v24 }
 0x2f0   : > { %v2051_v31 = vmul.f32 %v2050_v42, %v9489_v7  ;;  %v3065_v34 = vor.u32 1.1754944e-38, %v3064_v5  ;;  %v8316_v26 = vmul.f32 %v8228_v29, %v8012_v10  ;;  %v3169_v20 = vmul.f32 %v3168_v37, %v8177_v35 }
 0x2f1   : > { %vm1863_vm15 = vcmp.eq.f32.partialorder %v1862_v62, 8.507059e+37  ;;  %v3118_v9 = vmul.f32 %v3117_v3, %v8120_v51  ;;  %v3155_v16 = vadd.f32 0.0036580483, %v3154_v8  ;;  %5121 = vrcp.f32 %v8309_v50 }
 0x2f2   : > { %v1866_v12 = vsel %vm1863_vm15, %v1865_v52, %v1861_v27  ;;  %v8321_v30 = vpop.eup %5117  ;;  %v3066_v21 = vsel %vm8264_vm11, %v3065_v34, %v3061_v13  ;;  %v8325_v5 = vadd.f32 1.0, %v2051_v31  ;;  %v1930_v7 = vadd.f32 0.4994258, %v1929_v19 }
 0x2f3   : > { %v2084_v10 = vadd.f32 0.001143296, %v2083_v43  ;;  %v8328_v29 = vmul.f32 %v3482_v1, %v8133_v33  ;;  %v8332_v17 = vadd.f32 1.0, %v3131_v36  ;;  %v3170_v23 = vadd.f32 0.4994258, %v3169_v20  ;;  %v9503_v20 = vld [vmem:[#allocation60_spill] sm:$0xff] }
 0x2f4   : > { %v1867_v38 = vmul.f32 %v1866_v12, %v9502_v54  ;;  %5123 = vrcp.f32 %v8325_v5  ;;  %v8337_v44 = vadd.f32 %v688_v18, %v9433_v28  ;;  %v8340_v37 = vmul.f32 %v3066_v21, %v8204_v41 }
 0x2f5   : > { %v5120_v47 = vpop.eup %5119  ;;  %v8343_v1 = vadd.f32 0.18741608, %v3118_v9  ;;  %v8348_v13 = vmul.f32 %v8321_v30, %v8258_v11  ;;  %v8351_v8 = vmul.f32 %v3155_v16, %v8177_v35  ;;  %v1931_v53 = vmul.f32 %v1930_v7, %v9492_v61 }
 0x2f6   : > { %v2014_v62 = vmul.f32 %v5120_v47, %v8287_v22  ;;  %v2085_v24 = vmul.f32 %v2084_v10, %v9501_v6  ;;  %5125 = vrcp.f32 %v8332_v17  ;;  %v2022_v27 = vand.u32 2147483647, %v8287_v22 }
 0x2f7   : > { %v5122_v42 = vpop.eup %5121  ;;  %v2024_v19 = vand.u32 2147483648, %v8287_v22  ;;  %v3171_v43 = vmul.f32 %v3170_v23, %v8177_v35  ;;  %v4730_v36 = vclamps-f32 %v1867_v38, 1.0  ;;  %v8361_v31 = vmul.f32 0.70710677, %v8337_v44 }
 0x2f8   : > { %v2015_v41 = vsub.f32 1.0, %v2014_v62  ;;  %v1894_v52 = vmul.f32 %v5122_v42, %v8309_v50  ;;  %vm2019_vm0 = vweird.f32 %v5120_v47  ;;  %v1904_v61 = vand.u32 2147483648, %v8309_v50 }
 0x2f9   : > { %v1963_v9 = vmul.f32 3.8918573e-05, %v9503_v20  ;;  %vm2018_vm1 = vweird.f32 %v8287_v22  ;;  %v8366_v18 = vadd.f32 1.0, %v1931_v53  ;;  %v2086_v21 = vadd.f32 0.014752088, %v2085_v24 }
 0x2fa   : > { %v2016_v34 = vmul.f32 %v5120_v47, %v2015_v41  ;;  %v5124_v16 = vpop.eup %5123  ;;  %v1895_v12 = vsub.f32 1.0, %v1894_v52  ;;  %vm2023_vm2 = vcmp.eq.f32.partialorder %v2022_v27, 8.507059e+37  ;;  %v2025_v10 = vor.u32 1.1754944e-38, %v2024_v19  ;;  %vm2020_vm3 = vmor %vm2018_vm1, %vm2019_vm0 }
 0x2fb   : > { %v2054_v23 = vmul.f32 %v5124_v16, %v8325_v5  ;;  %vm1899_vm4 = vweird.f32 %v5122_v42  ;;  %v1902_v38 = vand.u32 2147483647, %v8309_v50  ;;  %v3190_v62 = vmul.f32 %v8361_v31, %v8361_v31 }
 0x2fc   : > { %v2017_v7 = vadd.f32 %v5120_v47, %v2016_v34  ;;  %v1896_v54 = vmul.f32 %v5122_v42, %v1895_v12  ;;  %v8372_v41 = vpop.eup %5125  ;;  %vm1898_vm5 = vweird.f32 %v8309_v50  ;;  %v1905_v53 = vor.u32 1.1754944e-38, %v1904_v61  ;;  %v9504_v34 = vld [vmem:[#allocation75_spill] sm:$0xff] }
 0x2fd   : > { %v2055_v24 = vsub.f32 1.0, %v2054_v23  ;;  %v2064_v19 = vand.u32 2147483648, %v8325_v5  ;;  %5127 = vrcp.f32 %v8366_v18  ;;  %vm1900_vm6 = vmor %vm1898_vm5, %vm1899_vm4  ;;  %vm2059_vm7 = vweird.f32 %v5124_v16 }
 0x2fe   : > { %v2021_v22 = vsel %vm2020_vm3, %v5120_v47, %v2017_v7  ;;  %v1897_v27 = vadd.f32 %v5122_v42, %v1896_v54  ;;  %v2062_v33 = vand.u32 2147483647, %v8325_v5  ;;  %v3454_v63 = vadd.f32 1.0, %v4730_v36 }
 0x2ff   : > { %v2026_v52 = vsel %vm2023_vm2, %v2025_v10, %v2021_v22  ;;  %v2056_v3 = vmul.f32 %v5124_v16, %v2055_v24  ;;  %vm1903_vm8 = vcmp.eq.f32.partialorder %v1902_v38, 8.507059e+37  ;;  %v8379_v47 = vmin.f32 %v3190_v62, 16.0  ;;  %v9505_v10 = vld [vmem:[#allocation72_spill] sm:$0xff]  ;;  %v737_v22 = vpop.f32.mrf.mxu3 }
 0x300   : > { %v2027_v12 = vmul.f32 %v2026_v52, %v9504_v34  ;;  %v1901_v15 = vsel %vm1900_vm6, %v5122_v42, %v1897_v27  ;;  %vm2058_vm9 = vweird.f32 %v8325_v5  ;;  %v2065_v54 = vor.u32 1.1754944e-38, %v2064_v19  ;;  %v9507_v19 = vld [vmem:[#allocation64_spill] sm:$0xff] }
 0x301   : > { %v1906_v61 = vsel %vm1903_vm8, %v1905_v53, %v1901_v15  ;;  %v2057_v7 = vadd.f32 %v5124_v16, %v2056_v3  ;;  %vm2060_vm10 = vmor %vm2058_vm9, %vm2059_vm7  ;;  %v2087_v24 = vmul.f32 %v2086_v21, %v9501_v6  ;;  %v1964_v52 = vadd.f32 0.001143296, %v1963_v9  ;;  %v9506_v53 = vld [vmem:[#allocation54_spill] sm:$0xff] }
 0x302   : > { %v4734_v50 = vclamps-f32 %v2027_v12, 1.0  ;;  %v1907_v23 = vmul.f32 %v1906_v61, %v9505_v10  ;;  %v3095_v34 = vsub.f32 1.0, %v8348_v13  ;;  %vm2063_vm11 = vcmp.eq.f32.partialorder %v2062_v33, 8.507059e+37  ;;  %v9508_v61 = vld [vmem:[#allocation76_spill] sm:$0xff] }
 0x303   : > { %v2061_v42 = vsel %vm2060_vm10, %v5124_v16, %v2057_v7  ;;  %v8385_v38 = vpop.eup %5127  ;;  %v8387_v62 = vadd.f32 1.0, %v3171_v43  ;;  %v3203_v5 = vmul.f32 3.8918573e-05, %v8379_v47  ;;  %v3518_v27 = vmul.f32 %v3454_v63, %v9506_v53  ;;  %v9511_v53 = vld [vmem:[#allocation55_spill] sm:$0xff] }
 0x304   : > { %v3458_v36 = vadd.f32 1.0, %v4734_v50  ;;  %v4731_v15 = vclamps-f32 %v1907_v23, 1.0  ;;  %v2066_v3 = vsel %vm2063_vm11, %v2065_v54, %v2061_v42  ;;  %v8394_v9 = vadd.f32 %v737_v22, %v5610_v2 }
 0x305   : > { %v2067_v21 = vmul.f32 %v2066_v3, %v9508_v61  ;;  %v4760_v13 = vclamps-f32 %v8340_v37, 1.0  ;;  %v3120_v33 = vmul.f32 %v8343_v1, %v8120_v51  ;;  %v2088_v43 = vadd.f32 0.112945676, %v2087_v24 }
 0x306   : > { %v3522_v12 = vmul.f32 %v3458_v36, %v9507_v19  ;;  %v1965_v16 = vmul.f32 %v1964_v52, %v9503_v20  ;;  %vm3098_vm12 = vweird.f32 %v8258_v11  ;;  %v3455_v63 = vadd.f32 1.0, %v4731_v15 }
 0x307   : > { %v4735_v7 = vclamps-f32 %v2067_v21, 1.0  ;;  %v1934_v10 = vmul.f32 %v8385_v38, %v8366_v18  ;;  %v9509_v23 = vclamps-f32 %v8274_v40, 1.0  ;;  %v3134_v37 = vmul.f32 %v8372_v41, %v8332_v17 }
 0x308   : > { %v3570_v50 = vpack.c.bf16 %v3522_v12, %v3518_v27  ;;  %v3157_v22 = vadd.f32 0.05243302, %v8351_v8  ;;  %v3204_v51 = vadd.f32 0.001143296, %v3203_v5  ;;  %v3096_v1 = vmul.f32 %v8321_v30, %v3095_v34  ;;  %v9512_v8 = vld [vmem:[#allocation66_spill] sm:$0xff] }
 0x309   : > { %v3483_v54 = vadd.f32 1.0, %v9509_v23  ;;  %5129 = vrcp.f32 %v8387_v62  ;;  %v3459_v24 = vadd.f32 1.0, %v4735_v7  ;;  %v8411_v52 = vmul.f32 0.70710677, %v8394_v9 }
 0x30a   : > { %3873 = vmatmul.bf16.gmra.mxu0 %v3570_v50  ;;  %v3484_v36 = vadd.f32 1.0, %v4760_v13  ;;  %v9510_v42 = vand.u32 2147483648, %v8258_v11  ;;  %v3121_v15 = vadd.f32 1.1283791, %v3120_v33  ;;  %v2089_v3 = vmul.f32 %v2088_v43, %v9501_v6 }
 0x30b   : > { %v3519_v27 = vmul.f32 %v3455_v63, %v9511_v53  ;;  %v3523_v5 = vmul.f32 %v3459_v24, %v9512_v8  ;;  %v1935_v19 = vsub.f32 1.0, %v1934_v10  ;;  %v1966_v34 = vadd.f32 0.014752088, %v1965_v16 }
 0x30c   : > { %v3105_v40 = vor.u32 1.1754944e-38, %v9510_v42  ;;  %vm3099_vm13 = vweird.f32 %v8321_v30  ;;  %v3135_v12 = vsub.f32 1.0, %v3134_v37  ;;  %v3205_v61 = vmul.f32 %v3204_v51, %v8379_v47  ;;  %v9516_v51 = vld [vmem:[#allocation65_spill] sm:$0xff] }
 0x30d   : > { %v2090_v21 = vadd.f32 0.4994258, %v2089_v3  ;;  %v3097_v13 = vadd.f32 %v8321_v30, %v3096_v1  ;;  %v3158_v50 = vmul.f32 %v3157_v22, %v8177_v35  ;;  %v3571_v7 = vpack.c.bf16 %v3523_v5, %v3519_v27  ;;  %vm8450_vm15 = vmor %vm3098_vm12, %vm3099_vm13 }
 0x30e   : > { %v3230_v33 = vmul.f32 %v8411_v52, %v8411_v52  ;;  %v8425_v43 = vmul.f32 %v3483_v54, %v8145_v25  ;;  %v8428_v63 = vmul.f32 %v3484_v36, %v8148_v55  ;;  %v9513_v16 = vand.u32 2147483647, %v8258_v11 }
 0x30f   : > { %v8437_v23 = vmul.f32 %v3121_v15, %v8095_v48  ;;  %v2091_v37 = vmul.f32 %v2090_v21, %v9501_v6  ;;  %v8440_v22 = vpop.eup %5129  ;;  %3922 = vmatmul.bf16.gmra.mxu1 %v3571_v7  ;;  %v3192_v25 = vmul.f32 2.1237322e-06, %v8379_v47  ;;  %v1936_v54 = vmul.f32 %v8385_v38, %v1935_v19 }
 0x310   : > { %vm8432_vm14 = vcmp.eq.f32.partialorder %v9513_v16, 8.507059e+37  ;;  %v1967_v55 = vmul.f32 %v1966_v34, %v9503_v20  ;;  %v2123_v1 = vmul.f32 3.8918573e-05, %v9516_v51  ;;  %v3136_v6 = vmul.f32 %v8372_v41, %v3135_v12 }
 0x311   : > { %v3142_v24 = vand.u32 2147483647, %v8332_v17  ;;  %v3144_v36 = vand.u32 2147483648, %v8332_v17  ;;  %v3206_v42 = vadd.f32 0.014752088, %v3205_v61  ;;  %v3101_v15 = vsel %vm8450_vm15, %v8321_v30, %v3097_v13 }
 0x312   : > { %v3159_v3 = vadd.f32 0.18741608, %v3158_v50  ;;  %v8460_v53 = vmin.f32 %v3230_v33, 16.0  ;;  %v8462_v27 = vadd.f32 1.0, %v2091_v37  ;;  %vm3139_vm0 = vweird.f32 %v8372_v41 }
 0x313   : > { %v3174_v11 = vmul.f32 %v8440_v22, %v8387_v62  ;;  %v1968_v8 = vadd.f32 0.112945676, %v1967_v55  ;;  %v2124_v5 = vadd.f32 0.001143296, %v2123_v1  ;;  %v3193_v19 = vadd.f32 0.00028619796, %v3192_v25 }
 0x314   : > { %v1937_v34 = vadd.f32 %v8385_v38, %v1936_v54  ;;  %vm1939_vm1 = vweird.f32 %v8385_v38  ;;  %5131 = vrcp.f32 %v8462_v27  ;;  %v3137_v30 = vadd.f32 %v8372_v41, %v3136_v6 }
 0x315   : > { %v3207_v12 = vmul.f32 %v3206_v42, %v8379_v47  ;;  %v1944_v61 = vand.u32 2147483648, %v8366_v18  ;;  %v1969_v21 = vmul.f32 %v1968_v8, %v9503_v20  ;;  %v3243_v13 = vmul.f32 3.8918573e-05, %v8460_v53 }
 0x316   : > { %vm1938_vm2 = vweird.f32 %v8366_v18  ;;  %v1942_v50 = vand.u32 2147483647, %v8366_v18  ;;  %v2125_v7 = vmul.f32 %v2124_v5, %v9516_v51  ;;  %vm3138_vm3 = vweird.f32 %v8332_v17 }
 0x317   : > { %vm8479_vm4 = vcmp.eq.f32.partialorder %v3142_v24, 8.507059e+37  ;;  %v3160_v16 = vmul.f32 %v3159_v3, %v8177_v35  ;;  %vm8484_vm5 = vmor %vm1938_vm2, %vm1939_vm1  ;;  %v1970_v25 = vadd.f32 0.4994258, %v1969_v21  ;;  %v3106_v54 = vsel %vm8432_vm14, %v3105_v40, %v3101_v15 }
 0x318   : > { %v3175_v55 = vsub.f32 1.0, %v3174_v11  ;;  %v3194_v18 = vmul.f32 %v3193_v19, %v8379_v47  ;;  %v1941_v17 = vsel %vm8484_vm5, %v8385_v38, %v1937_v34  ;;  %vm8496_vm6 = vmor %vm3138_vm3, %vm3139_vm0  ;;  %v3208_v35 = vadd.f32 0.112945676, %v3207_v12 }
 0x319   : > { %v1945_v48 = vor.u32 1.1754944e-38, %v1944_v61  ;;  %v1971_v6 = vmul.f32 %v1970_v25, %v9503_v20  ;;  %v2126_v24 = vadd.f32 0.014752088, %v2125_v7  ;;  %v3141_v40 = vsel %vm8496_vm6, %v8372_v41, %v3137_v30  ;;  %v9525_v61 = vld [vmem:[#allocation73_spill] sm:$0xff] }
 0x31a   : > { %v5132_v10 = vpop.eup %5131  ;;  %v3145_v42 = vor.u32 1.1754944e-38, %v3144_v36  ;;  %v3244_v15 = vadd.f32 0.001143296, %v3243_v13  ;;  %vm1943_vm7 = vcmp.eq.f32.partialorder %v1942_v50, 8.507059e+37  ;;  %v8505_v38 = vmul.f32 %v3106_v54, %v8316_v26 }
 0x31b   : > { %v3161_v3 = vadd.f32 1.1283791, %v3160_v16  ;;  %v1946_v11 = vsel %vm1943_vm7, %v1945_v48, %v1941_v17  ;;  %v2094_v8 = vmul.f32 %v5132_v10, %v8462_v27  ;;  %v3182_v5 = vand.u32 2147483647, %v8387_v62 }
 0x31c   : > { %v3195_v19 = vadd.f32 0.0036580483, %v3194_v18  ;;  %v8509_v20 = vadd.f32 1.0, %v1971_v6  ;;  %v2127_v34 = vmul.f32 %v2126_v24, %v9516_v51  ;;  %v3146_v41 = vsel %vm8479_vm4, %v3145_v42, %v3141_v40 }
 0x31d   : > { %v3176_v36 = vmul.f32 %v8440_v22, %v3175_v55  ;;  %v3209_v30 = vmul.f32 %v3208_v35, %v8379_v47  ;;  %v2095_v26 = vsub.f32 1.0, %v2094_v8  ;;  %v3245_v12 = vmul.f32 %v3244_v15, %v8460_v53  ;;  %v9528_v8 = vld [vmem:[#allocation77_spill] sm:$0xff] }
 0x31e   : > { %v1947_v21 = vmul.f32 %v1946_v11, %v9525_v61  ;;  %v2104_v13 = vand.u32 2147483648, %v8462_v27  ;;  %5133 = vrcp.f32 %v8509_v20  ;;  %vm2099_vm8 = vweird.f32 %v5132_v10 }
 0x31f   : > { %v2096_v50 = vmul.f32 %v5132_v10, %v2095_v26  ;;  %v2102_v7 = vand.u32 2147483647, %v8462_v27  ;;  %v2128_v16 = vadd.f32 0.112945676, %v2127_v34  ;;  %v8522_v33 = vmul.f32 %v3161_v3, %v8136_v32  ;;  %v592_v34 = vpop.f32.mrf.mxu0 }
 0x320   : > { %vm3178_vm9 = vweird.f32 %v8387_v62  ;;  %v3184_v37 = vand.u32 2147483648, %v8387_v62  ;;  %v3196_v25 = vmul.f32 %v3195_v19, %v8379_v47  ;;  %v8528_v54 = vmul.f32 %v3146_v41, %v8437_v23 }
 0x321   : > { %v3210_v55 = vadd.f32 0.4994258, %v3209_v30  ;;  %v2097_v18 = vadd.f32 %v5132_v10, %v2096_v50  ;;  %vm2098_vm10 = vweird.f32 %v8462_v27  ;;  %v3246_v17 = vadd.f32 0.014752088, %v3245_v12 }
 0x322   : > { %v4732_v1 = vclamps-f32 %v1947_v21, 1.0  ;;  %vm2100_vm11 = vmor %vm2098_vm10, %vm2099_vm8  ;;  %v2105_v35 = vor.u32 1.1754944e-38, %v2104_v13  ;;  %v2129_v32 = vmul.f32 %v2128_v16, %v9516_v51  ;;  %v3177_v48 = vadd.f32 %v8440_v22, %v3176_v36 }
 0x323   : > { %vm3179_vm12 = vweird.f32 %v8440_v22  ;;  %vm8534_vm13 = vcmp.eq.f32.partialorder %v3182_v5, 8.507059e+37  ;;  %v2101_v23 = vsel %vm2100_vm11, %v5132_v10, %v2097_v18  ;;  %vm2103_vm14 = vcmp.eq.f32.partialorder %v2102_v7, 8.507059e+37  ;;  %v9531_v18 = vld [vmem:[#allocation56_spill] sm:$0xff] }
 0x324   : > { %v8538_v24 = vpop.eup %5133  ;;  %v3197_v40 = vadd.f32 0.05243302, %v3196_v25  ;;  %v3232_v27 = vmul.f32 2.1237322e-06, %v8460_v53  ;;  %v2106_v42 = vsel %vm2103_vm14, %v2105_v35, %v2101_v23  ;;  %v2130_v15 = vadd.f32 0.4994258, %v2129_v32  ;;  %vm8547_vm15 = vmor %vm3178_vm9, %vm3179_vm12 }
 0x325   : > { %v3185_v3 = vor.u32 1.1754944e-38, %v3184_v37  ;;  %v3211_v11 = vmul.f32 %v3210_v55, %v8379_v47  ;;  %v2107_v19 = vmul.f32 %v2106_v42, %v9528_v8  ;;  %v1974_v5 = vmul.f32 %v8538_v24, %v8509_v20 }
 0x326   : > { %v3247_v41 = vmul.f32 %v3246_v17, %v8460_v53  ;;  %v3456_v36 = vadd.f32 1.0, %v4732_v1  ;;  %v2131_v30 = vmul.f32 %v2130_v15, %v9516_v51  ;;  %v8554_v26 = vadd.f32 %v592_v34, %v5595_v57  ;;  %v641_v51 = vpop.f32.mrf.mxu1  ;;  %v9532_v1 = vld [vmem:[#allocation70_spill] sm:$0xff] }
 0x327   : > { %v3181_v61 = vsel %vm8547_vm15, %v8440_v22, %v3177_v48  ;;  %v4736_v21 = vclamps-f32 %v2107_v19, 1.0  ;;  %v1975_v62 = vsub.f32 1.0, %v1974_v5  ;;  %v3198_v13 = vmul.f32 %v3197_v40, %v8379_v47  ;;  %v690_v5 = vpop.f32.mrf.mxu2 }
 0x328   : > { %v3233_v50 = vadd.f32 0.00028619796, %v3232_v27  ;;  %v8561_v7 = vadd.f32 1.0, %v2131_v30  ;;  %v8564_v16 = vmul.f32 0.70710677, %v8554_v26  ;;  %v8566_v37 = vadd.f32 1.0, %v3211_v11 }
 0x329   : > { %v3460_v57 = vadd.f32 1.0, %v4736_v21  ;;  %v1976_v25 = vmul.f32 %v8538_v24, %v1975_v62  ;;  %v8570_v55 = vadd.f32 %v641_v51, %v5597_v59  ;;  %v3248_v22 = vadd.f32 0.112945676, %v3247_v41  ;;  %v739_v21 = vpop.f32.mrf.mxu3  ;;  %v9535_v62 = vld [vmem:[#allocation6_spill] sm:$0xff] }
 0x32a   : > { %v3520_v17 = vmul.f32 %v3456_v36, %v9531_v18  ;;  %vm1979_vm0 = vweird.f32 %v8538_v24  ;;  %5135 = vrcp.f32 %v8561_v7  ;;  %v1982_v48 = vand.u32 2147483647, %v8509_v20  ;;  %v9536_v18 = vld [vmem:[#allocation79_spill] sm:$0xff] }
 0x32b   : > { %v3524_v35 = vmul.f32 %v3460_v57, %v9532_v1  ;;  %v1977_v32 = vadd.f32 %v8538_v24, %v1976_v25  ;;  %v1984_v23 = vand.u32 2147483648, %v8509_v20  ;;  %v8581_v40 = vsel %vm8534_vm13, %v3185_v3, %v3181_v61 }
 0x32c   : > { %vm1978_vm1 = vweird.f32 %v8509_v20  ;;  %v3270_v59 = vmul.f32 %v8564_v16, %v8564_v16  ;;  %v8587_v27 = vmul.f32 0.70710677, %v8570_v55  ;;  %v8589_v42 = vadd.f32 0.18741608, %v3198_v13 }
 0x32d   : > { %5137 = vrcp.f32 %v8566_v37  ;;  %v8593_v15 = vmul.f32 %v3233_v50, %v8460_v53  ;;  %v3572_v11 = vpack.c.bf16 %v3524_v35, %v3520_v17  ;;  %vm8595_vm2 = vmor %vm1978_vm1, %vm1979_vm0  ;;  %v8600_v20 = vmul.f32 %v3248_v22, %v8460_v53 }
 0x32e   : > { %v1981_v3 = vsel %vm8595_vm2, %v8538_v24, %v1977_v32  ;;  %v8605_v8 = vmin.f32 %v3270_v59, 16.0  ;;  %v3310_v19 = vmul.f32 %v8587_v27, %v8587_v27  ;;  %vm1983_vm3 = vcmp.eq.f32.partialorder %v1982_v48, 8.507059e+37 }
 0x32f   : > { %3971 = vmatmul.bf16.gmra.mxu2 %v3572_v11  ;;  %v1985_v34 = vor.u32 1.1754944e-38, %v1984_v23  ;;  %v2142_v10 = vand.u32 2147483647, %v8561_v7  ;;  %v8611_v41 = vadd.f32 %v690_v5, %v9433_v28  ;;  %v3574_v13 = vpack.c.bf16 %v7458_v14, %v9535_v62 }
 0x330   : > { %v5136_v36 = vpop.eup %5135  ;;  %v3272_v30 = vmul.f32 2.1237322e-06, %v8605_v8  ;;  %v3283_v61 = vmul.f32 3.8918573e-05, %v8605_v8  ;;  %v8615_v24 = vmin.f32 %v3310_v19, 16.0  ;;  %vm2138_vm4 = vweird.f32 %v8561_v7 }
 0x331   : > { %v1986_v50 = vsel %vm1983_vm3, %v1985_v34, %v1981_v3  ;;  %v2134_v51 = vmul.f32 %v5136_v36, %v8561_v7  ;;  %v2144_v57 = vand.u32 2147483648, %v8561_v7  ;;  %3878 = vmatmul.bf16.gmra.mxu0 %v3574_v13  ;;  %v3575_v17 = vpack.c.bf16 %v7478_v39, %v9536_v18  ;;  %v9539_v39 = vld [vmem:[#allocation74_spill] sm:$0xff] }
 0x332   : > { %v3273_v28 = vadd.f32 0.00028619796, %v3272_v30  ;;  %v3284_v25 = vadd.f32 0.001143296, %v3283_v61  ;;  %v3312_v22 = vmul.f32 2.1237322e-06, %v8615_v24  ;;  %v8633_v48 = vadd.f32 %v739_v21, %v5610_v2 }
 0x333   : > { %v8625_v1 = vpop.eup %5137  ;;  %v2135_v35 = vsub.f32 1.0, %v2134_v51  ;;  %vm8627_vm5 = vcmp.eq.f32.partialorder %v2142_v10, 8.507059e+37  ;;  %v3323_v32 = vmul.f32 3.8918573e-05, %v8615_v24  ;;  %v8638_v6 = vmul.f32 0.70710677, %v8611_v41  ;;  %3927 = vmatmul.bf16.gmra.mxu1 %v3575_v17 }
 0x334   : > { %v3274_v23 = vmul.f32 %v3273_v28, %v8605_v8  ;;  %v3285_v59 = vmul.f32 %v3284_v25, %v8605_v8  ;;  %v3313_v11 = vadd.f32 0.00028619796, %v3312_v22  ;;  %v1987_v3 = vmul.f32 %v1986_v50, %v9539_v39 }
 0x335   : > { %v2136_v19 = vmul.f32 %v5136_v36, %v2135_v35  ;;  %vm2139_vm6 = vweird.f32 %v5136_v36  ;;  %v3324_v5 = vadd.f32 0.001143296, %v3323_v32  ;;  %v3350_v2 = vmul.f32 %v8638_v6, %v8638_v6  ;;  %v9540_v35 = vld [vmem:[#allocation59_spill] sm:$0xff] }
 0x336   : > { %v3275_v34 = vadd.f32 0.0036580483, %v3274_v23  ;;  %v3286_v10 = vadd.f32 0.014752088, %v3285_v59  ;;  %v3314_v30 = vmul.f32 %v3313_v11, %v8615_v24  ;;  %v2145_v21 = vor.u32 1.1754944e-38, %v2144_v57  ;;  %vm2140_vm7 = vmor %vm2138_vm4, %vm2139_vm6  ;;  %v9541_v11 = vld [vmem:[#allocation78_spill] sm:$0xff] }
 0x337   : > { %v2137_v61 = vadd.f32 %v5136_v36, %v2136_v19  ;;  %v3325_v62 = vmul.f32 %v3324_v5, %v8615_v24  ;;  %v8646_v13 = vmul.f32 0.70710677, %v8633_v48  ;;  %v8652_v25 = vmin.f32 %v3350_v2, 16.0 }
 0x338   : > { %v3276_v50 = vmul.f32 %v3275_v34, %v8605_v8  ;;  %v3287_v51 = vmul.f32 %v3286_v10, %v8605_v8  ;;  %v3315_v28 = vadd.f32 0.0036580483, %v3314_v30  ;;  %v4733_v22 = vclamps-f32 %v1987_v3, 1.0 }
 0x339   : > { %v2141_v18 = vsel %vm2140_vm7, %v5136_v36, %v2137_v61  ;;  %v3326_v17 = vadd.f32 0.014752088, %v3325_v62  ;;  %v3576_v57 = vpack.c.bf16 %v7482_v58, %v9540_v35  ;;  %v3352_v5 = vmul.f32 2.1237322e-06, %v8652_v25 }
 0x33a   : > { %v2146_v32 = vsel %vm8627_vm5, %v2145_v21, %v2141_v18  ;;  %v3277_v23 = vadd.f32 0.05243302, %v3276_v50  ;;  %v3288_v59 = vadd.f32 0.112945676, %v3287_v51  ;;  %v3316_v7 = vmul.f32 %v3315_v28, %v8615_v24 }
 0x33b   : > { %v2147_v39 = vmul.f32 %v2146_v32, %v9541_v11  ;;  %v3327_v19 = vmul.f32 %v3326_v17, %v8615_v24  ;;  %v3363_v3 = vmul.f32 3.8918573e-05, %v8652_v25  ;;  %v3200_v36 = vmul.f32 %v8589_v42, %v8379_v47  ;;  %v9542_v32 = vld [vmem:[#allocation11_spill] sm:$0xff] }
 0x33c   : > { %v3235_v58 = vadd.f32 0.0036580483, %v8593_v15  ;;  %v3289_v14 = vmul.f32 %v3288_v59, %v8605_v8  ;;  %v3390_v34 = vmul.f32 %v8646_v13, %v8646_v13  ;;  %v3457_v30 = vadd.f32 1.0, %v4733_v22 }
 0x33d   : > { %v4737_v10 = vclamps-f32 %v2147_v39, 1.0  ;;  %v3328_v2 = vadd.f32 0.112945676, %v3327_v19  ;;  %v3353_v61 = vadd.f32 0.00028619796, %v3352_v5  ;;  %v3214_v21 = vmul.f32 %v8625_v1, %v8566_v37 }
 0x33e   : > { %v3250_v62 = vadd.f32 0.4994258, %v8600_v20  ;;  %v3290_v50 = vadd.f32 0.4994258, %v3289_v14  ;;  %v3364_v51 = vadd.f32 0.001143296, %v3363_v3  ;;  %v3278_v47 = vmul.f32 %v3277_v23, %v8605_v8 }
 0x33f   : > { %v3461_v28 = vadd.f32 1.0, %v4737_v10  ;;  %v3317_v42 = vadd.f32 0.05243302, %v3316_v7  ;;  %v3329_v15 = vmul.f32 %v3328_v2, %v8615_v24  ;;  %3976 = vmatmul.bf16.gmra.mxu2 %v3576_v57  ;;  %v3236_v18 = vmul.f32 %v3235_v58, %v8460_v53  ;;  %v9543_v20 = vld [vmem:[#allocation71_spill] sm:$0xff] }
 0x340   : > { %v3291_v22 = vmul.f32 %v3290_v50, %v8605_v8  ;;  %v3365_v17 = vmul.f32 %v3364_v51, %v8652_v25  ;;  %v8677_v35 = vmin.f32 %v3390_v34, 16.0  ;;  %v3521_v59 = vmul.f32 %v3457_v30, %v9542_v32 }
 0x341   : > { %v3525_v11 = vmul.f32 %v3461_v28, %v9543_v20  ;;  %v3330_v39 = vadd.f32 0.4994258, %v3329_v15  ;;  %v3354_v19 = vmul.f32 %v3353_v61, %v8652_v25  ;;  %v3215_v23 = vsub.f32 1.0, %v3214_v21  ;;  %v9545_v20 = vld [vmem:[#allocation10_spill] sm:$0xff] }
 0x342   : > { %v3251_v7 = vmul.f32 %v3250_v62, %v8460_v53  ;;  %v8683_v5 = vadd.f32 1.0, %v3291_v22  ;;  %v3366_v57 = vadd.f32 0.014752088, %v3365_v17  ;;  %v3279_v58 = vadd.f32 0.18741608, %v3278_v47 }
 0x343   : > { %v3573_v3 = vpack.c.bf16 %v3525_v11, %v3521_v59  ;;  %v3318_v14 = vmul.f32 %v3317_v42, %v8615_v24  ;;  %v3331_v34 = vmul.f32 %v3330_v39, %v8615_v24  ;;  %v8687_v10 = vadd.f32 1.1283791, %v3200_v36  ;;  %v9544_v59 = vld [vmem:[#allocation13_spill] sm:$0xff] }
 0x344   : > { %v3224_v30 = vand.u32 2147483648, %v8566_v37  ;;  %5139 = vrcp.f32 %v8683_v5  ;;  %v3392_v2 = vmul.f32 2.1237322e-06, %v8677_v35  ;;  %v8694_v61 = vmul.f32 %v8581_v40, %v8522_v33  ;;  %v9546_v39 = vld [vmem:[#allocation21_spill] sm:$0xff] }
 0x345   : > { %v8696_v21 = vadd.f32 0.05243302, %v3236_v18  ;;  %4020 = vmatmul.bf16.gmra.mxu3 %v3573_v3  ;;  %v8698_v62 = vadd.f32 1.0, %v3331_v34  ;;  %v3355_v50 = vadd.f32 0.0036580483, %v3354_v19  ;;  %v3216_v51 = vmul.f32 %v8625_v1, %v3215_v23  ;;  %v9547_v19 = vld [vmem:[#allocation16_spill] sm:$0xff] }
 0x346   : > { %v8701_v36 = vadd.f32 1.0, %v3251_v7  ;;  %v3367_v28 = vmul.f32 %v3366_v57, %v8652_v25  ;;  %v3403_v47 = vmul.f32 3.8918573e-05, %v8677_v35  ;;  %v3280_v15 = vmul.f32 %v3279_v58, %v8605_v8 }
 0x347   : > { %v3319_v33 = vadd.f32 0.18741608, %v3318_v14  ;;  %5141 = vrcp.f32 %v8698_v62  ;;  %vm3218_vm8 = vweird.f32 %v8566_v37  ;;  %v8709_v40 = vor.u32 1.1754944e-38, %v3224_v30 }
 0x348   : > { %v3368_v18 = vadd.f32 0.112945676, %v3367_v28  ;;  %v3393_v22 = vadd.f32 0.00028619796, %v3392_v2  ;;  %v3356_v17 = vmul.f32 %v3355_v50, %v8652_v25  ;;  %v3404_v32 = vadd.f32 0.001143296, %v3403_v47 }
 0x349   : > { %v3578_v11 = vpack.c.bf16 %v9545_v20, %v9544_v59  ;;  %v3579_v23 = vpack.c.bf16 %v9547_v19, %v9546_v39  ;;  %v8717_v8 = vadd.f32 %v8625_v1, %v3216_v51  ;;  %vm3219_vm9 = vweird.f32 %v8625_v1  ;;  %v9548_v51 = vld [vmem:[#allocation28_spill] sm:$0xff]  ;;  %v9549_v28 = vld [vmem:[#allocation34_spill] sm:$0xff]  ;;  %v9550_v39 = vld [vmem:[#allocation17_spill] sm:$0xff] }
 0x34a   : > { %v5140_v7 = vpop.eup %5139  ;;  %5143 = vrcp.f32 %v8701_v36  ;;  %v3369_v57 = vmul.f32 %v3368_v18, %v8652_v25  ;;  %v3281_v3 = vadd.f32 1.1283791, %v3280_v15  ;;  %v3320_v14 = vmul.f32 %v3319_v33, %v8615_v24  ;;  %v9551_v19 = vld [vmem:[#allocation20_spill] sm:$0xff]  ;;  %vm8744_vm12 = vmor %vm3218_vm8, %vm3219_vm9 }
 0x34b   : > { %v3294_v58 = vmul.f32 %v5140_v7, %v8683_v5  ;;  %v3405_v34 = vmul.f32 %v3404_v32, %v8677_v35  ;;  %3883 = vmatmul.bf16.gmra.mxu0 %v3578_v11  ;;  %3932 = vmatmul.bf16.gmra.mxu1 %v3579_v23  ;;  %v3304_v30 = vand.u32 2147483648, %v8683_v5  ;;  %v3394_v50 = vmul.f32 %v3393_v22, %v8677_v35 }
 0x34c   : > { %v3370_v2 = vadd.f32 0.4994258, %v3369_v57  ;;  %v3580_v47 = vpack.c.bf16 %v9549_v28, %v9548_v51  ;;  %v3357_v18 = vadd.f32 0.05243302, %v3356_v17  ;;  %v3577_v12 = vpack.c.bf16 %v9551_v19, %v9550_v39 }
 0x34d   : > { %v5142_v59 = vpop.eup %5141  ;;  %v3295_v20 = vsub.f32 1.0, %v3294_v58  ;;  %v3406_v15 = vadd.f32 0.014752088, %v3405_v34  ;;  %vm3298_vm10 = vweird.f32 %v8683_v5  ;;  %v3302_v24 = vand.u32 2147483647, %v8683_v5 }
 0x34e   : > { %v3334_v33 = vmul.f32 %v5142_v59, %v8698_v62  ;;  %v3371_v32 = vmul.f32 %v3370_v2, %v8652_v25  ;;  %vm3299_vm11 = vweird.f32 %v5140_v7  ;;  %v3321_v22 = vadd.f32 1.1283791, %v3320_v14 }
 0x34f   : > { %v3296_v11 = vmul.f32 %v5140_v7, %v3295_v20  ;;  %v3407_v23 = vmul.f32 %v3406_v15, %v8677_v35  ;;  %3981 = vmatmul.bf16.gmra.mxu2 %v3580_v47  ;;  %v3305_v17 = vor.u32 1.1754944e-38, %v3304_v30  ;;  %v3395_v51 = vadd.f32 0.0036580483, %v3394_v50  ;;  %vm3300_vm13 = vmor %vm3298_vm10, %vm3299_vm11 }
 0x350   : > { %v8736_v57 = vpop.eup %5143  ;;  %v3335_v58 = vsub.f32 1.0, %v3334_v33  ;;  %v8738_v34 = vadd.f32 1.0, %v3371_v32  ;;  %v3344_v14 = vand.u32 2147483648, %v8698_v62  ;;  %v3358_v47 = vmul.f32 %v3357_v18, %v8652_v25 }
 0x351   : > { %v3297_v2 = vadd.f32 %v5140_v7, %v3296_v11  ;;  %v3408_v20 = vadd.f32 0.112945676, %v3407_v23  ;;  %vm3339_vm14 = vweird.f32 %v5142_v59  ;;  %v3342_v50 = vand.u32 2147483647, %v8698_v62 }
 0x352   : > { %v3336_v30 = vmul.f32 %v5142_v59, %v3335_v58  ;;  %5145 = vrcp.f32 %v8738_v34  ;;  %v3221_v15 = vsel %vm8744_vm12, %v8625_v1, %v8717_v8  ;;  %vm3303_vm15 = vcmp.eq.f32.partialorder %v3302_v24, 8.507059e+37 }
 0x353   : > { %v3301_v39 = vsel %vm3300_vm13, %v5140_v7, %v3297_v2  ;;  %v3409_v19 = vmul.f32 %v3408_v20, %v8677_v35  ;;  %v3282_v18 = vmul.f32 %v3281_v3, %v8564_v16  ;;  %vm3338_vm0 = vweird.f32 %v8698_v62 }
 0x354   : > { %v3306_v33 = vsel %vm3303_vm15, %v3305_v17, %v3301_v39  ;;  %v3337_v5 = vadd.f32 %v5142_v59, %v3336_v30  ;;  %v3322_v32 = vmul.f32 %v3321_v22, %v8587_v27  ;;  %vm3340_vm1 = vmor %vm3338_vm0, %vm3339_vm14  ;;  %v3345_v11 = vor.u32 1.1754944e-38, %v3344_v14 }
 0x355   : > { %v3359_v23 = vadd.f32 0.18741608, %v3358_v47  ;;  %v3410_v58 = vadd.f32 0.4994258, %v3409_v19  ;;  %4025 = vmatmul.bf16.gmra.mxu3 %v3577_v12  ;;  %v3307_v42 = vmul.f32 %v3306_v33, %v3282_v18  ;;  %vm3343_vm2 = vcmp.eq.f32.partialorder %v3342_v50, 8.507059e+37 }
 0x356   : > { %v3341_v28 = vsel %vm3340_vm1, %v5142_v59, %v3337_v5  ;;  %v3396_v1 = vmul.f32 %v3395_v51, %v8677_v35  ;;  %v3582_v16 = vpack.c.bf16 %v8328_v29, %v8123_v0  ;;  %v3583_v62 = vpack.c.bf16 %v8425_v43, %v8126_v49 }
 0x357   : > { %v3346_v7 = vsel %vm3343_vm2, %v3345_v11, %v3341_v28  ;;  %v3411_v8 = vmul.f32 %v3410_v58, %v8677_v35  ;;  %v4763_v3 = vclamps-f32 %v8694_v61, 1.0  ;;  %v3202_v12 = vmul.f32 %v8687_v10, %v8361_v31 }
 0x358   : > { %v5146_v27 = vpop.eup %5145  ;;  %v9554_v59 = vand.u32 2147483647, %v8566_v37  ;;  %v3347_v24 = vmul.f32 %v3346_v7, %v3322_v32  ;;  %v3360_v17 = vmul.f32 %v3359_v23, %v8652_v25  ;;  %v3238_v49 = vmul.f32 %v8696_v21, %v8460_v53  ;;  %v9556_v23 = vld [vmem:[#allocation44_spill] sm:$0xff] }
 0x359   : > { %v3374_v51 = vmul.f32 %v5146_v27, %v8738_v34  ;;  %v8776_v0 = vadd.f32 1.0, %v3411_v8  ;;  %v3254_v29 = vmul.f32 %v8736_v57, %v8701_v36  ;;  %v4766_v43 = vclamps-f32 %v3307_v42, 1.0 }
 0x35a   : > { %vm3223_vm3 = vcmp.eq.f32.partialorder %v9554_v59, 8.507059e+37  ;;  %v3397_v31 = vadd.f32 0.05243302, %v3396_v1  ;;  %v4767_v10 = vclamps-f32 %v3347_v24, 1.0  ;;  %v3584_v25 = vpack.c.bf16 %v8428_v63, %v8130_v56  ;;  %v3859_v24 = vpop.f32.mrf.mxu0 }
 0x35b   : > { %v3226_v22 = vsel %vm3223_vm3, %v8709_v40, %v3221_v15  ;;  %v3375_v37 = vsub.f32 1.0, %v3374_v51  ;;  %5147 = vrcp.f32 %v8776_v0  ;;  %3888 = vmatmul.bf16.gmra.mxu0 %v3582_v16  ;;  %3937 = vmatmul.bf16.gmra.mxu1 %v3583_v62  ;;  %v4761_v61 = vclamps-f32 %v8505_v38, 1.0 }
 0x35c   : > { %v9555_v40 = vclamps-f32 %v8528_v54, 1.0  ;;  %v3227_v21 = vmul.f32 %v3226_v22, %v3202_v12  ;;  %v3384_v14 = vand.u32 2147483648, %v8738_v34  ;;  %v3361_v47 = vadd.f32 1.1283791, %v3360_v17 }
 0x35d   : > { %v3376_v42 = vmul.f32 %v5146_v27, %v3375_v37  ;;  %vm3379_vm4 = vweird.f32 %v5146_v27  ;;  %v3382_v20 = vand.u32 2147483647, %v8738_v34  ;;  %v3487_v30 = vadd.f32 1.0, %v4763_v3 }
 0x35e   : > { %v3486_v2 = vadd.f32 1.0, %v9555_v40  ;;  %v3239_v50 = vadd.f32 0.18741608, %v3238_v49  ;;  %v3490_v15 = vadd.f32 1.0, %v4766_v43  ;;  %v3398_v39 = vmul.f32 %v3397_v31, %v8677_v35  ;;  %v4006_v49 = vpop.f32.mrf.mxu3 }
 0x35f   : > { %v3255_v19 = vsub.f32 1.0, %v3254_v29  ;;  %v3491_v56 = vadd.f32 1.0, %v4767_v10  ;;  %v3377_v63 = vadd.f32 %v5146_v27, %v3376_v42  ;;  %vm3378_vm5 = vweird.f32 %v8738_v34  ;;  %3986 = vmatmul.bf16.gmra.mxu2 %v3584_v25 }
 0x360   : > { %v4764_v38 = vclamps-f32 %v3227_v21, 1.0  ;;  %v802_v54 = vmul.f32 0.5, %v8554_v26  ;;  %v803_v18 = vmul.f32 0.5, %v8570_v55  ;;  %vm3380_vm6 = vmor %vm3378_vm5, %vm3379_vm4  ;;  %v3385_v33 = vor.u32 1.1754944e-38, %v3384_v14 }
 0x361   : > { %v8794_v5 = vpop.eup %5147  ;;  %v3362_v32 = vmul.f32 %v3361_v47, %v8638_v6  ;;  %v3381_v11 = vsel %vm3380_vm6, %v5146_v27, %v3377_v63  ;;  %vm3383_vm7 = vcmp.eq.f32.partialorder %v3382_v20, 8.507059e+37  ;;  %v3581_v58 = vpack.c.bf16 %v8103_v4, %v9556_v23 }
 0x362   : > { %v3554_v28 = vmul.f32 %v3490_v15, %v802_v54  ;;  %v3386_v1 = vsel %vm3383_vm7, %v3385_v33, %v3381_v11  ;;  %v3399_v34 = vadd.f32 0.18741608, %v3398_v39  ;;  %v3414_v7 = vmul.f32 %v8794_v5, %v8776_v0  ;;  %v9559_v15 = vld [vmem:[#allocation18_spill] sm:$0xff]  ;;  %v3861_v54 = vpop.f32.mrf.mxu0 }
 0x363   : > { %v3485_v26 = vadd.f32 1.0, %v4761_v61  ;;  %v3550_v55 = vmul.f32 %v3486_v2, %v8156_v60  ;;  %v3555_v8 = vmul.f32 %v3491_v56, %v803_v18  ;;  %v3387_v16 = vmul.f32 %v3386_v1, %v3362_v32  ;;  %v8810_v60 = vld [vmem:[%s9163_s4] ss:$0 sm:$0xff] }
 0x364   : > { %v800_v62 = vmul.f32 0.5, %v8337_v44  ;;  %v3488_v3 = vadd.f32 1.0, %v4764_v38  ;;  %v3256_v6 = vmul.f32 %v8736_v57, %v3255_v19  ;;  %v3415_v27 = vsub.f32 1.0, %v3414_v7  ;;  %v3908_v44 = vpop.f32.mrf.mxu1  ;;  %v280_v61 = vld [vmem:[%s5534_s20] sm:$0xff]  }
 0x365   : > { %v3551_v12 = vmul.f32 %v3487_v30, %v8190_v45  ;;  %v3240_v4 = vmul.f32 %v3239_v50, %v8460_v53  ;;  %vm3259_vm8 = vweird.f32 %v8736_v57  ;;  %v4768_v59 = vclamps-f32 %v3387_v16, 1.0  ;;  %4030 = vmatmul.bf16.gmra.mxu3 %v3581_v58  ;;  %v3957_v53 = vpop.f32.mrf.mxu2  ;;  %v9562_v58 = vld [vmem:[#allocation46_spill] sm:$0xff] }
 0x366   : > { %v804_v22 = vmul.f32 0.5, %v8611_v41  ;;  %v3400_v17 = vmul.f32 %v3399_v34, %v8677_v35  ;;  %v3416_v45 = vmul.f32 %v8794_v5, %v3415_v27  ;;  %v3586_v51 = vpack.c.bf16 %v3554_v28, %v3550_v55  ;;  %v4008_v23 = vpop.f32.mrf.mxu3 }
 0x367   : > { %v3492_v29 = vadd.f32 1.0, %v4768_v59  ;;  %vm3419_vm9 = vweird.f32 %v8794_v5  ;;  %v3587_v43 = vpack.c.bf16 %v3555_v8, %v3551_v12  ;;  %v3860_v31 = vadd.f32 %v8810_v60, %v3859_v24 }
 0x368   : > { %v3552_v10 = vmul.f32 %v3488_v3, %v800_v62  ;;  %v3257_v37 = vadd.f32 %v8736_v57, %v3256_v6  ;;  %v3417_v25 = vadd.f32 %v8794_v5, %v3416_v45  ;;  %v3424_v41 = vand.u32 2147483648, %v8776_v0 }
 0x369   : > { %v3556_v35 = vmul.f32 %v3492_v29, %v804_v22  ;;  %vm3418_vm10 = vweird.f32 %v8776_v0  ;;  %v3422_v40 = vand.u32 2147483647, %v8776_v0  ;;  %v3909_v2 = vadd.f32 %v3908_v44, %v3860_v31  ;;  %v282_v22 = vld [vmem:[%s5534_s20 + $0x8] sm:$0xff]  }
 0x36a   : > { %vm3258_vm11 = vweird.f32 %v8701_v36  ;;  %v3262_v21 = vand.u32 2147483647, %v8701_v36  ;;  %v3264_v14 = vand.u32 2147483648, %v8701_v36  ;;  %v3401_v47 = vadd.f32 1.1283791, %v3400_v17  ;;  %vm8828_vm12 = vmor %vm3418_vm10, %vm3419_vm9  ;;  %v3864_v12 = vpop.f32.mrf.mxu0 }
 0x36b   : > { %v3421_v20 = vsel %vm8828_vm12, %v8794_v5, %v3417_v25  ;;  %3893 = vmatmul.bf16.gmra.mxu0 %v3586_v51  ;;  %3942 = vmatmul.bf16.gmra.mxu1 %v3587_v43  ;;  %v3588_v0 = vpack.c.bf16 %v3556_v35, %v3552_v10  ;;  %v3958_v30 = vadd.f32 %v3957_v53, %v3909_v2  ;;  %v4046_v50 = vunpack.c.l.bf16 %v280_v61  ;;  %vm8839_vm13 = vmor %vm3258_vm11, %vm3259_vm8 }
 0x36c   : > { %v793_v39 = vmul.f32 0.5, %v9559_v15  ;;  %v3549_v36 = vmul.f32 %v3485_v26, %v8151_v46  ;;  %v3425_v56 = vor.u32 1.1754944e-38, %v3424_v41  ;;  %v3241_v63 = vadd.f32 1.1283791, %v3240_v4  ;;  %v3910_v18 = vpop.f32.mrf.mxu1  ;;  %v284_v15 = vld [vmem:[%s5534_s20 + $0x10] sm:$0xff]  }
 0x36d   : > { %v3261_v38 = vsel %vm8839_vm13, %v8736_v57, %v3257_v37  ;;  %vm3423_vm14 = vcmp.eq.f32.partialorder %v3422_v40, 8.507059e+37  ;;  %v4007_v33 = vadd.f32 %v4006_v49, %v3958_v30  ;;  %v3265_v5 = vor.u32 1.1754944e-38, %v3264_v14  ;;  %v3959_v11 = vpop.f32.mrf.mxu2 }
 0x36e   : > { %v3426_v32 = vsel %vm3423_vm14, %v3425_v56, %v3421_v20  ;;  %v3862_v46 = vadd.f32 %v8810_v60, %v3861_v54  ;;  %v3545_v28 = vmul.f32 %v9562_v58, %v793_v39  ;;  %vm3263_vm15 = vcmp.eq.f32.partialorder %v3262_v21, 8.507059e+37  ;;  %v4011_v44 = vpop.f32.mrf.mxu3 }
 0x36f   : > { %v3402_v1 = vmul.f32 %v3401_v47, %v8646_v13  ;;  %3991 = vmatmul.bf16.gmra.mxu2 %v3588_v0  ;;  %v8849_v34 = vadd.f32 %v4046_v50, %v4007_v33  ;;  %v3266_v7 = vsel %vm3263_vm15, %v3265_v5, %v3261_v38  ;;  %v3242_v26 = vmul.f32 %v3241_v63, %v8411_v52 }
 0x370   : > { %v3911_v57 = vadd.f32 %v3910_v18, %v3862_v46  ;;  %v3585_v8 = vpack.c.bf16 %v3549_v36, %v3545_v28  ;;  %v4047_v62 = vunpack.c.h.bf16 %v280_v61  ;;  %v3865_v4 = vadd.f32 %v8810_v60, %v3864_v12 }
 0x371   : > { %v3427_v55 = vmul.f32 %v3426_v32, %v3402_v1  ;;  %4078 = vadd.xlane.f32.xlu0 %v8849_v34  ;;  %v3267_v3 = vmul.f32 %v3266_v7, %v3242_v26  ;;  %v4048_v53 = vunpack.c.l.bf16 %v282_v22  ;;  %v805_v29 = vmul.f32 0.5, %v8633_v48 }
 0x372   : > { %v3960_v16 = vadd.f32 %v3959_v11, %v3911_v57  ;;  %v801_v31 = vmul.f32 0.5, %v8394_v9  ;;  %v3866_v37 = vpop.f32.mrf.mxu0  ;;  %v4049_v48 = vunpack.c.h.bf16 %v282_v22  ;;  %v4050_v56 = vunpack.c.l.bf16 %v284_v15 }
 0x373   : > { %v4769_v27 = vclamps-f32 %v3427_v55, 1.0  ;;  %v4765_v52 = vclamps-f32 %v3267_v3, 1.0  ;;  %v3867_v41 = vadd.f32 %v8810_v60, %v3866_v37  ;;  %v4051_v11 = vunpack.c.h.bf16 %v284_v15 }
 0x374   : > { %v4009_v6 = vadd.f32 %v4008_v23, %v3960_v16  ;;  %v3913_v13 = vpop.f32.mrf.mxu1 }
 0x375   : > { %4035 = vmatmul.bf16.gmra.mxu3 %v3585_v8  ;;  %v3962_v24 = vpop.f32.mrf.mxu2  ;;  %v3914_v17 = vadd.f32 %v3913_v13, %v3865_v4  ;;  %v3493_v45 = vadd.f32 1.0, %v4769_v27  ;;  %v3489_v49 = vadd.f32 1.0, %v4765_v52  ;;  %v286_v27 = vld [vmem:[%s5534_s20 + $0x18] sm:$0xff]  }
 0x376   : > { %v8854_v59 = vadd.f32 %v4047_v62, %v4009_v6  ;;  %v4013_v2 = vpop.f32.mrf.mxu3 }
 0x377   : > { %v3963_v51 = vadd.f32 %v3962_v24, %v3914_v17  ;;  %v3557_v10 = vmul.f32 %v3493_v45, %v805_v29  ;;  %v3553_v40 = vmul.f32 %v3489_v49, %v801_v31  ;;  %v4052_v24 = vunpack.c.l.bf16 %v286_v27 }
 0x379   : > { %4080 = vadd.xlane.f32.xlu0 %v8854_v59  ;;  %v4012_v43 = vadd.f32 %v4011_v44, %v3963_v51  ;;  %v3589_v14 = vpack.c.bf16 %v3557_v10, %v3553_v40 }
 0x37a   : > { %v3869_v9 = vpop.f32.mrf.mxu0 }
 0x37b   : > { %v8861_v61 = vadd.f32 %v4048_v53, %v4012_v43  ;;  %v3870_v0 = vadd.f32 %v8810_v60, %v3869_v9  ;;  %v4053_v43 = vunpack.c.h.bf16 %v286_v27 }
 0x37c   : > { %v3915_v25 = vpop.f32.mrf.mxu1 }
 0x37d   : > { %v3964_v35 = vpop.f32.mrf.mxu2  ;;  %v3916_v21 = vadd.f32 %v3915_v25, %v3867_v41  ;;  %4082 = vadd.xlane.f32.xlu1 %v8861_v61 }
 0x37e   : > { %v4016_v36 = vpop.f32.mrf.mxu3 }
 0x37f   : > { %v3965_v47 = vadd.f32 %v3964_v35, %v3916_v21  ;;  %v288_v35 = vld [vmem:[%s5534_s20 + $0x20] sm:$0xff]  }
 0x381   : > { %v4014_v42 = vadd.f32 %v4013_v2, %v3965_v47 }
 0x382   : > { %v3871_v38 = vpop.f32.mrf.mxu0 }
 0x383   : > { %v8865_v30 = vadd.f32 %v4049_v48, %v4014_v42  ;;  %v3872_v54 = vadd.f32 %v8810_v60, %v3871_v38 }
 0x384   : > { %v3918_v20 = vpop.f32.mrf.mxu1 }
 0x385   : > { %4040 = vmatmul.bf16.gmra.mxu3 %v3589_v14  ;;  %v3967_v50 = vpop.f32.mrf.mxu2  ;;  %v3919_v39 = vadd.f32 %v3918_v20, %v3870_v0  ;;  %4084 = vadd.xlane.f32.xlu1 %v8865_v30  ;;  %v4054_v14 = vunpack.c.l.bf16 %v288_v35 }
 0x386   : > { %v4018_v23 = vpop.f32.mrf.mxu3 }
 0x387   : > { %v3968_v19 = vadd.f32 %v3967_v50, %v3919_v39  ;;  %v4055_v39 = vunpack.c.h.bf16 %v288_v35 }
 0x389   : > { %v4017_v63 = vadd.f32 %v4016_v36, %v3968_v19 }
 0x38a   : > { %v3874_v1 = vpop.f32.mrf.mxu0 }
 0x38b   : > { %v8870_v18 = vadd.f32 %v4050_v56, %v4017_v63  ;;  %v3875_v62 = vadd.f32 %v8810_v60, %v3874_v1 }
 0x38c   : > { %v3920_v33 = vpop.f32.mrf.mxu1 }
 0x38d   : > { %v3969_v5 = vpop.f32.mrf.mxu2  ;;  %v3921_v32 = vadd.f32 %v3920_v33, %v3872_v54  ;;  %4086 = vadd.xlane.f32.xlu2 %v8870_v18  ;;  %v290_v33 = vld [vmem:[%s5534_s20 + $0x28] sm:$0xff]  }
 0x38f   : > { %v3970_v46 = vadd.f32 %v3969_v5, %v3921_v32  ;;  %v5247_v32 = vmov 128.0  }
 0x390   : > { %5149 = vrcp.f32 %v5247_v32 }
 0x391   : > { %v4019_v58 = vadd.f32 %v4018_v23, %v3970_v46  ;;  %v4056_v23 = vunpack.c.l.bf16 %v290_v33 }
 0x392   : > { %v3876_v26 = vpop.f32.mrf.mxu0 }
 0x393   : > { %v8873_v28 = vadd.f32 %v4051_v11, %v4019_v58  ;;  %v3877_v4 = vadd.f32 %v8810_v60, %v3876_v26 }
 0x394   : > { %v3923_v7 = vpop.f32.mrf.mxu1 }
 0x395   : > { %4088 = vadd.xlane.f32.xlu2 %v8873_v28  ;;  %v3924_v3 = vadd.f32 %v3923_v7, %v3875_v62 }
 0x396   : > { %v5150_v7 = vpop.eup %5149 }
 0x397   : > { %v4111_v62 = vmul.f32 128.0, %v5150_v7  ;;  %vm4115_vm0 = vweird.f32 %v5150_v7 }
 0x39c   : > { %v3925_v55 = vpop.f32.mrf.mxu1 }
 0x39d   : > { %v3926_v17 = vadd.f32 %v3925_v55, %v3877_v4  ;;  %v4112_v4 = vsub.f32 1.0, %v4111_v62 }
 0x3ae   : > { %v3879_v16 = vpop.f32.mrf.mxu0 }
 0x3af   : > { %v3880_v29 = vadd.f32 %v8810_v60, %v3879_v16 }
 0x3b0   : > { %v3928_v6 = vpop.f32.mrf.mxu1 }
 0x3b1   : > { %v3929_v25 = vadd.f32 %v3928_v6, %v3880_v29  ;;  %v4057_v6 = vunpack.c.h.bf16 %v290_v33 }
 0x3b2   : > { %v3972_v57 = vpop.f32.mrf.mxu2 }
 0x3b3   : > { %v3973_v13 = vadd.f32 %v3972_v57, %v3924_v3 }
 0x3b6   : > { %v3881_v52 = vpop.f32.mrf.mxu0 }
 0x3b7   : > { %v3882_v2 = vadd.f32 %v8810_v60, %v3881_v52  ;;  %v292_v52 = vld [vmem:[%s5534_s20 + $0x30] sm:$0xff]  }
 0x3b8   : > { %v3930_v53 = vpop.f32.mrf.mxu1  ;;  %v4058_v29 = vunpack.c.l.bf16 %v292_v52 }
 0x3b9   : > { %v3931_v9 = vadd.f32 %v3930_v53, %v3882_v2  ;;  %v4113_v53 = vmul.f32 %v5150_v7, %v4112_v4 }
 0x3ba   : > { %v3974_v8 = vpop.f32.mrf.mxu2 }
 0x3bb   : > { %v3975_v51 = vadd.f32 %v3974_v8, %v3926_v17 }
 0x3c2   : > { %v3977_v12 = vpop.f32.mrf.mxu2 }
 0x3c3   : > { %v3978_v40 = vadd.f32 %v3977_v12, %v3929_v25 }
 0x3c8   : > { %v4021_v44 = vpop.f32.mrf.mxu3  ;;  %v3884_v37 = vpop.f32.mrf.mxu0 }
 0x3c9   : > { %v4022_v22 = vadd.f32 %v4021_v44, %v3973_v13  ;;  %v3933_v21 = vpop.f32.mrf.mxu1  ;;  %v3885_v15 = vadd.f32 %v8810_v60, %v3884_v37  ;;  %v4114_v37 = vadd.f32 %v5150_v7, %v4113_v53 }
 0x3ca   : > { %v3979_v49 = vpop.f32.mrf.mxu2 }
 0x3cb   : > { %v8879_v45 = vadd.f32 %v4052_v24, %v4022_v22  ;;  %v3980_v50 = vadd.f32 %v3979_v49, %v3931_v9  ;;  %v3934_v38 = vadd.f32 %v3933_v21, %v3885_v15 }
 0x3cd   : > { %4090 = vadd.xlane.f32.xlu0 %v8879_v45 }
 0x3d0   : > { %v4023_v31 = vpop.f32.mrf.mxu3  ;;  %v3886_v0 = vpop.f32.mrf.mxu0 }
 0x3d1   : > { %v4024_v10 = vadd.f32 %v4023_v31, %v3975_v51  ;;  %v3935_v56 = vpop.f32.mrf.mxu1  ;;  %v3887_v11 = vadd.f32 %v8810_v60, %v3886_v0 }
 0x3d2   : > { %v3982_v48 = vpop.f32.mrf.mxu2 }
 0x3d3   : > { %v8883_v41 = vadd.f32 %v4053_v43, %v4024_v10  ;;  %v3983_v5 = vadd.f32 %v3982_v48, %v3934_v38  ;;  %v3936_v57 = vadd.f32 %v3935_v56, %v3887_v11  ;;  %v294_v56 = vld [vmem:[%s5534_s20 + $0x38] sm:$0xff]   ;;  %s270_s20 = sand.u32 1, %s5237_s25  }
 0x3d4   : > { %v4060_v32 = vunpack.c.l.bf16 %v294_v56  ;;  %s4543_s14 = sshll.u32 %s270_s20, 7  ;;  %s4462_s28 = scalar_lea.sflag [#allocation3], %s270_s20 }
 0x3d5   : > { %4092 = vadd.xlane.f32.xlu1 %v8883_v41  ;;  %s9048_s15 = scalar_lea.vmem [#allocation2], %s4543_s14 }
 0x3d6   : > { %s4474_s13 = sshll.u32 %s9048_s15, 4  ;;  %s4475_s13 = int_to_ptr.vmem [resolvable:$true] %s4474_s13 }
 0x3d8   : > { %v4026_v47 = vpop.f32.mrf.mxu3  ;;  %v3889_v46 = vpop.f32.mrf.mxu0 }
 0x3d9   : > { %v4027_v42 = vadd.f32 %v4026_v47, %v3978_v40  ;;  %v3938_v26 = vpop.f32.mrf.mxu1  ;;  %v3890_v3 = vadd.f32 %v8810_v60, %v3889_v46 }
 0x3da   : > { %v3984_v63 = vpop.f32.mrf.mxu2 }
 0x3db   : > { %v8888_v20 = vadd.f32 %v4054_v14, %v4027_v42  ;;  %v3985_v16 = vadd.f32 %v3984_v63, %v3936_v57  ;;  %v3939_v24 = vadd.f32 %v3938_v26, %v3890_v3  ;;  %v8909_v14 = vsel %vm4115_vm0, %v5150_v7, %v4114_v37 }
 0x3dc   : > { %v4059_v42 = vunpack.c.h.bf16 %v292_v52 }
 0x3dd   : > { %4094 = vadd.xlane.f32.xlu2 %v8888_v20 }
 0x3e0   : > { %v4028_v36 = vpop.f32.mrf.mxu3  ;;  %v3891_v12 = vpop.f32.mrf.mxu0 }
 0x3e1   : > { %v4029_v19 = vadd.f32 %v4028_v36, %v3980_v50  ;;  %v3940_v22 = vpop.f32.mrf.mxu1  ;;  %v3892_v49 = vadd.f32 %v8810_v60, %v3891_v12 }
 0x3e2   : > { %v3987_v8 = vpop.f32.mrf.mxu2 }
 0x3e3   : > { %v8892_v54 = vadd.f32 %v4055_v39, %v4029_v19  ;;  %v3988_v17 = vadd.f32 %v3987_v8, %v3939_v24  ;;  %v3941_v25 = vadd.f32 %v3940_v22, %v3892_v49 }
 0x3e4   : > { %v4079_v40 = vpop.xlane.xlu0 %4078 }
 0x3e5   : > { %4096 = vadd.xlane.f32.xlu0 %v8892_v54  ;;  %v4117_v15 = vmul.f32 %v8909_v14, %v4079_v40 }
 0x3e7   : > { %v8918_v38 = vsub.f32 %v8849_v34, %v4117_v15 }
 0x3e8   : > { %v4031_v58 = vpop.f32.mrf.mxu3  ;;  %v3894_v10 = vpop.f32.mrf.mxu0 }
 0x3e9   : > { %v4032_v1 = vadd.f32 %v4031_v58, %v3983_v5  ;;  %v3895_v47 = vadd.f32 %v8810_v60, %v3894_v10  ;;  %v3943_v48 = vpop.f32.mrf.mxu1  ;;  %v4149_v58 = vmul.f32 %v8918_v38, %v8918_v38 }
 0x3ea   : > { %v3989_v51 = vpop.f32.mrf.mxu2 }
 0x3eb   : > { %v8897_v55 = vadd.f32 %v4056_v23, %v4032_v1  ;;  %v3990_v2 = vadd.f32 %v3989_v51, %v3941_v25  ;;  %v3944_v39 = vadd.f32 %v3943_v48, %v3895_v47 }
 0x3ec   : > { %v4081_v33 = vpop.xlane.xlu0 %4080 }
 0x3ed   : > { %4098 = vadd.xlane.f32.xlu1 %v8897_v55  ;;  %v4118_v1 = vmul.f32 %v8909_v14, %v4081_v33 }
 0x3ef   : > { %v8929_v62 = vsub.f32 %v8854_v59, %v4118_v1 }
 0x3f0   : > { %v4033_v27 = vpop.f32.mrf.mxu3  ;;  %v4083_v21 = vpop.xlane.xlu1 %4082 }
 0x3f1   : > { %v4034_v13 = vadd.f32 %v4033_v27, %v3985_v16  ;;  %v3896_v19 = vpop.f32.mrf.mxu0  ;;  %v3945_v7 = vpop.f32.mrf.mxu1  ;;  %v4119_v4 = vmul.f32 %v8909_v14, %v4083_v21 }
 0x3f2   : > { %v3992_v0 = vpop.f32.mrf.mxu2  ;;  %v3897_v5 = vadd.f32 %v8810_v60, %v3896_v19 }
 0x3f3   : > { %v8901_v44 = vadd.f32 %v4057_v6, %v4034_v13  ;;  %v3993_v63 = vadd.f32 %v3992_v0, %v3944_v39  ;;  %v4061_v6 = vunpack.c.h.bf16 %v294_v56  ;;  %v4150_v13 = vmul.f32 %v8929_v62, %v8929_v62 }
 0x3f4   : > { %v3946_v8 = vadd.f32 %v3945_v7, %v3897_v5  ;;  %v8944_v59 = vsub.f32 %v8861_v61, %v4119_v4 }
 0x3f5   : > { %4100 = vadd.xlane.f32.xlu2 %v8901_v44 }
 0x3f6   : > { %v4151_v51 = vmul.f32 %v8944_v59, %v8944_v59 }
 0x3f8   : > { %v4036_v43 = vpop.f32.mrf.mxu3  ;;  %v4085_v46 = vpop.xlane.xlu1 %4084 }
 0x3f9   : > { %v4037_v31 = vadd.f32 %v4036_v43, %v3988_v17  ;;  %v4120_v26 = vmul.f32 %v8909_v14, %v4085_v46 }
 0x3fa   : > { %v3994_v57 = vpop.f32.mrf.mxu2 }
 0x3fb   : > { %v8906_v35 = vadd.f32 %v4058_v29, %v4037_v31  ;;  %v3995_v60 = vadd.f32 %v3994_v57, %v3946_v8  ;;  %v8932_v3 = vsub.f32 %v8865_v30, %v4120_v26 }
 0x3fd   : > { %4102 = vadd.xlane.f32.xlu0 %v8906_v35  ;;  %v4152_v52 = vmul.f32 %v8932_v3, %v8932_v3 }
 0x400   : > { %v4038_v9 = vpop.f32.mrf.mxu3  ;;  %v4087_v34 = vpop.xlane.xlu2 %4086 }
 0x401   : > { %v4039_v50 = vadd.f32 %v4038_v9, %v3990_v2  ;;  %v4121_v24 = vmul.f32 %v8909_v14, %v4087_v34 }
 0x403   : > { %v8913_v36 = vadd.f32 %v4059_v42, %v4039_v50  ;;  %v8947_v30 = vsub.f32 %v8870_v18, %v4121_v24 }
 0x405   : > { %4104 = vadd.xlane.f32.xlu1 %v8913_v36  ;;  %v4153_v53 = vmul.f32 %v8947_v30, %v8947_v30 }
 0x408   : > { %v4041_v11 = vpop.f32.mrf.mxu3  ;;  %v4089_v17 = vpop.xlane.xlu2 %4088 }
 0x409   : > { %v4042_v23 = vadd.f32 %v4041_v11, %v3993_v63  ;;  %v4122_v49 = vmul.f32 %v8909_v14, %v4089_v17 }
 0x40b   : > { %v8925_v16 = vadd.f32 %v4060_v32, %v4042_v23  ;;  %v8955_v29 = vsub.f32 %v8873_v28, %v4122_v49 }
 0x40d   : > { %4106 = vadd.xlane.f32.xlu2 %v8925_v16  ;;  %4165 = vadd.xlane.f32.xlu1 %v4149_v58  ;;  %v4154_v61 = vmul.f32 %v8955_v29, %v8955_v29 }
 0x410   : > { %v4043_v27 = vpop.f32.mrf.mxu3 }
 0x411   : > { %v4044_v12 = vadd.f32 %v4043_v27, %v3995_v60 }
 0x413   : > { %v8940_v22 = vadd.f32 %v4061_v6, %v4044_v12 }
 0x415   : > { %4108 = vadd.xlane.f32.xlu0 %v8940_v22  ;;  %4167 = vadd.xlane.f32.xlu2 %v4150_v13 }
 0x416   : > { %4171 = vadd.xlane.f32.xlu1 %v4152_v52 }
 0x41d   : > { %4169 = vadd.xlane.f32.xlu0 %v4151_v51  ;;  %4173 = vadd.xlane.f32.xlu2 %v4153_v53 }
 0x425   : > { %4175 = vadd.xlane.f32.xlu0 %v4154_v61 }
 0x440   : > { %v4091_v18 = vpop.xlane.xlu0 %4090 }
 0x441   : > { %v4123_v43 = vmul.f32 %v8909_v14, %v4091_v18 }
 0x443   : > { %v8961_v31 = vsub.f32 %v8879_v45, %v4123_v43 }
 0x445   : > { %v4155_v10 = vmul.f32 %v8961_v31, %v8961_v31 }
 0x447   : > { %4177 = vadd.xlane.f32.xlu1 %v4155_v10 }
 0x448   : > { %v4093_v37 = vpop.xlane.xlu1 %4092 }
 0x449   : > { %v4124_v25 = vmul.f32 %v8909_v14, %v4093_v37 }
 0x44b   : > { %v8967_v28 = vsub.f32 %v8883_v41, %v4124_v25 }
 0x44d   : > { %v4156_v40 = vmul.f32 %v8967_v28, %v8967_v28 }
 0x44f   : > { %4179 = vadd.xlane.f32.xlu2 %v4156_v40 }
 0x450   : > { %v4095_v2 = vpop.xlane.xlu2 %4094 }
 0x451   : > { %v4125_v21 = vmul.f32 %v8909_v14, %v4095_v2 }
 0x453   : > { %v8973_v45 = vsub.f32 %v8888_v20, %v4125_v21  ;;  %v9032_v21 = vld [vmem:[%s9164_s5] ss:$0 sm:$0xff] }
 0x455   : > { %v4157_v47 = vmul.f32 %v8973_v45, %v8973_v45 }
 0x457   : > { %4181 = vadd.xlane.f32.xlu0 %v4157_v47 }
 0x458   : > { %v4097_v48 = vpop.xlane.xlu0 %4096 }
 0x459   : > { %v4126_v42 = vmul.f32 %v8909_v14, %v4097_v48 }
 0x45b   : > { %v8979_v41 = vsub.f32 %v8892_v54, %v4126_v42 }
 0x45d   : > { %v4158_v9 = vmul.f32 %v8979_v41, %v8979_v41 }
 0x45f   : > { %4183 = vadd.xlane.f32.xlu1 %v4158_v9  ;;  %v9039_v9 = vld [vmem:[%s9165_s6] ss:$0 sm:$0xff] }
 0x460   : > { %v4099_v0 = vpop.xlane.xlu1 %4098 }
 0x461   : > { %v4127_v50 = vmul.f32 %v8909_v14, %v4099_v0 }
 0x463   : > { %v8985_v20 = vsub.f32 %v8897_v55, %v4127_v50 }
 0x465   : > { %v4159_v15 = vmul.f32 %v8985_v20, %v8985_v20 }
 0x467   : > { %4185 = vadd.xlane.f32.xlu2 %v4159_v15 }
 0x468   : > { %v4101_v39 = vpop.xlane.xlu2 %4100 }
 0x469   : > { %v4128_v19 = vmul.f32 %v8909_v14, %v4101_v39 }
 0x46b   : > { %v8991_v54 = vsub.f32 %v8901_v44, %v4128_v19 }
 0x46d   : > { %v4160_v56 = vmul.f32 %v8991_v54, %v8991_v54 }
 0x46f   : > { %4187 = vadd.xlane.f32.xlu0 %v4160_v56 }
 0x470   : > { %v4103_v63 = vpop.xlane.xlu0 %4102 }
 0x471   : > { %v4129_v33 = vmul.f32 %v8909_v14, %v4103_v63 }
 0x473   : > { %v8997_v55 = vsub.f32 %v8906_v35, %v4129_v33 }
 0x475   : > { %v4161_v5 = vmul.f32 %v8997_v55, %v8997_v55 }
 0x477   : > { %4189 = vadd.xlane.f32.xlu1 %v4161_v5 }
 0x478   : > { %v4105_v32 = vpop.xlane.xlu1 %4104 }
 0x479   : > { %v4130_v46 = vmul.f32 %v8909_v14, %v4105_v32 }
 0x47b   : > { %v9003_v44 = vsub.f32 %v8913_v36, %v4130_v46 }
 0x47d   : > { %v4162_v11 = vmul.f32 %v9003_v44, %v9003_v44 }
 0x47f   : > { %4191 = vadd.xlane.f32.xlu2 %v4162_v11 }
 0x480   : > { %v4107_v23 = vpop.xlane.xlu2 %4106  ;;  %v4166_v58 = vpop.xlane.xlu1 %4165 }
 0x481   : > { %v4131_v1 = vmul.f32 %v8909_v14, %v4107_v23  ;;  %v4197_v35 = vmul.f32 %v4166_v58, %v8909_v14 }
 0x483   : > { %v9010_v7 = vsub.f32 %v8925_v16, %v4131_v1  ;;  %v4213_v57 = vadd.f32 1e-05, %v4197_v35 }
 0x485   : > { %v4163_v26 = vmul.f32 %v9010_v7, %v9010_v7  ;;  %5151 = vrsqrt.f32 %v4213_v57  ;;  %vm4235_vm2 = vweird.f32 %v4213_v57 }
 0x487   : > { %4193 = vadd.xlane.f32.xlu0 %v4163_v26 }
 0x488   : > { %v4109_v36 = vpop.xlane.xlu0 %4108  ;;  %v4168_v8 = vpop.xlane.xlu2 %4167 }
 0x489   : > { %v4132_v34 = vmul.f32 %v8909_v14, %v4109_v36  ;;  %v4198_v60 = vmul.f32 %v4168_v8, %v8909_v14  ;;  %v4172_v6 = vpop.xlane.xlu1 %4171 }
 0x48a   : > { %v4200_v27 = vmul.f32 %v4172_v6, %v8909_v14 }
 0x48b   : > { %v5152_v12 = vpop.eup %5151  ;;  %v9018_v13 = vsub.f32 %v8940_v22, %v4132_v34  ;;  %v4214_v16 = vadd.f32 1e-05, %v4198_v60 }
 0x48c   : > { %v4230_v4 = vmul.f32 %v5152_v12, %v4213_v57  ;;  %v4216_v24 = vadd.f32 1e-05, %v4200_v27  ;;  %vm4236_vm1 = vweird.f32 %v5152_v12 }
 0x48d   : > { %v4164_v52 = vmul.f32 %v9018_v13, %v9018_v13  ;;  %5153 = vrsqrt.f32 %v4214_v16  ;;  %vm4237_vm3 = vmor %vm4235_vm2, %vm4236_vm1  ;;  %vm4245_vm6 = vweird.f32 %v4214_v16 }
 0x48e   : > { %v4231_v17 = vmul.f32 %v5152_v12, %v4230_v4  ;;  %5155 = vrsqrt.f32 %v4216_v24  ;;  %vm4265_vm8 = vweird.f32 %v4216_v24 }
 0x48f   : > { %4195 = vadd.xlane.f32.xlu1 %v4164_v52 }
 0x490   : > { %v4232_v51 = vmul.f32 0.5, %v4231_v17  ;;  %v4170_v53 = vpop.xlane.xlu0 %4169  ;;  %v4174_v49 = vpop.xlane.xlu2 %4173 }
 0x491   : > { %v4199_v61 = vmul.f32 %v4170_v53, %v8909_v14  ;;  %v4201_v18 = vmul.f32 %v4174_v49, %v8909_v14 }
 0x492   : > { %v4233_v22 = vsub.f32 1.5, %v4232_v51 }
 0x493   : > { %v5154_v43 = vpop.eup %5153  ;;  %v9024_v10 = vadd.f32 1e-05, %v4199_v61  ;;  %v9026_v37 = vadd.f32 1e-05, %v4201_v18 }
 0x494   : > { %v5156_v25 = vpop.eup %5155  ;;  %v4234_v40 = vmul.f32 %v5152_v12, %v4233_v22  ;;  %v4240_v2 = vmul.f32 %v5154_v43, %v4214_v16  ;;  %vm4246_vm4 = vweird.f32 %v5154_v43 }
 0x495   : > { %5157 = vrsqrt.f32 %v9024_v10  ;;  %v4260_v47 = vmul.f32 %v5156_v25, %v4216_v24  ;;  %vm4266_vm5 = vweird.f32 %v5156_v25  ;;  %vm4247_vm7 = vmor %vm4245_vm6, %vm4246_vm4  ;;  %vm4255_vm12 = vweird.f32 %v9024_v10 }
 0x496   : > { %v4238_v48 = vsel %vm4237_vm3, %v5152_v12, %v4234_v40  ;;  %v4241_v42 = vmul.f32 %v5154_v43, %v4240_v2  ;;  %5159 = vrsqrt.f32 %v9026_v37  ;;  %vm4267_vm9 = vmor %vm4265_vm8, %vm4266_vm5  ;;  %vm4275_vm14 = vweird.f32 %v9026_v37 }
 0x497   : > { %v4389_v0 = vmul.f32 %v4238_v48, %v8918_v38  ;;  %v4261_v50 = vmul.f32 %v5156_v25, %v4260_v47 }
 0x498   : > { %v4242_v15 = vmul.f32 0.5, %v4241_v42  ;;  %v4176_v39 = vpop.xlane.xlu0 %4175 }
 0x499   : > { %v4409_v19 = vmul.f32 %v9032_v21, %v4389_v0  ;;  %v4262_v56 = vmul.f32 0.5, %v4261_v50  ;;  %v4202_v63 = vmul.f32 %v4176_v39, %v8909_v14 }
 0x49a   : > { %v4243_v33 = vsub.f32 1.5, %v4242_v15 }
 0x49b   : > { %v5158_v5 = vpop.eup %5157  ;;  %v4429_v32 = vadd.f32 %v9039_v9, %v4409_v19  ;;  %v4263_v46 = vsub.f32 1.5, %v4262_v56  ;;  %v4218_v11 = vadd.f32 1e-05, %v4202_v63 }
 0x49c   : > { %v5160_v23 = vpop.eup %5159  ;;  %v4244_v58 = vmul.f32 %v5154_v43, %v4243_v33  ;;  %v4250_v38 = vmul.f32 %v5158_v5, %v9024_v10  ;;  %vm4256_vm10 = vweird.f32 %v5158_v5 }
 0x49d   : > { %4445 = vst [vmem:[%s9048_s15] sm:$0xff] %v4429_v32  ;;  %v4264_v1 = vmul.f32 %v5156_v25, %v4263_v46  ;;  %v4270_v35 = vmul.f32 %v5160_v23, %v9026_v37  ;;  %5161 = vrsqrt.f32 %v4218_v11  ;;  %vm4276_vm11 = vweird.f32 %v5160_v23  ;;  %vm4257_vm13 = vmor %vm4255_vm12, %vm4256_vm10 }
 0x49e   : > { %v4248_v57 = vsel %vm4247_vm7, %v5154_v43, %v4244_v58  ;;  %v4251_v26 = vmul.f32 %v5158_v5, %v4250_v38  ;;  %vm4277_vm15 = vmor %vm4275_vm14, %vm4276_vm11  ;;  %vm4285_vm1 = vweird.f32 %v4218_v11 }
 0x49f   : > { %v4390_v36 = vmul.f32 %v4248_v57, %v8929_v62  ;;  %v4268_v8 = vsel %vm4267_vm9, %v5156_v25, %v4264_v1  ;;  %v4271_v34 = vmul.f32 %v5160_v23, %v4270_v35 }
 0x4a0   : > { %v4252_v60 = vmul.f32 0.5, %v4251_v26  ;;  %v4392_v6 = vmul.f32 %v4268_v8, %v8932_v3 }
 0x4a1   : > { %v4410_v27 = vmul.f32 %v9032_v21, %v4390_v36  ;;  %v4272_v12 = vmul.f32 0.5, %v4271_v34 }
 0x4a2   : > { %v4253_v16 = vsub.f32 1.5, %v4252_v60  ;;  %v4412_v4 = vmul.f32 %v9032_v21, %v4392_v6 }
 0x4a3   : > { %v5162_v24 = vpop.eup %5161  ;;  %v4430_v52 = vadd.f32 %v9039_v9, %v4410_v27  ;;  %v4273_v17 = vsub.f32 1.5, %v4272_v12 }
 0x4a4   : > { %v4254_v62 = vmul.f32 %v5158_v5, %v4253_v16  ;;  %v4432_v51 = vadd.f32 %v9039_v9, %v4412_v4  ;;  %v4280_v53 = vmul.f32 %v5162_v24, %v4218_v11  ;;  %vm4286_vm0 = vweird.f32 %v5162_v24 }
 0x4a5   : > { %4446 = vst [vmem:[%s9048_s15 + $0x8] sm:$0xff] %v4430_v52  ;;  %v4274_v3 = vmul.f32 %v5160_v23, %v4273_v17  ;;  %vm4287_vm2 = vmor %vm4285_vm1, %vm4286_vm0 }
 0x4a6   : > { %v4258_v49 = vsel %vm4257_vm13, %v5158_v5, %v4254_v62  ;;  %4448 = vst [vmem:[%s9048_s15 + $0x18] sm:$0xff] %v4432_v51  ;;  %v4281_v61 = vmul.f32 %v5162_v24, %v4280_v53 }
 0x4a7   : > { %v4391_v18 = vmul.f32 %v4258_v49, %v8944_v59  ;;  %v4278_v22 = vsel %vm4277_vm15, %v5160_v23, %v4274_v3 }
 0x4a8   : > { %v4393_v43 = vmul.f32 %v4278_v22, %v8947_v30  ;;  %v4282_v10 = vmul.f32 0.5, %v4281_v61 }
 0x4a9   : > { %v4411_v25 = vmul.f32 %v9032_v21, %v4391_v18 }
 0x4aa   : > { %v4413_v40 = vmul.f32 %v9032_v21, %v4393_v43  ;;  %v4283_v2 = vsub.f32 1.5, %v4282_v10 }
 0x4ab   : > { %v4431_v37 = vadd.f32 %v9039_v9, %v4411_v25 }
 0x4ac   : > { %v4433_v47 = vadd.f32 %v9039_v9, %v4413_v40  ;;  %v4284_v48 = vmul.f32 %v5162_v24, %v4283_v2 }
 0x4ad   : > { %4447 = vst [vmem:[%s9048_s15 + $0x10] sm:$0xff] %v4431_v37 }
 0x4ae   : > { %4449 = vst [vmem:[%s9048_s15 + $0x20] sm:$0xff] %v4433_v47  ;;  %v4288_v59 = vsel %vm4287_vm2, %v5162_v24, %v4284_v48 }
 0x4af   : > { %v4394_v30 = vmul.f32 %v4288_v59, %v8955_v29 }
 0x4b1   : > { %v4414_v42 = vmul.f32 %v9032_v21, %v4394_v30 }
 0x4b3   : > { %v4434_v0 = vadd.f32 %v9039_v9, %v4414_v42 }
 0x4b5   : > { %4450 = vst [vmem:[%s9048_s15 + $0x28] sm:$0xff] %v4434_v0 }
 0x4ba   : > { %v4178_v50 = vpop.xlane.xlu1 %4177 }
 0x4bb   : > { %v4203_v15 = vmul.f32 %v4178_v50, %v8909_v14 }
 0x4bd   : > { %v4219_v39 = vadd.f32 1e-05, %v4203_v15 }
 0x4bf   : > { %5163 = vrsqrt.f32 %v4219_v39  ;;  %vm4295_vm4 = vweird.f32 %v4219_v39 }
 0x4c2   : > { %v4180_v19 = vpop.xlane.xlu2 %4179 }
 0x4c3   : > { %v4204_v56 = vmul.f32 %v4180_v19, %v8909_v14 }
 0x4c5   : > { %v5164_v63 = vpop.eup %5163  ;;  %v4220_v33 = vadd.f32 1e-05, %v4204_v56 }
 0x4c6   : > { %v4290_v5 = vmul.f32 %v5164_v63, %v4219_v39  ;;  %vm4296_vm3 = vweird.f32 %v5164_v63 }
 0x4c7   : > { %5165 = vrsqrt.f32 %v4220_v33  ;;  %vm4297_vm5 = vmor %vm4295_vm4, %vm4296_vm3  ;;  %vm4305_vm7 = vweird.f32 %v4220_v33 }
 0x4c8   : > { %v4291_v32 = vmul.f32 %v5164_v63, %v4290_v5 }
 0x4ca   : > { %v4292_v46 = vmul.f32 0.5, %v4291_v32  ;;  %v4182_v29 = vpop.xlane.xlu0 %4181 }
 0x4cb   : > { %v4205_v11 = vmul.f32 %v4182_v29, %v8909_v14 }
 0x4cc   : > { %v4293_v23 = vsub.f32 1.5, %v4292_v46 }
 0x4cd   : > { %v5166_v58 = vpop.eup %5165  ;;  %v4221_v38 = vadd.f32 1e-05, %v4205_v11 }
 0x4ce   : > { %v4294_v1 = vmul.f32 %v5164_v63, %v4293_v23  ;;  %v4300_v35 = vmul.f32 %v5166_v58, %v4220_v33  ;;  %vm4306_vm6 = vweird.f32 %v5166_v58 }
 0x4cf   : > { %5167 = vrsqrt.f32 %v4221_v38  ;;  %vm4307_vm8 = vmor %vm4305_vm7, %vm4306_vm6  ;;  %vm4315_vm10 = vweird.f32 %v4221_v38 }
 0x4d0   : > { %v4298_v57 = vsel %vm4297_vm5, %v5164_v63, %v4294_v1  ;;  %v4301_v26 = vmul.f32 %v5166_v58, %v4300_v35 }
 0x4d1   : > { %v4395_v36 = vmul.f32 %v4298_v57, %v8961_v31 }
 0x4d2   : > { %v4302_v8 = vmul.f32 0.5, %v4301_v26  ;;  %v4184_v34 = vpop.xlane.xlu1 %4183 }
 0x4d3   : > { %v4415_v60 = vmul.f32 %v9032_v21, %v4395_v36  ;;  %v4206_v6 = vmul.f32 %v4184_v34, %v8909_v14 }
 0x4d4   : > { %v4303_v27 = vsub.f32 1.5, %v4302_v8 }
 0x4d5   : > { %v5168_v12 = vpop.eup %5167  ;;  %v4435_v16 = vadd.f32 %v9039_v9, %v4415_v60  ;;  %v4222_v4 = vadd.f32 1e-05, %v4206_v6 }
 0x4d6   : > { %v4304_v24 = vmul.f32 %v5166_v58, %v4303_v27  ;;  %v4310_v52 = vmul.f32 %v5168_v12, %v4221_v38  ;;  %vm4316_vm9 = vweird.f32 %v5168_v12 }
 0x4d7   : > { %4451 = vst [vmem:[%s9048_s15 + $0x30] sm:$0xff] %v4435_v16  ;;  %5169 = vrsqrt.f32 %v4222_v4  ;;  %vm4317_vm11 = vmor %vm4315_vm10, %vm4316_vm9  ;;  %vm4325_vm13 = vweird.f32 %v4222_v4 }
 0x4d8   : > { %v4308_v31 = vsel %vm4307_vm8, %v5166_v58, %v4304_v24  ;;  %v4311_v17 = vmul.f32 %v5168_v12, %v4310_v52 }
 0x4d9   : > { %v4396_v62 = vmul.f32 %v4308_v31, %v8967_v28 }
 0x4da   : > { %v4312_v51 = vmul.f32 0.5, %v4311_v17  ;;  %v4186_v53 = vpop.xlane.xlu2 %4185 }
 0x4db   : > { %v4416_v3 = vmul.f32 %v9032_v21, %v4396_v62  ;;  %v4207_v49 = vmul.f32 %v4186_v53, %v8909_v14 }
 0x4dc   : > { %v4313_v61 = vsub.f32 1.5, %v4312_v51 }
 0x4dd   : > { %v5170_v18 = vpop.eup %5169  ;;  %v4436_v22 = vadd.f32 %v9039_v9, %v4416_v3  ;;  %v4223_v43 = vadd.f32 1e-05, %v4207_v49 }
 0x4de   : > { %v4314_v10 = vmul.f32 %v5168_v12, %v4313_v61  ;;  %v4320_v25 = vmul.f32 %v5170_v18, %v4222_v4  ;;  %vm4326_vm12 = vweird.f32 %v5170_v18 }
 0x4df   : > { %4452 = vst [vmem:[%s9048_s15 + $0x38] sm:$0xff] %v4436_v22  ;;  %5171 = vrsqrt.f32 %v4223_v43  ;;  %vm4327_vm14 = vmor %vm4325_vm13, %vm4326_vm12  ;;  %vm4335_vm0 = vweird.f32 %v4223_v43 }
 0x4e0   : > { %v4318_v28 = vsel %vm4317_vm11, %v5168_v12, %v4314_v10  ;;  %v4321_v40 = vmul.f32 %v5170_v18, %v4320_v25 }
 0x4e1   : > { %v4397_v2 = vmul.f32 %v4318_v28, %v8973_v45 }
 0x4e2   : > { %v4322_v37 = vmul.f32 0.5, %v4321_v40  ;;  %v4188_v47 = vpop.xlane.xlu0 %4187 }
 0x4e3   : > { %v4417_v48 = vmul.f32 %v9032_v21, %v4397_v2  ;;  %v4208_v59 = vmul.f32 %v4188_v47, %v8909_v14 }
 0x4e4   : > { %v4323_v30 = vsub.f32 1.5, %v4322_v37 }
 0x4e5   : > { %v5172_v42 = vpop.eup %5171  ;;  %v4437_v0 = vadd.f32 %v9039_v9, %v4417_v48  ;;  %v4224_v50 = vadd.f32 1e-05, %v4208_v59 }
 0x4e6   : > { %v4324_v15 = vmul.f32 %v5170_v18, %v4323_v30  ;;  %v4330_v39 = vmul.f32 %v5172_v42, %v4223_v43  ;;  %vm4336_vm15 = vweird.f32 %v5172_v42 }
 0x4e7   : > { %4453 = vst [vmem:[%s9048_s15 + $0x40] sm:$0xff] %v4437_v0  ;;  %5173 = vrsqrt.f32 %v4224_v50  ;;  %vm4337_vm1 = vmor %vm4335_vm0, %vm4336_vm15  ;;  %vm4345_vm3 = vweird.f32 %v4224_v50 }
 0x4e8   : > { %v4328_v45 = vsel %vm4327_vm14, %v5170_v18, %v4324_v15  ;;  %v4331_v19 = vmul.f32 %v5172_v42, %v4330_v39 }
 0x4e9   : > { %v4398_v56 = vmul.f32 %v4328_v45, %v8979_v41 }
 0x4ea   : > { %v4332_v63 = vmul.f32 0.5, %v4331_v19  ;;  %v4190_v33 = vpop.xlane.xlu1 %4189 }
 0x4eb   : > { %v4418_v5 = vmul.f32 %v9032_v21, %v4398_v56  ;;  %v4209_v32 = vmul.f32 %v4190_v33, %v8909_v14 }
 0x4ec   : > { %v4333_v46 = vsub.f32 1.5, %v4332_v63 }
 0x4ed   : > { %v5174_v29 = vpop.eup %5173  ;;  %v4438_v11 = vadd.f32 %v9039_v9, %v4418_v5  ;;  %v4225_v23 = vadd.f32 1e-05, %v4209_v32 }
 0x4ee   : > { %v4334_v58 = vmul.f32 %v5172_v42, %v4333_v46  ;;  %v4340_v38 = vmul.f32 %v5174_v29, %v4224_v50  ;;  %vm4346_vm2 = vweird.f32 %v5174_v29 }
 0x4ef   : > { %4454 = vst [vmem:[%s9048_s15 + $0x48] sm:$0xff] %v4438_v11  ;;  %5175 = vrsqrt.f32 %v4225_v23  ;;  %vm4347_vm4 = vmor %vm4345_vm3, %vm4346_vm2  ;;  %vm4355_vm6 = vweird.f32 %v4225_v23 }
 0x4f0   : > { %v4338_v41 = vsel %vm4337_vm1, %v5172_v42, %v4334_v58  ;;  %v4341_v1 = vmul.f32 %v5174_v29, %v4340_v38 }
 0x4f1   : > { %v4399_v35 = vmul.f32 %v4338_v41, %v8985_v20 }
 0x4f2   : > { %v4342_v57 = vmul.f32 0.5, %v4341_v1  ;;  %v4192_v26 = vpop.xlane.xlu2 %4191 }
 0x4f3   : > { %v4419_v36 = vmul.f32 %v9032_v21, %v4399_v35  ;;  %v4210_v8 = vmul.f32 %v4192_v26, %v8909_v14 }
 0x4f4   : > { %v4343_v34 = vsub.f32 1.5, %v4342_v57 }
 0x4f5   : > { %v5176_v60 = vpop.eup %5175  ;;  %v4439_v6 = vadd.f32 %v9039_v9, %v4419_v36  ;;  %v4226_v27 = vadd.f32 1e-05, %v4210_v8 }
 0x4f6   : > { %v4344_v12 = vmul.f32 %v5174_v29, %v4343_v34  ;;  %v4350_v16 = vmul.f32 %v5176_v60, %v4225_v23  ;;  %vm4356_vm5 = vweird.f32 %v5176_v60 }
 0x4f7   : > { %4455 = vst [vmem:[%s9048_s15 + $0x50] sm:$0xff] %v4439_v6  ;;  %5177 = vrsqrt.f32 %v4226_v27  ;;  %vm4357_vm7 = vmor %vm4355_vm6, %vm4356_vm5  ;;  %vm4365_vm9 = vweird.f32 %v4226_v27 }
 0x4f8   : > { %v4348_v20 = vsel %vm4347_vm4, %v5174_v29, %v4344_v12  ;;  %v4351_v4 = vmul.f32 %v5176_v60, %v4350_v16 }
 0x4f9   : > { %v4400_v24 = vmul.f32 %v4348_v20, %v8991_v54 }
 0x4fa   : > { %v4352_v52 = vmul.f32 0.5, %v4351_v4  ;;  %v4194_v31 = vpop.xlane.xlu0 %4193 }
 0x4fb   : > { %v4420_v17 = vmul.f32 %v9032_v21, %v4400_v24  ;;  %v4211_v62 = vmul.f32 %v4194_v31, %v8909_v14 }
 0x4fc   : > { %v4353_v51 = vsub.f32 1.5, %v4352_v52 }
 0x4fd   : > { %v5178_v53 = vpop.eup %5177  ;;  %v4440_v3 = vadd.f32 %v9039_v9, %v4420_v17  ;;  %v4227_v49 = vadd.f32 1e-05, %v4211_v62 }
 0x4fe   : > { %v4354_v61 = vmul.f32 %v5176_v60, %v4353_v51  ;;  %v4360_v18 = vmul.f32 %v5178_v53, %v4226_v27  ;;  %vm4366_vm8 = vweird.f32 %v5178_v53 }
 0x4ff   : > { %4456 = vst [vmem:[%s9048_s15 + $0x58] sm:$0xff] %v4440_v3  ;;  %5179 = vrsqrt.f32 %v4227_v49  ;;  %vm4367_vm10 = vmor %vm4365_vm9, %vm4366_vm8  ;;  %vm4375_vm12 = vweird.f32 %v4227_v49 }
 0x500   : > { %v4358_v54 = vsel %vm4357_vm7, %v5176_v60, %v4354_v61  ;;  %v4361_v22 = vmul.f32 %v5178_v53, %v4360_v18 }
 0x501   : > { %v4401_v43 = vmul.f32 %v4358_v54, %v8997_v55 }
 0x502   : > { %v4362_v10 = vmul.f32 0.5, %v4361_v22  ;;  %v4196_v25 = vpop.xlane.xlu1 %4195 }
 0x503   : > { %v4421_v28 = vmul.f32 %v9032_v21, %v4401_v43  ;;  %v4212_v40 = vmul.f32 %v4196_v25, %v8909_v14 }
 0x504   : > { %v4363_v2 = vsub.f32 1.5, %v4362_v10 }
 0x505   : > { %v5180_v37 = vpop.eup %5179  ;;  %v4441_v47 = vadd.f32 %v9039_v9, %v4421_v28  ;;  %v4228_v48 = vadd.f32 1e-05, %v4212_v40 }
 0x506   : > { %v4364_v59 = vmul.f32 %v5178_v53, %v4363_v2  ;;  %v4370_v30 = vmul.f32 %v5180_v37, %v4227_v49  ;;  %vm4376_vm11 = vweird.f32 %v5180_v37 }
 0x507   : > { %4457 = vst [vmem:[%s9048_s15 + $0x60] sm:$0xff] %v4441_v47  ;;  %5181 = vrsqrt.f32 %v4228_v48  ;;  %vm4377_vm13 = vmor %vm4375_vm12, %vm4376_vm11  ;;  %vm4385_vm15 = vweird.f32 %v4228_v48 }
 0x508   : > { %v4368_v55 = vsel %vm4367_vm10, %v5178_v53, %v4364_v59  ;;  %v4371_v42 = vmul.f32 %v5180_v37, %v4370_v30 }
 0x509   : > { %v4402_v0 = vmul.f32 %v4368_v55, %v9003_v44 }
 0x50a   : > { %v4372_v50 = vmul.f32 0.5, %v4371_v42 }
 0x50b   : > { %v4422_v14 = vmul.f32 %v9032_v21, %v4402_v0 }
 0x50c   : > { %v4373_v15 = vsub.f32 1.5, %v4372_v50 }
 0x50d   : > { %v5182_v39 = vpop.eup %5181  ;;  %v4442_v45 = vadd.f32 %v9039_v9, %v4422_v14 }
 0x50e   : > { %v4374_v19 = vmul.f32 %v5180_v37, %v4373_v15  ;;  %v4380_v56 = vmul.f32 %v5182_v39, %v4228_v48  ;;  %vm4386_vm14 = vweird.f32 %v5182_v39 }
 0x50f   : > { %4458 = vst [vmem:[%s9048_s15 + $0x68] sm:$0xff] %v4442_v45  ;;  %vm4387_vm0 = vmor %vm4385_vm15, %vm4386_vm14 }
 0x510   : > { %v4378_v63 = vsel %vm4377_vm13, %v5180_v37, %v4374_v19  ;;  %v4381_v33 = vmul.f32 %v5182_v39, %v4380_v56 }
 0x511   : > { %v4403_v44 = vmul.f32 %v4378_v63, %v9010_v7 }
 0x512   : > { %v4382_v5 = vmul.f32 0.5, %v4381_v33 }
 0x513   : > { %v4423_v32 = vmul.f32 %v9032_v21, %v4403_v44 }
 0x514   : > { %v4383_v46 = vsub.f32 1.5, %v4382_v5 }
 0x515   : > { %v4443_v29 = vadd.f32 %v9039_v9, %v4423_v32 }
 0x516   : > { %v4384_v11 = vmul.f32 %v5182_v39, %v4383_v46 }
 0x517   : > { %4459 = vst [vmem:[%s9048_s15 + $0x70] sm:$0xff] %v4443_v29 }
 0x518   : > { %v4388_v7 = vsel %vm4387_vm0, %v5182_v39, %v4384_v11 }
 0x519   : > { %v4404_v23 = vmul.f32 %v4388_v7, %v9018_v13 }
 0x51b   : > { %v4424_v58 = vmul.f32 %v9032_v21, %v4404_v23 }
 0x51d   : > { %v4444_v38 = vadd.f32 %v9039_v9, %v4424_v58 }
 0x51f   : > { %4460 = vst [vmem:[%s9048_s15 + $0x78] sm:$0xff] %v4444_v38 }
 0x520   : > { %5210 = shalt.err (!%p5207_p3)
}
 0x521   : > { %s5248_s20 = smov 128   ;;  %s5249_s15 = smov 8  }
 0x522   : > { %4976 = dma.vmem_to_hbm [thread:$0]  (%p5328_p5), %s4475_s13, 2048, %s4477_s21, %s4462_s28, %s5248_s20, %s5248_s20, %s5249_s15  }
 0x523 PF: > { %p4982_p4 = scmp.ge.s32.totalorder %s5245_s27, 2  ;;  %s4491_s17 = sand.u32 1, %s5233_s24  }
 0x524   : > { %s4492_s18 = scalar_lea.sflag [#allocation3], %s4491_s17 }
 0x525   : > { %p4979_p7 = pnand %p4982_p4, %p5332_p6 }
 0x527   : > { %p4980_p8 = pneg %p4979_p7 }
 0x529   : > { %5228 = dma.done.wait (%p4980_p8), %s4492_s18, 2048  }
 0x52a   : > { %5230 = vsyncadd (%p4980_p8), %s4492_s18, 4294965248  ;;  %p17_p9 = scmp.ge.s32.totalorder %s5315_s30, 6   ;;  %s9563_s24 = smov %s5237_s25 }
 0x52b   : > { %s9564_s25 = smov %s5241_s26  ;;  %s9565_s26 = smov %s5326_s10 }
 0x52c   : > { %s9566_s27 = smov %s5315_s30  ;;  %19 = sbr.rel (!%p17_p9) target bundleno = 3 (0x3), region = 83 }
 0x531   :  { %4498 = vsyncpa [#allocation3], 1 }
 0x532   :  { %4500 = vsyncpa [#allocation3 + $0x1], 1 }

// kernel: transformer_block_forward.2
= control target key start
LH: loop header
LB: loop body
LE: loop exit
PB: predicated region body
PF: predicated region fallthrough
CT: control target
= control target key end

     0   :  { %s4128_s17 = smov 0   ;;  %s4130_s18 = smov 0   ;;  %s6379_s0 = inlined_call_operand.vmem [shape: f32[2,256,128], index: 0, kind: input, shape index: {}]   ;;  %s6380_s1 = inlined_call_operand.vmem [shape: bf16[4,128,32], index: 1, kind: input, shape index: {}]   ;;  %s6381_s2 = inlined_call_operand.vmem [shape: bf16[4,128,32], index: 2, kind: input, shape index: {}]   ;;  %s6382_s3 = inlined_call_operand.vmem [shape: bf16[4,128,32], index: 3, kind: input, shape index: {}]   ;;  %s6383_s4 = inlined_call_operand.vmem [shape: f32[4,1,32], index: 4, kind: input, shape index: {}]   ;;  %s6384_s5 = inlined_call_operand.vmem [shape: f32[4,1,32], index: 5, kind: input, shape index: {}]   ;;  %s6385_s6 = inlined_call_operand.vmem [shape: f32[4,1,32], index: 6, kind: input, shape index: {}]   ;;  %s6386_s7 = inlined_call_operand.vmem [shape: bf16[4,32,128], index: 7, kind: input, shape index: {}]   ;;  %s6387_s8 = inlined_call_operand.vmem [shape: f32[1,128], index: 8, kind: input, shape index: {}]   ;;  %s6388_s9 = inlined_call_operand.vmem [shape: f32[1,128], index: 9, kind: input, shape index: {}]   ;;  %s6389_s10 = inlined_call_operand.vmem [shape: f32[1,128], index: 10, kind: input, shape index: {}]   ;;  %s6390_s11 = inlined_call_operand.vmem [shape: bf16[2,256,128], index: 11, kind: output, shape index: {}]  }
   0x1   :  { %s4132_s19 = smov 0   ;;  %s4134_s20 = smov 0  }
   0x2   :  { %s4136_s21 = smov 0  }
   0x3 LB: > { %6424 = sst [smem:[#allocation3_spill]] %s4057_s19  ;;  %s30_s22 = sadd.s32 1, %s4057_s19  ;;  %s4065_s21 = sphi %s4136_s21, %s21_s21   ;;  %s4061_s20 = sphi %s4134_s20, %s6524_s20   ;;  %s4057_s19 = sphi %s4132_s19, %s6523_s19   ;;  %s4053_s18 = sphi %s4130_s18, %s6522_s18   ;;  %s4049_s17 = sphi %s4128_s17, %s6521_s17  }
   0x4   : > { %6425 = sst [smem:[#allocation4_spill]] %s4061_s20  ;;  %s33_s23 = sadd.s32 1, %s4061_s20 }
   0x5   : > { %p31_p0 = scmp.ge.s32.totalorder %s30_s22, 4  ;;  %p3423_p1 = scmp.ge.s32.totalorder %s4065_s21, 1 }
   0x6   : > { %p413_p2 = scmp.lt.s32.totalorder %s4065_s21, 9 }
   0x7   : > { %s6526_s22 = smov (%p31_p0, %s30_s22), 0  ;;  %s6528_s23 = smov (!%p31_p0, %s33_s23), %s4061_s20 }
   0x8   : > { %6426 = sst [smem:[#allocation5_spill]] %s6526_s22  ;;  %p414_p3 = pnand %p3423_p1, %p413_p2 }
   0x9   : > { %p35_p4 = scmp.ge.s32.totalorder %s6528_s23, 2 }
   0xa   : > { %417 = sbr.rel (%p414_p3) target bundleno = 2072 (0x818), region = 64 }
   0xb   : > { %s6530_s23 = smov (%p35_p4, %s6528_s23), 0 }
   0xc   : > { %6427 = sst [smem:[#allocation6_spill]] %s6530_s23 }
   0xf   : > { %p487_p5 = scmp.lt.s32.totalorder %s4049_s17, 3  ;;  %p482_p6 = scmp.lt.s32.totalorder %s4053_s18, 1  ;;  %vm1105_vm0 = vcmask 261120  }
  0x10   : > { %p3588_p7 = scmp.ne.s32.totalorder %s4049_s17, 0 }
  0x11   : > { %s4162_s24 = scalar_select %p487_p5, %s4049_s17, 3 }
  0x12   : > { %s6532_s18 = smov (!%p482_p6, %s4053_s18), 1 }
  0x13   : > { %s4165_s25 = sshll.u32 %s4162_s24, 6  ;;  %s504_s28 = scalar_lea.vmem %s6383_s4, %s4162_s24 }
  0x14   : > { %s496_s12 = scalar_lea.vmem %s6381_s2, %s4165_s25  ;;  %s507_s15 = scalar_lea.vmem %s6384_s5, %s4162_s24 }
  0x15   : > { %s510_s22 = scalar_lea.vmem %s6385_s6, %s4162_s24  ;;  %v3614_v0 = vld [vmem:[%s496_s12 + $0x38] sm:$0xff]  ;;  %s3598_s20 = sshll.u32 %s6532_s18, 7  ;;  %v3613_v1 = vld [vmem:[%s496_s12 + $0x30] sm:$0xff]  ;;  %v3612_v2 = vld [vmem:[%s496_s12 + $0x28] sm:$0xff] }
  0x16   : > { %795 = vmatpush.bf16.msra.mxu1 %v3614_v0  ;;  %s4186_s27 = scalar_lea.vmem %s6390_s11, %s3598_s20  ;;  %v3611_v3 = vld [vmem:[%s496_s12 + $0x20] sm:$0xff]  ;;  %v3610_v4 = vld [vmem:[%s496_s12 + $0x18] sm:$0xff]  ;;  %v3609_v5 = vld [vmem:[%s496_s12 + $0x10] sm:$0xff]  ;;  %s3593_s29 = sshll.u32 %s6532_s18, 8 }
  0x17   : > { %v3608_v6 = vld [vmem:[%s496_s12 + $0x8] sm:$0xff]  ;;  %s4191_s13 = scalar_lea.vmem %s6379_s0, %s3593_s29  ;;  %v3607_v7 = vld [vmem:[%s496_s12] sm:$0xff]  ;;  %s491_s20 = scalar_lea.vmem %s6380_s1, %s4165_s25 }
  0x18   : > { %v4194_v8 = vld [vmem:[%s4191_s13] sm:$0xff]  ;;  %v4197_v9 = vld [vmem:[%s4191_s13 + $0x8] sm:$0xff]  ;;  %v4205_v11 = vld [vmem:[%s4191_s13 + $0x10] sm:$0xff]  ;;  %s4498_s29 = scalar_lea.vmem %s6382_s3, %s4165_s25 }
  0x19   : > { %6428 = vst [vmem:[#allocation7_spill] sm:$0xff] %v4197_v9  ;;  %v4201_v10 = vpack.c.bf16 %v4197_v9, %v4194_v8  ;;  %v4208_v12 = vld [vmem:[%s4191_s13 + $0x18] sm:$0xff]  ;;  %v4216_v14 = vld [vmem:[%s4191_s13 + $0x20] sm:$0xff]  ;;  %v4219_v15 = vld [vmem:[%s4191_s13 + $0x28] sm:$0xff] }
  0x1a   : > { %796 = vmatpush.bf16.msra.mxu1 %v3613_v1  ;;  %6429 = vst [vmem:[#allocation8_spill] sm:$0xff] %v4205_v11  ;;  %v4212_v13 = vpack.c.bf16 %v4208_v12, %v4205_v11  ;;  %v4223_v16 = vpack.c.bf16 %v4219_v15, %v4216_v14  ;;  %v4227_v17 = vld [vmem:[%s4191_s13 + $0x30] sm:$0xff]  ;;  %v4230_v18 = vld [vmem:[%s4191_s13 + $0x38] sm:$0xff]  ;;  %v4238_v20 = vld [vmem:[%s4191_s13 + $0x40] sm:$0xff] }
  0x1b   : > { %6430 = vst [vmem:[#allocation9_spill] sm:$0xff] %v4208_v12  ;;  %v4234_v19 = vpack.c.bf16 %v4230_v18, %v4227_v17  ;;  %v4241_v21 = vld [vmem:[%s4191_s13 + $0x48] sm:$0xff]  ;;  %v4249_v23 = vld [vmem:[%s4191_s13 + $0x50] sm:$0xff]  ;;  %v4252_v24 = vld [vmem:[%s4191_s13 + $0x58] sm:$0xff] }
  0x1c   : > { %6431 = vst [vmem:[#allocation10_spill] sm:$0xff] %v4216_v14  ;;  %v4245_v22 = vpack.c.bf16 %v4241_v21, %v4238_v20  ;;  %v4256_v25 = vpack.c.bf16 %v4252_v24, %v4249_v23  ;;  %v4260_v26 = vld [vmem:[%s4191_s13 + $0x60] sm:$0xff]  ;;  %v4263_v27 = vld [vmem:[%s4191_s13 + $0x68] sm:$0xff]  ;;  %v4271_v29 = vld [vmem:[%s4191_s13 + $0x70] sm:$0xff] }
  0x1d   : > { %6432 = vst [vmem:[#allocation11_spill] sm:$0xff] %v4219_v15  ;;  %v4267_v28 = vpack.c.bf16 %v4263_v27, %v4260_v26  ;;  %v4274_v30 = vld [vmem:[%s4191_s13 + $0x78] sm:$0xff]  ;;  %v3605_v33 = vld [vmem:[%s491_s20 + $0x30] sm:$0xff]  ;;  %v3604_v34 = vld [vmem:[%s491_s20 + $0x28] sm:$0xff] }
  0x1e   : > { %797 = vmatpush.bf16.msra.mxu1 %v3612_v2  ;;  %6433 = vst [vmem:[#allocation12_spill] sm:$0xff] %v4227_v17  ;;  %v4282_v31 = vpack.c.bf16 %v4274_v30, %v4271_v29  ;;  %v3606_v32 = vld [vmem:[%s491_s20 + $0x38] sm:$0xff]  ;;  %v4286_v35 = vld [vmem:[%s4191_s13 + $0x80] sm:$0xff]  ;;  %v4289_v36 = vld [vmem:[%s4191_s13 + $0x88] sm:$0xff] }
  0x1f   : > { %6434 = vst [vmem:[#allocation13_spill] sm:$0xff] %v4230_v18  ;;  %638 = vmatpush.bf16.msra.mxu0 %v3606_v32  ;;  %v3603_v37 = vld [vmem:[%s491_s20 + $0x20] sm:$0xff]  ;;  %v4293_v38 = vpack.c.bf16 %v4289_v36, %v4286_v35  ;;  %v3602_v40 = vld [vmem:[%s491_s20 + $0x18] sm:$0xff]  ;;  %v3601_v41 = vld [vmem:[%s491_s20 + $0x10] sm:$0xff] }
  0x20   : > { %6435 = vst [vmem:[#allocation14_spill] sm:$0xff] %v4238_v20  ;;  %v4301_v42 = vld [vmem:[%s507_s15] ss:$0 sm:$0xff]  ;;  %v3600_v44 = vld [vmem:[%s491_s20 + $0x8] sm:$0xff]  ;;  %v4312_v48 = vld [vmem:[%s4191_s13 + $0x90] sm:$0xff] }
  0x21   : > { %6436 = vst [vmem:[#allocation15_spill] sm:$0xff] %v4241_v21  ;;  %v4315_v49 = vld [vmem:[%s4191_s13 + $0x98] sm:$0xff]  ;;  %v3599_v50 = vld [vmem:[%s491_s20] sm:$0xff]  ;;  %v4335_v58 = vld [vmem:[%s4191_s13 + $0xa8] sm:$0xff] }
  0x22   : > { %798 = vmatpush.bf16.msra.mxu1 %v3611_v3  ;;  %6437 = vst [vmem:[#allocation16_spill] sm:$0xff] %v4249_v23  ;;  %v4319_v51 = vpack.c.bf16 %v4315_v49, %v4312_v48  ;;  %v4332_v57 = vld [vmem:[%s4191_s13 + $0xa0] sm:$0xff]  ;;  %v4352_v1 = vld [vmem:[%s4191_s13 + $0xb0] sm:$0xff]  ;;  %v4355_v2 = vld [vmem:[%s4191_s13 + $0xb8] sm:$0xff] }
  0x23   : > { %6438 = vst [vmem:[#allocation17_spill] sm:$0xff] %v4252_v24  ;;  %639 = vmatpush.bf16.msra.mxu0 %v3605_v33  ;;  %v4339_v59 = vpack.c.bf16 %v4335_v58, %v4332_v57  ;;  %v4359_v3 = vpack.c.bf16 %v4355_v2, %v4352_v1  ;;  %v4366_v33 = vld [vmem:[%s4191_s13 + $0xc0] sm:$0xff] }
  0x24   : > { %6439 = vst [vmem:[#allocation18_spill] sm:$0xff] %v4260_v26 }
  0x25   : > { %6440 = vst [vmem:[#allocation19_spill] sm:$0xff] %v4263_v27  ;;  %v3617_v27 = vld [vmem:[%s4498_s29 + $0x10] sm:$0xff] }
  0x26   : > { %799 = vmatpush.bf16.msra.mxu1 %v3610_v4  ;;  %6441 = vst [vmem:[#allocation20_spill] sm:$0xff] %v4271_v29 }
  0x27   : > { %6442 = vst [vmem:[#allocation21_spill] sm:$0xff] %v4274_v30  ;;  %640 = vmatpush.bf16.msra.mxu0 %v3604_v34  ;;  %v4369_v34 = vld [vmem:[%s4191_s13 + $0xc8] sm:$0xff]  ;;  %v3619_v30 = vld [vmem:[%s4498_s29 + $0x20] sm:$0xff] }
  0x28   : > { %6443 = vst [vmem:[#allocation22_spill] sm:$0xff] %v4286_v35 }
  0x29   : > { %6444 = vst [vmem:[#allocation23_spill] sm:$0xff] %v4289_v36 }
  0x2a   : > { %800 = vmatpush.bf16.msra.mxu1 %v3609_v5  ;;  %6445 = vst [vmem:[#allocation24_spill] sm:$0xff] %v4312_v48 }
  0x2b   : > { %641 = vmatpush.bf16.msra.mxu0 %v3603_v37  ;;  %6446 = vst [vmem:[#allocation25_spill] sm:$0xff] %v4315_v49  ;;  %v4373_v37 = vpack.c.bf16 %v4369_v34, %v4366_v33 }
  0x2c   : > { %6447 = vst [vmem:[#allocation26_spill] sm:$0xff] %v4332_v57 }
  0x2d   : > { %6448 = vst [vmem:[#allocation27_spill] sm:$0xff] %v4335_v58 }
  0x2e   : > { %801 = vmatpush.bf16.msra.mxu1 %v3608_v6  ;;  %6449 = vst [vmem:[#allocation28_spill] sm:$0xff] %v4352_v1 }
  0x2f   : > { %642 = vmatpush.bf16.msra.mxu0 %v3602_v40  ;;  %6450 = vst [vmem:[#allocation29_spill] sm:$0xff] %v4355_v2 }
  0x30   : > { %6451 = vst [vmem:[#allocation30_spill] sm:$0xff] %v4366_v33 }
  0x31   : > { %6452 = vst [vmem:[#allocation31_spill] sm:$0xff] %v4369_v34 }
  0x32   : > { %802 = vmatpush.bf16.msra.mxu1 %v3607_v7 }
  0x33   : > { %643 = vmatpush.bf16.msra.mxu0 %v3601_v41  ;;  %v4378_v41 = vld [vmem:[%s4191_s13 + $0xd0] sm:$0xff] }
  0x34   : > { %6453 = vst [vmem:[#allocation32_spill] sm:$0xff] %v4378_v41 }
  0x35   : > { %803 = vmatmul.bf16.vlgmr.msra.gmra.mxu1 %v4201_v10 }
  0x37   : > { %644 = vmatpush.bf16.msra.mxu0 %v3600_v44 }
  0x3b   : > { %645 = vmatpush.bf16.msra.mxu0 %v3599_v50 }
  0x3e   : > { %646 = vmatmul.bf16.vlgmr.msra.gmra.mxu0 %v4201_v10 }
  0x45   : > { %808 = vmatmul.bf16.gmra.mxu1 %v4212_v13 }
  0x4e   : > { %651 = vmatmul.bf16.gmra.mxu0 %v4212_v13 }
  0x55   : > { %813 = vmatmul.bf16.gmra.mxu1 %v4223_v16 }
  0x5e   : > { %656 = vmatmul.bf16.gmra.mxu0 %v4223_v16 }
  0x65   : > { %818 = vmatmul.bf16.gmra.mxu1 %v4234_v19 }
  0x6e   : > { %661 = vmatmul.bf16.gmra.mxu0 %v4234_v19 }
  0x75   : > { %823 = vmatmul.bf16.gmra.mxu1 %v4245_v22 }
  0x7e   : > { %666 = vmatmul.bf16.gmra.mxu0 %v4245_v22 }
  0x85   : > { %828 = vmatmul.bf16.gmra.mxu1 %v4256_v25 }
  0x8e   : > { %671 = vmatmul.bf16.gmra.mxu0 %v4256_v25 }
  0x95   : > { %833 = vmatmul.bf16.gmra.mxu1 %v4267_v28 }
  0x9e   : > { %676 = vmatmul.bf16.gmra.mxu0 %v4267_v28 }
  0xa5   : > { %838 = vmatmul.bf16.gmra.mxu1 %v4282_v31 }
  0xae   : > { %681 = vmatmul.bf16.gmra.mxu0 %v4282_v31 }
  0xb2   : > { %v804_v39 = vpop.f32.mrf.mxu1 }
  0xb3   : > { %v4304_v45 = vadd.f32 %v4301_v42, %v804_v39 }
  0xb5   : > { %843 = vmatmul.bf16.gmra.mxu1 %v4293_v38 }
  0xba   : > { %v806_v43 = vpop.f32.mrf.mxu1 }
  0xbb   : > { %v4307_v46 = vadd.f32 %v4301_v42, %v806_v43  ;;  %v4381_v43 = vld [vmem:[%s4191_s13 + $0xd8] sm:$0xff] }
  0xbc   : > { %6454 = vst [vmem:[#allocation33_spill] sm:$0xff] %v4381_v43  ;;  %v4385_v44 = vpack.c.bf16 %v4381_v43, %v4378_v41 }
  0xbe   : > { %686 = vmatmul.bf16.gmra.mxu0 %v4293_v38 }
  0xc2   : > { %v809_v52 = vpop.f32.mrf.mxu1 }
  0xc3   : > { %v4324_v54 = vadd.f32 %v4301_v42, %v809_v52 }
  0xc5   : > { %848 = vmatmul.bf16.gmra.mxu1 %v4319_v51 }
  0xca   : > { %v811_v53 = vpop.f32.mrf.mxu1 }
  0xcb   : > { %v4327_v55 = vadd.f32 %v4301_v42, %v811_v53  ;;  %v4390_v53 = vld [vmem:[%s4191_s13 + $0xe0] sm:$0xff] }
  0xcc   : > { %6455 = vst [vmem:[#allocation34_spill] sm:$0xff] %v4390_v53 }
  0xce   : > { %691 = vmatmul.bf16.gmra.mxu0 %v4319_v51 }
  0xd2   : > { %v814_v60 = vpop.f32.mrf.mxu1 }
  0xd3   : > { %v4344_v62 = vadd.f32 %v4301_v42, %v814_v60  ;;  %v4393_v60 = vld [vmem:[%s4191_s13 + $0xe8] sm:$0xff] }
  0xd4   : > { %6456 = vst [vmem:[#allocation35_spill] sm:$0xff] %v4393_v60 }
  0xd5   : > { %853 = vmatmul.bf16.gmra.mxu1 %v4339_v59 }
  0xda   : > { %v816_v61 = vpop.f32.mrf.mxu1 }
  0xdb   : > { %v4347_v63 = vadd.f32 %v4301_v42, %v816_v61  ;;  %v4397_v61 = vpack.c.bf16 %v4393_v60, %v4390_v53 }
  0xde   : > { %696 = vmatmul.bf16.gmra.mxu0 %v4339_v59 }
  0xe2   : > { %v819_v4 = vpop.f32.mrf.mxu1 }
  0xe3   : > { %v820_v6 = vadd.f32 %v4301_v42, %v819_v4 }
  0xe5   : > { %858 = vmatmul.bf16.gmra.mxu1 %v4359_v3 }
  0xea   : > { %v821_v5 = vpop.f32.mrf.mxu1 }
  0xeb   : > { %v822_v7 = vadd.f32 %v4301_v42, %v821_v5 }
  0xed   : > { %v1092_v32 = vpack.c.bf16 %v822_v7, %v820_v6  ;;  %v4402_v6 = vld [vmem:[%s4191_s13 + $0xf0] sm:$0xff]  ;;  %v4405_v7 = vld [vmem:[%s4191_s13 + $0xf8] sm:$0xff] }
  0xee   : > { %6457 = vst [vmem:[#allocation36_spill] sm:$0xff] %v4402_v6  ;;  %v4409_v47 = vpack.c.bf16 %v4405_v7, %v4402_v6  ;;  %701 = vmatmul.bf16.gmra.mxu0 %v4359_v3 }
  0xef   : > { %6458 = vst [vmem:[#allocation37_spill] sm:$0xff] %v4405_v7 }
  0xf2   : > { %v824_v39 = vpop.f32.mrf.mxu1 }
  0xf5   : > { %863 = vmatmul.bf16.gmra.mxu1 %v4373_v37 }
  0xfa   : > { %v826_v40 = vpop.f32.mrf.mxu1 }
 0x102   : > { %v829_v50 = vpop.f32.mrf.mxu1 }
 0x105   : > { %868 = vmatmul.bf16.gmra.mxu1 %v4385_v44 }
 0x10a   : > { %v831_v52 = vpop.f32.mrf.mxu1 }
 0x10b   : > { %v832_v2 = vadd.f32 %v4301_v42, %v831_v52 }
 0x112   : > { %v834_v4 = vpop.f32.mrf.mxu1 }
 0x113   : > { %v835_v7 = vadd.f32 %v4301_v42, %v834_v4  ;;  %v647_v4 = vpop.f32.mrf.mxu0 }
 0x115   : > { %873 = vmatmul.bf16.gmra.mxu1 %v4397_v61 }
 0x11a   : > { %v836_v5 = vpop.f32.mrf.mxu1 }
 0x11b   : > { %v837_v41 = vadd.f32 %v4301_v42, %v836_v5 }
 0x11d   : > { %v1095_v33 = vpack.c.bf16 %v837_v41, %v835_v7  ;;  %v825_v41 = vadd.f32 %v4301_v42, %v824_v39  ;;  %v6459_v39 = vpack.c.bf16 %v4347_v63, %v4344_v62 }
 0x122   : > { %v839_v56 = vpop.f32.mrf.mxu1 }
 0x123   : > { %v840_v60 = vadd.f32 %v4301_v42, %v839_v56  ;;  %v1173_v56 = vsel %vm1105_vm0, %v1095_v33, 0 }
 0x125   : > { %878 = vmatmul.bf16.gmra.mxu1 %v4409_v47 }
 0x12a   : > { %v841_v0 = vpop.f32.mrf.mxu1 }
 0x12b   : > { %v842_v53 = vadd.f32 %v4301_v42, %v841_v0  ;;  %v830_v0 = vadd.f32 %v4301_v42, %v829_v50  ;;  %v649_v50 = vpop.f32.mrf.mxu0  ;;  %706 = vmatmul.bf16.gmra.mxu0 %v4373_v37 }
 0x12d   : > { %v1096_v43 = vpack.c.bf16 %v842_v53, %v840_v60  ;;  %v1094_v60 = vpack.c.bf16 %v832_v2, %v830_v0  ;;  %v1164_v2 = vsel %vm1105_vm0, %v1092_v32, 0  ;;  %v1161_v0 = vsel %vm1105_vm0, %v6459_v39, 0  ;;  %v4450_v32 = vld [vmem:[%s504_s28] ss:$0 sm:$0xff] }
 0x12e   : > { %v648_v63 = vadd.f32 %v4450_v32, %v647_v4 }
 0x12f   : > { %v1176_v34 = vsel %vm1105_vm0, %v1096_v43, 0  ;;  %v827_v43 = vadd.f32 %v4301_v42, %v826_v40 }
 0x130   : > { %1202 = vmatpush.bf16.xpose.msra.mxu3 %v1176_v34  ;;  %v1170_v34 = vsel %vm1105_vm0, %v1094_v60, 0 }
 0x131   : > { %v1093_v52 = vpack.c.bf16 %v827_v43, %v825_v41 }
 0x132   : > { %v4418_v6 = vpop.f32.mrf.mxu1 }
 0x133   : > { %v1167_v33 = vsel %vm1105_vm0, %v1093_v52, 0  ;;  %v652_v40 = vpop.f32.mrf.mxu0 }
 0x138   : > { %1203 = vmatpush.bf16.xpose.msra.mxu3 %v1173_v56 }
 0x13a   : > { %v4424_v53 = vpop.f32.mrf.mxu1 }
 0x13b   : > { %v654_v60 = vpop.f32.mrf.mxu0  ;;  %711 = vmatmul.bf16.gmra.mxu0 %v4385_v44 }
 0x140   : > { %1204 = vmatpush.bf16.xpose.msra.mxu3 %v1170_v34  ;;  %v6460_v34 = vpack.c.bf16 %v4327_v55, %v4324_v54 }
 0x142   : > { %v4429_v5 = vpop.f32.mrf.mxu1  ;;  %v1158_v41 = vsel %vm1105_vm0, %v6460_v34, 0 }
 0x143   : > { %v657_v52 = vpop.f32.mrf.mxu0 }
 0x148   : > { %1205 = vmatpush.bf16.xpose.msra.mxu3 %v1167_v33  ;;  %v650_v33 = vadd.f32 %v4450_v32, %v649_v50 }
 0x14a   : > { %v4433_v7 = vpop.f32.mrf.mxu1  ;;  %v1042_v1 = vmul.f32 0.17677669, %v650_v33 }
 0x14b   : > { %v659_v54 = vpop.f32.mrf.mxu0  ;;  %716 = vmatmul.bf16.gmra.mxu0 %v4397_v61 }
 0x150   : > { %1206 = vmatpush.bf16.xpose.msra.mxu3 %v1164_v2  ;;  %v6461_v2 = vpack.c.bf16 %v4307_v46, %v4304_v45  ;;  %v655_v45 = vadd.f32 %v4450_v32, %v654_v60  ;;  %v660_v60 = vadd.f32 %v4450_v32, %v659_v54 }
 0x152   : > { %v4436_v56 = vpop.f32.mrf.mxu1  ;;  %v1155_v39 = vsel %vm1105_vm0, %v6461_v2, 0 }
 0x153   : > { %v662_v4 = vpop.f32.mrf.mxu0 }
 0x154   : > { %v663_v48 = vadd.f32 %v4450_v32, %v662_v4 }
 0x158   : > { %1207 = vmatpush.bf16.xpose.msra.mxu3 %v1161_v0  ;;  %v1041_v0 = vmul.f32 0.17677669, %v648_v63  ;;  %v1044_v63 = vmul.f32 0.17677669, %v655_v45  ;;  %v1046_v45 = vmul.f32 0.17677669, %v660_v60 }
 0x15a   : > { %v4443_v43 = vpop.f32.mrf.mxu1  ;;  %v4467_v34 = vpack.c.bf16 %v1042_v1, %v1041_v0 }
 0x15b   : > { %v664_v33 = vpop.f32.mrf.mxu0  ;;  %721 = vmatmul.bf16.gmra.mxu0 %v4409_v47 }
 0x15c   : > { %v665_v36 = vadd.f32 %v4450_v32, %v664_v33 }
 0x15e   : > { %v1048_v54 = vmul.f32 0.17677669, %v665_v36 }
 0x160   : > { %1208 = vmatpush.bf16.xpose.msra.mxu3 %v1158_v41  ;;  %v653_v41 = vadd.f32 %v4450_v32, %v652_v40  ;;  %v658_v40 = vadd.f32 %v4450_v32, %v657_v52  ;;  %v1047_v52 = vmul.f32 0.17677669, %v663_v48 }
 0x162   : > { %v4456_v62 = vpop.f32.mrf.mxu1  ;;  %v1043_v46 = vmul.f32 0.17677669, %v653_v41  ;;  %v1045_v41 = vmul.f32 0.17677669, %v658_v40  ;;  %v3622_v40 = vld [vmem:[%s4498_s29 + $0x38] sm:$0xff]  ;;  %v4502_v33 = vpack.c.bf16 %v1048_v54, %v1047_v52 }
 0x163   : > { %v667_v1 = vpop.f32.mrf.mxu0  ;;  %952 = vmatpush.bf16.msra.mxu2 %v3622_v40  ;;  %v3618_v40 = vld [vmem:[%s4498_s29 + $0x18] sm:$0xff] }
 0x164   : > { %v4487_v49 = vpack.c.bf16 %v1046_v45, %v1045_v41  ;;  %v3621_v41 = vld [vmem:[%s4498_s29 + $0x30] sm:$0xff]  ;;  %v3620_v45 = vld [vmem:[%s4498_s29 + $0x28] sm:$0xff]  ;;  %v668_v36 = vadd.f32 %v4450_v32, %v667_v1 }
 0x166   : > { %v1049_v52 = vmul.f32 0.17677669, %v668_v36  ;;  %v3616_v36 = vld [vmem:[%s4498_s29 + $0x8] sm:$0xff] }
 0x167   : > { %953 = vmatpush.bf16.msra.mxu2 %v3621_v41 }
 0x168   : > { %1209 = vmatpush.bf16.xpose.msra.mxu3 %v1155_v39  ;;  %v4478_v39 = vpack.c.bf16 %v1044_v63, %v1043_v46 }
 0x16a   : > { %v4465_v55 = vpop.f32.mrf.mxu1 }
 0x16b   : > { %v669_v58 = vpop.f32.mrf.mxu0  ;;  %954 = vmatpush.bf16.msra.mxu2 %v3620_v45 }
 0x16c   : > { %v670_v48 = vadd.f32 %v4450_v32, %v669_v58 }
 0x16e   : > { %v1050_v54 = vmul.f32 0.17677669, %v670_v48 }
 0x16f   : > { %3532 = vmatmul.msk.bf16.vlgmr.msra.gmra.mxu3 %vm1105_vm0, %v4467_v34  ;;  %955 = vmatpush.bf16.msra.mxu2 %v3619_v30 }
 0x170   : > { %v4515_v23 = vpack.c.bf16 %v1050_v54, %v1049_v52 }
 0x172   : > { %v4471_v50 = vpop.f32.mrf.mxu1 }
 0x173   : > { %v672_v46 = vpop.f32.mrf.mxu0  ;;  %956 = vmatpush.bf16.msra.mxu2 %v3618_v40 }
 0x177   : > { %957 = vmatpush.bf16.msra.mxu2 %v3617_v27 }
 0x17a   : > { %v4476_v2 = vpop.f32.mrf.mxu1 }
 0x17b   : > { %v674_v60 = vpop.f32.mrf.mxu0  ;;  %958 = vmatpush.bf16.msra.mxu2 %v3616_v36  ;;  %v862_v36 = vadd.f32 %v4301_v42, %v4465_v55 }
 0x17f   : > { %3533 = vmatmul.msk.bf16.gmra.mxu3 %vm1105_vm0, %v4478_v39 }
 0x182   : > { %v4482_v0 = vpop.f32.mrf.mxu1 }
 0x183   : > { %v677_v35 = vpop.f32.mrf.mxu0 }
 0x18a   : > { %v871_v57 = vpop.f32.mrf.mxu1 }
 0x18b   : > { %v679_v41 = vpop.f32.mrf.mxu0  ;;  %v872_v27 = vadd.f32 %v4301_v42, %v871_v57 }
 0x18f   : > { %3534 = vmatmul.msk.bf16.gmra.mxu3 %vm1105_vm0, %v4487_v49 }
 0x192   : > { %v874_v63 = vpop.f32.mrf.mxu1 }
 0x193   : > { %v682_v48 = vpop.f32.mrf.mxu0  ;;  %v875_v40 = vadd.f32 %v4301_v42, %v874_v63 }
 0x19a   : > { %v876_v4 = vpop.f32.mrf.mxu1 }
 0x19b   : > { %v877_v58 = vadd.f32 %v4301_v42, %v876_v4  ;;  %v684_v63 = vpop.f32.mrf.mxu0 }
 0x19d   : > { %v1103_v21 = vpack.c.bf16 %v877_v58, %v875_v40 }
 0x19f   : > { %3535 = vmatmul.msk.bf16.gmra.mxu3 %vm1105_vm0, %v4502_v33  ;;  %v1197_v4 = vsel %vm1105_vm0, %v1103_v21, 0 }
 0x1a2   : > { %v879_v29 = vpop.f32.mrf.mxu1 }
 0x1a3   : > { %v880_v45 = vadd.f32 %v4301_v42, %v879_v29  ;;  %v3615_v29 = vld [vmem:[%s4498_s29] sm:$0xff]  ;;  %v687_v21 = vpop.f32.mrf.mxu0 }
 0x1a4   : > { %959 = vmatpush.bf16.msra.mxu2 %v3615_v29 }
 0x1a7   : > { %960 = vmatmul.bf16.vlgmr.msra.gmra.mxu2 %v4201_v10  ;;  %v865_v10 = vadd.f32 %v4301_v42, %v4471_v50 }
 0x1aa   : > { %v881_v26 = vpop.f32.mrf.mxu1 }
 0x1ab   : > { %v882_v24 = vadd.f32 %v4301_v42, %v881_v26  ;;  %v673_v26 = vadd.f32 %v4450_v32, %v672_v46 }
 0x1ad   : > { %v1104_v1 = vpack.c.bf16 %v882_v24, %v880_v45  ;;  %v675_v24 = vadd.f32 %v4450_v32, %v674_v60  ;;  %v1051_v52 = vmul.f32 0.17677669, %v673_v26  ;;  %v870_v45 = vadd.f32 %v4301_v42, %v4482_v0  ;;  %v689_v26 = vpop.f32.mrf.mxu0 }
 0x1ae   : > { %v867_v60 = vadd.f32 %v4301_v42, %v4476_v2  ;;  %v680_v0 = vadd.f32 %v4450_v32, %v679_v41 }
 0x1af   : > { %v1200_v30 = vsel %vm1105_vm0, %v1104_v1, 0  ;;  %3536 = vmatmul.msk.bf16.gmra.mxu3 %vm1105_vm0, %v4515_v23  ;;  %v1052_v54 = vmul.f32 0.17677669, %v675_v24  ;;  %v1102_v1 = vpack.c.bf16 %v872_v27, %v870_v45  ;;  %v860_v24 = vadd.f32 %v4301_v42, %v4456_v62 }
 0x1b0   : > { %1291 = vmatpush.bf16.xpose.msrb.mxu0 %v1200_v30  ;;  %v1101_v57 = vpack.c.bf16 %v867_v60, %v865_v10  ;;  %v678_v30 = vadd.f32 %v4450_v32, %v677_v35  ;;  %v1054_v29 = vmul.f32 0.17677669, %v680_v0  ;;  %v857_v35 = vadd.f32 %v4301_v42, %v4443_v43 }
 0x1b1   : > { %v4532_v46 = vpack.c.bf16 %v1052_v54, %v1051_v52  ;;  %v1194_v58 = vsel %vm1105_vm0, %v1102_v1, 0  ;;  %v1100_v50 = vpack.c.bf16 %v862_v36, %v860_v24  ;;  %v683_v52 = vadd.f32 %v4450_v32, %v682_v48 }
 0x1b2   : > { %v1191_v2 = vsel %vm1105_vm0, %v1101_v57, 0  ;;  %v1053_v40 = vmul.f32 0.17677669, %v678_v30  ;;  %v685_v62 = vadd.f32 %v4450_v32, %v684_v63  ;;  %v852_v54 = vadd.f32 %v4301_v42, %v4433_v7 }
 0x1b3   : > { %v1188_v41 = vsel %vm1105_vm0, %v1100_v50, 0  ;;  %v1055_v45 = vmul.f32 0.17677669, %v683_v52  ;;  %v847_v48 = vadd.f32 %v4301_v42, %v4424_v53  ;;  %v845_v7 = vadd.f32 %v4301_v42, %v4418_v6 }
 0x1b4   : > { %v4549_v27 = vpack.c.bf16 %v1054_v29, %v1053_v40  ;;  %v1056_v1 = vmul.f32 0.17677669, %v685_v62  ;;  %v688_v30 = vadd.f32 %v4450_v32, %v687_v21 }
 0x1b5   : > { %v692_v55 = vpop.f32.mrf.mxu0  ;;  %v1097_v57 = vpack.c.bf16 %v847_v48, %v845_v7 }
 0x1b6   : > { %v4566_v10 = vpack.c.bf16 %v1056_v1, %v1055_v45  ;;  %v1057_v36 = vmul.f32 0.17677669, %v688_v30 }
 0x1b7   : > { %965 = vmatmul.bf16.gmra.mxu2 %v4212_v13  ;;  %v855_v13 = vadd.f32 %v4301_v42, %v4436_v56  ;;  %v1179_v0 = vsel %vm1105_vm0, %v1097_v57, 0 }
 0x1b8   : > { %1292 = vmatpush.bf16.xpose.msrb.mxu0 %v1197_v4 }
 0x1b9   : > { %v1099_v4 = vpack.c.bf16 %v857_v35, %v855_v13 }
 0x1bb   : > { %v1185_v43 = vsel %vm1105_vm0, %v1099_v4, 0 }
 0x1bd   : > { %v694_v60 = vpop.f32.mrf.mxu0 }
 0x1be   : > { %v695_v6 = vadd.f32 %v4450_v32, %v694_v60 }
 0x1bf   : > { %3537 = vmatmul.msk.bf16.gmra.mxu3 %vm1105_vm0, %v4532_v46 }
 0x1c0   : > { %1293 = vmatpush.bf16.xpose.msrb.mxu0 %v1194_v58  ;;  %v850_v58 = vadd.f32 %v4301_v42, %v4429_v5  ;;  %v690_v5 = vadd.f32 %v4450_v32, %v689_v26  ;;  %v693_v42 = vadd.f32 %v4450_v32, %v692_v55  ;;  %v1060_v26 = vmul.f32 0.17677669, %v695_v6 }
 0x1c2   : > { %v1098_v56 = vpack.c.bf16 %v852_v54, %v850_v58  ;;  %v1059_v29 = vmul.f32 0.17677669, %v693_v42 }
 0x1c4   : > { %v1182_v63 = vsel %vm1105_vm0, %v1098_v56, 0  ;;  %v4588_v24 = vpack.c.bf16 %v1060_v26, %v1059_v29 }
 0x1c7   : > { %970 = vmatmul.bf16.gmra.mxu2 %v4223_v16  ;;  %v697_v16 = vpop.f32.mrf.mxu0 }
 0x1c8   : > { %1294 = vmatpush.bf16.xpose.msrb.mxu0 %v1191_v2  ;;  %v1058_v2 = vmul.f32 0.17677669, %v690_v5 }
 0x1ca   : > { %v4579_v53 = vpack.c.bf16 %v1058_v2, %v1057_v36 }
 0x1cf   : > { %3538 = vmatmul.msk.bf16.gmra.mxu3 %vm1105_vm0, %v4549_v27  ;;  %v699_v40 = vpop.f32.mrf.mxu0 }
 0x1d0   : > { %1295 = vmatpush.bf16.xpose.msrb.mxu0 %v1188_v41  ;;  %v700_v50 = vadd.f32 %v4450_v32, %v699_v40 }
 0x1d2   : > { %v1062_v41 = vmul.f32 0.17677669, %v700_v50 }
 0x1d7   : > { %975 = vmatmul.bf16.gmra.mxu2 %v4234_v19  ;;  %v702_v21 = vpop.f32.mrf.mxu0 }
 0x1d8   : > { %1296 = vmatpush.bf16.xpose.msrb.mxu0 %v1185_v43 }
 0x1df   : > { %3539 = vmatmul.msk.bf16.gmra.mxu3 %vm1105_vm0, %v4566_v10  ;;  %v704_v19 = vpop.f32.mrf.mxu0 }
 0x1e0   : > { %1297 = vmatpush.bf16.xpose.msrb.mxu0 %v1182_v63 }
 0x1e7   : > { %980 = vmatmul.bf16.gmra.mxu2 %v4245_v22  ;;  %v707_v55 = vpop.f32.mrf.mxu0  ;;  %v703_v22 = vadd.f32 %v4450_v32, %v702_v21 }
 0x1e8   : > { %1298 = vmatpush.bf16.xpose.msrb.mxu0 %v1179_v0 }
 0x1e9   : > { %v1063_v52 = vmul.f32 0.17677669, %v703_v22 }
 0x1ef   : > { %3548 = vmatmul.msk.bf16.vlgmr.msrb.gmra.mxu0 %vm1105_vm0, %v4467_v34  ;;  %3540 = vmatmul.msk.bf16.gmra.mxu3 %vm1105_vm0, %v4579_v53  ;;  %v698_v34 = vadd.f32 %v4450_v32, %v697_v16  ;;  %v709_v4 = vpop.f32.mrf.mxu0 }
 0x1f0   : > { %v710_v45 = vadd.f32 %v4450_v32, %v709_v4 }
 0x1f1   : > { %v1061_v35 = vmul.f32 0.17677669, %v698_v34 }
 0x1f2   : > { %v4606_v54 = vpop.f32.mrf.mxu3  ;;  %v1066_v58 = vmul.f32 0.17677669, %v710_v45 }
 0x1f3   : > { %v4597_v13 = vpack.c.bf16 %v1062_v41, %v1061_v35 }
 0x1f7   : > { %985 = vmatmul.bf16.gmra.mxu2 %v4256_v25  ;;  %v712_v43 = vpop.f32.mrf.mxu0 }
 0x1f8   : > { %v713_v63 = vadd.f32 %v4450_v32, %v712_v43 }
 0x1fa   : > { %v4616_v1 = vpop.f32.mrf.mxu3  ;;  %v1067_v16 = vmul.f32 0.17677669, %v713_v63 }
 0x1ff   : > { %3549 = vmatmul.msk.bf16.gmra.mxu0 %vm1105_vm0, %v4478_v39  ;;  %3541 = vmatmul.msk.bf16.gmra.mxu3 %vm1105_vm0, %v4588_v24  ;;  %v705_v39 = vadd.f32 %v4450_v32, %v704_v19 }
 0x201   : > { %v1064_v62 = vmul.f32 0.17677669, %v705_v39 }
 0x202   : > { %v4621_v48 = vpop.f32.mrf.mxu3 }
 0x203   : > { %v4608_v25 = vpack.c.bf16 %v1064_v62, %v1063_v52 }
 0x207   : > { %990 = vmatmul.bf16.gmra.mxu2 %v4267_v28  ;;  %v714_v28 = vpop.f32.mrf.mxu0 }
 0x208   : > { %v715_v7 = vadd.f32 %v4450_v32, %v714_v28 }
 0x20a   : > { %v1068_v57 = vmul.f32 0.17677669, %v715_v7  ;;  %v4629_v30 = vpop.f32.mrf.mxu3 }
 0x20f   : > { %3550 = vmatmul.msk.bf16.gmra.mxu0 %vm1105_vm0, %v4487_v49  ;;  %3542 = vmatmul.msk.bf16.gmra.mxu3 %vm1105_vm0, %v4597_v13  ;;  %v708_v49 = vadd.f32 %v4450_v32, %v707_v55 }
 0x211   : > { %v1065_v60 = vmul.f32 0.17677669, %v708_v49 }
 0x213   : > { %v4619_v56 = vpack.c.bf16 %v1066_v58, %v1065_v60 }
 0x217   : > { %995 = vmatmul.bf16.gmra.mxu2 %v4282_v31  ;;  %v4632_v31 = vpack.c.bf16 %v1068_v57, %v1067_v16 }
 0x21f   : > { %3551 = vmatmul.msk.bf16.gmra.mxu0 %vm1105_vm0, %v4502_v33  ;;  %3543 = vmatmul.msk.bf16.gmra.mxu3 %vm1105_vm0, %v4608_v25  ;;  %v717_v33 = vpop.f32.mrf.mxu0 }
 0x220   : > { %v718_v36 = vadd.f32 %v4450_v32, %v717_v33 }
 0x222   : > { %v1069_v42 = vmul.f32 0.17677669, %v718_v36 }
 0x227   : > { %1000 = vmatmul.bf16.gmra.mxu2 %v4293_v38  ;;  %v719_v0 = vpop.f32.mrf.mxu0 }
 0x228   : > { %v720_v2 = vadd.f32 %v4450_v32, %v719_v0 }
 0x22a   : > { %v4634_v5 = vpop.f32.mrf.mxu2  ;;  %v1070_v6 = vmul.f32 0.17677669, %v720_v2 }
 0x22c   : > { %v4647_v21 = vpack.c.bf16 %v1070_v6, %v1069_v42 }
 0x22f   : > { %3552 = vmatmul.msk.bf16.gmra.mxu0 %vm1105_vm0, %v4515_v23  ;;  %3544 = vmatmul.msk.bf16.gmra.mxu3 %vm1105_vm0, %v4619_v56  ;;  %v4640_v23 = vpop.f32.mrf.mxu3  ;;  %v722_v38 = vpop.f32.mrf.mxu0 }
 0x230   : > { %v723_v19 = vadd.f32 %v4450_v32, %v722_v38 }
 0x232   : > { %v4644_v40 = vpop.f32.mrf.mxu2  ;;  %v1071_v35 = vmul.f32 0.17677669, %v723_v19 }
 0x237   : > { %1005 = vmatmul.bf16.gmra.mxu2 %v4319_v51  ;;  %v724_v26 = vpop.f32.mrf.mxu0 }
 0x238   : > { %v725_v34 = vadd.f32 %v4450_v32, %v724_v26 }
 0x23a   : > { %v4649_v29 = vpop.f32.mrf.mxu2  ;;  %v1072_v41 = vmul.f32 0.17677669, %v725_v34 }
 0x23c   : > { %v4664_v55 = vpack.c.bf16 %v1072_v41, %v1071_v35 }
 0x23f   : > { %3553 = vmatmul.msk.bf16.gmra.mxu0 %vm1105_vm0, %v4532_v46  ;;  %3545 = vmatmul.msk.bf16.gmra.mxu3 %vm1105_vm0, %v4632_v31  ;;  %v4651_v46 = vpop.f32.mrf.mxu3 }
 0x242   : > { %v4659_v50 = vpop.f32.mrf.mxu2 }
 0x247   : > { %v4661_v51 = vpop.f32.mrf.mxu3  ;;  %1010 = vmatmul.bf16.gmra.mxu2 %v4339_v59 }
 0x24a   : > { %v4666_v22 = vpop.f32.mrf.mxu2 }
 0x24f   : > { %3554 = vmatmul.msk.bf16.gmra.mxu0 %vm1105_vm0, %v4549_v27  ;;  %3546 = vmatmul.msk.bf16.gmra.mxu3 %vm1105_vm0, %v4647_v21  ;;  %v4670_v27 = vpop.f32.mrf.mxu3 }
 0x252   : > { %v4674_v32 = vpop.f32.mrf.mxu2 }
 0x257   : > { %1015 = vmatmul.bf16.gmra.mxu2 %v4359_v3  ;;  %v4723_v36 = vpop.f32.mrf.mxu3 }
 0x25a   : > { %v4677_v39 = vpop.f32.mrf.mxu2 }
 0x25f   : > { %3555 = vmatmul.msk.bf16.gmra.mxu0 %vm1105_vm0, %v4566_v10  ;;  %3547 = vmatmul.msk.bf16.gmra.mxu3 %vm1105_vm0, %v4664_v55 }
 0x262   : > { %v978_v10 = vpop.f32.mrf.mxu2 }
 0x267   : > { %1020 = vmatmul.bf16.gmra.mxu2 %v4373_v37 }
 0x26a   : > { %v981_v3 = vpop.f32.mrf.mxu2 }
 0x26c   : > { %v4679_v4 = vpop.f32.mrf.mxu0 }
 0x26d   : > { %v1380_v59 = vmax.f32 %v4606_v54, %v4679_v4 }
 0x26f   : > { %1381 = vmax.xlane.f32.xlu0 %v1380_v59  ;;  %3556 = vmatmul.msk.bf16.gmra.mxu0 %vm1105_vm0, %v4579_v53 }
 0x272   : > { %v983_v53 = vpop.f32.mrf.mxu2 }
 0x274   : > { %v4685_v52 = vpop.f32.mrf.mxu0 }
 0x275   : > { %v1383_v62 = vmax.f32 %v4616_v1, %v4685_v52 }
 0x277   : > { %1384 = vmax.xlane.f32.xlu0 %v1383_v62  ;;  %1025 = vmatmul.bf16.gmra.mxu2 %v4385_v44 }
 0x27a   : > { %v986_v37 = vpop.f32.mrf.mxu2 }
 0x27c   : > { %v4690_v43 = vpop.f32.mrf.mxu0 }
 0x27d   : > { %v1386_v49 = vmax.f32 %v4621_v48, %v4690_v43 }
 0x27f   : > { %1387 = vmax.xlane.f32.xlu1 %v1386_v49  ;;  %3557 = vmatmul.msk.bf16.gmra.mxu0 %vm1105_vm0, %v4588_v24 }
 0x282   : > { %v988_v24 = vpop.f32.mrf.mxu2 }
 0x284   : > { %v4696_v45 = vpop.f32.mrf.mxu0 }
 0x285   : > { %v1389_v60 = vmax.f32 %v4629_v30, %v4696_v45 }
 0x287   : > { %1390 = vmax.xlane.f32.xlu1 %v1389_v60  ;;  %1030 = vmatmul.bf16.gmra.mxu2 %v4397_v61 }
 0x28a   : > { %v991_v44 = vpop.f32.mrf.mxu2 }
 0x28c   : > { %v4701_v58 = vpop.f32.mrf.mxu0 }
 0x28d   : > { %v1392_v28 = vmax.f32 %v4640_v23, %v4701_v58 }
 0x28f   : > { %1393 = vmax.xlane.f32.xlu2 %v1392_v28  ;;  %3558 = vmatmul.msk.bf16.gmra.mxu0 %vm1105_vm0, %v4597_v13 }
 0x292   : > { %v993_v13 = vpop.f32.mrf.mxu2 }
 0x294   : > { %v4707_v33 = vpop.f32.mrf.mxu0 }
 0x295   : > { %v1395_v63 = vmax.f32 %v4651_v46, %v4707_v33 }
 0x297   : > { %1396 = vmax.xlane.f32.xlu2 %v1395_v63  ;;  %1035 = vmatmul.bf16.gmra.mxu2 %v4409_v47  ;;  %v4740_v47 = vld [vmem:[%s510_s22] ss:$0 sm:$0xff]  ;;  %s3597_s22 = sshll.u32 %s4162_s24, 4 }
 0x298   : > { %v994_v35 = vadd.f32 %v4740_v47, %v993_v13  ;;  %v989_v59 = vadd.f32 %v4740_v47, %v988_v24  ;;  %v977_v60 = vadd.f32 %v4740_v47, %v4677_v39  ;;  %v979_v28 = vadd.f32 %v4740_v47, %v978_v10  ;;  %s515_s18 = scalar_lea.vmem %s6386_s7, %s3597_s22 }
 0x299   : > { %v982_v63 = vadd.f32 %v4740_v47, %v981_v3  ;;  %v969_v13 = vadd.f32 %v4740_v47, %v4659_v50  ;;  %v972_v39 = vadd.f32 %v4740_v47, %v4666_v22  ;;  %v974_v10 = vadd.f32 %v4740_v47, %v4674_v32 }
 0x29a   : > { %v996_v61 = vpop.f32.mrf.mxu2  ;;  %v1895_v24 = vpack.c.bf16 %v979_v28, %v977_v60  ;;  %v962_v22 = vadd.f32 %v4740_v47, %v4634_v5  ;;  %v964_v32 = vadd.f32 %v4740_v47, %v4644_v40 }
 0x29b   : > { %v997_v6 = vadd.f32 %v4740_v47, %v996_v61 }
 0x29c   : > { %v4712_v7 = vpop.f32.mrf.mxu0 }
 0x29d   : > { %v1398_v16 = vmax.f32 %v4661_v51, %v4712_v7 }
 0x29f   : > { %1399 = vmax.xlane.f32.xlu0 %v1398_v16  ;;  %3559 = vmatmul.msk.bf16.gmra.mxu0 %vm1105_vm0, %v4608_v25 }
 0x2a2   : > { %v998_v25 = vpop.f32.mrf.mxu2 }
 0x2a3   : > { %v999_v26 = vadd.f32 %v4740_v47, %v998_v25  ;;  %v4781_v25 = vpop.f32.mrf.mxu3 }
 0x2a4   : > { %v4718_v57 = vpop.f32.mrf.mxu0 }
 0x2a5   : > { %v1401_v0 = vmax.f32 %v4670_v27, %v4718_v57  ;;  %v1899_v34 = vpack.c.bf16 %v999_v26, %v997_v6 }
 0x2a7   : > { %1402 = vmax.xlane.f32.xlu1 %v1401_v0  ;;  %1908 = vmatpush.bf16.msrb.mxu1 %v1899_v34  ;;  %v1892_v34 = vpack.c.bf16 %v964_v32, %v962_v22 }
 0x2aa   : > { %v4731_v42 = vpop.f32.mrf.mxu2 }
 0x2ac   : > { %v4725_v2 = vpop.f32.mrf.mxu0 }
 0x2ad   : > { %v1404_v38 = vmax.f32 %v4723_v36, %v4725_v2 }
 0x2af   : > { %1405 = vmax.xlane.f32.xlu1 %v1404_v38  ;;  %3560 = vmatmul.msk.bf16.gmra.mxu0 %vm1105_vm0, %v4619_v56  ;;  %v992_v56 = vadd.f32 %v4740_v47, %v991_v44  ;;  %v984_v44 = vadd.f32 %v4740_v47, %v983_v53  ;;  %v1894_v53 = vpack.c.bf16 %v974_v10, %v972_v39 }
 0x2b1   : > { %v1898_v62 = vpack.c.bf16 %v994_v35, %v992_v56 }
 0x2b2   : > { %v4744_v19 = vpop.f32.mrf.mxu2 }
 0x2b3   : > { %1909 = vmatpush.bf16.msrb.mxu1 %v1898_v62 }
 0x2b4   : > { %v4773_v38 = vpop.f32.mrf.mxu0 }
 0x2b5   : > { %v1407_v10 = vmax.f32 %v4781_v25, %v4773_v38 }
 0x2ba   : > { %v4748_v41 = vpop.f32.mrf.mxu2 }
 0x2bc   : > { %v4787_v5 = vpop.f32.mrf.mxu0 }
 0x2bf   : > { %3561 = vmatmul.msk.bf16.gmra.mxu0 %vm1105_vm0, %v4632_v31  ;;  %v987_v31 = vadd.f32 %v4740_v47, %v986_v37  ;;  %v1896_v37 = vpack.c.bf16 %v984_v44, %v982_v63 }
 0x2c1   : > { %v1897_v49 = vpack.c.bf16 %v989_v59, %v987_v31 }
 0x2c2   : > { %v4759_v16 = vpop.f32.mrf.mxu2 }
 0x2c3   : > { %1910 = vmatpush.bf16.msrb.mxu1 %v1897_v49  ;;  %v4795_v49 = vpop.f32.mrf.mxu3 }
 0x2c7   : > { %1911 = vmatpush.bf16.msrb.mxu1 %v1896_v37 }
 0x2ca   : > { %v4769_v3 = vpop.f32.mrf.mxu2 }
 0x2cb   : > { %1912 = vmatpush.bf16.msrb.mxu1 %v1895_v24 }
 0x2cf   : > { %3562 = vmatmul.msk.bf16.gmra.mxu0 %vm1105_vm0, %v4647_v21  ;;  %v967_v21 = vadd.f32 %v4740_v47, %v4649_v29  ;;  %1913 = vmatpush.bf16.msrb.mxu1 %v1894_v53 }
 0x2d1   : > { %v1893_v0 = vpack.c.bf16 %v969_v13, %v967_v21  ;;  %v4807_v13 = vpop.f32.mrf.mxu0 }
 0x2d2   : > { %v4783_v6 = vpop.f32.mrf.mxu2 }
 0x2d3   : > { %1914 = vmatpush.bf16.msrb.mxu1 %v1893_v0 }
 0x2d7   : > { %1915 = vmatpush.bf16.msrb.mxu1 %v1892_v34 }
 0x2d9   : > { %v4827_v34 = vpop.f32.mrf.mxu0 }
 0x2da   : > { %v4789_v35 = vpop.f32.mrf.mxu2 }
 0x2df   : > { %3563 = vmatmul.msk.bf16.gmra.mxu0 %vm1105_vm0, %v4664_v55 }
 0x2e2   : > { %v1382_v61 = vpop.xlane.xlu0 %1381  ;;  %v4801_v63 = vpop.f32.mrf.mxu2 }
 0x2e3   : > { %v1476_v29 = vsub.f32 %v4606_v54, %v1382_v61  ;;  %v1477_v50 = vsub.f32 %v4679_v4, %v1382_v61 }
 0x2e5   : > { %v1540_v55 = vmul.f32 1.442695, %v1476_v29  ;;  %v1542_v26 = vmul.f32 1.442695, %v1477_v50 }
 0x2e7   : > { %3766 = vpow2.f32 %v1540_v55 }
 0x2e8   : > { %3768 = vpow2.f32 %v1542_v26  ;;  %v1410_v26 = vmax.f32 %v4795_v49, %v4787_v5 }
 0x2ea   : > { %v1385_v56 = vpop.xlane.xlu0 %1384  ;;  %v4817_v61 = vpop.f32.mrf.mxu2 }
 0x2eb   : > { %v1478_v54 = vsub.f32 %v4616_v1, %v1385_v56  ;;  %v1479_v4 = vsub.f32 %v4685_v52, %v1385_v56 }
 0x2ed   : > { %v4791_v40 = vpop.eup %3766  ;;  %v1544_v31 = vmul.f32 1.442695, %v1478_v54  ;;  %v1546_v59 = vmul.f32 1.442695, %v1479_v4 }
 0x2ee   : > { %v4793_v62 = vpop.eup %3768 }
 0x2ef   : > { %3770 = vpow2.f32 %v1544_v31  ;;  %v1668_v60 = vadd.f32 %v4793_v62, %v4791_v40 }
 0x2f0   : > { %3772 = vpow2.f32 %v1546_v59 }
 0x2f1   : > { %1669 = vadd.xlane.f32.xlu2 %v1668_v60 }
 0x2f2   : > { %v1388_v1 = vpop.xlane.xlu1 %1387  ;;  %v4833_v4 = vpop.f32.mrf.mxu2 }
 0x2f3   : > { %v1480_v52 = vsub.f32 %v4621_v48, %v1388_v1  ;;  %v1481_v28 = vsub.f32 %v4690_v43, %v1388_v1  ;;  %v4813_v48 = vpop.f32.mrf.mxu3 }
 0x2f5   : > { %v4803_v44 = vpop.eup %3770  ;;  %v1548_v37 = vmul.f32 1.442695, %v1480_v52  ;;  %v1550_v24 = vmul.f32 1.442695, %v1481_v28  ;;  %v1413_v28 = vmax.f32 %v4813_v48, %v4807_v13 }
 0x2f6   : > { %v4805_v21 = vpop.eup %3772 }
 0x2f7   : > { %3774 = vpow2.f32 %v1548_v37  ;;  %v1671_v39 = vadd.f32 %v4805_v21, %v4803_v44 }
 0x2f8   : > { %3776 = vpow2.f32 %v1550_v24 }
 0x2f9   : > { %1672 = vadd.xlane.f32.xlu0 %v1671_v39  ;;  %1408 = vmax.xlane.f32.xlu2 %v1407_v10 }
 0x2fa   : > { %v1391_v43 = vpop.xlane.xlu1 %1390  ;;  %v4849_v10 = vpop.f32.mrf.mxu2 }
 0x2fb   : > { %v1482_v53 = vsub.f32 %v4629_v30, %v1391_v43  ;;  %v1483_v0 = vsub.f32 %v4696_v45, %v1391_v43  ;;  %v4829_v45 = vpop.f32.mrf.mxu3 }
 0x2fd   : > { %v4819_v29 = vpop.eup %3774  ;;  %v1552_v50 = vmul.f32 1.442695, %v1482_v53  ;;  %v1554_v22 = vmul.f32 1.442695, %v1483_v0 }
 0x2fe   : > { %v4821_v32 = vpop.eup %3776 }
 0x2ff   : > { %3778 = vpow2.f32 %v1552_v50  ;;  %v1674_v55 = vadd.f32 %v4821_v32, %v4819_v29 }
 0x300   : > { %3780 = vpow2.f32 %v1554_v22 }
 0x301   : > { %1675 = vadd.xlane.f32.xlu0 %v1674_v55  ;;  %1411 = vmax.xlane.f32.xlu2 %v1410_v26  ;;  %v1416_v55 = vmax.f32 %v4829_v45, %v4827_v34 }
 0x302   : > { %v1394_v30 = vpop.xlane.xlu2 %1393 }
 0x303   : > { %v1484_v56 = vsub.f32 %v4640_v23, %v1394_v30  ;;  %v1485_v54 = vsub.f32 %v4701_v58, %v1394_v30  ;;  %v4843_v58 = vpop.f32.mrf.mxu0  ;;  %v4847_v39 = vpop.f32.mrf.mxu3 }
 0x305   : > { %v4835_v31 = vpop.eup %3778  ;;  %v1556_v59 = vmul.f32 1.442695, %v1484_v56  ;;  %v1558_v60 = vmul.f32 1.442695, %v1485_v54  ;;  %v1028_v56 = vpop.f32.mrf.mxu2 }
 0x306   : > { %v4837_v1 = vpop.eup %3780 }
 0x307   : > { %3782 = vpow2.f32 %v1556_v59  ;;  %v1677_v52 = vadd.f32 %v4837_v1, %v4835_v31 }
 0x308   : > { %3784 = vpow2.f32 %v1558_v60 }
 0x309   : > { %1678 = vadd.xlane.f32.xlu1 %v1677_v52  ;;  %1414 = vmax.xlane.f32.xlu0 %v1413_v28 }
 0x30a   : > { %v1397_v23 = vpop.xlane.xlu2 %1396 }
 0x30b   : > { %v1486_v37 = vsub.f32 %v4651_v46, %v1397_v23  ;;  %v1487_v24 = vsub.f32 %v4707_v33, %v1397_v23  ;;  %v4861_v30 = vpop.f32.mrf.mxu0  ;;  %v4867_v28 = vpop.f32.mrf.mxu3 }
 0x30d   : > { %v4851_v43 = vpop.eup %3782  ;;  %v1560_v53 = vmul.f32 1.442695, %v1486_v37  ;;  %v1562_v0 = vmul.f32 1.442695, %v1487_v24 }
 0x30e   : > { %v4853_v50 = vpop.eup %3784 }
 0x30f   : > { %3786 = vpow2.f32 %v1560_v53  ;;  %v1680_v22 = vadd.f32 %v4853_v50, %v4851_v43  ;;  %v1031_v53 = vpop.f32.mrf.mxu2 }
 0x310   : > { %3788 = vpow2.f32 %v1562_v0  ;;  %v1032_v18 = vadd.f32 %v4740_v47, %v1031_v53 }
 0x311   : > { %1681 = vadd.xlane.f32.xlu1 %v1680_v22  ;;  %1417 = vmax.xlane.f32.xlu0 %v1416_v55 }
 0x312   : > { %v1400_v46 = vpop.xlane.xlu0 %1399 }
 0x313   : > { %v1488_v33 = vsub.f32 %v4661_v51, %v1400_v46  ;;  %v1489_v26 = vsub.f32 %v4712_v7, %v1400_v46  ;;  %v1419_v51 = vmax.f32 %v4847_v39, %v4843_v58 }
 0x315   : > { %v4863_v54 = vpop.eup %3786  ;;  %v1564_v59 = vmul.f32 1.442695, %v1488_v33  ;;  %v1566_v60 = vmul.f32 1.442695, %v1489_v26  ;;  %v4879_v33 = vpop.f32.mrf.mxu0 }
 0x316   : > { %v4865_v52 = vpop.eup %3788 }
 0x317   : > { %3790 = vpow2.f32 %v1564_v59  ;;  %v1683_v23 = vadd.f32 %v4865_v52, %v4863_v54  ;;  %v1422_v59 = vmax.f32 %v4867_v28, %v4861_v30 }
 0x318   : > { %3792 = vpow2.f32 %v1566_v60 }
 0x319   : > { %1684 = vadd.xlane.f32.xlu2 %v1683_v23  ;;  %1420 = vmax.xlane.f32.xlu1 %v1419_v51  ;;  %v1033_v51 = vpop.f32.mrf.mxu2 }
 0x31a   : > { %v1403_v7 = vpop.xlane.xlu1 %1402  ;;  %v1034_v17 = vadd.f32 %v4740_v47, %v1033_v51  ;;  %v1009_v51 = vadd.f32 %v4740_v47, %v4759_v16 }
 0x31b   : > { %v1490_v37 = vsub.f32 %v4670_v27, %v1403_v7  ;;  %v1491_v24 = vsub.f32 %v4718_v57, %v1403_v7  ;;  %v4885_v27 = vpop.f32.mrf.mxu3 }
 0x31d   : > { %v4875_v0 = vpop.eup %3790  ;;  %v1568_v22 = vmul.f32 1.442695, %v1490_v37  ;;  %v1570_v55 = vmul.f32 1.442695, %v1491_v24 }
 0x31e   : > { %v4877_v46 = vpop.eup %3792 }
 0x31f   : > { %3794 = vpow2.f32 %v1568_v22  ;;  %v1686_v26 = vadd.f32 %v4877_v46, %v4875_v0 }
 0x320   : > { %3796 = vpow2.f32 %v1570_v55 }
 0x321   : > { %1687 = vadd.xlane.f32.xlu2 %v1686_v26  ;;  %1423 = vmax.xlane.f32.xlu1 %v1422_v59  ;;  %v1425_v26 = vmax.f32 %v4885_v27, %v4879_v33  ;;  %v4897_v59 = vpop.f32.mrf.mxu0 }
 0x322   : > { %v1406_v57 = vpop.xlane.xlu1 %1405 }
 0x323   : > { %v1492_v60 = vsub.f32 %v4723_v36, %v1406_v57  ;;  %v1493_v23 = vsub.f32 %v4725_v2, %v1406_v57  ;;  %v4899_v36 = vpop.f32.mrf.mxu3  ;;  %v1036_v2 = vpop.f32.mrf.mxu2 }
 0x325   : > { %v4889_v7 = vpop.eup %3794  ;;  %v1572_v37 = vmul.f32 1.442695, %v1492_v60  ;;  %v1574_v24 = vmul.f32 1.442695, %v1493_v23 }
 0x326   : > { %v4891_v22 = vpop.eup %3796 }
 0x327   : > { %3798 = vpow2.f32 %v1572_v37  ;;  %v1689_v55 = vadd.f32 %v4891_v22, %v4889_v7  ;;  %v1428_v37 = vmax.f32 %v4899_v36, %v4897_v59 }
 0x328   : > { %3800 = vpow2.f32 %v1574_v24 }
 0x329   : > { %1690 = vadd.xlane.f32.xlu0 %v1689_v55  ;;  %1426 = vmax.xlane.f32.xlu2 %v1425_v26  ;;  %v4909_v24 = vpop.f32.mrf.mxu0  ;;  %v1037_v55 = vadd.f32 %v4740_v47, %v1036_v2  ;;  %v1906_v2 = vpack.c.bf16 %v1034_v17, %v1032_v18 }
 0x32b   : > { %v4912_v26 = vpop.f32.mrf.mxu3  ;;  %v1038_v20 = vpop.f32.mrf.mxu2 }
 0x32c   : > { %v1039_v15 = vadd.f32 %v4740_v47, %v1038_v20  ;;  %v1431_v14 = vmax.f32 %v4912_v26, %v4909_v24  ;;  %v1022_v20 = vadd.f32 %v4740_v47, %v4817_v61  ;;  %v1012_v61 = vadd.f32 %v4740_v47, %v4769_v3 }
 0x32d   : > { %v4901_v57 = vpop.eup %3798 }
 0x32e   : > { %v4903_v60 = vpop.eup %3800  ;;  %v1907_v12 = vpack.c.bf16 %v1039_v15, %v1037_v55  ;;  %v1024_v15 = vadd.f32 %v4740_v47, %v4833_v4  ;;  %v1014_v4 = vadd.f32 %v4740_v47, %v4783_v6  ;;  %v1004_v55 = vadd.f32 %v4740_v47, %v4744_v19 }
 0x32f   : > { %v1692_v23 = vadd.f32 %v4903_v60, %v4901_v57 }
 0x330   : > { %1997 = vmatpush.bf16.msrb.mxu2 %v1907_v12  ;;  %v1017_v12 = vadd.f32 %v4740_v47, %v4789_v35  ;;  %v1904_v17 = vpack.c.bf16 %v1024_v15, %v1022_v20  ;;  %v1902_v35 = vpack.c.bf16 %v1014_v4, %v1012_v61 }
 0x331   : > { %1693 = vadd.xlane.f32.xlu0 %v1692_v23  ;;  %1429 = vmax.xlane.f32.xlu2 %v1428_v37  ;;  %v1027_v23 = vadd.f32 %v4740_v47, %v4849_v10  ;;  %v1029_v37 = vadd.f32 %v4740_v47, %v1028_v56  ;;  %v4922_v11 = vpop.f32.mrf.mxu0  ;;  %v1007_v56 = vadd.f32 %v4740_v47, %v4748_v41 }
 0x333   : > { %v1905_v53 = vpack.c.bf16 %v1029_v37, %v1027_v23  ;;  %v4924_v9 = vpop.f32.mrf.mxu3  ;;  %v1901_v23 = vpack.c.bf16 %v1009_v51, %v1007_v56 }
 0x334   : > { %1998 = vmatpush.bf16.msrb.mxu2 %v1906_v2  ;;  %v1434_v10 = vmax.f32 %v4924_v9, %v4922_v11 }
 0x338   : > { %1999 = vmatpush.bf16.msrb.mxu2 %v1905_v53 }
 0x339   : > { %1432 = vmax.xlane.f32.xlu0 %v1431_v14  ;;  %v1019_v14 = vadd.f32 %v4740_v47, %v4801_v63  ;;  %v1002_v63 = vadd.f32 %v4740_v47, %v4731_v42  ;;  %v4950_v47 = vpop.f32.mrf.mxu0 }
 0x33b   : > { %v1903_v18 = vpack.c.bf16 %v1019_v14, %v1017_v12  ;;  %v1900_v3 = vpack.c.bf16 %v1004_v55, %v1002_v63 }
 0x33c   : > { %2000 = vmatpush.bf16.msrb.mxu2 %v1904_v17 }
 0x340   : > { %2001 = vmatpush.bf16.msrb.mxu2 %v1903_v18  ;;  %v4956_v18 = vpop.f32.mrf.mxu3 }
 0x341   : > { %1435 = vmax.xlane.f32.xlu0 %v1434_v10 }
 0x344   : > { %2002 = vmatpush.bf16.msrb.mxu2 %v1902_v35 }
 0x348   : > { %2003 = vmatpush.bf16.msrb.mxu2 %v1901_v23 }
 0x34c   : > { %2004 = vmatpush.bf16.msrb.mxu2 %v1900_v3  ;;  %v4972_v3 = vpop.f32.mrf.mxu3 }
 0x364   : > { %v1670_v6 = vpop.xlane.xlu2 %1669 }
 0x365   : > { %3802 = vrcp.f32 %v1670_v6 }
 0x36b   : > { %v3803_v15 = vpop.eup %3802 }
 0x36c   : > { %v1673_v37 = vpop.xlane.xlu0 %1672  ;;  %v1409_v2 = vpop.xlane.xlu2 %1408  ;;  %v1796_v19 = vmul.f32 %v3803_v15, %v4791_v40  ;;  %v1797_v10 = vmul.f32 %v3803_v15, %v4793_v62 }
 0x36d   : > { %3804 = vrcp.f32 %v1673_v37  ;;  %v1494_v41 = vsub.f32 %v4781_v25, %v1409_v2  ;;  %v1495_v16 = vsub.f32 %v4773_v38, %v1409_v2 }
 0x36f   : > { %v1576_v53 = vmul.f32 1.442695, %v1494_v41  ;;  %v1578_v20 = vmul.f32 1.442695, %v1495_v16 }
 0x371   : > { %3806 = vpow2.f32 %v1576_v53 }
 0x372   : > { %3808 = vpow2.f32 %v1578_v20 }
 0x373   : > { %v3805_v42 = vpop.eup %3804 }
 0x374   : > { %v1798_v12 = vmul.f32 %v3805_v42, %v4803_v44  ;;  %v1799_v14 = vmul.f32 %v3805_v42, %v4805_v21  ;;  %v1676_v17 = vpop.xlane.xlu0 %1675  ;;  %v1412_v25 = vpop.xlane.xlu2 %1411 }
 0x375   : > { %v1496_v38 = vsub.f32 %v4795_v49, %v1412_v25  ;;  %v1497_v61 = vsub.f32 %v4787_v5, %v1412_v25  ;;  %v4966_v5 = vpop.f32.mrf.mxu0 }
 0x376   : > { %v1860_v4 = vpack.c.bf16 %v1798_v12, %v1796_v19  ;;  %v1861_v56 = vpack.c.bf16 %v1799_v14, %v1797_v10 }
 0x377   : > { %v4960_v51 = vpop.eup %3806  ;;  %v1580_v35 = vmul.f32 1.442695, %v1496_v38  ;;  %v1582_v40 = vmul.f32 1.442695, %v1497_v61 }
 0x378   : > { %v4962_v63 = vpop.eup %3808  ;;  %1916 = vmatmul.bf16.vlgmr.msrb.gmra.mxu1 %v1860_v4  ;;  %2005 = vmatmul.bf16.vlgmr.msrb.gmra.mxu2 %v1861_v56 }
 0x379   : > { %3810 = vpow2.f32 %v1580_v35  ;;  %v1695_v62 = vadd.f32 %v4962_v63, %v4960_v51 }
 0x37a   : > { %3812 = vpow2.f32 %v1582_v40 }
 0x37b   : > { %3814 = vrcp.f32 %v1676_v17  ;;  %1696 = vadd.xlane.f32.xlu1 %v1695_v62 }
 0x37c   : > { %v1679_v49 = vpop.xlane.xlu1 %1678  ;;  %v1415_v44 = vpop.xlane.xlu0 %1414 }
 0x37d   : > { %3816 = vrcp.f32 %v1679_v49  ;;  %v1498_v21 = vsub.f32 %v4813_v48, %v1415_v44  ;;  %v1499_v55 = vsub.f32 %v4807_v13, %v1415_v44  ;;  %v4986_v38 = vpop.f32.mrf.mxu0 }
 0x37f   : > { %v4970_v23 = vpop.eup %3810  ;;  %v1584_v6 = vmul.f32 1.442695, %v1498_v21  ;;  %v1586_v37 = vmul.f32 1.442695, %v1499_v55 }
 0x380   : > { %v4974_v2 = vpop.eup %3812 }
 0x381   : > { %v3815_v41 = vpop.eup %3814  ;;  %3818 = vpow2.f32 %v1584_v6  ;;  %v1698_v16 = vadd.f32 %v4974_v2, %v4970_v23 }
 0x382   : > { %3820 = vpow2.f32 %v1586_v37  ;;  %v1800_v13 = vmul.f32 %v3815_v41, %v4819_v29  ;;  %v1801_v42 = vmul.f32 %v3815_v41, %v4821_v32  ;;  %v4990_v29 = vpop.f32.mrf.mxu3  ;;  %v1440_v37 = vmax.f32 %v4972_v3, %v4966_v5 }
 0x383   : > { %v3817_v53 = vpop.eup %3816  ;;  %1699 = vadd.xlane.f32.xlu1 %v1698_v16 }
 0x384   : > { %v1682_v20 = vpop.xlane.xlu1 %1681  ;;  %v1418_v48 = vpop.xlane.xlu0 %1417  ;;  %v1802_v15 = vmul.f32 %v3817_v53, %v4835_v31  ;;  %v1803_v19 = vmul.f32 %v3817_v53, %v4837_v1 }
 0x385   : > { %v1500_v10 = vsub.f32 %v4829_v45, %v1418_v48  ;;  %v1501_v12 = vsub.f32 %v4827_v34, %v1418_v48  ;;  %v1437_v34 = vmax.f32 %v4956_v18, %v4950_v47  ;;  %v5002_v55 = vpop.f32.mrf.mxu0 }
 0x386   : > { %v1862_v14 = vpack.c.bf16 %v1802_v15, %v1800_v13  ;;  %v1863_v17 = vpack.c.bf16 %v1803_v19, %v1801_v42 }
 0x387   : > { %v4984_v25 = vpop.eup %3818  ;;  %v1588_v61 = vmul.f32 1.442695, %v1500_v10  ;;  %v1590_v4 = vmul.f32 1.442695, %v1501_v12 }
 0x388   : > { %v4988_v56 = vpop.eup %3820  ;;  %1921 = vmatmul.bf16.gmra.mxu1 %v1862_v14  ;;  %2010 = vmatmul.bf16.gmra.mxu2 %v1863_v17 }
 0x389   : > { %3822 = vpow2.f32 %v1588_v61  ;;  %v1701_v32 = vadd.f32 %v4988_v56, %v4984_v25 }
 0x38a   : > { %3824 = vpow2.f32 %v1590_v4  ;;  %v5008_v41 = vpop.f32.mrf.mxu3 }
 0x38b   : > { %3826 = vrcp.f32 %v1682_v20  ;;  %1702 = vadd.xlane.f32.xlu2 %v1701_v32  ;;  %1438 = vmax.xlane.f32.xlu1 %v1437_v34 }
 0x38c   : > { %v1685_v45 = vpop.xlane.xlu2 %1684  ;;  %v1421_v31 = vpop.xlane.xlu1 %1420 }
 0x38d   : > { %3828 = vrcp.f32 %v1685_v45  ;;  %v1502_v1 = vsub.f32 %v4847_v39, %v1421_v31  ;;  %v1503_v35 = vsub.f32 %v4843_v58, %v1421_v31 }
 0x38f   : > { %v4998_v40 = vpop.eup %3822  ;;  %v1592_v62 = vmul.f32 1.442695, %v1502_v1  ;;  %v1594_v49 = vmul.f32 1.442695, %v1503_v35 }
 0x390   : > { %v5000_v44 = vpop.eup %3824 }
 0x391   : > { %v3827_v21 = vpop.eup %3826  ;;  %3830 = vpow2.f32 %v1592_v62  ;;  %v1704_v6 = vadd.f32 %v5000_v44, %v4998_v40 }
 0x392   : > { %3832 = vpow2.f32 %v1594_v49  ;;  %v1804_v53 = vmul.f32 %v3827_v21, %v4851_v43  ;;  %v1805_v48 = vmul.f32 %v3827_v21, %v4853_v50  ;;  %v1443_v50 = vmax.f32 %v4990_v29, %v4986_v38  ;;  %v5028_v32 = vpop.f32.mrf.mxu3 }
 0x393   : > { %v3829_v39 = vpop.eup %3828  ;;  %1705 = vadd.xlane.f32.xlu2 %v1704_v6  ;;  %1441 = vmax.xlane.f32.xlu1 %v1440_v37  ;;  %v1446_v49 = vmax.f32 %v5008_v41, %v5002_v55 }
 0x394   : > { %v1688_v58 = vpop.xlane.xlu2 %1687  ;;  %v1424_v16 = vpop.xlane.xlu1 %1423  ;;  %v1806_v20 = vmul.f32 %v3829_v39, %v4863_v54  ;;  %v1807_v13 = vmul.f32 %v3829_v39, %v4865_v52 }
 0x395   : > { %v1504_v15 = vsub.f32 %v4867_v28, %v1424_v16  ;;  %v1505_v42 = vsub.f32 %v4861_v30, %v1424_v16  ;;  %v5024_v54 = vpop.f32.mrf.mxu0 }
 0x396   : > { %v1864_v19 = vpack.c.bf16 %v1806_v20, %v1804_v53  ;;  %v1865_v10 = vpack.c.bf16 %v1807_v13, %v1805_v48 }
 0x397   : > { %v5016_v12 = vpop.eup %3830  ;;  %v1596_v14 = vmul.f32 1.442695, %v1504_v15  ;;  %v1598_v17 = vmul.f32 1.442695, %v1505_v42 }
 0x398   : > { %v5018_v61 = vpop.eup %3832  ;;  %1926 = vmatmul.bf16.gmra.mxu1 %v1864_v19  ;;  %2015 = vmatmul.bf16.gmra.mxu2 %v1865_v10 }
 0x399   : > { %3834 = vpow2.f32 %v1596_v14  ;;  %v1707_v43 = vadd.f32 %v5018_v61, %v5016_v12 }
 0x39a   : > { %3836 = vpow2.f32 %v1598_v17 }
 0x39b   : > { %3838 = vrcp.f32 %v1688_v58  ;;  %1708 = vadd.xlane.f32.xlu0 %v1707_v43  ;;  %1444 = vmax.xlane.f32.xlu2 %v1443_v50 }
 0x39c   : > { %v1691_v30 = vpop.xlane.xlu0 %1690  ;;  %v1427_v52 = vpop.xlane.xlu2 %1426 }
 0x39d   : > { %3840 = vrcp.f32 %v1691_v30  ;;  %v1506_v28 = vsub.f32 %v4885_v27, %v1427_v52  ;;  %v1507_v4 = vsub.f32 %v4879_v33, %v1427_v52  ;;  %v5046_v20 = vpop.f32.mrf.mxu0 }
 0x39f   : > { %v5030_v34 = vpop.eup %3834  ;;  %v1600_v45 = vmul.f32 1.442695, %v1506_v28  ;;  %v1602_v31 = vmul.f32 1.442695, %v1507_v4 }
 0x3a0   : > { %v5032_v1 = vpop.eup %3836 }
 0x3a1   : > { %v3839_v35 = vpop.eup %3838  ;;  %3842 = vpow2.f32 %v1600_v45  ;;  %v1710_v62 = vadd.f32 %v5032_v1, %v5030_v34 }
 0x3a2   : > { %3844 = vpow2.f32 %v1602_v31  ;;  %v1808_v6 = vmul.f32 %v3839_v35, %v4875_v0  ;;  %v1809_v39 = vmul.f32 %v3839_v35, %v4877_v46  ;;  %v5052_v0 = vpop.f32.mrf.mxu3 }
 0x3a3   : > { %v3841_v27 = vpop.eup %3840  ;;  %1711 = vadd.xlane.f32.xlu0 %v1710_v62  ;;  %1447 = vmax.xlane.f32.xlu2 %v1446_v49  ;;  %v1452_v28 = vmax.f32 %v5052_v0, %v5046_v20 }
 0x3a4   : > { %v5038_v33 = vpop.xlane.xlu0 %1693  ;;  %v1430_v21 = vpop.xlane.xlu2 %1429  ;;  %v1810_v37 = vmul.f32 %v3841_v27, %v4889_v7  ;;  %v1811_v58 = vmul.f32 %v3841_v27, %v4891_v22  ;;  %v1449_v7 = vmax.f32 %v5028_v32, %v5024_v54 }
 0x3a5   : > { %v1508_v16 = vsub.f32 %v4899_v36, %v1430_v21  ;;  %v1509_v53 = vsub.f32 %v4897_v59, %v1430_v21  ;;  %v5064_v30 = vpop.f32.mrf.mxu0 }
 0x3a6   : > { %v1866_v48 = vpack.c.bf16 %v1810_v37, %v1808_v6  ;;  %v1867_v13 = vpack.c.bf16 %v1811_v58, %v1809_v39 }
 0x3a7   : > { %v5048_v15 = vpop.eup %3842  ;;  %v1604_v42 = vmul.f32 1.442695, %v1508_v16  ;;  %v1606_v19 = vmul.f32 1.442695, %v1509_v53 }
 0x3a8   : > { %v5050_v10 = vpop.eup %3844  ;;  %1931 = vmatmul.bf16.gmra.mxu1 %v1866_v48  ;;  %2020 = vmatmul.bf16.gmra.mxu2 %v1867_v13 }
 0x3a9   : > { %3846 = vpow2.f32 %v1604_v42  ;;  %v1713_v46 = vadd.f32 %v5050_v10, %v5048_v15 }
 0x3aa   : > { %3848 = vpow2.f32 %v1606_v19  ;;  %v5070_v4 = vpop.f32.mrf.mxu3 }
 0x3ab   : > { %1714 = vadd.xlane.f32.xlu1 %v1713_v46  ;;  %1450 = vmax.xlane.f32.xlu0 %v1449_v7  ;;  %v1455_v21 = vmax.f32 %v5070_v4, %v5064_v30  ;;  %v3624_v46 = vld [vmem:[%s515_s18 + $0x8] sm:$0xff]  ;;  %v3623_v7 = vld [vmem:[%s515_s18] sm:$0xff] }
 0x3ac   : > { %v1433_v22 = vpop.xlane.xlu0 %1432  ;;  %2172 = vmatpush.bf16.msra.mxu0 %v3624_v46  ;;  %3720 = vmatpush.bf16.msrb.mxu3 %v3624_v46 }
 0x3ad   : > { %v1510_v59 = vsub.f32 %v4912_v26, %v1433_v22  ;;  %v1511_v36 = vsub.f32 %v4909_v24, %v1433_v22  ;;  %v5082_v6 = vpop.f32.mrf.mxu0 }
 0x3af   : > { %v5060_v14 = vpop.eup %3846  ;;  %v1608_v17 = vmul.f32 1.442695, %v1510_v59  ;;  %v1610_v43 = vmul.f32 1.442695, %v1511_v36 }
 0x3b0   : > { %v5062_v50 = vpop.eup %3848  ;;  %2173 = vmatpush.bf16.msra.mxu0 %v3623_v7  ;;  %3721 = vmatpush.bf16.msrb.mxu3 %v3623_v7 }
 0x3b1   : > { %3850 = vpow2.f32 %v1608_v17  ;;  %v1716_v52 = vadd.f32 %v5062_v50, %v5060_v14 }
 0x3b2   : > { %3852 = vpow2.f32 %v1610_v43 }
 0x3b3   : > { %1717 = vadd.xlane.f32.xlu1 %v1716_v52  ;;  %1453 = vmax.xlane.f32.xlu0 %v1452_v28 }
 0x3b4   : > { %v1436_v24 = vpop.xlane.xlu0 %1435 }
 0x3b5   : > { %v1512_v26 = vsub.f32 %v4924_v9, %v1436_v24  ;;  %v1513_v45 = vsub.f32 %v4922_v11, %v1436_v24  ;;  %v5084_v9 = vpop.f32.mrf.mxu3  ;;  %v5094_v16 = vpop.f32.mrf.mxu0 }
 0x3b6   : > { %v1458_v58 = vmax.f32 %v5084_v9, %v5082_v6 }
 0x3b7   : > { %v5074_v31 = vpop.eup %3850  ;;  %v1612_v35 = vmul.f32 1.442695, %v1512_v26  ;;  %v1614_v62 = vmul.f32 1.442695, %v1513_v45 }
 0x3b8   : > { %v5076_v49 = vpop.eup %3852 }
 0x3b9   : > { %3854 = vpow2.f32 %v1612_v35  ;;  %v1719_v27 = vadd.f32 %v5076_v49, %v5074_v31 }
 0x3ba   : > { %3856 = vpow2.f32 %v1614_v62 }
 0x3bb   : > { %1720 = vadd.xlane.f32.xlu2 %v1719_v27  ;;  %1456 = vmax.xlane.f32.xlu1 %v1455_v21  ;;  %3858 = vrcp.f32 %v5038_v33 }
 0x3bd   : > { %v5096_v53 = vpop.f32.mrf.mxu3  ;;  %v5100_v13 = vpop.f32.mrf.mxu0 }
 0x3be   : > { %v1461_v48 = vmax.f32 %v5096_v53, %v5094_v16 }
 0x3bf   : > { %v5086_v11 = vpop.eup %3854 }
 0x3c0   : > { %v5088_v37 = vpop.eup %3856 }
 0x3c1   : > { %v1722_v39 = vadd.f32 %v5088_v37, %v5086_v11  ;;  %v3859_v59 = vpop.eup %3858 }
 0x3c2   : > { %v1812_v52 = vmul.f32 %v3859_v59, %v4901_v57  ;;  %v1813_v24 = vmul.f32 %v3859_v59, %v4903_v60 }
 0x3c3   : > { %1723 = vadd.xlane.f32.xlu2 %v1722_v39  ;;  %1459 = vmax.xlane.f32.xlu1 %v1458_v58 }
 0x3c5   : > { %v5102_v42 = vpop.f32.mrf.mxu3 }
 0x3c6   : > { %v1464_v19 = vmax.f32 %v5102_v42, %v5100_v13 }
 0x3cb   : > { %1462 = vmax.xlane.f32.xlu2 %v1461_v48 }
 0x3d3   : > { %1465 = vmax.xlane.f32.xlu2 %v1464_v19 }
 0x3ee   : > { %v1697_v22 = vpop.xlane.xlu1 %1696 }
 0x3ef   : > { %3860 = vrcp.f32 %v1697_v22 }
 0x3f5   : > { %v3861_v36 = vpop.eup %3860  ;;  %v1917_v17 = vpop.f32.mrf.mxu1 }
 0x3f6   : > { %v1700_v43 = vpop.xlane.xlu1 %1699  ;;  %v1814_v28 = vmul.f32 %v3861_v36, %v4960_v51  ;;  %v1815_v26 = vmul.f32 %v3861_v36, %v4962_v63 }
 0x3f7   : > { %3862 = vrcp.f32 %v1700_v43 }
 0x3f8   : > { %v1868_v45 = vpack.c.bf16 %v1814_v28, %v1812_v52  ;;  %v1869_v35 = vpack.c.bf16 %v1815_v26, %v1813_v24 }
 0x3fa   : > { %1936 = vmatmul.bf16.gmra.mxu1 %v1868_v45  ;;  %2025 = vmatmul.bf16.gmra.mxu2 %v1869_v35 }
 0x3fb   : > { %v2006_v62 = vpop.f32.mrf.mxu2 }
 0x3fc   : > { %v2007_v63 = vadd.f32 %v2006_v62, %v1917_v17 }
 0x3fd   : > { %v1919_v33 = vpop.f32.mrf.mxu1  ;;  %v3863_v48 = vpop.eup %3862 }
 0x3fe   : > { %v1703_v27 = vpop.xlane.xlu2 %1702  ;;  %v1439_v21 = vpop.xlane.xlu1 %1438  ;;  %v1816_v22 = vmul.f32 %v3863_v48, %v4970_v23 }
 0x3ff   : > { %3864 = vrcp.f32 %v1703_v27  ;;  %v1514_v39 = vsub.f32 %v4956_v18, %v1439_v21  ;;  %v1515_v57 = vsub.f32 %v4950_v47, %v1439_v21  ;;  %v1817_v18 = vmul.f32 %v3863_v48, %v4974_v2  ;;  %v5136_v48 = vpop.f32.mrf.mxu0 }
 0x401   : > { %v1616_v58 = vmul.f32 1.442695, %v1514_v39  ;;  %v1618_v51 = vmul.f32 1.442695, %v1515_v57 }
 0x403   : > { %3866 = vpow2.f32 %v1616_v58  ;;  %v2008_v60 = vpop.f32.mrf.mxu2 }
 0x404   : > { %3868 = vpow2.f32 %v1618_v51  ;;  %v2009_v19 = vadd.f32 %v2008_v60, %v1919_v33 }
 0x405   : > { %v3865_v46 = vpop.eup %3864  ;;  %v1922_v7 = vpop.f32.mrf.mxu1 }
 0x406   : > { %v2086_v59 = vpack.c.bf16 %v2009_v19, %v2007_v63  ;;  %v1706_v36 = vpop.xlane.xlu2 %1705  ;;  %v1442_v43 = vpop.xlane.xlu1 %1441  ;;  %v1818_v52 = vmul.f32 %v3865_v46, %v4984_v25  ;;  %v1819_v47 = vmul.f32 %v3865_v46, %v4988_v56 }
 0x407   : > { %v1516_v28 = vsub.f32 %v4972_v3, %v1442_v43  ;;  %v1517_v24 = vsub.f32 %v4966_v5, %v1442_v43  ;;  %3870 = vrcp.f32 %v1706_v36 }
 0x408   : > { %3572 = vmatmul.msk.bf16.vlgmr.msra.gmra.mxu0 %vm1105_vm0, %v2086_v59  ;;  %v1870_v17 = vpack.c.bf16 %v1818_v52, %v1816_v22  ;;  %v1871_v26 = vpack.c.bf16 %v1819_v47, %v1817_v18  ;;  %v5140_v22 = vpop.f32.mrf.mxu3 }
 0x409   : > { %v5124_v45 = vpop.eup %3866  ;;  %v1620_v23 = vmul.f32 1.442695, %v1516_v28  ;;  %v1622_v35 = vmul.f32 1.442695, %v1517_v24 }
 0x40a   : > { %v5126_v62 = vpop.eup %3868  ;;  %1941 = vmatmul.bf16.gmra.mxu1 %v1870_v17  ;;  %2030 = vmatmul.bf16.gmra.mxu2 %v1871_v26 }
 0x40b   : > { %3872 = vpow2.f32 %v1620_v23  ;;  %v2011_v2 = vpop.f32.mrf.mxu2  ;;  %v1725_v3 = vadd.f32 %v5126_v62, %v5124_v45 }
 0x40c   : > { %3874 = vpow2.f32 %v1622_v35  ;;  %v2012_v19 = vadd.f32 %v2011_v2, %v1922_v7 }
 0x40d   : > { %1726 = vadd.xlane.f32.xlu0 %v1725_v3  ;;  %v1924_v5 = vpop.f32.mrf.mxu1  ;;  %v3871_v21 = vpop.eup %3870 }
 0x40e   : > { %v1709_v25 = vpop.xlane.xlu0 %1708  ;;  %v1445_v56 = vpop.xlane.xlu2 %1444  ;;  %v1820_v59 = vmul.f32 %v3871_v21, %v4998_v40  ;;  %v1821_v47 = vmul.f32 %v3871_v21, %v5000_v44 }
 0x40f   : > { %3876 = vrcp.f32 %v1709_v25  ;;  %v1518_v33 = vsub.f32 %v4990_v29, %v1445_v56  ;;  %v1519_v27 = vsub.f32 %v4986_v38, %v1445_v56 }
 0x411   : > { %v5132_v39 = vpop.eup %3872  ;;  %v1624_v57 = vmul.f32 1.442695, %v1518_v33  ;;  %v1626_v58 = vmul.f32 1.442695, %v1519_v27  ;;  %v5161_v27 = vpop.f32.mrf.mxu3 }
 0x412   : > { %v5134_v51 = vpop.eup %3874 }
 0x413   : > { %3878 = vpow2.f32 %v1624_v57  ;;  %v2013_v60 = vpop.f32.mrf.mxu2  ;;  %v1728_v63 = vadd.f32 %v5134_v51, %v5132_v39 }
 0x414   : > { %3880 = vpow2.f32 %v1626_v58  ;;  %v2014_v46 = vadd.f32 %v2013_v60, %v1924_v5 }
 0x415   : > { %v3877_v29 = vpop.eup %3876  ;;  %1729 = vadd.xlane.f32.xlu0 %v1728_v63  ;;  %v1927_v38 = vpop.f32.mrf.mxu1 }
 0x416   : > { %v2087_v36 = vpack.c.bf16 %v2014_v46, %v2012_v19  ;;  %v1712_v43 = vpop.xlane.xlu0 %1711  ;;  %v1448_v52 = vpop.xlane.xlu2 %1447  ;;  %v1822_v18 = vmul.f32 %v3877_v29, %v5016_v12  ;;  %v1823_v28 = vmul.f32 %v3877_v29, %v5018_v61 }
 0x417   : > { %v1520_v7 = vsub.f32 %v5008_v41, %v1448_v52  ;;  %v1521_v24 = vsub.f32 %v5002_v55, %v1448_v52  ;;  %3882 = vrcp.f32 %v1712_v43  ;;  %v1467_v55 = vmax.f32 %v5140_v22, %v5136_v48  ;;  %v5157_v12 = vpop.f32.mrf.mxu0 }
 0x418   : > { %3573 = vmatmul.msk.bf16.vlgmr.msrb.gmra.mxu3 %vm1105_vm0, %v2087_v36  ;;  %v1872_v17 = vpack.c.bf16 %v1822_v18, %v1820_v59  ;;  %v1873_v26 = vpack.c.bf16 %v1823_v28, %v1821_v47  ;;  %v1470_v46 = vmax.f32 %v5161_v27, %v5157_v12 }
 0x419   : > { %v5149_v23 = vpop.eup %3878  ;;  %v1628_v40 = vmul.f32 1.442695, %v1520_v7  ;;  %v1630_v35 = vmul.f32 1.442695, %v1521_v24 }
 0x41a   : > { %v5151_v2 = vpop.eup %3880  ;;  %1946 = vmatmul.bf16.gmra.mxu1 %v1872_v17  ;;  %2035 = vmatmul.bf16.gmra.mxu2 %v1873_v26 }
 0x41b   : > { %3884 = vpow2.f32 %v1628_v40  ;;  %v2016_v44 = vpop.f32.mrf.mxu2  ;;  %v1731_v41 = vadd.f32 %v5151_v2, %v5149_v23 }
 0x41c   : > { %3886 = vpow2.f32 %v1630_v35 }
 0x41d   : > { %1732 = vadd.xlane.f32.xlu1 %v1731_v41  ;;  %1468 = vmax.xlane.f32.xlu0 %v1467_v55  ;;  %v1929_v5 = vpop.f32.mrf.mxu1  ;;  %v3883_v33 = vpop.eup %3882 }
 0x41e   : > { %v1715_v61 = vpop.xlane.xlu1 %1714  ;;  %v1451_v3 = vpop.xlane.xlu0 %1450  ;;  %v1824_v59 = vmul.f32 %v3883_v33, %v5030_v34  ;;  %v1825_v47 = vmul.f32 %v3883_v33, %v5032_v1 }
 0x41f   : > { %3888 = vrcp.f32 %v1715_v61  ;;  %v1522_v25 = vsub.f32 %v5028_v32, %v1451_v3  ;;  %v1523_v56 = vsub.f32 %v5024_v54, %v1451_v3  ;;  %v2017_v32 = vadd.f32 %v2016_v44, %v1927_v38  ;;  %v5177_v24 = vpop.f32.mrf.mxu0  ;;  %v5184_v1 = vpop.f32.mrf.mxu3 }
 0x421   : > { %v5163_v21 = vpop.eup %3884  ;;  %v1632_v57 = vmul.f32 1.442695, %v1522_v25  ;;  %v1634_v58 = vmul.f32 1.442695, %v1523_v56 }
 0x422   : > { %v5165_v60 = vpop.eup %3886 }
 0x423   : > { %3890 = vpow2.f32 %v1632_v57  ;;  %v2018_v63 = vpop.f32.mrf.mxu2  ;;  %v1734_v19 = vadd.f32 %v5165_v60, %v5163_v21 }
 0x424   : > { %3892 = vpow2.f32 %v1634_v58  ;;  %v2019_v54 = vadd.f32 %v2018_v63, %v1929_v5 }
 0x425   : > { %v3889_v29 = vpop.eup %3888  ;;  %1735 = vadd.xlane.f32.xlu1 %v1734_v19  ;;  %1471 = vmax.xlane.f32.xlu0 %v1470_v46  ;;  %v1932_v40 = vpop.f32.mrf.mxu1 }
 0x426   : > { %v2088_v36 = vpack.c.bf16 %v2019_v54, %v2017_v32  ;;  %v1718_v43 = vpop.xlane.xlu1 %1717  ;;  %v1454_v52 = vpop.xlane.xlu0 %1453  ;;  %v1826_v18 = vmul.f32 %v3889_v29, %v5048_v15  ;;  %v1827_v28 = vmul.f32 %v3889_v29, %v5050_v10 }
 0x427   : > { %v1524_v7 = vsub.f32 %v5052_v0, %v1454_v52  ;;  %v1525_v38 = vsub.f32 %v5046_v20, %v1454_v52  ;;  %3894 = vrcp.f32 %v1718_v43  ;;  %v1473_v0 = vmax.f32 %v5184_v1, %v5177_v24 }
 0x428   : > { %3574 = vmatmul.msk.bf16.gmra.mxu3 %vm1105_vm0, %v2088_v36  ;;  %v1874_v17 = vpack.c.bf16 %v1826_v18, %v1824_v59  ;;  %v1875_v26 = vpack.c.bf16 %v1827_v28, %v1825_v47 }
 0x429   : > { %v5180_v34 = vpop.eup %3890  ;;  %v1636_v35 = vmul.f32 1.442695, %v1524_v7  ;;  %v1638_v44 = vmul.f32 1.442695, %v1525_v38 }
 0x42a   : > { %v5182_v15 = vpop.eup %3892  ;;  %1951 = vmatmul.bf16.gmra.mxu1 %v1874_v17  ;;  %2040 = vmatmul.bf16.gmra.mxu2 %v1875_v26 }
 0x42b   : > { %3896 = vpow2.f32 %v1636_v35  ;;  %v2021_v20 = vpop.f32.mrf.mxu2  ;;  %v1737_v10 = vadd.f32 %v5182_v15, %v5180_v34 }
 0x42c   : > { %3898 = vpow2.f32 %v1638_v44  ;;  %v2022_v46 = vadd.f32 %v2021_v20, %v1932_v40 }
 0x42d   : > { %1738 = vadd.xlane.f32.xlu2 %v1737_v10  ;;  %1474 = vmax.xlane.f32.xlu1 %v1473_v0  ;;  %v3895_v5 = vpop.eup %3894  ;;  %v1934_v58 = vpop.f32.mrf.mxu1 }
 0x42e   : > { %v1721_v41 = vpop.xlane.xlu2 %1720  ;;  %v1457_v55 = vpop.xlane.xlu1 %1456  ;;  %v1829_v43 = vmul.f32 %v3895_v5, %v5062_v50 }
 0x42f   : > { %3900 = vrcp.f32 %v1721_v41  ;;  %v1526_v61 = vsub.f32 %v5070_v4, %v1457_v55  ;;  %v1527_v3 = vsub.f32 %v5064_v30, %v1457_v55  ;;  %v1828_v30 = vmul.f32 %v3895_v5, %v5060_v14 }
 0x431   : > { %v5192_v25 = vpop.eup %3896  ;;  %v1640_v56 = vmul.f32 1.442695, %v1526_v61  ;;  %v1642_v33 = vmul.f32 1.442695, %v1527_v3 }
 0x432   : > { %v5194_v57 = vpop.eup %3898 }
 0x433   : > { %3902 = vpow2.f32 %v1640_v56  ;;  %v2023_v63 = vpop.f32.mrf.mxu2  ;;  %v1740_v19 = vadd.f32 %v5194_v57, %v5192_v25 }
 0x434   : > { %3904 = vpow2.f32 %v1642_v33  ;;  %v2024_v32 = vadd.f32 %v2023_v63, %v1934_v58 }
 0x435   : > { %v3901_v54 = vpop.eup %3900  ;;  %1741 = vadd.xlane.f32.xlu2 %v1740_v19 }
 0x436   : > { %v2089_v4 = vpack.c.bf16 %v2024_v32, %v2022_v46  ;;  %v1724_v29 = vpop.xlane.xlu2 %1723  ;;  %v1460_v59 = vpop.xlane.xlu1 %1459  ;;  %v1830_v36 = vmul.f32 %v3901_v54, %v5074_v31  ;;  %v1831_v52 = vmul.f32 %v3901_v54, %v5076_v49 }
 0x437   : > { %v1528_v18 = vsub.f32 %v5084_v9, %v1460_v59  ;;  %v1529_v47 = vsub.f32 %v5082_v6, %v1460_v59 }
 0x438   : > { %3575 = vmatmul.msk.bf16.gmra.mxu3 %vm1105_vm0, %v2089_v4  ;;  %v1876_v28 = vpack.c.bf16 %v1830_v36, %v1828_v30  ;;  %v1877_v7 = vpack.c.bf16 %v1831_v52, %v1829_v43 }
 0x439   : > { %v5205_v38 = vpop.eup %3902  ;;  %v1644_v14 = vmul.f32 1.442695, %v1528_v18  ;;  %v1646_v17 = vmul.f32 1.442695, %v1529_v47 }
 0x43a   : > { %v5207_v26 = vpop.eup %3904  ;;  %1956 = vmatmul.bf16.gmra.mxu1 %v1876_v28  ;;  %2045 = vmatmul.bf16.gmra.mxu2 %v1877_v7 }
 0x43b   : > { %3906 = vpow2.f32 %v1644_v14  ;;  %v1743_v50 = vadd.f32 %v5207_v26, %v5205_v38 }
 0x43c   : > { %3908 = vpow2.f32 %v1646_v17 }
 0x43d   : > { %1744 = vadd.xlane.f32.xlu0 %v1743_v50 }
 0x43e   : > { %v1463_v31 = vpop.xlane.xlu2 %1462 }
 0x43f   : > { %v1530_v49 = vsub.f32 %v5096_v53, %v1463_v31  ;;  %v1531_v6 = vsub.f32 %v5094_v16, %v1463_v31 }
 0x441   : > { %v5213_v9 = vpop.eup %3906  ;;  %v1648_v40 = vmul.f32 1.442695, %v1530_v49  ;;  %v1650_v35 = vmul.f32 1.442695, %v1531_v6 }
 0x442   : > { %v5215_v44 = vpop.eup %3908 }
 0x443   : > { %3910 = vpow2.f32 %v1648_v40  ;;  %v1746_v20 = vadd.f32 %v5215_v44, %v5213_v9 }
 0x444   : > { %3912 = vpow2.f32 %v1650_v35 }
 0x445   : > { %1747 = vadd.xlane.f32.xlu1 %v1746_v20 }
 0x446   : > { %v1466_v10 = vpop.xlane.xlu2 %1465 }
 0x447   : > { %v1532_v0 = vsub.f32 %v5102_v42, %v1466_v10  ;;  %v1533_v41 = vsub.f32 %v5100_v13, %v1466_v10 }
 0x449   : > { %v5221_v53 = vpop.eup %3910  ;;  %v1652_v16 = vmul.f32 1.442695, %v1532_v0  ;;  %v1654_v55 = vmul.f32 1.442695, %v1533_v41 }
 0x44a   : > { %v5223_v61 = vpop.eup %3912 }
 0x44b   : > { %3914 = vpow2.f32 %v1652_v16  ;;  %v1749_v3 = vadd.f32 %v5223_v61, %v5221_v53 }
 0x44c   : > { %3916 = vpow2.f32 %v1654_v55 }
 0x44d   : > { %1750 = vadd.xlane.f32.xlu2 %v1749_v3  ;;  %3918 = vrcp.f32 %v1724_v29 }
 0x451   : > { %v5227_v5 = vpop.eup %3914 }
 0x452   : > { %v5229_v56 = vpop.eup %3916 }
 0x453   : > { %v1752_v42 = vadd.f32 %v5229_v56, %v5227_v5  ;;  %v3919_v19 = vpop.eup %3918 }
 0x454   : > { %v1832_v36 = vmul.f32 %v3919_v19, %v5086_v11  ;;  %v1833_v47 = vmul.f32 %v3919_v19, %v5088_v37 }
 0x455   : > { %1753 = vadd.xlane.f32.xlu0 %v1752_v42 }
 0x477   : > { %v1937_v13 = vpop.f32.mrf.mxu1 }
 0x47d   : > { %v2026_v33 = vpop.f32.mrf.mxu2 }
 0x47e   : > { %v2027_v54 = vadd.f32 %v2026_v33, %v1937_v13 }
 0x47f   : > { %v1939_v58 = vpop.f32.mrf.mxu1 }
 0x480   : > { %v1727_v63 = vpop.xlane.xlu0 %1726 }
 0x481   : > { %3920 = vrcp.f32 %v1727_v63 }
 0x485   : > { %v2028_v46 = vpop.f32.mrf.mxu2  ;;  %v5233_v32 = vpop.f32.mrf.mxu0 }
 0x486   : > { %v2029_v30 = vadd.f32 %v2028_v46, %v1939_v58 }
 0x487   : > { %v3921_v4 = vpop.eup %3920  ;;  %v1942_v59 = vpop.f32.mrf.mxu1 }
 0x488   : > { %v2090_v43 = vpack.c.bf16 %v2029_v30, %v2027_v54  ;;  %v1730_v52 = vpop.xlane.xlu0 %1729  ;;  %v1834_v18 = vmul.f32 %v3921_v4, %v5124_v45  ;;  %v1835_v29 = vmul.f32 %v3921_v4, %v5126_v62 }
 0x489   : > { %3922 = vrcp.f32 %v1730_v52 }
 0x48a   : > { %3576 = vmatmul.msk.bf16.gmra.mxu3 %vm1105_vm0, %v2090_v43  ;;  %v1878_v28 = vpack.c.bf16 %v1834_v18, %v1832_v36  ;;  %v1879_v7 = vpack.c.bf16 %v1835_v29, %v1833_v47 }
 0x48c   : > { %1961 = vmatmul.bf16.gmra.mxu1 %v1878_v28  ;;  %2050 = vmatmul.bf16.gmra.mxu2 %v1879_v7 }
 0x48d   : > { %v2031_v14 = vpop.f32.mrf.mxu2  ;;  %v5240_v17 = vpop.f32.mrf.mxu0 }
 0x48e   : > { %v2032_v35 = vadd.f32 %v2031_v14, %v1942_v59 }
 0x48f   : > { %v1944_v50 = vpop.f32.mrf.mxu1  ;;  %v3923_v6 = vpop.eup %3922 }
 0x490   : > { %v1733_v11 = vpop.xlane.xlu1 %1732  ;;  %v1469_v31 = vpop.xlane.xlu0 %1468  ;;  %v1836_v41 = vmul.f32 %v3923_v6, %v5132_v39 }
 0x491   : > { %3924 = vrcp.f32 %v1733_v11  ;;  %v1534_v45 = vsub.f32 %v5140_v22, %v1469_v31  ;;  %v1535_v37 = vsub.f32 %v5136_v48, %v1469_v31  ;;  %v1837_v22 = vmul.f32 %v3923_v6, %v5134_v51 }
 0x493   : > { %v1656_v49 = vmul.f32 1.442695, %v1534_v45  ;;  %v1658_v62 = vmul.f32 1.442695, %v1535_v37 }
 0x495   : > { %3926 = vpow2.f32 %v1656_v49  ;;  %v2033_v40 = vpop.f32.mrf.mxu2 }
 0x496   : > { %3928 = vpow2.f32 %v1658_v62  ;;  %v2034_v20 = vadd.f32 %v2033_v40, %v1944_v50 }
 0x497   : > { %v3925_v10 = vpop.eup %3924  ;;  %v1947_v0 = vpop.f32.mrf.mxu1 }
 0x498   : > { %v2091_v16 = vpack.c.bf16 %v2034_v20, %v2032_v35  ;;  %v1736_v55 = vpop.xlane.xlu1 %1735  ;;  %v1472_v3 = vpop.xlane.xlu0 %1471  ;;  %v1838_v42 = vmul.f32 %v3925_v10, %v5149_v23  ;;  %v1839_v48 = vmul.f32 %v3925_v10, %v5151_v2 }
 0x499   : > { %v1536_v13 = vsub.f32 %v5161_v27, %v1472_v3  ;;  %v1537_v33 = vsub.f32 %v5157_v12, %v1472_v3  ;;  %3930 = vrcp.f32 %v1736_v55 }
 0x49a   : > { %3577 = vmatmul.msk.bf16.gmra.mxu3 %vm1105_vm0, %v2091_v16  ;;  %v1880_v58 = vpack.c.bf16 %v1838_v42, %v1836_v41  ;;  %v1881_v63 = vpack.c.bf16 %v1839_v48, %v1837_v22 }
 0x49b   : > { %v5251_v19 = vpop.eup %3926  ;;  %v1660_v39 = vmul.f32 1.442695, %v1536_v13  ;;  %v1662_v46 = vmul.f32 1.442695, %v1537_v33  ;;  %v5253_v54 = vpop.f32.mrf.mxu3 }
 0x49c   : > { %v5255_v30 = vpop.eup %3928  ;;  %1966 = vmatmul.bf16.gmra.mxu1 %v1880_v58  ;;  %2055 = vmatmul.bf16.gmra.mxu2 %v1881_v63 }
 0x49d   : > { %3932 = vpow2.f32 %v1660_v39  ;;  %v2036_v51 = vpop.f32.mrf.mxu2  ;;  %v1755_v23 = vadd.f32 %v5255_v30, %v5251_v19 }
 0x49e   : > { %3934 = vpow2.f32 %v1662_v46  ;;  %v2037_v14 = vadd.f32 %v2036_v51, %v1947_v0 }
 0x49f   : > { %1756 = vadd.xlane.f32.xlu1 %v1755_v23  ;;  %v1949_v2 = vpop.f32.mrf.mxu1  ;;  %v3931_v36 = vpop.eup %3930 }
 0x4a0   : > { %v1739_v12 = vpop.xlane.xlu2 %1738  ;;  %v1475_v27 = vpop.xlane.xlu1 %1474  ;;  %v1840_v11 = vmul.f32 %v3931_v36, %v5163_v21  ;;  %v1841_v37 = vmul.f32 %v3931_v36, %v5165_v60 }
 0x4a1   : > { %3936 = vrcp.f32 %v1739_v12  ;;  %v1538_v4 = vsub.f32 %v5184_v1, %v1475_v27  ;;  %v1539_v59 = vsub.f32 %v5177_v24, %v1475_v27 }
 0x4a3   : > { %v5261_v43 = vpop.eup %3932  ;;  %v1664_v52 = vmul.f32 1.442695, %v1538_v4  ;;  %v1666_v18 = vmul.f32 1.442695, %v1539_v59  ;;  %v5263_v47 = vpop.f32.mrf.mxu3 }
 0x4a4   : > { %v5265_v29 = vpop.eup %3934 }
 0x4a5   : > { %3938 = vpow2.f32 %v1664_v52  ;;  %v2038_v28 = vpop.f32.mrf.mxu2  ;;  %v1758_v7 = vadd.f32 %v5265_v29, %v5261_v43 }
 0x4a6   : > { %3940 = vpow2.f32 %v1666_v18  ;;  %v2039_v50 = vadd.f32 %v2038_v28, %v1949_v2 }
 0x4a7   : > { %v3937_v1 = vpop.eup %3936  ;;  %1759 = vadd.xlane.f32.xlu2 %v1758_v7  ;;  %v1952_v24 = vpop.f32.mrf.mxu1 }
 0x4a8   : > { %v2092_v31 = vpack.c.bf16 %v2039_v50, %v2037_v14  ;;  %v1842_v45 = vmul.f32 %v3937_v1, %v5180_v34  ;;  %v1843_v49 = vmul.f32 %v3937_v1, %v5182_v15  ;;  %v1742_v35 = vpop.xlane.xlu2 %1741 }
 0x4a9   : > { %3942 = vrcp.f32 %v1742_v35 }
 0x4aa   : > { %3578 = vmatmul.msk.bf16.gmra.mxu3 %vm1105_vm0, %v2092_v31  ;;  %v1882_v62 = vpack.c.bf16 %v1842_v45, %v1840_v11  ;;  %v1883_v6 = vpack.c.bf16 %v1843_v49, %v1841_v37 }
 0x4ab   : > { %v5274_v40 = vpop.eup %3938  ;;  %v5276_v20 = vpop.f32.mrf.mxu3 }
 0x4ac   : > { %v5278_v10 = vpop.eup %3940  ;;  %1971 = vmatmul.bf16.gmra.mxu1 %v1882_v62  ;;  %2060 = vmatmul.bf16.gmra.mxu2 %v1883_v6 }
 0x4ad   : > { %v2041_v21 = vpop.f32.mrf.mxu2  ;;  %v1761_v34 = vadd.f32 %v5278_v10, %v5274_v40 }
 0x4ae   : > { %v2042_v55 = vadd.f32 %v2041_v21, %v1952_v24 }
 0x4af   : > { %1762 = vadd.xlane.f32.xlu0 %v1761_v34  ;;  %v1954_v60 = vpop.f32.mrf.mxu1  ;;  %v3943_v41 = vpop.eup %3942 }
 0x4b0   : > { %v1745_v15 = vpop.xlane.xlu0 %1744  ;;  %v1844_v22 = vmul.f32 %v3943_v41, %v5192_v25  ;;  %v1845_v33 = vmul.f32 %v3943_v41, %v5194_v57 }
 0x4b1   : > { %3944 = vrcp.f32 %v1745_v15 }
 0x4b3   : > { %v5282_v0 = vpop.f32.mrf.mxu3 }
 0x4b5   : > { %v2043_v16 = vpop.f32.mrf.mxu2 }
 0x4b6   : > { %v2044_v3 = vadd.f32 %v2043_v16, %v1954_v60 }
 0x4b7   : > { %v3945_v42 = vpop.eup %3944  ;;  %v1957_v63 = vpop.f32.mrf.mxu1 }
 0x4b8   : > { %v2093_v48 = vpack.c.bf16 %v2044_v3, %v2042_v55  ;;  %v1846_v13 = vmul.f32 %v3945_v42, %v5205_v38  ;;  %v1847_v58 = vmul.f32 %v3945_v42, %v5207_v26  ;;  %v1748_v51 = vpop.xlane.xlu1 %1747 }
 0x4b9   : > { %3946 = vrcp.f32 %v1748_v51 }
 0x4ba   : > { %3579 = vmatmul.msk.bf16.gmra.mxu3 %vm1105_vm0, %v2093_v48  ;;  %v1884_v39 = vpack.c.bf16 %v1846_v13, %v1844_v22  ;;  %v1885_v46 = vpack.c.bf16 %v1847_v58, %v1845_v33 }
 0x4bb   : > { %v5289_v23 = vpop.f32.mrf.mxu3 }
 0x4bc   : > { %1976 = vmatmul.bf16.gmra.mxu1 %v1884_v39  ;;  %2065 = vmatmul.bf16.gmra.mxu2 %v1885_v46 }
 0x4bd   : > { %v2046_v2 = vpop.f32.mrf.mxu2 }
 0x4be   : > { %v2047_v26 = vadd.f32 %v2046_v2, %v1957_v63 }
 0x4bf   : > { %v3947_v38 = vpop.eup %3946  ;;  %v1959_v57 = vpop.f32.mrf.mxu1 }
 0x4c0   : > { %v1751_v25 = vpop.xlane.xlu2 %1750  ;;  %v1848_v36 = vmul.f32 %v3947_v38, %v5213_v9  ;;  %v1849_v28 = vmul.f32 %v3947_v38, %v5215_v44 }
 0x4c1   : > { %3948 = vrcp.f32 %v1751_v25 }
 0x4c3   : > { %v5291_v12 = vpop.f32.mrf.mxu3 }
 0x4c5   : > { %v2048_v27 = vpop.f32.mrf.mxu2 }
 0x4c6   : > { %v2049_v4 = vadd.f32 %v2048_v27, %v1959_v57 }
 0x4c7   : > { %v3949_v59 = vpop.eup %3948 }
 0x4c8   : > { %v2094_v52 = vpack.c.bf16 %v2049_v4, %v2047_v26  ;;  %v1850_v18 = vmul.f32 %v3949_v59, %v5221_v53  ;;  %v1851_v7 = vmul.f32 %v3949_v59, %v5223_v61  ;;  %v1754_v24 = vpop.xlane.xlu0 %1753 }
 0x4c9   : > { %3950 = vrcp.f32 %v1754_v24 }
 0x4ca   : > { %3580 = vmatmul.msk.bf16.gmra.mxu3 %vm1105_vm0, %v2094_v52  ;;  %v1886_v14 = vpack.c.bf16 %v1850_v18, %v1848_v36  ;;  %v1887_v50 = vpack.c.bf16 %v1851_v7, %v1849_v28 }
 0x4cc   : > { %1981 = vmatmul.bf16.gmra.mxu1 %v1886_v14  ;;  %2070 = vmatmul.bf16.gmra.mxu2 %v1887_v50 }
 0x4cf   : > { %v3951_v44 = vpop.eup %3950 }
 0x4d0   : > { %v1852_v35 = vmul.f32 %v3951_v44, %v5227_v5  ;;  %v1853_v60 = vmul.f32 %v3951_v44, %v5229_v56 }
 0x509   : > { %v1962_v1 = vpop.f32.mrf.mxu1 }
 0x50d   : > { %v5298_v11 = vpop.f32.mrf.mxu3 }
 0x50f   : > { %v2051_v31 = vpop.f32.mrf.mxu2 }
 0x510   : > { %v2052_v61 = vadd.f32 %v2051_v31, %v1962_v1 }
 0x511   : > { %v1964_v9 = vpop.f32.mrf.mxu1 }
 0x512   : > { %v1757_v45 = vpop.xlane.xlu1 %1756 }
 0x513   : > { %3952 = vrcp.f32 %v1757_v45 }
 0x515   : > { %v5300_v53 = vpop.f32.mrf.mxu3 }
 0x517   : > { %v2053_v37 = vpop.f32.mrf.mxu2 }
 0x518   : > { %v2054_v49 = vadd.f32 %v2053_v37, %v1964_v9 }
 0x519   : > { %v3953_v62 = vpop.eup %3952  ;;  %v1967_v6 = vpop.f32.mrf.mxu1 }
 0x51a   : > { %v2095_v21 = vpack.c.bf16 %v2054_v49, %v2052_v61  ;;  %v1854_v34 = vmul.f32 %v3953_v62, %v5251_v19  ;;  %v1855_v15 = vmul.f32 %v3953_v62, %v5255_v30  ;;  %v1760_v55 = vpop.xlane.xlu2 %1759 }
 0x51b   : > { %3954 = vrcp.f32 %v1760_v55 }
 0x51c   : > { %3581 = vmatmul.msk.bf16.gmra.mxu3 %vm1105_vm0, %v2095_v21  ;;  %v1888_v41 = vpack.c.bf16 %v1854_v34, %v1852_v35  ;;  %v1889_v16 = vpack.c.bf16 %v1855_v15, %v1853_v60 }
 0x51d   : > { %v5307_v3 = vpop.f32.mrf.mxu3 }
 0x51e   : > { %1986 = vmatmul.bf16.gmra.mxu1 %v1888_v41  ;;  %2075 = vmatmul.bf16.gmra.mxu2 %v1889_v16 }
 0x51f   : > { %v2056_v42 = vpop.f32.mrf.mxu2 }
 0x520   : > { %v2057_v13 = vadd.f32 %v2056_v42, %v1967_v6 }
 0x521   : > { %v1969_v22 = vpop.f32.mrf.mxu1  ;;  %v3955_v19 = vpop.eup %3954 }
 0x522   : > { %v1763_v5 = vpop.xlane.xlu0 %1762  ;;  %v1856_v63 = vmul.f32 %v3955_v19, %v5261_v43  ;;  %v1857_v51 = vmul.f32 %v3955_v19, %v5265_v29 }
 0x523   : > { %3956 = vrcp.f32 %v1763_v5 }
 0x525   : > { %v5309_v48 = vpop.f32.mrf.mxu3 }
 0x527   : > { %v2058_v56 = vpop.f32.mrf.mxu2 }
 0x528   : > { %v2059_v30 = vadd.f32 %v2058_v56, %v1969_v22 }
 0x529   : > { %v3957_v33 = vpop.eup %3956  ;;  %v1972_v58 = vpop.f32.mrf.mxu1 }
 0x52a   : > { %v2096_v39 = vpack.c.bf16 %v2059_v30, %v2057_v13  ;;  %v1858_v46 = vmul.f32 %v3957_v33, %v5274_v40  ;;  %v1859_v2 = vmul.f32 %v3957_v33, %v5278_v10 }
 0x52c   : > { %3582 = vmatmul.msk.bf16.gmra.mxu3 %vm1105_vm0, %v2096_v39  ;;  %v1890_v25 = vpack.c.bf16 %v1858_v46, %v1856_v63  ;;  %v1891_v38 = vpack.c.bf16 %v1859_v2, %v1857_v51 }
 0x52d   : > { %v5316_v57 = vpop.f32.mrf.mxu3 }
 0x52e   : > { %1991 = vmatmul.bf16.gmra.mxu1 %v1890_v25  ;;  %2080 = vmatmul.bf16.gmra.mxu2 %v1891_v38 }
 0x52f   : > { %v2061_v27 = vpop.f32.mrf.mxu2 }
 0x530   : > { %v2062_v59 = vadd.f32 %v2061_v27, %v1972_v58 }
 0x531   : > { %v1974_v26 = vpop.f32.mrf.mxu1 }
 0x535   : > { %v5318_v4 = vpop.f32.mrf.mxu3 }
 0x537   : > { %v2063_v43 = vpop.f32.mrf.mxu2 }
 0x538   : > { %v2064_v36 = vadd.f32 %v2063_v43, %v1974_v26 }
 0x539   : > { %v1977_v40 = vpop.f32.mrf.mxu1 }
 0x53a   : > { %v2097_v52 = vpack.c.bf16 %v2064_v36, %v2062_v59 }
 0x53c   : > { %3583 = vmatmul.msk.bf16.gmra.mxu3 %vm1105_vm0, %v2097_v52 }
 0x53d   : > { %v5321_v29 = vpop.f32.mrf.mxu3 }
 0x53f   : > { %v2066_v10 = vpop.f32.mrf.mxu2 }
 0x540   : > { %v2067_v14 = vadd.f32 %v2066_v10, %v1977_v40 }
 0x541   : > { %v1979_v18 = vpop.f32.mrf.mxu1 }
 0x545   : > { %v5323_v28 = vpop.f32.mrf.mxu3 }
 0x547   : > { %v2068_v7 = vpop.f32.mrf.mxu2 }
 0x548   : > { %v2069_v50 = vadd.f32 %v2068_v7, %v1979_v18 }
 0x549   : > { %v1982_v24 = vpop.f32.mrf.mxu1 }
 0x54a   : > { %v2098_v1 = vpack.c.bf16 %v2069_v50, %v2067_v14 }
 0x54c   : > { %3584 = vmatmul.msk.bf16.gmra.mxu3 %vm1105_vm0, %v2098_v1 }
 0x54d   : > { %v5326_v31 = vpop.f32.mrf.mxu3 }
 0x54f   : > { %v2071_v9 = vpop.f32.mrf.mxu2 }
 0x550   : > { %v2072_v61 = vadd.f32 %v2071_v9, %v1982_v24 }
 0x551   : > { %v1984_v44 = vpop.f32.mrf.mxu1 }
 0x555   : > { %v5328_v45 = vpop.f32.mrf.mxu3 }
 0x557   : > { %v2073_v37 = vpop.f32.mrf.mxu2 }
 0x558   : > { %v2074_v49 = vadd.f32 %v2073_v37, %v1984_v44 }
 0x55a   : > { %v2099_v62 = vpack.c.bf16 %v2074_v49, %v2072_v61 }
 0x55c   : > { %3585 = vmatmul.msk.bf16.gmra.mxu3 %vm1105_vm0, %v2099_v62 }
 0x59b   : > { %v1987_v6 = vpop.f32.mrf.mxu1 }
 0x59f   : > { %v5331_v35 = vpop.f32.mrf.mxu3 }
 0x5a1   : > { %v2076_v21 = vpop.f32.mrf.mxu2 }
 0x5a2   : > { %v2077_v41 = vadd.f32 %v2076_v21, %v1987_v6 }
 0x5a3   : > { %v1989_v34 = vpop.f32.mrf.mxu1 }
 0x5a7   : > { %v5333_v60 = vpop.f32.mrf.mxu3 }
 0x5a9   : > { %v2078_v15 = vpop.f32.mrf.mxu2 }
 0x5aa   : > { %v2079_v16 = vadd.f32 %v2078_v15, %v1989_v34 }
 0x5ab   : > { %v1992_v42 = vpop.f32.mrf.mxu1 }
 0x5ac   : > { %v2100_v55 = vpack.c.bf16 %v2079_v16, %v2077_v41 }
 0x5ae   : > { %3586 = vmatmul.msk.bf16.gmra.mxu3 %vm1105_vm0, %v2100_v55 }
 0x5af   : > { %v5336_v22 = vpop.f32.mrf.mxu3 }
 0x5b1   : > { %v2081_v5 = vpop.f32.mrf.mxu2 }
 0x5b2   : > { %v2082_v30 = vadd.f32 %v2081_v5, %v1992_v42 }
 0x5b3   : > { %v1994_v56 = vpop.f32.mrf.mxu1 }
 0x5b7   : > { %v5338_v19 = vpop.f32.mrf.mxu3 }
 0x5b9   : > { %v2083_v13 = vpop.f32.mrf.mxu2 }
 0x5ba   : > { %v2084_v33 = vadd.f32 %v2083_v13, %v1994_v56 }
 0x5bc   : > { %v2101_v58 = vpack.c.bf16 %v2084_v33, %v2082_v30 }
 0x5be   : > { %3587 = vmatmul.msk.bf16.gmra.mxu3 %vm1105_vm0, %v2101_v58 }
 0x5bf   : > { %v5341_v63 = vpop.f32.mrf.mxu3 }
 0x5c7   : > { %v5343_v39 = vpop.f32.mrf.mxu3 }
 0x5cf   : > { %v5345_v46 = vpop.f32.mrf.mxu3 }
 0x5d7   : > { %v5347_v51 = vpop.f32.mrf.mxu3 }
 0x5df   : > { %v5349_v2 = vpop.f32.mrf.mxu3 }
 0x5e7   : > { %v5351_v25 = vpop.f32.mrf.mxu3 }
 0x631   : > { %v5353_v38 = vpop.f32.mrf.mxu3 }
 0x639   : > { %v5355_v27 = vpop.f32.mrf.mxu3 }
 0x641   : > { %v5357_v26 = vpop.f32.mrf.mxu3 }
 0x645   : > { %2258 = sbr.rel (%p3588_p7) target bundleno = 1647 (0x66f), region = 68 }
 0x649   : > { %v5359_v43 = vpop.f32.mrf.mxu3 }
 0x64a   : > { %v5365_v59 = vld [vmem:[%s6387_s8] ss:$0 sm:$0xff]  ;;  %v6463_v24 = vld [vmem:[#allocation8_spill] sm:$0xff]  ;;  %v6464_v37 = vld [vmem:[#allocation9_spill] sm:$0xff] }
 0x64b   : > { %v2263_v36 = vadd.f32 %v5365_v59, %v5233_v32  ;;  %v2264_v40 = vadd.f32 %v5365_v59, %v5240_v17  ;;  %v2265_v52 = vadd.f32 %v5365_v59, %v5253_v54  ;;  %v2266_v10 = vadd.f32 %v5365_v59, %v5263_v47  ;;  %v6462_v50 = vld [vmem:[#allocation7_spill] sm:$0xff]  ;;  %v6465_v62 = vld [vmem:[#allocation10_spill] sm:$0xff]  ;;  %v6467_v41 = vld [vmem:[#allocation12_spill] sm:$0xff] }
 0x64c   : > { %v2267_v18 = vadd.f32 %v5365_v59, %v5276_v20  ;;  %v2268_v7 = vadd.f32 %v5365_v59, %v5282_v0  ;;  %v2269_v44 = vadd.f32 %v5365_v59, %v5289_v23  ;;  %v2270_v49 = vadd.f32 %v5365_v59, %v5291_v12  ;;  %v6468_v42 = vld [vmem:[#allocation13_spill] sm:$0xff]  ;;  %v6469_v13 = vld [vmem:[#allocation14_spill] sm:$0xff]  ;;  %v6470_v58 = vld [vmem:[#allocation15_spill] sm:$0xff] }
 0x64d   : > { %v2295_v14 = vadd.f32 %v2263_v36, %v4194_v8  ;;  %v2296_v1 = vadd.f32 %v2264_v40, %v6462_v50  ;;  %v2297_v9 = vadd.f32 %v2265_v52, %v6463_v24  ;;  %v2298_v61 = vadd.f32 %v2266_v10, %v6464_v37  ;;  %v6466_v8 = vld [vmem:[#allocation11_spill] sm:$0xff]  ;;  %v6471_v52 = vld [vmem:[#allocation16_spill] sm:$0xff] }
 0x64e   : > { %v2299_v6 = vadd.f32 %v2267_v18, %v6465_v62  ;;  %v2271_v21 = vadd.f32 %v5365_v59, %v5298_v11  ;;  %v2300_v34 = vadd.f32 %v2268_v7, %v6466_v8  ;;  %v2272_v15 = vadd.f32 %v5365_v59, %v5300_v53  ;;  %v6472_v7 = vld [vmem:[#allocation17_spill] sm:$0xff] }
 0x64f   : > { %2327 = vst [vmem:[#allocation2 + $0xb0] sm:$0xff] %v2295_v14  ;;  %v2301_v16 = vadd.f32 %v2269_v44, %v6467_v41  ;;  %v2273_v55 = vadd.f32 %v5365_v59, %v5307_v3  ;;  %v2302_v5 = vadd.f32 %v2270_v49, %v6468_v42  ;;  %v2274_v56 = vadd.f32 %v5365_v59, %v5309_v48  ;;  %v6474_v44 = vld [vmem:[#allocation19_spill] sm:$0xff]  ;;  %v6475_v49 = vld [vmem:[#allocation20_spill] sm:$0xff] }
 0x650   : > { %2328 = vst [vmem:[#allocation2] sm:$0xff] %v2296_v1  ;;  %v2303_v30 = vadd.f32 %v2271_v21, %v6469_v13  ;;  %v2275_v33 = vadd.f32 %v5365_v59, %v5316_v57  ;;  %v2304_v36 = vadd.f32 %v2272_v15, %v6470_v58  ;;  %v2276_v40 = vadd.f32 %v5365_v59, %v5318_v4  ;;  %v6473_v1 = vld [vmem:[#allocation18_spill] sm:$0xff]  ;;  %v6476_v21 = vld [vmem:[#allocation21_spill] sm:$0xff] }
 0x651   : > { %2329 = vst [vmem:[#allocation2 + $0xd8] sm:$0xff] %v2297_v9  ;;  %v2305_v10 = vadd.f32 %v2273_v55, %v6471_v52  ;;  %v2277_v18 = vadd.f32 %v5365_v59, %v5321_v29  ;;  %v2306_v14 = vadd.f32 %v2274_v56, %v6472_v7  ;;  %v2278_v50 = vadd.f32 %v5365_v59, %v5323_v28  ;;  %v6477_v15 = vld [vmem:[#allocation22_spill] sm:$0xff]  ;;  %v6478_v55 = vld [vmem:[#allocation23_spill] sm:$0xff]  ;;  %v6479_v56 = vld [vmem:[#allocation24_spill] sm:$0xff] }
 0x652   : > { %2330 = vst [vmem:[#allocation2 + $0x18] sm:$0xff] %v2298_v61  ;;  %v2307_v24 = vadd.f32 %v2275_v33, %v6473_v1  ;;  %v2279_v9 = vadd.f32 %v5365_v59, %v5326_v31  ;;  %v2308_v37 = vadd.f32 %v2276_v40, %v6474_v44  ;;  %v2280_v61 = vadd.f32 %v5365_v59, %v5328_v45  ;;  %v6480_v33 = vld [vmem:[#allocation25_spill] sm:$0xff]  ;;  %v6481_v40 = vld [vmem:[#allocation26_spill] sm:$0xff] }
 0x653   : > { %2331 = vst [vmem:[#allocation2 + $0x50] sm:$0xff] %v2299_v6  ;;  %v2309_v62 = vadd.f32 %v2277_v18, %v6475_v49  ;;  %v2281_v6 = vadd.f32 %v5365_v59, %v5331_v35  ;;  %v2310_v8 = vadd.f32 %v2278_v50, %v6476_v21  ;;  %v6482_v18 = vld [vmem:[#allocation27_spill] sm:$0xff]  ;;  %v6483_v50 = vld [vmem:[#allocation28_spill] sm:$0xff] }
 0x654   : > { %2332 = vst [vmem:[#allocation2 + $0x68] sm:$0xff] %v2300_v34  ;;  %v2282_v34 = vadd.f32 %v5365_v59, %v5333_v60  ;;  %v2311_v41 = vadd.f32 %v2279_v9, %v6477_v15  ;;  %v2312_v42 = vadd.f32 %v2280_v61, %v6478_v55  ;;  %v6484_v9 = vld [vmem:[#allocation29_spill] sm:$0xff]  ;;  %v6485_v61 = vld [vmem:[#allocation30_spill] sm:$0xff] }
 0x655   : > { %2333 = vst [vmem:[#allocation2 + $0x30] sm:$0xff] %v2301_v16  ;;  %v2283_v16 = vadd.f32 %v5365_v59, %v5336_v22  ;;  %v2313_v13 = vadd.f32 %v2281_v6, %v6479_v56  ;;  %v6486_v6 = vld [vmem:[#allocation31_spill] sm:$0xff] }
 0x656   : > { %2334 = vst [vmem:[#allocation2 + $0x48] sm:$0xff] %v2302_v5  ;;  %v2284_v5 = vadd.f32 %v5365_v59, %v5338_v19  ;;  %v2314_v58 = vadd.f32 %v2282_v34, %v6480_v33  ;;  %v6487_v34 = vld [vmem:[#allocation32_spill] sm:$0xff] }
 0x657   : > { %2335 = vst [vmem:[#allocation2 + $0x80] sm:$0xff] %v2303_v30  ;;  %v2285_v30 = vadd.f32 %v5365_v59, %v5341_v63  ;;  %v2315_v52 = vadd.f32 %v2283_v16, %v6481_v40  ;;  %v6488_v16 = vld [vmem:[#allocation33_spill] sm:$0xff]  ;;  %v6491_v33 = vld [vmem:[#allocation36_spill] sm:$0xff] }
 0x658   : > { %2336 = vst [vmem:[#allocation2 + $0x88] sm:$0xff] %v2304_v36  ;;  %v2286_v36 = vadd.f32 %v5365_v59, %v5343_v39  ;;  %v2316_v7 = vadd.f32 %v2284_v5, %v6482_v18  ;;  %v6489_v5 = vld [vmem:[#allocation34_spill] sm:$0xff] }
 0x659   : > { %2337 = vst [vmem:[#allocation2 + $0xe8] sm:$0xff] %v2305_v10  ;;  %v2287_v10 = vadd.f32 %v5365_v59, %v5345_v46  ;;  %v2317_v1 = vadd.f32 %v2285_v30, %v6483_v50 }
 0x65a   : > { %2338 = vst [vmem:[#allocation2 + $0xb8] sm:$0xff] %v2306_v14  ;;  %v2288_v14 = vadd.f32 %v5365_v59, %v5347_v51  ;;  %v2318_v44 = vadd.f32 %v2286_v36, %v6484_v9  ;;  %v6492_v36 = vld [vmem:[#allocation37_spill] sm:$0xff] }
 0x65b   : > { %2339 = vst [vmem:[#allocation2 + $0x60] sm:$0xff] %v2307_v24  ;;  %v2289_v24 = vadd.f32 %v5365_v59, %v5349_v2  ;;  %v2319_v49 = vadd.f32 %v2287_v10, %v6485_v61 }
 0x65c   : > { %2340 = vst [vmem:[#allocation2 + $0xf0] sm:$0xff] %v2308_v37  ;;  %v2290_v37 = vadd.f32 %v5365_v59, %v5351_v25  ;;  %v2320_v21 = vadd.f32 %v2288_v14, %v6486_v6 }
 0x65d   : > { %2341 = vst [vmem:[#allocation2 + $0x8] sm:$0xff] %v2309_v62  ;;  %v2291_v62 = vadd.f32 %v5365_v59, %v5353_v38  ;;  %v2321_v15 = vadd.f32 %v2289_v24, %v6487_v34 }
 0x65e   : > { %2342 = vst [vmem:[#allocation2 + $0x78] sm:$0xff] %v2310_v8  ;;  %v2292_v8 = vadd.f32 %v5365_v59, %v5355_v27  ;;  %v2322_v55 = vadd.f32 %v2290_v37, %v6488_v16 }
 0x65f   : > { %2343 = vst [vmem:[#allocation2 + $0x38] sm:$0xff] %v2311_v41  ;;  %v2293_v41 = vadd.f32 %v5365_v59, %v5357_v26  ;;  %v2323_v56 = vadd.f32 %v2291_v62, %v6489_v5 }
 0x660   : > { %2344 = vst [vmem:[#allocation2 + $0x58] sm:$0xff] %v2312_v42  ;;  %v2294_v42 = vadd.f32 %v5365_v59, %v5359_v43 }
 0x661   : > { %2345 = vst [vmem:[#allocation2 + $0x40] sm:$0xff] %v2313_v13  ;;  %v6490_v13 = vld [vmem:[#allocation35_spill] sm:$0xff] }
 0x662   : > { %2346 = vst [vmem:[#allocation2 + $0xc8] sm:$0xff] %v2314_v58  ;;  %v2324_v30 = vadd.f32 %v2292_v8, %v6490_v13  ;;  %v2325_v58 = vadd.f32 %v2293_v41, %v6491_v33  ;;  %v2326_v40 = vadd.f32 %v2294_v42, %v6492_v36 }
 0x663   : > { %2347 = vst [vmem:[#allocation2 + $0xe0] sm:$0xff] %v2315_v52 }
 0x664   : > { %2348 = vst [vmem:[#allocation2 + $0x90] sm:$0xff] %v2316_v7 }
 0x665   : > { %2349 = vst [vmem:[#allocation2 + $0x70] sm:$0xff] %v2317_v1 }
 0x666   : > { %2350 = vst [vmem:[#allocation2 + $0xc0] sm:$0xff] %v2318_v44 }
 0x667   : > { %2351 = vst [vmem:[#allocation2 + $0xa8] sm:$0xff] %v2319_v49 }
 0x668   : > { %2352 = vst [vmem:[#allocation2 + $0xd0] sm:$0xff] %v2320_v21 }
 0x669   : > { %2353 = vst [vmem:[#allocation2 + $0x10] sm:$0xff] %v2321_v15 }
 0x66a   : > { %2354 = vst [vmem:[#allocation2 + $0x28] sm:$0xff] %v2322_v55 }
 0x66b   : > { %2355 = vst [vmem:[#allocation2 + $0xa0] sm:$0xff] %v2323_v56 }
 0x66c   : > { %2356 = vst [vmem:[#allocation2 + $0xf8] sm:$0xff] %v2324_v30 }
 0x66d   : > { %2357 = vst [vmem:[#allocation2 + $0x20] sm:$0xff] %v2325_v58 }
 0x66e   : > { %2358 = vst [vmem:[#allocation2 + $0x98] sm:$0xff] %v2326_v40 }
 0x66f PF: > { %p3589_p8 = scmp.eq.s32.totalorder %s4049_s17, 0 }
 0x671   : > { %2362 = sbr.rel (%p3589_p8) target bundleno = 1689 (0x699), region = 72 }
 0x676   : > { %v2363_v59 = vld [vmem:[#allocation2 + $0xb0] sm:$0xff]  ;;  %v2364_v52 = vld [vmem:[#allocation2] sm:$0xff]  ;;  %v2365_v10 = vld [vmem:[#allocation2 + $0xd8] sm:$0xff] }
 0x677   : > { %v2395_v18 = vadd.f32 %v2363_v59, %v5233_v32  ;;  %v2396_v7 = vadd.f32 %v2364_v52, %v5240_v17  ;;  %v2397_v14 = vadd.f32 %v2365_v10, %v5253_v54  ;;  %v2366_v50 = vld [vmem:[#allocation2 + $0x18] sm:$0xff]  ;;  %v2367_v1 = vld [vmem:[#allocation2 + $0x50] sm:$0xff]  ;;  %v2368_v24 = vld [vmem:[#allocation2 + $0x68] sm:$0xff] }
 0x678   : > { %v2398_v9 = vadd.f32 %v2366_v50, %v5263_v47  ;;  %v2369_v44 = vld [vmem:[#allocation2 + $0x30] sm:$0xff]  ;;  %v2399_v37 = vadd.f32 %v2367_v1, %v5276_v20  ;;  %v2370_v61 = vld [vmem:[#allocation2 + $0x48] sm:$0xff]  ;;  %v2400_v49 = vadd.f32 %v2368_v24, %v5282_v0  ;;  %v2371_v62 = vld [vmem:[#allocation2 + $0x80] sm:$0xff] }
 0x679   : > { %2427 = vst [vmem:[#allocation2 + $0xb0] sm:$0xff] %v2395_v18  ;;  %v2401_v32 = vadd.f32 %v2369_v44, %v5289_v23  ;;  %v2372_v17 = vld [vmem:[#allocation2 + $0x88] sm:$0xff]  ;;  %v2402_v54 = vadd.f32 %v2370_v61, %v5291_v12  ;;  %v2403_v47 = vadd.f32 %v2371_v62, %v5298_v11  ;;  %v2374_v21 = vld [vmem:[#allocation2 + $0xb8] sm:$0xff]  ;;  %v2375_v8 = vld [vmem:[#allocation2 + $0x60] sm:$0xff] }
 0x67a   : > { %2428 = vst [vmem:[#allocation2] sm:$0xff] %v2396_v7  ;;  %v2373_v6 = vld [vmem:[#allocation2 + $0xe8] sm:$0xff]  ;;  %v2404_v20 = vadd.f32 %v2372_v17, %v5300_v53  ;;  %v2376_v34 = vld [vmem:[#allocation2 + $0xf0] sm:$0xff]  ;;  %v2406_v23 = vadd.f32 %v2374_v21, %v5309_v48  ;;  %v2407_v12 = vadd.f32 %v2375_v8, %v5316_v57  ;;  %v2378_v41 = vld [vmem:[#allocation2 + $0x78] sm:$0xff] }
 0x67b   : > { %2429 = vst [vmem:[#allocation2 + $0xd8] sm:$0xff] %v2397_v14  ;;  %v2405_v0 = vadd.f32 %v2373_v6, %v5307_v3  ;;  %v2377_v15 = vld [vmem:[#allocation2 + $0x8] sm:$0xff]  ;;  %v2408_v11 = vadd.f32 %v2376_v34, %v5318_v4  ;;  %v2379_v16 = vld [vmem:[#allocation2 + $0x38] sm:$0xff]  ;;  %v2410_v3 = vadd.f32 %v2378_v41, %v5323_v28  ;;  %v2381_v42 = vld [vmem:[#allocation2 + $0x40] sm:$0xff] }
 0x67c   : > { %2430 = vst [vmem:[#allocation2 + $0x18] sm:$0xff] %v2398_v9  ;;  %v2409_v53 = vadd.f32 %v2377_v15, %v5321_v29  ;;  %v2380_v55 = vld [vmem:[#allocation2 + $0x58] sm:$0xff]  ;;  %v2411_v48 = vadd.f32 %v2379_v16, %v5326_v31  ;;  %v2382_v5 = vld [vmem:[#allocation2 + $0xc8] sm:$0xff]  ;;  %v2383_v56 = vld [vmem:[#allocation2 + $0xe0] sm:$0xff]  ;;  %v2413_v4 = vadd.f32 %v2381_v42, %v5331_v35 }
 0x67d   : > { %2431 = vst [vmem:[#allocation2 + $0x50] sm:$0xff] %v2399_v37  ;;  %v2412_v57 = vadd.f32 %v2380_v55, %v5328_v45  ;;  %v2384_v13 = vld [vmem:[#allocation2 + $0x90] sm:$0xff]  ;;  %v2414_v29 = vadd.f32 %v2382_v5, %v5333_v60  ;;  %v2415_v28 = vadd.f32 %v2383_v56, %v5336_v22  ;;  %v2386_v33 = vld [vmem:[#allocation2 + $0xc0] sm:$0xff]  ;;  %v2387_v58 = vld [vmem:[#allocation2 + $0xa8] sm:$0xff] }
 0x67e   : > { %2432 = vst [vmem:[#allocation2 + $0x68] sm:$0xff] %v2400_v49  ;;  %v2385_v30 = vld [vmem:[#allocation2 + $0x70] sm:$0xff]  ;;  %v2416_v31 = vadd.f32 %v2384_v13, %v5338_v19  ;;  %v2418_v35 = vadd.f32 %v2386_v33, %v5343_v39  ;;  %v2419_v60 = vadd.f32 %v2387_v58, %v5345_v46  ;;  %v2390_v59 = vld [vmem:[#allocation2 + $0x28] sm:$0xff]  ;;  %v2391_v52 = vld [vmem:[#allocation2 + $0xa0] sm:$0xff] }
 0x67f   : > { %2433 = vst [vmem:[#allocation2 + $0x30] sm:$0xff] %v2401_v32  ;;  %v2417_v45 = vadd.f32 %v2385_v30, %v5341_v63  ;;  %v2388_v36 = vld [vmem:[#allocation2 + $0xd0] sm:$0xff]  ;;  %v2392_v10 = vld [vmem:[#allocation2 + $0xf8] sm:$0xff]  ;;  %v2422_v63 = vadd.f32 %v2390_v59, %v5351_v25  ;;  %v2393_v18 = vld [vmem:[#allocation2 + $0x20] sm:$0xff]  ;;  %v2423_v39 = vadd.f32 %v2391_v52, %v5353_v38 }
 0x680   : > { %2434 = vst [vmem:[#allocation2 + $0x48] sm:$0xff] %v2402_v54  ;;  %v2389_v40 = vld [vmem:[#allocation2 + $0x10] sm:$0xff]  ;;  %v2420_v22 = vadd.f32 %v2388_v36, %v5347_v51  ;;  %v2394_v7 = vld [vmem:[#allocation2 + $0x98] sm:$0xff]  ;;  %v2424_v46 = vadd.f32 %v2392_v10, %v5355_v27  ;;  %v2425_v14 = vadd.f32 %v2393_v18, %v5357_v26 }
 0x681   : > { %2435 = vst [vmem:[#allocation2 + $0x80] sm:$0xff] %v2403_v47  ;;  %v2421_v19 = vadd.f32 %v2389_v40, %v5349_v2  ;;  %v2426_v51 = vadd.f32 %v2394_v7, %v5359_v43 }
 0x682   : > { %2436 = vst [vmem:[#allocation2 + $0x88] sm:$0xff] %v2404_v20 }
 0x683   : > { %2437 = vst [vmem:[#allocation2 + $0xe8] sm:$0xff] %v2405_v0 }
 0x684   : > { %2438 = vst [vmem:[#allocation2 + $0xb8] sm:$0xff] %v2406_v23 }
 0x685   : > { %2439 = vst [vmem:[#allocation2 + $0x60] sm:$0xff] %v2407_v12 }
 0x686   : > { %2440 = vst [vmem:[#allocation2 + $0xf0] sm:$0xff] %v2408_v11 }
 0x687   : > { %2441 = vst [vmem:[#allocation2 + $0x8] sm:$0xff] %v2409_v53 }
 0x688   : > { %2442 = vst [vmem:[#allocation2 + $0x78] sm:$0xff] %v2410_v3 }
 0x689   : > { %2443 = vst [vmem:[#allocation2 + $0x38] sm:$0xff] %v2411_v48 }
 0x68a   : > { %2444 = vst [vmem:[#allocation2 + $0x58] sm:$0xff] %v2412_v57 }
 0x68b   : > { %2445 = vst [vmem:[#allocation2 + $0x40] sm:$0xff] %v2413_v4 }
 0x68c   : > { %2446 = vst [vmem:[#allocation2 + $0xc8] sm:$0xff] %v2414_v29 }
 0x68d   : > { %2447 = vst [vmem:[#allocation2 + $0xe0] sm:$0xff] %v2415_v28 }
 0x68e   : > { %2448 = vst [vmem:[#allocation2 + $0x90] sm:$0xff] %v2416_v31 }
 0x68f   : > { %2449 = vst [vmem:[#allocation2 + $0x70] sm:$0xff] %v2417_v45 }
 0x690   : > { %2450 = vst [vmem:[#allocation2 + $0xc0] sm:$0xff] %v2418_v35 }
 0x691   : > { %2451 = vst [vmem:[#allocation2 + $0xa8] sm:$0xff] %v2419_v60 }
 0x692   : > { %2452 = vst [vmem:[#allocation2 + $0xd0] sm:$0xff] %v2420_v22 }
 0x693   : > { %2453 = vst [vmem:[#allocation2 + $0x10] sm:$0xff] %v2421_v19 }
 0x694   : > { %2454 = vst [vmem:[#allocation2 + $0x28] sm:$0xff] %v2422_v63 }
 0x695   : > { %2455 = vst [vmem:[#allocation2 + $0xa0] sm:$0xff] %v2423_v39 }
 0x696   : > { %2456 = vst [vmem:[#allocation2 + $0xf8] sm:$0xff] %v2424_v46 }
 0x697   : > { %2457 = vst [vmem:[#allocation2 + $0x20] sm:$0xff] %v2425_v14 }
 0x698   : > { %2458 = vst [vmem:[#allocation2 + $0x98] sm:$0xff] %v2426_v51 }
 0x699 PF: > { %p3590_p9 = scmp.ne.s32.totalorder %s4049_s17, 3 }
 0x69b   : > { %2462 = sbr.rel (%p3590_p9) target bundleno = 2072 (0x818), region = 76 }
 0x6a0   : > { %v5497_v2 = vld [vmem:[#allocation2 + $0x50] sm:$0xff]  ;;  %v5499_v25 = vld [vmem:[#allocation2 + $0xd8] sm:$0xff]  ;;  %v5506_v27 = vld [vmem:[#allocation2 + $0x68] sm:$0xff]  ;;  %v4067_v55 = vmov 128.0  }
 0x6a1   : > { %v5501_v38 = vld [vmem:[#allocation2 + $0xb0] sm:$0xff]  ;;  %2503 = vadd.xlane.f32.xlu2 %v5497_v2  ;;  %2499 = vadd.xlane.f32.xlu1 %v5499_v25  ;;  %v5508_v26 = vld [vmem:[#allocation2 + $0x18] sm:$0xff]  ;;  %v5510_v43 = vld [vmem:[#allocation2] sm:$0xff]  ;;  %3961 = vrcp.f32 %v4067_v55 }
 0x6a2   : > { %2495 = vadd.xlane.f32.xlu0 %v5501_v38  ;;  %v5515_v50 = vld [vmem:[#allocation2 + $0x80] sm:$0xff]  ;;  %v5517_v1 = vld [vmem:[#allocation2 + $0x48] sm:$0xff]  ;;  %v5519_v24 = vld [vmem:[#allocation2 + $0x30] sm:$0xff] }
 0x6a3   : > { %v5524_v9 = vld [vmem:[#allocation2 + $0xb8] sm:$0xff]  ;;  %v5526_v44 = vld [vmem:[#allocation2 + $0xe8] sm:$0xff]  ;;  %v5535_v49 = vld [vmem:[#allocation2 + $0xf0] sm:$0xff] }
 0x6a4   : > { %v5528_v37 = vld [vmem:[#allocation2 + $0x88] sm:$0xff]  ;;  %v5537_v62 = vld [vmem:[#allocation2 + $0x60] sm:$0xff]  ;;  %v5542_v32 = vld [vmem:[#allocation2 + $0x58] sm:$0xff] }
 0x6a5   : > { %v5533_v61 = vld [vmem:[#allocation2 + $0x8] sm:$0xff]  ;;  %v5544_v17 = vld [vmem:[#allocation2 + $0x38] sm:$0xff]  ;;  %v5551_v6 = vld [vmem:[#allocation2 + $0xe0] sm:$0xff] }
 0x6a6   : > { %v5546_v54 = vld [vmem:[#allocation2 + $0x78] sm:$0xff]  ;;  %v5553_v47 = vld [vmem:[#allocation2 + $0xc8] sm:$0xff]  ;;  %v5555_v21 = vld [vmem:[#allocation2 + $0x40] sm:$0xff] }
 0x6a7   : > { %v5560_v20 = vld [vmem:[#allocation2 + $0xc0] sm:$0xff]  ;;  %v5562_v8 = vld [vmem:[#allocation2 + $0x70] sm:$0xff]  ;;  %v5573_v15 = vld [vmem:[#allocation2 + $0xa8] sm:$0xff]  ;;  %v3962_v3 = vpop.eup %3961 }
 0x6a8   : > { %v5564_v0 = vld [vmem:[#allocation2 + $0x90] sm:$0xff]  ;;  %v5578_v12 = vld [vmem:[#allocation2 + $0xf8] sm:$0xff]  ;;  %v5580_v41 = vld [vmem:[#allocation2 + $0xa0] sm:$0xff]  ;;  %v2560_v42 = vmul.f32 128.0, %v3962_v3  ;;  %vm2564_vm1 = vweird.f32 %v3962_v3 }
 0x6a9   : > { %2505 = vadd.xlane.f32.xlu2 %v5506_v27  ;;  %2501 = vadd.xlane.f32.xlu1 %v5508_v26  ;;  %v5569_v34 = vld [vmem:[#allocation2 + $0x10] sm:$0xff]  ;;  %v5582_v11 = vld [vmem:[#allocation2 + $0x28] sm:$0xff]  ;;  %v5587_v16 = vld [vmem:[#allocation2 + $0x98] sm:$0xff] }
 0x6aa   : > { %2497 = vadd.xlane.f32.xlu0 %v5510_v43  ;;  %v5571_v23 = vld [vmem:[#allocation2 + $0xd0] sm:$0xff]  ;;  %v5589_v53 = vld [vmem:[#allocation2 + $0x20] sm:$0xff]  ;;  %v2561_v48 = vsub.f32 1.0, %v2560_v42 }
 0x6ac   : > { %v2562_v5 = vmul.f32 %v3962_v3, %v2561_v48 }
 0x6ae   : > { %v2563_v57 = vadd.f32 %v3962_v3, %v2562_v5 }
 0x6b0   : > { %v5593_v56 = vsel %vm2564_vm1, %v3962_v3, %v2563_v57 }
 0x6b1   : > { %2511 = vadd.xlane.f32.xlu2 %v5515_v50  ;;  %2509 = vadd.xlane.f32.xlu1 %v5517_v1 }
 0x6b2   : > { %2507 = vadd.xlane.f32.xlu0 %v5519_v24 }
 0x6b9   : > { %2517 = vadd.xlane.f32.xlu2 %v5524_v9  ;;  %2515 = vadd.xlane.f32.xlu1 %v5526_v44 }
 0x6ba   : > { %2513 = vadd.xlane.f32.xlu0 %v5528_v37 }
 0x6c1   : > { %2523 = vadd.xlane.f32.xlu2 %v5533_v61  ;;  %2521 = vadd.xlane.f32.xlu1 %v5535_v49 }
 0x6c2   : > { %2519 = vadd.xlane.f32.xlu0 %v5537_v62 }
 0x6c9   : > { %2529 = vadd.xlane.f32.xlu2 %v5542_v32  ;;  %2527 = vadd.xlane.f32.xlu1 %v5544_v17 }
 0x6ca   : > { %2525 = vadd.xlane.f32.xlu0 %v5546_v54 }
 0x6d1   : > { %2535 = vadd.xlane.f32.xlu2 %v5551_v6  ;;  %2533 = vadd.xlane.f32.xlu1 %v5553_v47 }
 0x6d2   : > { %2531 = vadd.xlane.f32.xlu0 %v5555_v21 }
 0x6d9   : > { %2541 = vadd.xlane.f32.xlu2 %v5560_v20  ;;  %2539 = vadd.xlane.f32.xlu1 %v5562_v8 }
 0x6da   : > { %2537 = vadd.xlane.f32.xlu0 %v5564_v0 }
 0x6e1   : > { %2547 = vadd.xlane.f32.xlu2 %v5569_v34  ;;  %2545 = vadd.xlane.f32.xlu1 %v5571_v23 }
 0x6e2   : > { %2543 = vadd.xlane.f32.xlu0 %v5573_v15 }
 0x6e9   : > { %2553 = vadd.xlane.f32.xlu2 %v5578_v12  ;;  %2551 = vadd.xlane.f32.xlu1 %v5580_v41 }
 0x6ea   : > { %2549 = vadd.xlane.f32.xlu0 %v5582_v11 }
 0x6f1   : > { %2557 = vadd.xlane.f32.xlu1 %v5587_v16 }
 0x6f2   : > { %2555 = vadd.xlane.f32.xlu0 %v5589_v53 }
 0x714   : > { %v2504_v4 = vpop.xlane.xlu2 %2503  ;;  %v2500_v13 = vpop.xlane.xlu1 %2499 }
 0x715   : > { %v2568_v29 = vmul.f32 %v5593_v56, %v2500_v13  ;;  %v2496_v30 = vpop.xlane.xlu0 %2495  ;;  %v2570_v10 = vmul.f32 %v5593_v56, %v2504_v4 }
 0x716   : > { %v2566_v28 = vmul.f32 %v5593_v56, %v2496_v30 }
 0x717   : > { %v5598_v33 = vsub.f32 %v5499_v25, %v2568_v29  ;;  %v5627_v46 = vsub.f32 %v5497_v2, %v2570_v10 }
 0x718   : > { %v5601_v31 = vsub.f32 %v5501_v38, %v2566_v28 }
 0x719   : > { %v2632_v58 = vmul.f32 %v5598_v33, %v5598_v33  ;;  %v2634_v55 = vmul.f32 %v5627_v46, %v5627_v46 }
 0x71a   : > { %v2630_v45 = vmul.f32 %v5601_v31, %v5601_v31 }
 0x71b   : > { %2666 = vadd.xlane.f32.xlu1 %v2632_v58 }
 0x71c   : > { %2662 = vadd.xlane.f32.xlu2 %v2630_v45  ;;  %v2506_v36 = vpop.xlane.xlu2 %2505  ;;  %v2502_v35 = vpop.xlane.xlu1 %2501 }
 0x71d   : > { %v2571_v40 = vmul.f32 %v5593_v56, %v2506_v36  ;;  %v2569_v60 = vmul.f32 %v5593_v56, %v2502_v35  ;;  %v2498_v59 = vpop.xlane.xlu0 %2497 }
 0x71e   : > { %v2567_v22 = vmul.f32 %v5593_v56, %v2498_v59 }
 0x71f   : > { %v5611_v52 = vsub.f32 %v5506_v27, %v2571_v40  ;;  %v5614_v19 = vsub.f32 %v5508_v26, %v2569_v60 }
 0x720   : > { %v5618_v63 = vsub.f32 %v5510_v43, %v2567_v22 }
 0x721   : > { %v2635_v18 = vmul.f32 %v5611_v52, %v5611_v52  ;;  %v2633_v39 = vmul.f32 %v5614_v19, %v5614_v19 }
 0x722   : > { %v2631_v7 = vmul.f32 %v5618_v63, %v5618_v63 }
 0x723   : > { %2672 = vadd.xlane.f32.xlu1 %v2635_v18 }
 0x724   : > { %2668 = vadd.xlane.f32.xlu2 %v2633_v39  ;;  %2664 = vadd.xlane.f32.xlu0 %v2631_v7  ;;  %v2512_v14 = vpop.xlane.xlu2 %2511  ;;  %v2510_v51 = vpop.xlane.xlu1 %2509 }
 0x725   : > { %v2574_v25 = vmul.f32 %v5593_v56, %v2512_v14  ;;  %v2508_v38 = vpop.xlane.xlu0 %2507  ;;  %v2573_v2 = vmul.f32 %v5593_v56, %v2510_v51 }
 0x726   : > { %v2572_v27 = vmul.f32 %v5593_v56, %v2508_v38 }
 0x727   : > { %v5632_v26 = vsub.f32 %v5515_v50, %v2574_v25  ;;  %v5645_v50 = vsub.f32 %v5517_v1, %v2573_v2 }
 0x728   : > { %v5635_v43 = vsub.f32 %v5519_v24, %v2572_v27 }
 0x729   : > { %v2638_v3 = vmul.f32 %v5632_v26, %v5632_v26  ;;  %v2637_v30 = vmul.f32 %v5645_v50, %v5645_v50 }
 0x72a   : > { %v2636_v42 = vmul.f32 %v5635_v43, %v5635_v43 }
 0x72b   : > { %2678 = vadd.xlane.f32.xlu1 %v2638_v3 }
 0x72c   : > { %2670 = vadd.xlane.f32.xlu0 %v2634_v55  ;;  %2674 = vadd.xlane.f32.xlu2 %v2636_v42  ;;  %v2518_v48 = vpop.xlane.xlu2 %2517  ;;  %v2516_v24 = vpop.xlane.xlu1 %2515 }
 0x72d   : > { %v2577_v5 = vmul.f32 %v5593_v56, %v2518_v48  ;;  %v2514_v57 = vpop.xlane.xlu0 %2513  ;;  %v2576_v28 = vmul.f32 %v5593_v56, %v2516_v24 }
 0x72e   : > { %v2575_v4 = vmul.f32 %v5593_v56, %v2514_v57 }
 0x72f   : > { %v5650_v13 = vsub.f32 %v5524_v9, %v2577_v5  ;;  %v5663_v9 = vsub.f32 %v5526_v44, %v2576_v28 }
 0x730   : > { %v5653_v29 = vsub.f32 %v5528_v37, %v2575_v4 }
 0x731   : > { %v2641_v1 = vmul.f32 %v5650_v13, %v5650_v13  ;;  %v2640_v22 = vmul.f32 %v5663_v9, %v5663_v9 }
 0x732   : > { %v2639_v58 = vmul.f32 %v5653_v29, %v5653_v29 }
 0x733   : > { %2684 = vadd.xlane.f32.xlu1 %v2641_v1 }
 0x734   : > { %2676 = vadd.xlane.f32.xlu0 %v2637_v30  ;;  %2680 = vadd.xlane.f32.xlu2 %v2639_v58  ;;  %v2524_v45 = vpop.xlane.xlu2 %2523  ;;  %v2522_v37 = vpop.xlane.xlu1 %2521 }
 0x735   : > { %v2580_v36 = vmul.f32 %v5593_v56, %v2524_v45  ;;  %v2520_v35 = vpop.xlane.xlu0 %2519  ;;  %v2579_v10 = vmul.f32 %v5593_v56, %v2522_v37 }
 0x736   : > { %v2578_v40 = vmul.f32 %v5593_v56, %v2520_v35 }
 0x737   : > { %v5668_v60 = vsub.f32 %v5533_v61, %v2580_v36  ;;  %v5681_v61 = vsub.f32 %v5535_v49, %v2579_v10 }
 0x738   : > { %v5671_v59 = vsub.f32 %v5537_v62, %v2578_v40 }
 0x739   : > { %v2644_v44 = vmul.f32 %v5668_v60, %v5668_v60  ;;  %v2643_v27 = vmul.f32 %v5681_v61, %v5681_v61 }
 0x73a   : > { %v2642_v18 = vmul.f32 %v5671_v59, %v5671_v59 }
 0x73b   : > { %2690 = vadd.xlane.f32.xlu1 %v2644_v44 }
 0x73c   : > { %2682 = vadd.xlane.f32.xlu0 %v2640_v22  ;;  %2686 = vadd.xlane.f32.xlu2 %v2642_v18  ;;  %v2530_v39 = vpop.xlane.xlu2 %2529  ;;  %v2528_v62 = vpop.xlane.xlu1 %2527 }
 0x73d   : > { %v2583_v7 = vmul.f32 %v5593_v56, %v2530_v39  ;;  %v2526_v14 = vpop.xlane.xlu0 %2525  ;;  %v2582_v55 = vmul.f32 %v5593_v56, %v2528_v62 }
 0x73e   : > { %v2581_v51 = vmul.f32 %v5593_v56, %v2526_v14 }
 0x73f   : > { %v5686_v25 = vsub.f32 %v5542_v32, %v2583_v7  ;;  %v5699_v32 = vsub.f32 %v5544_v17, %v2582_v55 }
 0x740   : > { %v5689_v38 = vsub.f32 %v5546_v54, %v2581_v51 }
 0x741   : > { %v2647_v49 = vmul.f32 %v5686_v25, %v5686_v25  ;;  %v2646_v4 = vmul.f32 %v5699_v32, %v5699_v32 }
 0x742   : > { %v2645_v2 = vmul.f32 %v5689_v38, %v5689_v38 }
 0x743   : > { %2696 = vadd.xlane.f32.xlu1 %v2647_v49 }
 0x744   : > { %2688 = vadd.xlane.f32.xlu0 %v2643_v27  ;;  %2692 = vadd.xlane.f32.xlu2 %v2645_v2  ;;  %v2536_v3 = vpop.xlane.xlu2 %2535  ;;  %v2534_v54 = vpop.xlane.xlu1 %2533 }
 0x745   : > { %v2586_v42 = vmul.f32 %v5593_v56, %v2536_v3  ;;  %v2532_v48 = vpop.xlane.xlu0 %2531  ;;  %v2585_v30 = vmul.f32 %v5593_v56, %v2534_v54 }
 0x746   : > { %v2584_v24 = vmul.f32 %v5593_v56, %v2532_v48 }
 0x747   : > { %v5704_v5 = vsub.f32 %v5551_v6, %v2586_v42  ;;  %v5717_v6 = vsub.f32 %v5553_v47, %v2585_v30 }
 0x748   : > { %v5707_v57 = vsub.f32 %v5555_v21, %v2584_v24 }
 0x749   : > { %v2650_v17 = vmul.f32 %v5704_v5, %v5704_v5  ;;  %v2649_v40 = vmul.f32 %v5717_v6, %v5717_v6 }
 0x74a   : > { %v2648_v28 = vmul.f32 %v5707_v57, %v5707_v57 }
 0x74b   : > { %2702 = vadd.xlane.f32.xlu1 %v2650_v17 }
 0x74c   : > { %2694 = vadd.xlane.f32.xlu0 %v2646_v4  ;;  %2698 = vadd.xlane.f32.xlu2 %v2648_v28  ;;  %v2542_v1 = vpop.xlane.xlu2 %2541  ;;  %v2540_v21 = vpop.xlane.xlu1 %2539 }
 0x74d   : > { %v2589_v58 = vmul.f32 %v5593_v56, %v2542_v1  ;;  %v2538_v45 = vpop.xlane.xlu0 %2537  ;;  %v2588_v22 = vmul.f32 %v5593_v56, %v2540_v21 }
 0x74e   : > { %v2587_v37 = vmul.f32 %v5593_v56, %v2538_v45 }
 0x74f   : > { %v5722_v36 = vsub.f32 %v5560_v20, %v2589_v58  ;;  %v5735_v20 = vsub.f32 %v5562_v8, %v2588_v22 }
 0x750   : > { %v5725_v35 = vsub.f32 %v5564_v0, %v2587_v37 }
 0x751   : > { %v2653_v47 = vmul.f32 %v5722_v36, %v5722_v36  ;;  %v2652_v51 = vmul.f32 %v5735_v20, %v5735_v20 }
 0x752   : > { %v2651_v10 = vmul.f32 %v5725_v35, %v5725_v35 }
 0x753   : > { %2708 = vadd.xlane.f32.xlu1 %v2653_v47 }
 0x754   : > { %2700 = vadd.xlane.f32.xlu0 %v2649_v40  ;;  %2704 = vadd.xlane.f32.xlu2 %v2651_v10  ;;  %v2548_v44 = vpop.xlane.xlu2 %2547  ;;  %v2546_v0 = vpop.xlane.xlu1 %2545 }
 0x755   : > { %v2592_v18 = vmul.f32 %v5593_v56, %v2548_v44  ;;  %v2544_v39 = vpop.xlane.xlu0 %2543  ;;  %v2591_v27 = vmul.f32 %v5593_v56, %v2546_v0 }
 0x756   : > { %v2590_v62 = vmul.f32 %v5593_v56, %v2544_v39 }
 0x757   : > { %v5740_v7 = vsub.f32 %v5569_v34, %v2592_v18  ;;  %v5753_v34 = vsub.f32 %v5571_v23, %v2591_v27 }
 0x758   : > { %v5743_v14 = vsub.f32 %v5573_v15, %v2590_v62 }
 0x759   : > { %v2656_v8 = vmul.f32 %v5740_v7, %v5740_v7  ;;  %v2655_v24 = vmul.f32 %v5753_v34, %v5753_v34 }
 0x75a   : > { %v2654_v55 = vmul.f32 %v5743_v14, %v5743_v14 }
 0x75b   : > { %2714 = vadd.xlane.f32.xlu1 %v2656_v8 }
 0x75c   : > { %2706 = vadd.xlane.f32.xlu0 %v2652_v51  ;;  %2710 = vadd.xlane.f32.xlu2 %v2654_v55  ;;  %v2554_v49 = vpop.xlane.xlu2 %2553  ;;  %v2552_v15 = vpop.xlane.xlu1 %2551 }
 0x75d   : > { %v2595_v2 = vmul.f32 %v5593_v56, %v2554_v49  ;;  %v2550_v3 = vpop.xlane.xlu0 %2549  ;;  %v2594_v4 = vmul.f32 %v5593_v56, %v2552_v15 }
 0x75e   : > { %v2593_v54 = vmul.f32 %v5593_v56, %v2550_v3 }
 0x75f   : > { %v5758_v42 = vsub.f32 %v5578_v12, %v2595_v2  ;;  %v5771_v12 = vsub.f32 %v5580_v41, %v2594_v4 }
 0x760   : > { %v5761_v48 = vsub.f32 %v5582_v11, %v2593_v54 }
 0x761   : > { %v2659_v23 = vmul.f32 %v5758_v42, %v5758_v42  ;;  %v2658_v21 = vmul.f32 %v5771_v12, %v5771_v12 }
 0x762   : > { %v2657_v30 = vmul.f32 %v5761_v48, %v5761_v48 }
 0x763   : > { %2720 = vadd.xlane.f32.xlu1 %v2659_v23 }
 0x764   : > { %2712 = vadd.xlane.f32.xlu0 %v2655_v24  ;;  %2716 = vadd.xlane.f32.xlu2 %v2657_v30  ;;  %v2558_v11 = vpop.xlane.xlu1 %2557 }
 0x765   : > { %v2556_v17 = vpop.xlane.xlu0 %2555  ;;  %v2597_v58 = vmul.f32 %v5593_v56, %v2558_v11 }
 0x766   : > { %v2596_v28 = vmul.f32 %v5593_v56, %v2556_v17 }
 0x767   : > { %v5783_v41 = vsub.f32 %v5587_v16, %v2597_v58 }
 0x768   : > { %v5775_v1 = vsub.f32 %v5589_v53, %v2596_v28 }
 0x769   : > { %v2661_v37 = vmul.f32 %v5783_v41, %v5783_v41 }
 0x76a   : > { %v2660_v45 = vmul.f32 %v5775_v1, %v5775_v1 }
 0x76c   : > { %2718 = vadd.xlane.f32.xlu0 %v2658_v21  ;;  %2722 = vadd.xlane.f32.xlu2 %v2660_v45 }
 0x774   : > { %2724 = vadd.xlane.f32.xlu0 %v2661_v37 }
 0x78e   : > { %v2667_v40 = vpop.xlane.xlu1 %2666 }
 0x78f   : > { %v2728_v53 = vmul.f32 %v2667_v40, %v5593_v56  ;;  %v2663_v22 = vpop.xlane.xlu2 %2662 }
 0x790   : > { %v2726_v47 = vmul.f32 %v2663_v22, %v5593_v56 }
 0x791   : > { %v2760_v10 = vadd.f32 1e-05, %v2728_v53 }
 0x792   : > { %v2758_v44 = vadd.f32 1e-05, %v2726_v47 }
 0x793   : > { %3963 = vrsqrt.f32 %v2760_v10  ;;  %vm2816_vm2 = vweird.f32 %v2760_v10 }
 0x794   : > { %3965 = vrsqrt.f32 %v2758_v44  ;;  %vm2796_vm5 = vweird.f32 %v2758_v44 }
 0x796   : > { %v2673_v0 = vpop.xlane.xlu1 %2672 }
 0x797   : > { %v2731_v18 = vmul.f32 %v2673_v0, %v5593_v56  ;;  %v2669_v39 = vpop.xlane.xlu2 %2668  ;;  %v2665_v16 = vpop.xlane.xlu0 %2664 }
 0x798   : > { %v2729_v62 = vmul.f32 %v2669_v39, %v5593_v56  ;;  %v2727_v51 = vmul.f32 %v2665_v16, %v5593_v56 }
 0x799   : > { %v3964_v27 = vpop.eup %3963  ;;  %v5792_v8 = vadd.f32 1e-05, %v2731_v18 }
 0x79a   : > { %v3966_v55 = vpop.eup %3965  ;;  %v2811_v49 = vmul.f32 %v3964_v27, %v2760_v10  ;;  %v5794_v15 = vadd.f32 1e-05, %v2729_v62  ;;  %v5796_v2 = vadd.f32 1e-05, %v2727_v51  ;;  %vm2817_vm3 = vweird.f32 %v3964_v27 }
 0x79b   : > { %v2791_v3 = vmul.f32 %v3966_v55, %v2758_v44  ;;  %3967 = vrsqrt.f32 %v5792_v8  ;;  %vm2797_vm4 = vweird.f32 %v3966_v55  ;;  %vm5813_vm6 = vmor %vm2816_vm2, %vm2817_vm3  ;;  %vm2846_vm8 = vweird.f32 %v5792_v8 }
 0x79c   : > { %v2812_v54 = vmul.f32 %v3964_v27, %v2811_v49  ;;  %3969 = vrsqrt.f32 %v5794_v15  ;;  %vm2798_vm7 = vmor %vm2796_vm5, %vm2797_vm4  ;;  %vm2826_vm10 = vweird.f32 %v5794_v15  ;;  %vm2806_vm12 = vweird.f32 %v5796_v2 }
 0x79d   : > { %v2792_v24 = vmul.f32 %v3966_v55, %v2791_v3  ;;  %3971 = vrsqrt.f32 %v5796_v2 }
 0x79e   : > { %v2813_v4 = vmul.f32 0.5, %v2812_v54  ;;  %v2679_v23 = vpop.xlane.xlu1 %2678 }
 0x79f   : > { %v2793_v30 = vmul.f32 0.5, %v2792_v24  ;;  %v2734_v17 = vmul.f32 %v2679_v23, %v5593_v56  ;;  %v2675_v11 = vpop.xlane.xlu2 %2674  ;;  %v2671_v58 = vpop.xlane.xlu0 %2670 }
 0x7a0   : > { %v2814_v28 = vsub.f32 1.5, %v2813_v4  ;;  %v2732_v21 = vmul.f32 %v2675_v11, %v5593_v56  ;;  %v2730_v62 = vmul.f32 %v2671_v58, %v5593_v56 }
 0x7a1   : > { %v5803_v45 = vpop.eup %3967  ;;  %v2794_v37 = vsub.f32 1.5, %v2793_v30  ;;  %v5805_v40 = vadd.f32 1e-05, %v2734_v17 }
 0x7a2   : > { %v3970_v53 = vpop.eup %3969  ;;  %v2815_v22 = vmul.f32 %v3964_v27, %v2814_v28  ;;  %v2841_v47 = vmul.f32 %v5803_v45, %v5792_v8  ;;  %v5809_v0 = vadd.f32 1e-05, %v2732_v21  ;;  %vm2847_vm9 = vweird.f32 %v5803_v45 }
 0x7a3   : > { %v5811_v18 = vpop.eup %3971  ;;  %v2795_v39 = vmul.f32 %v3966_v55, %v2794_v37  ;;  %v2821_v16 = vmul.f32 %v3970_v53, %v5794_v15  ;;  %3973 = vrsqrt.f32 %v5805_v40  ;;  %vm2827_vm11 = vweird.f32 %v3970_v53  ;;  %vm5857_vm14 = vmor %vm2846_vm8, %vm2847_vm9 }
 0x7a4   : > { %v2819_v44 = vsel %vm5813_vm6, %v3964_v27, %v2815_v22  ;;  %v2842_v51 = vmul.f32 %v5803_v45, %v2841_v47  ;;  %v2801_v49 = vmul.f32 %v5811_v18, %v5796_v2  ;;  %3975 = vrsqrt.f32 %v5809_v0  ;;  %v5831_v27 = vld [vmem:[%s6388_s9] ss:$0 sm:$0xff]  ;;  %vm2828_vm0 = vmor %vm2826_vm10, %vm2827_vm11 }
 0x7a5   : > { %v2799_v3 = vsel %vm2798_vm7, %v3966_v55, %v2795_v39  ;;  %v2822_v54 = vmul.f32 %v3970_v53, %v2821_v16  ;;  %v3112_v30 = vmul.f32 %v2819_v44, %v5598_v33  ;;  %v5835_v55 = vadd.f32 1e-05, %v2730_v62  ;;  %v5850_v39 = vld [vmem:[%s6389_s10] ss:$0 sm:$0xff] }
 0x7a6   : > { %v2843_v24 = vmul.f32 0.5, %v2842_v51  ;;  %v2802_v4 = vmul.f32 %v5811_v18, %v2801_v49  ;;  %v2685_v23 = vpop.xlane.xlu1 %2684  ;;  %v3110_v11 = vmul.f32 %v2799_v3, %v5601_v31  ;;  %vm2807_vm13 = vweird.f32 %v5811_v18 }
 0x7a7   : > { %v2823_v17 = vmul.f32 0.5, %v2822_v54  ;;  %v2737_v58 = vmul.f32 %v2685_v23, %v5593_v56  ;;  %v2681_v37 = vpop.xlane.xlu2 %2680  ;;  %3977 = vrsqrt.f32 %v5835_v55  ;;  %v2677_v10 = vpop.xlane.xlu0 %2676  ;;  %v3148_v16 = vmul.f32 %v5831_v27, %v3112_v30  ;;  %vm2808_vm2 = vmor %vm2806_vm12, %vm2807_vm13 }
 0x7a8   : > { %v2844_v28 = vsub.f32 1.5, %v2843_v24  ;;  %v2803_v21 = vmul.f32 0.5, %v2802_v4  ;;  %vm2876_vm15 = vweird.f32 %v5805_v40  ;;  %v3146_v3 = vmul.f32 %v5831_v27, %v3110_v11 }
 0x7a9   : > { %v5839_v22 = vpop.eup %3973  ;;  %v2824_v47 = vsub.f32 1.5, %v2823_v17  ;;  %v5862_v51 = vadd.f32 1e-05, %v2737_v58  ;;  %vm2856_vm1 = vweird.f32 %v5809_v0  ;;  %v2735_v30 = vmul.f32 %v2681_v37, %v5593_v56 }
 0x7aa   : > { %v2804_v33 = vsub.f32 1.5, %v2803_v21  ;;  %v2871_v31 = vmul.f32 %v5839_v22, %v5805_v40  ;;  %v5864_v49 = vpop.eup %3975  ;;  %v2845_v54 = vmul.f32 %v5803_v45, %v2844_v28  ;;  %v2733_v15 = vmul.f32 %v2677_v10, %v5593_v56 }
 0x7ab   : > { %v2825_v44 = vmul.f32 %v3970_v53, %v2824_v47  ;;  %v2851_v23 = vmul.f32 %v5864_v49, %v5809_v0  ;;  %3979 = vrsqrt.f32 %v5862_v51  ;;  %v3184_v58 = vadd.f32 %v5850_v39, %v3148_v16 }
 0x7ac   : > { %v2805_v8 = vmul.f32 %v5811_v18, %v2804_v33  ;;  %v2872_v24 = vmul.f32 %v5839_v22, %v2871_v31  ;;  %vm2877_vm3 = vweird.f32 %v5839_v22  ;;  %v2849_v37 = vsel %vm5857_vm14, %v5803_v45, %v2845_v54 }
 0x7ad   : > { %v2829_v4 = vsel %vm2828_vm0, %v3970_v53, %v2825_v44  ;;  %v3978_v21 = vpop.eup %3977  ;;  %v2852_v47 = vmul.f32 %v5864_v49, %v2851_v23  ;;  %v3182_v31 = vadd.f32 %v5850_v39, %v3146_v3  ;;  %v5896_v44 = vadd.f32 1e-05, %v2735_v30  ;;  %vm5908_vm4 = vmor %vm2876_vm15, %vm2877_vm3 }
 0x7ae   : > { %v3113_v17 = vmul.f32 %v2829_v4, %v5614_v19  ;;  %v2809_v11 = vsel %vm2808_vm2, %v5811_v18, %v2805_v8  ;;  %v2873_v28 = vmul.f32 0.5, %v2872_v24  ;;  %v2691_v53 = vpop.xlane.xlu1 %2690  ;;  %v2831_v33 = vmul.f32 %v3978_v21, %v5835_v55 }
 0x7af   : > { %v3111_v2 = vmul.f32 %v2809_v11, %v5618_v63  ;;  %v2853_v16 = vmul.f32 0.5, %v2852_v47  ;;  %v5900_v4 = vadd.f32 1e-05, %v2733_v15  ;;  %v2687_v45 = vpop.xlane.xlu2 %2686  ;;  %v3115_v62 = vmul.f32 %v2849_v37, %v5611_v52 }
 0x7b0   : > { %v3149_v19 = vmul.f32 %v5831_v27, %v3113_v17  ;;  %v2874_v18 = vsub.f32 1.5, %v2873_v28  ;;  %v2832_v24 = vmul.f32 %v3978_v21, %v2831_v33  ;;  %3981 = vrsqrt.f32 %v5896_v44  ;;  %v2683_v17 = vpop.xlane.xlu0 %2682 }
 0x7b1   : > { %v3147_v10 = vmul.f32 %v5831_v27, %v3111_v2  ;;  %v2854_v23 = vsub.f32 1.5, %v2853_v16  ;;  %v5913_v30 = vpop.eup %3979  ;;  %vm2857_vm5 = vweird.f32 %v5864_v49  ;;  %3983 = vrsqrt.f32 %v5900_v4 }
 0x7b2   : > { %v3185_v63 = vadd.f32 %v5850_v39, %v3149_v19  ;;  %v2875_v8 = vmul.f32 %v5839_v22, %v2874_v18  ;;  %v2833_v52 = vmul.f32 0.5, %v2832_v24  ;;  %v2901_v28 = vmul.f32 %v5913_v30, %v5862_v51  ;;  %vm5929_vm7 = vmor %vm2856_vm1, %vm2857_vm5 }
 0x7b3   : > { %v3183_v54 = vadd.f32 %v5850_v39, %v3147_v10  ;;  %v2855_v40 = vmul.f32 %v5864_v49, %v2854_v23  ;;  %vm2837_vm6 = vweird.f32 %v3978_v21  ;;  %v3151_v37 = vmul.f32 %v5831_v27, %v3115_v62 }
 0x7b4   : > { %v3633_v15 = vpack.c.bf16 %v3185_v63, %v3184_v58  ;;  %v2879_v2 = vsel %vm5908_vm4, %v5839_v22, %v2875_v8  ;;  %v2834_v47 = vsub.f32 1.5, %v2833_v52  ;;  %v2740_v58 = vmul.f32 %v2691_v53, %v5593_v56 }
 0x7b5   : > { %v3628_v11 = vpack.c.bf16 %v3183_v54, %v3182_v31  ;;  %v2902_v18 = vmul.f32 %v5913_v30, %v2901_v28  ;;  %v2738_v33 = vmul.f32 %v2687_v45, %v5593_v56  ;;  %v2859_v22 = vsel %vm5929_vm7, %v5864_v49, %v2855_v40 }
 0x7b6   : > { %3705 = vst [vmem:[%s4186_s27 + $0x8] sm:$0xff] %v3633_v15   ;;  %v2697_v31 = vpop.xlane.xlu1 %2696  ;;  %v2835_v10 = vmul.f32 %v3978_v21, %v2834_v47  ;;  %vm2836_vm8 = vweird.f32 %v5835_v55  ;;  %v5939_v53 = vadd.f32 1e-05, %v2740_v58  ;;  %v3982_v16 = vpop.eup %3981  ;;  %v3118_v0 = vmul.f32 %v2879_v2, %v5632_v26 }
 0x7b7   : > { %3629 = vst [vmem:[%s4186_s27] sm:$0xff] %v3628_v11   ;;  %vm2838_vm9 = vmor %vm2836_vm8, %vm2837_vm6  ;;  %vm2906_vm10 = vweird.f32 %v5862_v51  ;;  %v5943_v63 = vadd.f32 1e-05, %v2738_v33  ;;  %v2736_v8 = vmul.f32 %v2683_v17, %v5593_v56  ;;  %v3984_v24 = vpop.eup %3983  ;;  %v2903_v62 = vmul.f32 0.5, %v2902_v18 }
 0x7b8   : > { %v2839_v45 = vsel %vm2838_vm9, %v3978_v21, %v2835_v10  ;;  %v2881_v49 = vmul.f32 %v3982_v16, %v5896_v44  ;;  %v2743_v54 = vmul.f32 %v2697_v31, %v5593_v56  ;;  %v3187_v55 = vadd.f32 %v5850_v39, %v3151_v37  ;;  %v2693_v21 = vpop.xlane.xlu2 %2692  ;;  %v2689_v2 = vpop.xlane.xlu0 %2688 }
 0x7b9   : > { %v3116_v3 = vmul.f32 %v2859_v22, %v5635_v43  ;;  %v3114_v26 = vmul.f32 %v2839_v45, %v5627_v46  ;;  %v2861_v23 = vmul.f32 %v3984_v24, %v5900_v4  ;;  %vm2907_vm11 = vweird.f32 %v5913_v30 }
 0x7ba   : > { %v2882_v15 = vmul.f32 %v3982_v16, %v2881_v49  ;;  %vm2886_vm12 = vweird.f32 %v5896_v44  ;;  %3985 = vrsqrt.f32 %v5939_v53  ;;  %v3154_v52 = vmul.f32 %v5831_v27, %v3118_v0  ;;  %vm5975_vm0 = vmor %vm2906_vm10, %vm2907_vm11 }
 0x7bb   : > { %v3150_v17 = vmul.f32 %v5831_v27, %v3114_v26  ;;  %v2862_v11 = vmul.f32 %v3984_v24, %v2861_v23  ;;  %3987 = vrsqrt.f32 %v5943_v63  ;;  %v2904_v43 = vsub.f32 1.5, %v2903_v62 }
 0x7bc   : > { %v2883_v40 = vmul.f32 0.5, %v2882_v15  ;;  %v5958_v46 = vadd.f32 1e-05, %v2736_v8  ;;  %v5960_v28 = vadd.f32 1e-05, %v2743_v54  ;;  %v3152_v47 = vmul.f32 %v5831_v27, %v3116_v3 }
 0x7bd   : > { %v3186_v58 = vadd.f32 %v5850_v39, %v3150_v17  ;;  %v2863_v37 = vmul.f32 0.5, %v2862_v11  ;;  %v2741_v19 = vmul.f32 %v2693_v21, %v5593_v56  ;;  %vm2887_vm13 = vweird.f32 %v3982_v16 }
 0x7be   : > { %v2884_v18 = vsub.f32 1.5, %v2883_v40  ;;  %vm2866_vm14 = vweird.f32 %v5900_v4  ;;  %3989 = vrsqrt.f32 %v5958_v46  ;;  %vm2867_vm15 = vweird.f32 %v3984_v24  ;;  %vm2888_vm1 = vmor %vm2886_vm12, %vm2887_vm13  ;;  %v2703_v15 = vpop.xlane.xlu1 %2702 }
 0x7bf   : > { %v3638_v33 = vpack.c.bf16 %v3187_v55, %v3186_v58  ;;  %v2864_v31 = vsub.f32 1.5, %v2863_v37  ;;  %3991 = vrsqrt.f32 %v5960_v28  ;;  %v2905_v10 = vmul.f32 %v5913_v30, %v2904_v43  ;;  %vm2868_vm2 = vmor %vm2866_vm14, %vm2867_vm15 }
 0x7c0   : > { %v5968_v22 = vpop.eup %3985  ;;  %v2885_v8 = vmul.f32 %v3982_v16, %v2884_v18  ;;  %v5979_v45 = vadd.f32 1e-05, %v2741_v19  ;;  %v2739_v62 = vmul.f32 %v2689_v2, %v5593_v56  ;;  %v3190_v54 = vadd.f32 %v5850_v39, %v3154_v52  ;;  %v2699_v37 = vpop.xlane.xlu2 %2698 }
 0x7c1   : > { %v5982_v49 = vpop.eup %3987  ;;  %v3188_v55 = vadd.f32 %v5850_v39, %v3152_v47  ;;  %3706 = vst [vmem:[%s4186_s27 + $0x10] sm:$0xff] %v3638_v33   ;;  %v2865_v51 = vmul.f32 %v3984_v24, %v2864_v31  ;;  %v2931_v3 = vmul.f32 %v5968_v22, %v5939_v53  ;;  %vm2936_vm3 = vweird.f32 %v5939_v53  ;;  %v6018_v19 = vpop.xlane.xlu0 %2694 }
 0x7c2   : > { %v2889_v26 = vsel %vm2888_vm1, %v3982_v16, %v2885_v8  ;;  %v2911_v23 = vmul.f32 %v5982_v49, %v5943_v63  ;;  %vm2916_vm4 = vweird.f32 %v5943_v63  ;;  %3993 = vrsqrt.f32 %v5979_v45 }
 0x7c3   : > { %v3119_v44 = vmul.f32 %v2889_v26, %v5653_v29  ;;  %v2869_v21 = vsel %vm2868_vm2, %v3984_v24, %v2865_v51  ;;  %v2932_v52 = vmul.f32 %v5968_v22, %v2931_v3  ;;  %v2909_v4 = vsel %vm5975_vm0, %v5913_v30, %v2905_v10 }
 0x7c4   : > { %v3990_v16 = vpop.eup %3989  ;;  %v3117_v17 = vmul.f32 %v2869_v21, %v5645_v50  ;;  %v2912_v11 = vmul.f32 %v5982_v49, %v2911_v23  ;;  %v6007_v43 = vadd.f32 1e-05, %v2739_v62  ;;  %v2746_v47 = vmul.f32 %v2703_v15, %v5593_v56 }
 0x7c5   : > { %v6009_v40 = vpop.eup %3991  ;;  %v3155_v29 = vmul.f32 %v5831_v27, %v3119_v44  ;;  %v2933_v24 = vmul.f32 0.5, %v2932_v52  ;;  %v2891_v2 = vmul.f32 %v3990_v16, %v5958_v46  ;;  %vm2937_vm5 = vweird.f32 %v5968_v22 }
 0x7c6   : > { %v3153_v58 = vmul.f32 %v5831_v27, %v3117_v17  ;;  %v2913_v30 = vmul.f32 0.5, %v2912_v11  ;;  %v2961_v50 = vmul.f32 %v6009_v40, %v5960_v28  ;;  %3995 = vrsqrt.f32 %v6007_v43  ;;  %vm6030_vm6 = vmor %vm2936_vm3, %vm2937_vm5 }
 0x7c7   : > { %v3191_v18 = vadd.f32 %v5850_v39, %v3155_v29  ;;  %v2934_v33 = vsub.f32 1.5, %v2933_v24  ;;  %v2892_v31 = vmul.f32 %v3990_v16, %v2891_v2  ;;  %v3121_v10 = vmul.f32 %v2909_v4, %v5650_v13 }
 0x7c8   : > { %v3189_v0 = vadd.f32 %v5850_v39, %v3153_v58  ;;  %v2914_v8 = vsub.f32 1.5, %v2913_v30  ;;  %v2962_v62 = vmul.f32 %v6009_v40, %v2961_v50  ;;  %v3994_v51 = vpop.eup %3993  ;;  %v6034_v13 = vadd.f32 1e-05, %v2746_v47  ;;  %v2709_v58 = vpop.xlane.xlu1 %2708 }
 0x7c9   : > { %v3648_v3 = vpack.c.bf16 %v3191_v18, %v3190_v54  ;;  %v2935_v26 = vmul.f32 %v5968_v22, %v2934_v33  ;;  %v2893_v15 = vmul.f32 0.5, %v2892_v31  ;;  %vm2917_vm7 = vweird.f32 %v5982_v49  ;;  %v2705_v31 = vpop.xlane.xlu2 %2704 }
 0x7ca   : > { %v3643_v44 = vpack.c.bf16 %v3189_v0, %v3188_v55  ;;  %v2963_v21 = vmul.f32 0.5, %v2962_v62  ;;  %v2941_v52 = vmul.f32 %v3994_v51, %v5979_v45  ;;  %v2915_v54 = vmul.f32 %v5982_v49, %v2914_v8  ;;  %vm6051_vm10 = vmor %vm2916_vm4, %vm2917_vm7 }
 0x7cb   : > { %3708 = vst [vmem:[%s4186_s27 + $0x20] sm:$0xff] %v3648_v3   ;;  %v2894_v4 = vsub.f32 1.5, %v2893_v15  ;;  %vm2897_vm8 = vweird.f32 %v3990_v16  ;;  %3997 = vrsqrt.f32 %v6034_v13  ;;  %v2939_v53 = vsel %vm6030_vm6, %v5968_v22, %v2935_v26 }
 0x7cc   : > { %3707 = vst [vmem:[%s4186_s27 + $0x18] sm:$0xff] %v3643_v44   ;;  %vm2896_vm9 = vweird.f32 %v5958_v46  ;;  %v2942_v55 = vmul.f32 %v3994_v51, %v2941_v52  ;;  %v6046_v17 = vpop.eup %3995  ;;  %v3157_v11 = vmul.f32 %v5831_v27, %v3121_v10  ;;  %v2964_v2 = vsub.f32 1.5, %v2963_v21  ;;  %v2701_v10 = vpop.xlane.xlu0 %2700 }
 0x7cd   : > { %v2895_v24 = vmul.f32 %v3990_v16, %v2894_v4  ;;  %v2744_v47 = vmul.f32 %v2699_v37, %v5593_v56  ;;  %vm2898_vm11 = vmor %vm2896_vm9, %vm2897_vm8  ;;  %vm2966_vm12 = vweird.f32 %v5960_v28  ;;  %vm2967_vm13 = vweird.f32 %v6009_v40 }
 0x7ce   : > { %v2943_v46 = vmul.f32 0.5, %v2942_v55  ;;  %v2921_v22 = vmul.f32 %v6046_v17, %v6007_v43  ;;  %v3124_v63 = vmul.f32 %v2939_v53, %v5668_v60  ;;  %v2919_v30 = vsel %vm6051_vm10, %v5982_v49, %v2915_v54  ;;  %vm6080_vm0 = vmor %vm2966_vm12, %vm2967_vm13 }
 0x7cf   : > { %v2899_v50 = vsel %vm2898_vm11, %v3990_v16, %v2895_v24  ;;  %v6064_v18 = vadd.f32 1e-05, %v2744_v47  ;;  %vm2946_vm14 = vweird.f32 %v5979_v45  ;;  %vm2947_vm15 = vweird.f32 %v3994_v51 }
 0x7d0   : > { %v3120_v37 = vmul.f32 %v2899_v50, %v5663_v9  ;;  %v2944_v33 = vsub.f32 1.5, %v2943_v46  ;;  %v3193_v8 = vadd.f32 %v5850_v39, %v3157_v11  ;;  %v2965_v60 = vmul.f32 %v6009_v40, %v2964_v2  ;;  %vm2948_vm1 = vmor %vm2946_vm14, %vm2947_vm15  ;;  %v2715_v46 = vpop.xlane.xlu1 %2714 }
 0x7d1   : > { %v6068_v0 = vpop.eup %3997  ;;  %v2922_v62 = vmul.f32 %v6046_v17, %v2921_v22  ;;  %3999 = vrsqrt.f32 %v6064_v18  ;;  %v3122_v49 = vmul.f32 %v2919_v30, %v5671_v59  ;;  %v3160_v23 = vmul.f32 %v5831_v27, %v3124_v63 }
 0x7d2   : > { %v3156_v9 = vmul.f32 %v5831_v27, %v3120_v37  ;;  %v2945_v3 = vmul.f32 %v3994_v51, %v2944_v33  ;;  %v2991_v26 = vmul.f32 %v6068_v0, %v6034_v13  ;;  %vm2927_vm2 = vweird.f32 %v6046_v17 }
 0x7d3   : > { %v2923_v59 = vmul.f32 0.5, %v2922_v62  ;;  %v2742_v15 = vmul.f32 %v6018_v19, %v5593_v56  ;;  %v2749_v52 = vmul.f32 %v2709_v58, %v5593_v56  ;;  %v2969_v54 = vsel %vm6080_vm0, %v6009_v40, %v2965_v60 }
 0x7d4   : > { %v3192_v28 = vadd.f32 %v5850_v39, %v3156_v9  ;;  %v2949_v44 = vsel %vm2948_vm1, %v3994_v51, %v2945_v3  ;;  %v2992_v21 = vmul.f32 %v6068_v0, %v2991_v26  ;;  %v2747_v51 = vmul.f32 %v2705_v31, %v5593_v56  ;;  %v2711_v31 = vpop.xlane.xlu2 %2710 }
 0x7d5   : > { %v3125_v45 = vmul.f32 %v2949_v44, %v5689_v38  ;;  %v2924_v4 = vsub.f32 1.5, %v2923_v59  ;;  %v6099_v53 = vadd.f32 1e-05, %v2742_v15  ;;  %v6101_v19 = vadd.f32 1e-05, %v2749_v52 }
 0x7d6   : > { %v3653_v55 = vpack.c.bf16 %v3193_v8, %v3192_v28  ;;  %v2993_v11 = vmul.f32 0.5, %v2992_v21  ;;  %vm2926_vm3 = vweird.f32 %v6007_v43  ;;  %v3196_v38 = vadd.f32 %v5850_v39, %v3160_v23  ;;  %v2707_v8 = vpop.xlane.xlu0 %2706 }
 0x7d7   : > { %v6104_v29 = vpop.eup %3999  ;;  %v3161_v24 = vmul.f32 %v5831_v27, %v3125_v45  ;;  %v2925_v2 = vmul.f32 %v6046_v17, %v2924_v4  ;;  %4001 = vrsqrt.f32 %v6099_v53  ;;  %v3158_v40 = vmul.f32 %v5831_v27, %v3122_v49  ;;  %vm2928_vm4 = vmor %vm2926_vm3, %vm2927_vm2 }
 0x7d8   : > { %3709 = vst [vmem:[%s4186_s27 + $0x28] sm:$0xff] %v3653_v55   ;;  %v2971_v47 = vmul.f32 %v6104_v29, %v6064_v18  ;;  %4003 = vrsqrt.f32 %v6101_v19  ;;  %v3127_v22 = vmul.f32 %v2969_v54, %v5686_v25  ;;  %v6121_v63 = vadd.f32 1e-05, %v2747_v51 }
 0x7d9   : > { %v3197_v43 = vadd.f32 %v5850_v39, %v3161_v24  ;;  %v2929_v58 = vsel %vm2928_vm4, %v6046_v17, %v2925_v2  ;;  %v2994_v50 = vsub.f32 1.5, %v2993_v11  ;;  %v2745_v33 = vmul.f32 %v2701_v10, %v5593_v56  ;;  %v2721_v2 = vpop.xlane.xlu1 %2720 }
 0x7da   : > { %v3123_v30 = vmul.f32 %v2929_v58, %v5681_v61  ;;  %v2972_v37 = vmul.f32 %v6104_v29, %v2971_v47  ;;  %vm2996_vm5 = vweird.f32 %v6034_v13  ;;  %4005 = vrsqrt.f32 %v6121_v63 }
 0x7db   : > { %v3663_v60 = vpack.c.bf16 %v3197_v43, %v3196_v38  ;;  %v2752_v25 = vmul.f32 %v2715_v46, %v5593_v56  ;;  %vm2997_vm6 = vweird.f32 %v6068_v0  ;;  %v6131_v62 = vadd.f32 1e-05, %v2745_v33 }
 0x7dc   : > { %v3159_v17 = vmul.f32 %v5831_v27, %v3123_v30  ;;  %v2973_v61 = vmul.f32 0.5, %v2972_v37  ;;  %v3194_v9 = vadd.f32 %v5850_v39, %v3158_v40  ;;  %v3163_v10 = vmul.f32 %v5831_v27, %v3127_v22  ;;  %vm6145_vm7 = vmor %vm2996_vm5, %vm2997_vm6  ;;  %v2717_v43 = vpop.xlane.xlu2 %2716 }
 0x7dd   : > { %v4002_v49 = vpop.eup %4001  ;;  %3711 = vst [vmem:[%s4186_s27 + $0x38] sm:$0xff] %v3663_v60   ;;  %v6136_v16 = vadd.f32 1e-05, %v2752_v25  ;;  %v2995_v23 = vmul.f32 %v6068_v0, %v2994_v50  ;;  %4007 = vrsqrt.f32 %v6131_v62  ;;  %v2750_v21 = vmul.f32 %v2711_v31, %v5593_v56 }
 0x7de   : > { %v6138_v3 = vpop.eup %4003  ;;  %v3195_v26 = vadd.f32 %v5850_v39, %v3159_v17  ;;  %v2974_v59 = vsub.f32 1.5, %v2973_v61  ;;  %v2951_v15 = vmul.f32 %v4002_v49, %v6099_v53  ;;  %v2748_v52 = vmul.f32 %v2707_v8, %v5593_v56  ;;  %v6176_v58 = vpop.xlane.xlu0 %2712 }
 0x7df   : > { %v3021_v44 = vmul.f32 %v6138_v3, %v6101_v19  ;;  %vm2976_vm8 = vweird.f32 %v6064_v18  ;;  %vm2977_vm9 = vweird.f32 %v6104_v29  ;;  %4009 = vrsqrt.f32 %v6136_v16 }
 0x7e0   : > { %v3658_v54 = vpack.c.bf16 %v3195_v26, %v3194_v9  ;;  %v2952_v45 = vmul.f32 %v4002_v49, %v2951_v15  ;;  %v6154_v4 = vpop.eup %4005  ;;  %v2999_v55 = vsel %vm6145_vm7, %v6068_v0, %v2995_v23  ;;  %v2975_v11 = vmul.f32 %v6104_v29, %v2974_v59  ;;  %vm6183_vm12 = vmor %vm2976_vm8, %vm2977_vm9 }
 0x7e1   : > { %v3022_v13 = vmul.f32 %v6138_v3, %v3021_v44  ;;  %v3001_v24 = vmul.f32 %v6154_v4, %v6121_v63  ;;  %v6168_v38 = vadd.f32 %v5850_v39, %v3163_v10  ;;  %v6170_v47 = vadd.f32 1e-05, %v2750_v21 }
 0x7e2   : > { %3710 = vst [vmem:[%s4186_s27 + $0x30] sm:$0xff] %v3658_v54   ;;  %v2953_v51 = vmul.f32 0.5, %v2952_v45  ;;  %v6172_v46 = vadd.f32 1e-05, %v2748_v52  ;;  %vm2956_vm10 = vweird.f32 %v6099_v53  ;;  %vm2957_vm11 = vweird.f32 %v4002_v49 }
 0x7e3   : > { %v3023_v40 = vmul.f32 0.5, %v3022_v13  ;;  %v3002_v0 = vmul.f32 %v6154_v4, %v3001_v24  ;;  %v4008_v30 = vpop.eup %4007  ;;  %v3130_v50 = vmul.f32 %v2999_v55, %v5704_v5  ;;  %vm3006_vm13 = vweird.f32 %v6121_v63  ;;  %vm2958_vm14 = vmor %vm2956_vm10, %vm2957_vm11 }
 0x7e4   : > { %v2954_v22 = vsub.f32 1.5, %v2953_v51  ;;  %4011 = vrsqrt.f32 %v6170_v47  ;;  %v2755_v33 = vmul.f32 %v2721_v2, %v5593_v56  ;;  %v2979_v31 = vsel %vm6183_vm12, %v6104_v29, %v2975_v11 }
 0x7e5   : > { %v3003_v5 = vmul.f32 0.5, %v3002_v0  ;;  %v2981_v60 = vmul.f32 %v4008_v30, %v6131_v62  ;;  %v6194_v25 = vpop.eup %4009  ;;  %v3024_v18 = vsub.f32 1.5, %v3023_v40  ;;  %vm3007_vm15 = vweird.f32 %v6154_v4 }
 0x7e6   : > { %v2955_v8 = vmul.f32 %v4002_v49, %v2954_v22  ;;  %4013 = vrsqrt.f32 %v6172_v46  ;;  %v2753_v17 = vmul.f32 %v2717_v43, %v5593_v56  ;;  %v3051_v10 = vmul.f32 %v6194_v25, %v6136_v16  ;;  %vm3008_vm2 = vmor %vm3006_vm13, %vm3007_vm15  ;;  %v2719_v40 = vpop.xlane.xlu0 %2718 }
 0x7e7   : > { %v3004_v9 = vsub.f32 1.5, %v3003_v5  ;;  %v2982_v29 = vmul.f32 %v4008_v30, %v2981_v60  ;;  %vm3026_vm0 = vweird.f32 %v6101_v19  ;;  %vm3027_vm1 = vweird.f32 %v6138_v3 }
 0x7e8   : > { %v2959_v61 = vsel %vm2958_vm14, %v4002_v49, %v2955_v8  ;;  %v6207_v53 = vadd.f32 1e-05, %v2755_v33  ;;  %v3128_v23 = vmul.f32 %v2979_v31, %v5707_v57  ;;  %v3052_v49 = vmul.f32 %v6194_v25, %v3051_v10  ;;  %vm6230_vm4 = vmor %vm3026_vm0, %vm3027_vm1  ;;  %v2723_v8 = vpop.xlane.xlu2 %2722 }
 0x7e9   : > { %v3126_v26 = vmul.f32 %v2959_v61, %v5699_v32  ;;  %v3005_v59 = vmul.f32 %v6154_v4, %v3004_v9  ;;  %v2983_v15 = vmul.f32 0.5, %v2982_v29  ;;  %v3166_v44 = vmul.f32 %v5831_v27, %v3130_v50 }
 0x7ea   : > { %v6212_v28 = vpop.eup %4011  ;;  %vm2987_vm3 = vweird.f32 %v4008_v30  ;;  %4015 = vrsqrt.f32 %v6207_v53  ;;  %v3025_v32 = vmul.f32 %v6138_v3, %v3024_v18  ;;  %v6223_v54 = vadd.f32 1e-05, %v2753_v17 }
 0x7eb   : > { %v3162_v21 = vmul.f32 %v5831_v27, %v3126_v26  ;;  %v3009_v57 = vsel %vm3008_vm2, %v6154_v4, %v3005_v59  ;;  %v2984_v52 = vsub.f32 1.5, %v2983_v15  ;;  %v3053_v11 = vmul.f32 0.5, %v3052_v49 }
 0x7ec   : > { %v4014_v45 = vpop.eup %4013  ;;  %v3131_v55 = vmul.f32 %v3009_v57, %v5725_v35  ;;  %v3031_v4 = vmul.f32 %v6212_v28, %v6170_v47  ;;  %v3164_v51 = vmul.f32 %v5831_v27, %v3128_v23  ;;  %vm2986_vm5 = vweird.f32 %v6131_v62 }
 0x7ed   : > { %v3198_v13 = vadd.f32 %v5850_v39, %v3162_v21  ;;  %v2985_v24 = vmul.f32 %v4008_v30, %v2984_v52  ;;  %v3011_v2 = vmul.f32 %v4014_v45, %v6172_v46  ;;  %v3202_v19 = vadd.f32 %v5850_v39, %v3166_v44  ;;  %vm2988_vm6 = vmor %vm2986_vm5, %vm2987_vm3 }
 0x7ee   : > { %v3167_v0 = vmul.f32 %v5831_v27, %v3131_v55  ;;  %v3029_v35 = vsel %vm6230_vm4, %v6138_v3, %v3025_v32  ;;  %4017 = vrsqrt.f32 %v6223_v54  ;;  %v3032_v31 = vmul.f32 %v6212_v28, %v3031_v4  ;;  %v2725_v57 = vpop.xlane.xlu0 %2724 }
 0x7ef   : > { %v3668_v22 = vpack.c.bf16 %v6168_v38, %v3198_v13  ;;  %v2989_v43 = vsel %vm2988_vm6, %v4008_v30, %v2985_v24  ;;  %v3012_v50 = vmul.f32 %v4014_v45, %v3011_v2  ;;  %v3054_v38 = vsub.f32 1.5, %v3053_v11 }
 0x7f0   : > { %v6248_v62 = vpop.eup %4015  ;;  %v3203_v37 = vadd.f32 %v5850_v39, %v3167_v0  ;;  %v3129_v33 = vmul.f32 %v2989_v43, %v5717_v6  ;;  %v3200_v5 = vadd.f32 %v5850_v39, %v3164_v51  ;;  %vm3056_vm7 = vweird.f32 %v6136_v16 }
 0x7f1   : > { %3712 = vst [vmem:[%s4186_s27 + $0x40] sm:$0xff] %v3668_v22   ;;  %v3013_v3 = vmul.f32 0.5, %v3012_v50  ;;  %v3081_v30 = vmul.f32 %v6248_v62, %v6207_v53  ;;  %v3133_v60 = vmul.f32 %v3029_v35, %v5722_v36  ;;  %vm3057_vm8 = vweird.f32 %v6194_v25 }
 0x7f2   : > { %v3678_v18 = vpack.c.bf16 %v3203_v37, %v3202_v19  ;;  %v3165_v17 = vmul.f32 %v5831_v27, %v3129_v33  ;;  %vm3017_vm9 = vweird.f32 %v4014_v45  ;;  %v2751_v61 = vmul.f32 %v6176_v58, %v5593_v56  ;;  %vm6270_vm11 = vmor %vm3056_vm7, %vm3057_vm8 }
 0x7f3   : > { %v3014_v6 = vsub.f32 1.5, %v3013_v3  ;;  %v2756_v9 = vmul.f32 %v2723_v8, %v5593_v56  ;;  %v3055_v10 = vmul.f32 %v6194_v25, %v3054_v38  ;;  %v3033_v26 = vmul.f32 0.5, %v3032_v31 }
 0x7f4   : > { %3714 = vst [vmem:[%s4186_s27 + $0x50] sm:$0xff] %v3678_v18   ;;  %v3201_v29 = vadd.f32 %v5850_v39, %v3165_v17  ;;  %vm3016_vm10 = vweird.f32 %v6172_v46  ;;  %v4018_v36 = vpop.eup %4017  ;;  %v3082_v58 = vmul.f32 %v6248_v62, %v3081_v30  ;;  %v6275_v15 = vadd.f32 1e-05, %v2751_v61 }
 0x7f5   : > { %v3015_v59 = vmul.f32 %v4014_v45, %v3014_v6  ;;  %v6277_v49 = vadd.f32 1e-05, %v2756_v9  ;;  %vm3018_vm12 = vmor %vm3016_vm10, %vm3017_vm9  ;;  %v3061_v21 = vmul.f32 %v4018_v36, %v6223_v54  ;;  %v2754_v46 = vmul.f32 %v2719_v40, %v5593_v56 }
 0x7f6   : > { %v3673_v44 = vpack.c.bf16 %v3201_v29, %v3200_v5  ;;  %v3169_v16 = vmul.f32 %v5831_v27, %v3133_v60  ;;  %v3059_v52 = vsel %vm6270_vm11, %v6194_v25, %v3055_v10  ;;  %4019 = vrsqrt.f32 %v6275_v15 }
 0x7f7   : > { %v3019_v32 = vsel %vm3018_vm12, %v4014_v45, %v3015_v59  ;;  %v3062_v63 = vmul.f32 %v4018_v36, %v3061_v21  ;;  %v3034_v55 = vsub.f32 1.5, %v3033_v26  ;;  %v3083_v11 = vmul.f32 0.5, %v3082_v58 }
 0x7f8   : > { %3713 = vst [vmem:[%s4186_s27 + $0x48] sm:$0xff] %v3673_v44   ;;  %v3132_v13 = vmul.f32 %v3019_v32, %v5735_v20  ;;  %4021 = vrsqrt.f32 %v6277_v49  ;;  %v6291_v24 = vadd.f32 1e-05, %v2754_v46  ;;  %v2757_v45 = vmul.f32 %v2725_v57, %v5593_v56 }
 0x7f9   : > { %v3063_v51 = vmul.f32 0.5, %v3062_v63  ;;  %v3205_v2 = vadd.f32 %v5850_v39, %v3169_v16  ;;  %v3136_v25 = vmul.f32 %v3059_v52, %v5740_v7  ;;  %vm3066_vm13 = vweird.f32 %v6223_v54 }
 0x7fa   : > { %v3168_v4 = vmul.f32 %v5831_v27, %v3132_v13  ;;  %vm3067_vm14 = vweird.f32 %v4018_v36  ;;  %4023 = vrsqrt.f32 %v6291_v24  ;;  %v3035_v19 = vmul.f32 %v6212_v28, %v3034_v55 }
 0x7fb   : > { %v3064_v40 = vsub.f32 1.5, %v3063_v51  ;;  %vm3036_vm15 = vweird.f32 %v6170_v47  ;;  %vm3037_vm0 = vweird.f32 %v6212_v28  ;;  %v6302_v56 = vadd.f32 1e-05, %v2757_v45  ;;  %vm3068_vm2 = vmor %vm3066_vm13, %vm3067_vm14 }
 0x7fc   : > { %v3204_v20 = vadd.f32 %v5850_v39, %v3168_v4  ;;  %v4020_v22 = vpop.eup %4019  ;;  %v3084_v7 = vsub.f32 1.5, %v3083_v11  ;;  %vm3086_vm1 = vweird.f32 %v6207_v53  ;;  %v3172_v47 = vmul.f32 %v5831_v27, %v3136_v25  ;;  %vm6310_vm3 = vmor %vm3036_vm15, %vm3037_vm0 }
 0x7fd   : > { %v3065_v35 = vmul.f32 %v4018_v36, %v3064_v40  ;;  %v3041_v50 = vmul.f32 %v4020_v22, %v6275_v15  ;;  %4025 = vrsqrt.f32 %v6302_v56  ;;  %vm3087_vm4 = vweird.f32 %v6248_v62 }
 0x7fe   : > { %v3683_v0 = vpack.c.bf16 %v3205_v2, %v3204_v20  ;;  %v4022_v43 = vpop.eup %4021  ;;  %v3039_v54 = vsel %vm6310_vm3, %v6212_v28, %v3035_v19  ;;  %v3085_v3 = vmul.f32 %v6248_v62, %v3084_v7  ;;  %vm6324_vm5 = vmor %vm3086_vm1, %vm3087_vm4  ;;  %v3208_v28 = vadd.f32 %v5850_v39, %v3172_v47 }
 0x7ff   : > { %v3069_v33 = vsel %vm3068_vm2, %v4018_v36, %v3065_v35  ;;  %v3091_v38 = vmul.f32 %v4022_v43, %v6277_v49  ;;  %v3042_v8 = vmul.f32 %v4020_v22, %v3041_v50  ;;  %vm3096_vm6 = vweird.f32 %v6277_v49 }
 0x800   : > { %3715 = vst [vmem:[%s4186_s27 + $0x58] sm:$0xff] %v3683_v0   ;;  %v3137_v31 = vmul.f32 %v3069_v33, %v5761_v48  ;;  %v4024_v5 = vpop.eup %4023  ;;  %v3134_v48 = vmul.f32 %v3039_v54, %v5743_v14  ;;  %vm3047_vm7 = vweird.f32 %v4020_v22  ;;  %v3089_v26 = vsel %vm6324_vm5, %v6248_v62, %v3085_v3 }
 0x801   : > { %v3092_v30 = vmul.f32 %v4022_v43, %v3091_v38  ;;  %v3043_v17 = vmul.f32 0.5, %v3042_v8  ;;  %v3071_v6 = vmul.f32 %v4024_v5, %v6291_v24  ;;  %vm3097_vm8 = vweird.f32 %v4022_v43 }
 0x802   : > { %v3173_v18 = vmul.f32 %v5831_v27, %v3137_v31  ;;  %vm3046_vm9 = vweird.f32 %v6275_v15  ;;  %v3170_v44 = vmul.f32 %v5831_v27, %v3134_v48  ;;  %v3139_v16 = vmul.f32 %v3089_v26, %v5758_v42  ;;  %vm3098_vm11 = vmor %vm3096_vm6, %vm3097_vm8 }
 0x803   : > { %v3093_v61 = vmul.f32 0.5, %v3092_v30  ;;  %v4026_v9 = vpop.eup %4025  ;;  %v3044_v53 = vsub.f32 1.5, %v3043_v17  ;;  %v3072_v10 = vmul.f32 %v4024_v5, %v3071_v6  ;;  %vm3048_vm10 = vmor %vm3046_vm9, %vm3047_vm7  ;;  %vm3077_vm12 = vweird.f32 %v4024_v5 }
 0x804   : > { %v3209_v29 = vadd.f32 %v5850_v39, %v3173_v18  ;;  %v3101_v23 = vmul.f32 %v4026_v9, %v6302_v56  ;;  %vm3076_vm13 = vweird.f32 %v6291_v24  ;;  %vm3107_vm15 = vweird.f32 %v4026_v9 }
 0x805   : > { %v3094_v36 = vsub.f32 1.5, %v3093_v61  ;;  %v3045_v14 = vmul.f32 %v4020_v22, %v3044_v53  ;;  %v3073_v58 = vmul.f32 0.5, %v3072_v10  ;;  %vm3078_vm14 = vmor %vm3076_vm13, %vm3077_vm12  ;;  %v3206_v42 = vadd.f32 %v5850_v39, %v3170_v44 }
 0x806   : > { %v3693_v59 = vpack.c.bf16 %v3209_v29, %v3208_v28  ;;  %v3102_v46 = vmul.f32 %v4026_v9, %v3101_v23  ;;  %v3175_v49 = vmul.f32 %v5831_v27, %v3139_v16  ;;  %vm3106_vm0 = vweird.f32 %v6302_v56 }
 0x807   : > { %v3095_v21 = vmul.f32 %v4022_v43, %v3094_v36  ;;  %v3049_v32 = vsel %vm3048_vm10, %v4020_v22, %v3045_v14  ;;  %v3074_v62 = vsub.f32 1.5, %v3073_v58  ;;  %vm3108_vm1 = vmor %vm3106_vm0, %vm3107_vm15 }
 0x808   : > { %3717 = vst [vmem:[%s4186_s27 + $0x68] sm:$0xff] %v3693_v59   ;;  %v3135_v57 = vmul.f32 %v3049_v32, %v5753_v34  ;;  %v3103_v13 = vmul.f32 0.5, %v3102_v46 }
 0x809   : > { %v3099_v52 = vsel %vm3098_vm11, %v4022_v43, %v3095_v21  ;;  %v3075_v15 = vmul.f32 %v4024_v5, %v3074_v62 }
 0x80a   : > { %v3171_v63 = vmul.f32 %v5831_v27, %v3135_v57  ;;  %v3104_v55 = vsub.f32 1.5, %v3103_v13  ;;  %v3140_v11 = vmul.f32 %v3099_v52, %v5775_v1  ;;  %v3211_v1 = vadd.f32 %v5850_v39, %v3175_v49 }
 0x80b   : > { %v3079_v4 = vsel %vm3078_vm14, %v4024_v5, %v3075_v15 }
 0x80c   : > { %v3207_v34 = vadd.f32 %v5850_v39, %v3171_v63  ;;  %v3138_v51 = vmul.f32 %v3079_v4, %v5771_v12  ;;  %v3105_v45 = vmul.f32 %v4026_v9, %v3104_v55  ;;  %v3176_v20 = vmul.f32 %v5831_v27, %v3140_v11 }
 0x80e   : > { %v3688_v24 = vpack.c.bf16 %v3207_v34, %v3206_v42  ;;  %v3174_v2 = vmul.f32 %v5831_v27, %v3138_v51  ;;  %v3109_v25 = vsel %vm3108_vm1, %v4026_v9, %v3105_v45  ;;  %v3212_v56 = vadd.f32 %v5850_v39, %v3176_v20 }
 0x80f   : > { %v3141_v40 = vmul.f32 %v3109_v25, %v5783_v41 }
 0x810   : > { %3716 = vst [vmem:[%s4186_s27 + $0x60] sm:$0xff] %v3688_v24   ;;  %v3210_v19 = vadd.f32 %v5850_v39, %v3174_v2 }
 0x811   : > { %v3177_v12 = vmul.f32 %v5831_v27, %v3141_v40 }
 0x812   : > { %v3698_v22 = vpack.c.bf16 %v3211_v1, %v3210_v19 }
 0x813   : > { %v3213_v0 = vadd.f32 %v5850_v39, %v3177_v12 }
 0x814   : > { %3718 = vst [vmem:[%s4186_s27 + $0x70] sm:$0xff] %v3698_v22  }
 0x815   : > { %v3703_v7 = vpack.c.bf16 %v3213_v0, %v3212_v56 }
 0x817   : > { %3719 = vst [vmem:[%s4186_s27 + $0x78] sm:$0xff] %v3703_v7  }
 0x818 PF: > { %s21_s21 = sadd.s32 1, %s4065_s21   ;;  %s6521_s17 = sld [smem:[#allocation3_spill]] }
 0x819   : > { %p18_p10 = scmp.ge.s32.totalorder %s21_s21, 10   ;;  %s6522_s18 = sld [smem:[#allocation4_spill]] }
 0x81a   : > { %s6523_s19 = sld [smem:[#allocation5_spill]] }
 0x81b   : > { %s6524_s20 = sld [smem:[#allocation6_spill]]  ;;  %20 = sbr.rel (!%p18_p10) target bundleno = 3 (0x3), region = 127 }

</bundles_post_ra>
